<compile_context>
chip_gen: v7x
topology: tpu7x:2x2x1
jax: 0.10.0
libtpu: 0.0.40
codegen_flags: <defaults>
</compile_context>

<pallas_src>
import functools

import numpy as np

import jax
import jax.numpy as jnp
from jax.experimental import pallas as pl
from jax.experimental.pallas import tpu as pltpu


# ---------------------------------------------------------------------------
# Fused Pallas kernel: conv1 -> conv2 -> BN+ReLU -> conv3 -> fc1 -> fc2
# ---------------------------------------------------------------------------
def _encoder_kernel(x_ref, t1_ref, b1_ref, t2_ref, b2_ref,
                    pool_ref, unpool_ref, g_ref, beta_ref,
                    t3_ref, b3_ref, w4_ref, b4_ref, w5_ref, b5_ref,
                    o_ref, *, bn_eps, bn_count):
    def mm(a, b):
        return jnp.dot(a, b, preferred_element_type=jnp.float32)

    x = x_ref[...]                                                    # (N, 784)

    # Conv1 (1->8, s2, p1) + ReLU as one lane-dense MXU matmul        -> (N, 1568)
    h = jnp.maximum(mm(x, t1_ref[...]) + b1_ref[...], 0.0)

    # Conv2 (8->16, s2, p1)                                           -> (N, 784)
    h = mm(h, t2_ref[...]) + b2_ref[...]

    # BatchNorm2d(16) with training-mode batch stats, fused here.
    # Channel reductions over the (h,w,c)-flattened layout are matmuls with a
    # constant 0/1 pooling matrix (784x16) and its transpose (16x784).
    csum = mm(jnp.sum(h, axis=0, keepdims=True), pool_ref[...])       # (1, 16)
    mean = csum * (1.0 / bn_count)
    centered = h - mm(mean, unpool_ref[...])                          # (N, 784)
    var = mm(jnp.sum(centered * centered, axis=0, keepdims=True),
             pool_ref[...]) * (1.0 / bn_count)                        # (1, 16)
    inv = mm(jax.lax.rsqrt(var + bn_eps), unpool_ref[...])            # (1, 784)
    h = jnp.maximum(centered * inv * g_ref[...] + beta_ref[...], 0.0)

    # Conv3 (16->32, s2, p0) + ReLU                                   -> (N, 288)
    h = jnp.maximum(mm(h, t3_ref[...]) + b3_ref[...], 0.0)

    # Linear(288,128) + ReLU (NCHW-flatten permutation folded into w4)-> (N, 128)
    h = jnp.maximum(mm(h, w4_ref[...]) + b4_ref[...], 0.0)

    # Linear(128, D)                                                  -> (N, D)
    o_ref[...] = (mm(h, w5_ref[...]) + b5_ref[...]).astype(o_ref.dtype)


# ---------------------------------------------------------------------------
# Host-side parameter preparation (runs once, outside the forward pass)
# ---------------------------------------------------------------------------
def _conv_toeplitz(w_oihw, hin, win, *, stride, padding):
    """Dense (Hin*Win*Cin, Hout*Wout*Cout) matrix for (h,w,c)-flattened layouts.

    Implements PyTorch Conv2d semantics (weight (Cout,Cin,KH,KW), zero padding)
    as a single matmul: y_flat = x_flat @ T.
    """
    cout, cin, kh, kw = w_oihw.shape
    hout = (hin + 2 * padding - kh) // stride + 1
    wout = (win + 2 * padding - kw) // stride + 1
    t = np.zeros((hin * win * cin, hout * wout * cout), dtype=np.float32)
    w = np.asarray(w_oihw, dtype=np.float32)
    for oy in range(hout):
        for ox in range(wout):
            c0 = (oy * wout + ox) * cout
            for ki in range(kh):
                iy = stride * oy - padding + ki
                if iy < 0 or iy >= hin:
                    continue
                for kj in range(kw):
                    ix = stride * ox - padding + kj
                    if ix < 0 or ix >= win:
                        continue
                    r0 = (iy * win + ix) * cin
                    # T[r0+ci, c0+co] = W[co, ci, ki, kj]
                    t[r0:r0 + cin, c0:c0 + cout] = w[:, :, ki, kj].T
    return t, hout, wout


def prepare_params(params, img_hw=28):
    c1_w = np.asarray(params["c1_w"], np.float32)
    c2_w = np.asarray(params["c2_w"], np.float32)
    c3_w = np.asarray(params["c3_w"], np.float32)

    t1, h1, w1 = _conv_toeplitz(c1_w, img_hw, img_hw, stride=2, padding=1)  # 28 -> 14
    t2, h2, w2 = _conv_toeplitz(c2_w, h1, w1, stride=2, padding=1)          # 14 -> 7
    t3, h3, w3 = _conv_toeplitz(c3_w, h2, w2, stride=2, padding=0)          # 7  -> 3

    c2n = c2_w.shape[0]
    c3n = c3_w.shape[0]

    # Biases expanded to the (h,w,c)-flattened layout (channel is innermost).
    b1e = np.tile(np.asarray(params["c1_b"], np.float32), h1 * w1)[None, :]
    b2e = np.tile(np.asarray(params["c2_b"], np.float32), h2 * w2)[None, :]
    b3e = np.tile(np.asarray(params["c3_b"], np.float32), h3 * w3)[None, :]

    # BN channel pooling / broadcast matrices over the flattened conv2 output.
    q2 = h2 * w2 * c2n
    pool = np.zeros((q2, c2n), np.float32)
    pool[np.arange(q2), np.arange(q2) % c2n] = 1.0
    unpool = np.ascontiguousarray(pool.T)
    gamma = np.tile(np.asarray(params["bn_g"], np.float32), h2 * w2)[None, :]
    beta = np.tile(np.asarray(params["bn_b"], np.float32), h2 * w2)[None, :]

    # fc1: fold PyTorch's NCHW flatten (c,h,w) order into the (h,w,c)-flattened
    # activation layout, and pre-transpose to (in, out).
    fc1_w = np.asarray(params["fc1_w"], np.float32)                    # (128, 288)
    assert fc1_w.shape[1] == h3 * w3 * c3n
    hh, ww, cc = np.meshgrid(np.arange(h3), np.arange(w3), np.arange(c3n),
                             indexing="ij")
    perm = (cc * (h3 * w3) + hh * w3 + ww).reshape(-1)                 # q -> pytorch col
    w4 = np.ascontiguousarray(fc1_w[:, perm].T)                        # (288, 128)
    b4 = np.asarray(params["fc1_b"], np.float32)[None, :]
    w5 = np.ascontiguousarray(np.asarray(params["fc2_w"], np.float32).T)  # (128, D)
    b5 = np.asarray(params["fc2_b"], np.float32)[None, :]

    to = lambda a: jnp.asarray(a, jnp.float32)
    return {"t1": to(t1), "b1": to(b1e), "t2": to(t2), "b2": to(b2e),
            "pool": to(pool), "unpool": to(unpool),
            "gamma": to(gamma), "beta": to(beta),
            "t3": to(t3), "b3": to(b3e),
            "w4": to(w4), "b4": to(b4), "w5": to(w5), "b5": to(b5)}


# ---------------------------------------------------------------------------
# Forward pass: one pallas_call for the whole encoder
# ---------------------------------------------------------------------------
@jax.jit
def encoder_forward(prep, x_nchw):
    n = x_nchw.shape[0]
    # NCHW with C=1: flattening gives exactly the (h,w,c)-flat layout T1 expects.
    x = x_nchw.reshape(n, -1).astype(jnp.float32)                      # (N, 784)
    d = prep["b5"].shape[1]
    bn_count = float(n * (prep["pool"].shape[0] // prep["pool"].shape[1]))

    kernel = functools.partial(_encoder_kernel, bn_eps=1e-5, bn_count=bn_count)

    operands = (x, prep["t1"], prep["b1"], prep["t2"], prep["b2"],
                prep["pool"], prep["unpool"], prep["gamma"], prep["beta"],
                prep["t3"], prep["b3"], prep["w4"], prep["b4"],
                prep["w5"], prep["b5"])
    in_specs = [pl.BlockSpec(op.shape, lambda i: (0, 0)) for op in operands]

    return pl.pallas_call(
        kernel,
        out_shape=jax.ShapeDtypeStruct((n, d), jnp.float32),
        grid=(1,),
        in_specs=in_specs,
        out_specs=pl.BlockSpec((n, d), lambda i: (0, 0)),
        compiler_params=pltpu.CompilerParams(
            dimension_semantics=("arbitrary",),
            vmem_limit_bytes=48 * 1024 * 1024),
    )(*operands)


# ---------------------------------------------------------------------------
# Parameter init (matches the PyTorch module's shapes)
# ---------------------------------------------------------------------------
def init_params(key, encoded_space_dim):
    ks = jax.random.split(key, 10)

    def norm(k, shape, scale=0.1):
        return (scale * jax.random.normal(k, shape)).astype(jnp.float32)

    return {
        "c1_w": norm(ks[0], (8, 1, 3, 3)),
        "c1_b": norm(ks[1], (8,)),
        "c2_w": norm(ks[2], (16, 8, 3, 3)),
        "c2_b": norm(ks[3], (16,)),
        "bn_g": jnp.ones((16,), jnp.float32),
        "bn_b": jnp.zeros((16,), jnp.float32),
        "c3_w": norm(ks[4], (32, 16, 3, 3)),
        "c3_b": norm(ks[5], (32,)),
        "fc1_w": norm(ks[6], (128, 3 * 3 * 32)),   # PyTorch Linear: (out, in)
        "fc1_b": norm(ks[7], (128,)),
        "fc2_w": norm(ks[8], (encoded_space_dim, 128)),
        "fc2_b": norm(ks[9], (encoded_space_dim,)),
    }


if __name__ == "__main__":
    encoded_space_dim = 32  # fc2_input_dim is unused by the PyTorch Encoder
    key = jax.random.PRNGKey(0)
    pkey, xkey = jax.random.split(key)

    params = init_params(pkey, encoded_space_dim)
    prep = prepare_params(params)

    # Input must be (N, 1, 28, 28) for the 3*3*32 flatten to hold.
    x = jax.random.normal(xkey, (2, 1, 28, 28), dtype=jnp.float32)

    out = encoder_forward(prep, x)
    out = jax.block_until_ready(out)
    assert out.shape == (2, encoded_space_dim)
    print("KERNEL_OK")
</pallas_src>

<mosaic_0001>
module attributes {stable_mosaic.version = 11 : i64} {
  func.func @_encoder_kernel(%arg0: i32, %arg1: memref<2x784xf32, #tpu.memory_space<vmem>>, %arg2: memref<784x1568xf32, #tpu.memory_space<vmem>>, %arg3: memref<1x1568xf32, #tpu.memory_space<vmem>>, %arg4: memref<1568x784xf32, #tpu.memory_space<vmem>>, %arg5: memref<1x784xf32, #tpu.memory_space<vmem>>, %arg6: memref<784x16xf32, #tpu.memory_space<vmem>>, %arg7: memref<16x784xf32, #tpu.memory_space<vmem>>, %arg8: memref<1x784xf32, #tpu.memory_space<vmem>>, %arg9: memref<1x784xf32, #tpu.memory_space<vmem>>, %arg10: memref<784x288xf32, #tpu.memory_space<vmem>>, %arg11: memref<1x288xf32, #tpu.memory_space<vmem>>, %arg12: memref<288x128xf32, #tpu.memory_space<vmem>>, %arg13: memref<1x128xf32, #tpu.memory_space<vmem>>, %arg14: memref<128x32xf32, #tpu.memory_space<vmem>>, %arg15: memref<1x32xf32, #tpu.memory_space<vmem>>, %arg16: memref<2x32xf32, #tpu.memory_space<vmem>>) attributes {dimension_semantics = [#tpu.dimension_semantics<arbitrary>], iteration_bounds = array<i64: 1>, scalar_prefetch = 0 : i64, scratch_operands = 0 : i64, tpu.core_type = #tpu.core_type<tc>, window_params = [{pipeline_mode = #tpu.pipeline_mode<synchronous>, transform_indices = @transform_0, window_bounds = array<i64: 2, 784>}, {pipeline_mode = #tpu.pipeline_mode<synchronous>, transform_indices = @transform_1, window_bounds = array<i64: 784, 1568>}, {pipeline_mode = #tpu.pipeline_mode<synchronous>, transform_indices = @transform_2, window_bounds = array<i64: 1, 1568>}, {pipeline_mode = #tpu.pipeline_mode<synchronous>, transform_indices = @transform_3, window_bounds = array<i64: 1568, 784>}, {pipeline_mode = #tpu.pipeline_mode<synchronous>, transform_indices = @transform_4, window_bounds = array<i64: 1, 784>}, {pipeline_mode = #tpu.pipeline_mode<synchronous>, transform_indices = @transform_5, window_bounds = array<i64: 784, 16>}, {pipeline_mode = #tpu.pipeline_mode<synchronous>, transform_indices = @transform_6, window_bounds = array<i64: 16, 784>}, {pipeline_mode = #tpu.pipeline_mode<synchronous>, transform_indices = @transform_7, window_bounds = array<i64: 1, 784>}, {pipeline_mode = #tpu.pipeline_mode<synchronous>, transform_indices = @transform_8, window_bounds = array<i64: 1, 784>}, {pipeline_mode = #tpu.pipeline_mode<synchronous>, transform_indices = @transform_9, window_bounds = array<i64: 784, 288>}, {pipeline_mode = #tpu.pipeline_mode<synchronous>, transform_indices = @transform_10, window_bounds = array<i64: 1, 288>}, {pipeline_mode = #tpu.pipeline_mode<synchronous>, transform_indices = @transform_11, window_bounds = array<i64: 288, 128>}, {pipeline_mode = #tpu.pipeline_mode<synchronous>, transform_indices = @transform_12, window_bounds = array<i64: 1, 128>}, {pipeline_mode = #tpu.pipeline_mode<synchronous>, transform_indices = @transform_13, window_bounds = array<i64: 128, 32>}, {pipeline_mode = #tpu.pipeline_mode<synchronous>, transform_indices = @transform_14, window_bounds = array<i64: 1, 32>}, {pipeline_mode = #tpu.pipeline_mode<synchronous>, transform_indices = @transform_15, window_bounds = array<i64: 2, 32>}]} {
    %c0 = arith.constant 0 : index
    %c0_0 = arith.constant 0 : index
    %0 = vector.load %arg1[%c0, %c0_0] : memref<2x784xf32, #tpu.memory_space<vmem>>, vector<2x784xf32>
    %c0_1 = arith.constant 0 : index
    %c0_2 = arith.constant 0 : index
    %1 = vector.load %arg2[%c0_1, %c0_2] : memref<784x1568xf32, #tpu.memory_space<vmem>>, vector<784x1568xf32>
    %cst = arith.constant dense<0.000000e+00> : vector<2x1568xf32>
    %2 = tpu.matmul %0, %1, %cst {dimension_numbers = #tpu.dot_dimension_numbers<[1], [0], [0], [1], [0, 0, 1, 1], [], []>} : vector<2x784xf32>, vector<784x1568xf32>, vector<2x1568xf32> -> vector<2x1568xf32>
    %c0_3 = arith.constant 0 : index
    %c0_4 = arith.constant 0 : index
    %3 = vector.load %arg3[%c0_3, %c0_4] : memref<1x1568xf32, #tpu.memory_space<vmem>>, vector<1x1568xf32>
    %4 = vector.broadcast %3 : vector<1x1568xf32> to vector<2x1568xf32>
    %5 = arith.addf %2, %4 : vector<2x1568xf32>
    %cst_5 = arith.constant 0.000000e+00 : f32
    %6 = vector.broadcast %cst_5 : f32 to vector<2x1568xf32>
    %7 = arith.maximumf %5, %6 : vector<2x1568xf32>
    %c0_6 = arith.constant 0 : index
    %c0_7 = arith.constant 0 : index
    %8 = vector.load %arg4[%c0_6, %c0_7] : memref<1568x784xf32, #tpu.memory_space<vmem>>, vector<1568x784xf32>
    %cst_8 = arith.constant dense<0.000000e+00> : vector<2x784xf32>
    %9 = tpu.matmul %7, %8, %cst_8 {dimension_numbers = #tpu.dot_dimension_numbers<[1], [0], [0], [1], [0, 0, 1, 1], [], []>} : vector<2x1568xf32>, vector<1568x784xf32>, vector<2x784xf32> -> vector<2x784xf32>
    %c0_9 = arith.constant 0 : index
    %c0_10 = arith.constant 0 : index
    %10 = vector.load %arg5[%c0_9, %c0_10] : memref<1x784xf32, #tpu.memory_space<vmem>>, vector<1x784xf32>
    %11 = vector.broadcast %10 : vector<1x784xf32> to vector<2x784xf32>
    %12 = arith.addf %9, %11 : vector<2x784xf32>
    %cst_11 = arith.constant dense<0.000000e+00> : vector<784xf32>
    %13 = vector.multi_reduction <add>, %12, %cst_11 [0] : vector<2x784xf32> to vector<784xf32>
    %14 = vector.shape_cast %13 : vector<784xf32> to vector<1x784xf32>
    %c0_12 = arith.constant 0 : index
    %c0_13 = arith.constant 0 : index
    %15 = vector.load %arg6[%c0_12, %c0_13] : memref<784x16xf32, #tpu.memory_space<vmem>>, vector<784x16xf32>
    %cst_14 = arith.constant dense<0.000000e+00> : vector<1x16xf32>
    %16 = tpu.matmul %14, %15, %cst_14 {dimension_numbers = #tpu.dot_dimension_numbers<[1], [0], [0], [1], [0, 0, 1, 1], [], []>} : vector<1x784xf32>, vector<784x16xf32>, vector<1x16xf32> -> vector<1x16xf32>
    %cst_15 = arith.constant 0.0102040814 : f32
    %17 = vector.broadcast %cst_15 : f32 to vector<1x16xf32>
    %18 = arith.mulf %16, %17 : vector<1x16xf32>
    %c0_16 = arith.constant 0 : index
    %c0_17 = arith.constant 0 : index
    %19 = vector.load %arg7[%c0_16, %c0_17] : memref<16x784xf32, #tpu.memory_space<vmem>>, vector<16x784xf32>
    %cst_18 = arith.constant dense<0.000000e+00> : vector<1x784xf32>
    %20 = tpu.matmul %18, %19, %cst_18 {dimension_numbers = #tpu.dot_dimension_numbers<[1], [0], [0], [1], [0, 0, 1, 1], [], []>} : vector<1x16xf32>, vector<16x784xf32>, vector<1x784xf32> -> vector<1x784xf32>
    %21 = vector.broadcast %20 : vector<1x784xf32> to vector<2x784xf32>
    %22 = arith.subf %12, %21 : vector<2x784xf32>
    %23 = arith.mulf %22, %22 : vector<2x784xf32>
    %cst_19 = arith.constant dense<0.000000e+00> : vector<784xf32>
    %24 = vector.multi_reduction <add>, %23, %cst_19 [0] : vector<2x784xf32> to vector<784xf32>
    %25 = vector.shape_cast %24 : vector<784xf32> to vector<1x784xf32>
    %c0_20 = arith.constant 0 : index
    %c0_21 = arith.constant 0 : index
    %26 = vector.load %arg6[%c0_20, %c0_21] : memref<784x16xf32, #tpu.memory_space<vmem>>, vector<784x16xf32>
    %cst_22 = arith.constant dense<0.000000e+00> : vector<1x16xf32>
    %27 = tpu.matmul %25, %26, %cst_22 {dimension_numbers = #tpu.dot_dimension_numbers<[1], [0], [0], [1], [0, 0, 1, 1], [], []>} : vector<1x784xf32>, vector<784x16xf32>, vector<1x16xf32> -> vector<1x16xf32>
    %cst_23 = arith.constant 0.0102040814 : f32
    %28 = vector.broadcast %cst_23 : f32 to vector<1x16xf32>
    %29 = arith.mulf %27, %28 : vector<1x16xf32>
    %cst_24 = arith.constant 9.99999974E-6 : f32
    %30 = vector.broadcast %cst_24 : f32 to vector<1x16xf32>
    %31 = arith.addf %29, %30 : vector<1x16xf32>
    %32 = math.rsqrt %31 : vector<1x16xf32>
    %c0_25 = arith.constant 0 : index
    %c0_26 = arith.constant 0 : index
    %33 = vector.load %arg7[%c0_25, %c0_26] : memref<16x784xf32, #tpu.memory_space<vmem>>, vector<16x784xf32>
    %cst_27 = arith.constant dense<0.000000e+00> : vector<1x784xf32>
    %34 = tpu.matmul %32, %33, %cst_27 {dimension_numbers = #tpu.dot_dimension_numbers<[1], [0], [0], [1], [0, 0, 1, 1], [], []>} : vector<1x16xf32>, vector<16x784xf32>, vector<1x784xf32> -> vector<1x784xf32>
    %35 = vector.broadcast %34 : vector<1x784xf32> to vector<2x784xf32>
    %36 = arith.mulf %22, %35 : vector<2x784xf32>
    %c0_28 = arith.constant 0 : index
    %c0_29 = arith.constant 0 : index
    %37 = vector.load %arg8[%c0_28, %c0_29] : memref<1x784xf32, #tpu.memory_space<vmem>>, vector<1x784xf32>
    %38 = vector.broadcast %37 : vector<1x784xf32> to vector<2x784xf32>
    %39 = arith.mulf %36, %38 : vector<2x784xf32>
    %c0_30 = arith.constant 0 : index
    %c0_31 = arith.constant 0 : index
    %40 = vector.load %arg9[%c0_30, %c0_31] : memref<1x784xf32, #tpu.memory_space<vmem>>, vector<1x784xf32>
    %41 = vector.broadcast %40 : vector<1x784xf32> to vector<2x784xf32>
    %42 = arith.addf %39, %41 : vector<2x784xf32>
    %cst_32 = arith.constant 0.000000e+00 : f32
    %43 = vector.broadcast %cst_32 : f32 to vector<2x784xf32>
    %44 = arith.maximumf %42, %43 : vector<2x784xf32>
    %c0_33 = arith.constant 0 : index
    %c0_34 = arith.constant 0 : index
    %45 = vector.load %arg10[%c0_33, %c0_34] : memref<784x288xf32, #tpu.memory_space<vmem>>, vector<784x288xf32>
    %cst_35 = arith.constant dense<0.000000e+00> : vector<2x288xf32>
    %46 = tpu.matmul %44, %45, %cst_35 {dimension_numbers = #tpu.dot_dimension_numbers<[1], [0], [0], [1], [0, 0, 1, 1], [], []>} : vector<2x784xf32>, vector<784x288xf32>, vector<2x288xf32> -> vector<2x288xf32>
    %c0_36 = arith.constant 0 : index
    %c0_37 = arith.constant 0 : index
    %47 = vector.load %arg11[%c0_36, %c0_37] : memref<1x288xf32, #tpu.memory_space<vmem>>, vector<1x288xf32>
    %48 = vector.broadcast %47 : vector<1x288xf32> to vector<2x288xf32>
    %49 = arith.addf %46, %48 : vector<2x288xf32>
    %cst_38 = arith.constant 0.000000e+00 : f32
    %50 = vector.broadcast %cst_38 : f32 to vector<2x288xf32>
    %51 = arith.maximumf %49, %50 : vector<2x288xf32>
    %c0_39 = arith.constant 0 : index
    %c0_40 = arith.constant 0 : index
    %52 = vector.load %arg12[%c0_39, %c0_40] : memref<288x128xf32, #tpu.memory_space<vmem>>, vector<288x128xf32>
    %cst_41 = arith.constant dense<0.000000e+00> : vector<2x128xf32>
    %53 = tpu.matmul %51, %52, %cst_41 {dimension_numbers = #tpu.dot_dimension_numbers<[1], [0], [0], [1], [0, 0, 1, 1], [], []>} : vector<2x288xf32>, vector<288x128xf32>, vector<2x128xf32> -> vector<2x128xf32>
    %c0_42 = arith.constant 0 : index
    %c0_43 = arith.constant 0 : index
    %54 = vector.load %arg13[%c0_42, %c0_43] : memref<1x128xf32, #tpu.memory_space<vmem>>, vector<1x128xf32>
    %55 = vector.broadcast %54 : vector<1x128xf32> to vector<2x128xf32>
    %56 = arith.addf %53, %55 : vector<2x128xf32>
    %cst_44 = arith.constant 0.000000e+00 : f32
    %57 = vector.broadcast %cst_44 : f32 to vector<2x128xf32>
    %58 = arith.maximumf %56, %57 : vector<2x128xf32>
    %c0_45 = arith.constant 0 : index
    %c0_46 = arith.constant 0 : index
    %59 = vector.load %arg14[%c0_45, %c0_46] : memref<128x32xf32, #tpu.memory_space<vmem>>, vector<128x32xf32>
    %cst_47 = arith.constant dense<0.000000e+00> : vector<2x32xf32>
    %60 = tpu.matmul %58, %59, %cst_47 {dimension_numbers = #tpu.dot_dimension_numbers<[1], [0], [0], [1], [0, 0, 1, 1], [], []>} : vector<2x128xf32>, vector<128x32xf32>, vector<2x32xf32> -> vector<2x32xf32>
    %c0_48 = arith.constant 0 : index
    %c0_49 = arith.constant 0 : index
    %61 = vector.load %arg15[%c0_48, %c0_49] : memref<1x32xf32, #tpu.memory_space<vmem>>, vector<1x32xf32>
    %62 = vector.broadcast %61 : vector<1x32xf32> to vector<2x32xf32>
    %63 = arith.addf %60, %62 : vector<2x32xf32>
    %c0_50 = arith.constant 0 : index
    %c0_51 = arith.constant 0 : index
    %64 = vector.load %arg16[%c0_50, %c0_51] : memref<2x32xf32, #tpu.memory_space<vmem>>, vector<2x32xf32>
    tpu.vector_store %arg16[%c0_50, %c0_51], %63 {strides = array<i32>} : memref<2x32xf32, #tpu.memory_space<vmem>>, vector<2x32xf32>,
    return
  }
  func.func @transform_0(%arg0: i32) -> (i32, i32) {
    %c0_i32 = arith.constant 0 : i32
    %c0_i32_0 = arith.constant 0 : i32
    %c0_i32_1 = arith.constant 0 : i32
    return %c0_i32, %c0_i32_0 : i32, i32
  }
  func.func @transform_1(%arg0: i32) -> (i32, i32) {
    %c0_i32 = arith.constant 0 : i32
    %c0_i32_0 = arith.constant 0 : i32
    %c0_i32_1 = arith.constant 0 : i32
    return %c0_i32, %c0_i32_0 : i32, i32
  }
  func.func @transform_2(%arg0: i32) -> (i32, i32) {
    %c0_i32 = arith.constant 0 : i32
    %c0_i32_0 = arith.constant 0 : i32
    %c0_i32_1 = arith.constant 0 : i32
    return %c0_i32, %c0_i32_0 : i32, i32
  }
  func.func @transform_3(%arg0: i32) -> (i32, i32) {
    %c0_i32 = arith.constant 0 : i32
    %c0_i32_0 = arith.constant 0 : i32
    %c0_i32_1 = arith.constant 0 : i32
    return %c0_i32, %c0_i32_0 : i32, i32
  }
  func.func @transform_4(%arg0: i32) -> (i32, i32) {
    %c0_i32 = arith.constant 0 : i32
    %c0_i32_0 = arith.constant 0 : i32
    %c0_i32_1 = arith.constant 0 : i32
    return %c0_i32, %c0_i32_0 : i32, i32
  }
  func.func @transform_5(%arg0: i32) -> (i32, i32) {
    %c0_i32 = arith.constant 0 : i32
    %c0_i32_0 = arith.constant 0 : i32
    %c0_i32_1 = arith.constant 0 : i32
    return %c0_i32, %c0_i32_0 : i32, i32
  }
  func.func @transform_6(%arg0: i32) -> (i32, i32) {
    %c0_i32 = arith.constant 0 : i32
    %c0_i32_0 = arith.constant 0 : i32
    %c0_i32_1 = arith.constant 0 : i32
    return %c0_i32, %c0_i32_0 : i32, i32
  }
  func.func @transform_7(%arg0: i32) -> (i32, i32) {
    %c0_i32 = arith.constant 0 : i32
    %c0_i32_0 = arith.constant 0 : i32
    %c0_i32_1 = arith.constant 0 : i32
    return %c0_i32, %c0_i32_0 : i32, i32
  }
  func.func @transform_8(%arg0: i32) -> (i32, i32) {
    %c0_i32 = arith.constant 0 : i32
    %c0_i32_0 = arith.constant 0 : i32
    %c0_i32_1 = arith.constant 0 : i32
    return %c0_i32, %c0_i32_0 : i32, i32
  }
  func.func @transform_9(%arg0: i32) -> (i32, i32) {
    %c0_i32 = arith.constant 0 : i32
    %c0_i32_0 = arith.constant 0 : i32
    %c0_i32_1 = arith.constant 0 : i32
    return %c0_i32, %c0_i32_0 : i32, i32
  }
  func.func @transform_10(%arg0: i32) -> (i32, i32) {
    %c0_i32 = arith.constant 0 : i32
    %c0_i32_0 = arith.constant 0 : i32
    %c0_i32_1 = arith.constant 0 : i32
    return %c0_i32, %c0_i32_0 : i32, i32
  }
  func.func @transform_11(%arg0: i32) -> (i32, i32) {
    %c0_i32 = arith.constant 0 : i32
    %c0_i32_0 = arith.constant 0 : i32
    %c0_i32_1 = arith.constant 0 : i32
    return %c0_i32, %c0_i32_0 : i32, i32
  }
  func.func @transform_12(%arg0: i32) -> (i32, i32) {
    %c0_i32 = arith.constant 0 : i32
    %c0_i32_0 = arith.constant 0 : i32
    %c0_i32_1 = arith.constant 0 : i32
    return %c0_i32, %c0_i32_0 : i32, i32
  }
  func.func @transform_13(%arg0: i32) -> (i32, i32) {
    %c0_i32 = arith.constant 0 : i32
    %c0_i32_0 = arith.constant 0 : i32
    %c0_i32_1 = arith.constant 0 : i32
    return %c0_i32, %c0_i32_0 : i32, i32
  }
  func.func @transform_14(%arg0: i32) -> (i32, i32) {
    %c0_i32 = arith.constant 0 : i32
    %c0_i32_0 = arith.constant 0 : i32
    %c0_i32_1 = arith.constant 0 : i32
    return %c0_i32, %c0_i32_0 : i32, i32
  }
  func.func @transform_15(%arg0: i32) -> (i32, i32) {
    %c0_i32 = arith.constant 0 : i32
    %c0_i32_0 = arith.constant 0 : i32
    %c0_i32_1 = arith.constant 0 : i32
    return %c0_i32, %c0_i32_0 : i32, i32
  }
}

</mosaic_0001>

<bundles_post_ra>
// kernel: encoder_forward.1
= control target key start
LH: loop header
LB: loop body
LE: loop exit
PB: predicated region body
PF: predicated region fallthrough
CT: control target
= control target key end

     0   :  { %vm1437_vm0 = vcmask 130048   ;;  %s23925_s0 = inlined_call_operand.vmem [shape: f32[2,784], index: 0, kind: input, shape index: {}]   ;;  %s23926_s1 = inlined_call_operand.vmem [shape: f32[784,1568], index: 1, kind: input, shape index: {}]   ;;  %s23927_s2 = inlined_call_operand.vmem [shape: f32[1,1568], index: 2, kind: input, shape index: {}]   ;;  %s23928_s3 = inlined_call_operand.vmem [shape: f32[1568,784], index: 3, kind: input, shape index: {}]   ;;  %s23929_s4 = inlined_call_operand.vmem [shape: f32[1,784], index: 4, kind: input, shape index: {}]   ;;  %s23930_s5 = inlined_call_operand.vmem [shape: f32[784,16], index: 5, kind: input, shape index: {}]   ;;  %s23931_s6 = inlined_call_operand.vmem [shape: f32[16,784], index: 6, kind: input, shape index: {}]   ;;  %s23932_s7 = inlined_call_operand.vmem [shape: f32[1,784], index: 7, kind: input, shape index: {}]   ;;  %s23933_s8 = inlined_call_operand.vmem [shape: f32[1,784], index: 8, kind: input, shape index: {}]   ;;  %s23934_s9 = inlined_call_operand.vmem [shape: f32[784,288], index: 9, kind: input, shape index: {}]   ;;  %s23935_s10 = inlined_call_operand.vmem [shape: f32[1,288], index: 10, kind: input, shape index: {}]   ;;  %s23936_s11 = inlined_call_operand.vmem [shape: f32[288,128], index: 11, kind: input, shape index: {}]   ;;  %s23937_s12 = inlined_call_operand.vmem [shape: f32[1,128], index: 12, kind: input, shape index: {}]   ;;  %s23938_s13 = inlined_call_operand.vmem [shape: f32[128,32], index: 13, kind: input, shape index: {}]   ;;  %s23939_s14 = inlined_call_operand.vmem [shape: f32[1,32], index: 14, kind: input, shape index: {}]   ;;  %s23940_s15 = inlined_call_operand.hbm [shape: f32[2,32], index: 15, kind: output, shape index: {}]  }
   0x1   :  { %v54_v0 = vld [vmem:[%s23926_s1 + $0x8] sm:$0xff]  ;;  %v67_v1 = vld [vmem:[%s23926_s1 + $0x70] sm:$0xff]  ;;  %v56_v2 = vld [vmem:[%s23926_s1 + $0x18] sm:$0xff] }
   0x2   :  { %v10369_v3 = vpack.c.bf16 %v67_v1, %v54_v0  ;;  %v69_v4 = vld [vmem:[%s23926_s1 + $0x80] sm:$0xff]  ;;  %v66_v6 = vld [vmem:[%s23926_s1 + $0x68] sm:$0xff]  ;;  %v55_v9 = vld [vmem:[%s23926_s1 + $0x10] sm:$0xff] }
   0x3   :  { %v53_v5 = vld [vmem:[%s23926_s1] sm:$0xff]  ;;  %v10565_v7 = vpack.c.bf16 %v69_v4, %v56_v2  ;;  %v68_v10 = vld [vmem:[%s23926_s1 + $0x78] sm:$0xff]  ;;  %v82_v14 = vld [vmem:[%s23926_s1 + $0xe8] sm:$0xff] }
   0x4   :  { %v10371_v8 = vpack.c.bf16 %v66_v6, %v53_v5  ;;  %v80_v11 = vld [vmem:[%s23926_s1 + $0xd8] sm:$0xff]  ;;  %10370 = vmatprep.subr.bf16.mxu0 %v10369_v3  ;;  %v10567_v12 = vpack.c.bf16 %v68_v10, %v55_v9  ;;  %v93_v13 = vld [vmem:[%s23926_s1 + $0x140] sm:$0xff]  ;;  %v95_v15 = vld [vmem:[%s23926_s1 + $0x150] sm:$0xff] }
   0x5   :  { %10566 = vmatprep.subr.bf16.mxu1 %v10565_v7  ;;  %v10373_v16 = vpack.c.bf16 %v93_v13, %v80_v11  ;;  %v10569_v17 = vpack.c.bf16 %v95_v15, %v82_v14  ;;  %v79_v18 = vld [vmem:[%s23926_s1 + $0xd0] sm:$0xff]  ;;  %v92_v19 = vld [vmem:[%s23926_s1 + $0x138] sm:$0xff]  ;;  %v81_v20 = vld [vmem:[%s23926_s1 + $0xe0] sm:$0xff] }
   0x6   :  { %10372 = vmatpush1.bf16.msra.mxu0 %v10371_v8  ;;  %10568 = vmatpush1.bf16.msra.mxu1 %v10567_v12  ;;  %v10375_v21 = vpack.c.bf16 %v92_v19, %v79_v18  ;;  %v94_v22 = vld [vmem:[%s23926_s1 + $0x148] sm:$0xff]  ;;  %v119_v24 = vld [vmem:[%s23926_s1 + $0x210] sm:$0xff]  ;;  %v108_v27 = vld [vmem:[%s23926_s1 + $0x1b8] sm:$0xff] }
   0x7   :  { %v106_v23 = vld [vmem:[%s23926_s1 + $0x1a8] sm:$0xff]  ;;  %10374 = vmatprep.subr.bf16.mxu0 %v10373_v16  ;;  %10570 = vmatprep.subr.bf16.mxu1 %v10569_v17  ;;  %v10571_v25 = vpack.c.bf16 %v94_v22, %v81_v20  ;;  %v121_v28 = vld [vmem:[%s23926_s1 + $0x220] sm:$0xff]  ;;  %v107_v32 = vld [vmem:[%s23926_s1 + $0x1b0] sm:$0xff] }
   0x8   :  { %v10377_v26 = vpack.c.bf16 %v119_v24, %v106_v23  ;;  %v105_v29 = vld [vmem:[%s23926_s1 + $0x1a0] sm:$0xff]  ;;  %v10573_v30 = vpack.c.bf16 %v121_v28, %v108_v27  ;;  %v118_v31 = vld [vmem:[%s23926_s1 + $0x208] sm:$0xff]  ;;  %v120_v33 = vld [vmem:[%s23926_s1 + $0x218] sm:$0xff] }
   0x9   :  { %v10379_v34 = vpack.c.bf16 %v118_v31, %v105_v29  ;;  %v132_v35 = vld [vmem:[%s23926_s1 + $0x278] sm:$0xff]  ;;  %v145_v36 = vld [vmem:[%s23926_s1 + $0x2e0] sm:$0xff]  ;;  %v134_v37 = vld [vmem:[%s23926_s1 + $0x288] sm:$0xff]  ;;  %v10575_v38 = vpack.c.bf16 %v120_v33, %v107_v32 }
   0xa   :  { %10376 = vmatpush1.bf16.msra.mxu0 %v10375_v21  ;;  %10572 = vmatpush1.bf16.msra.mxu1 %v10571_v25  ;;  %v10381_v39 = vpack.c.bf16 %v145_v36, %v132_v35  ;;  %v147_v40 = vld [vmem:[%s23926_s1 + $0x2f0] sm:$0xff]  ;;  %v144_v42 = vld [vmem:[%s23926_s1 + $0x2d8] sm:$0xff]  ;;  %v133_v44 = vld [vmem:[%s23926_s1 + $0x280] sm:$0xff] }
   0xb   :  { %10378 = vmatprep.subr.bf16.mxu0 %v10377_v26  ;;  %v131_v41 = vld [vmem:[%s23926_s1 + $0x270] sm:$0xff]  ;;  %10574 = vmatprep.subr.bf16.mxu1 %v10573_v30  ;;  %v10577_v43 = vpack.c.bf16 %v147_v40, %v134_v37  ;;  %v146_v45 = vld [vmem:[%s23926_s1 + $0x2e8] sm:$0xff]  ;;  %v160_v48 = vld [vmem:[%s23926_s1 + $0x358] sm:$0xff] }
   0xc   :  { %v158_v46 = vld [vmem:[%s23926_s1 + $0x348] sm:$0xff]  ;;  %v171_v47 = vld [vmem:[%s23926_s1 + $0x3b0] sm:$0xff]  ;;  %v173_v49 = vld [vmem:[%s23926_s1 + $0x3c0] sm:$0xff]  ;;  %v10383_v50 = vpack.c.bf16 %v144_v42, %v131_v41  ;;  %v10579_v51 = vpack.c.bf16 %v146_v45, %v133_v44 }
   0xd   :  { %v10385_v52 = vpack.c.bf16 %v171_v47, %v158_v46  ;;  %v157_v53 = vld [vmem:[%s23926_s1 + $0x340] sm:$0xff]  ;;  %v170_v54 = vld [vmem:[%s23926_s1 + $0x3a8] sm:$0xff]  ;;  %v159_v55 = vld [vmem:[%s23926_s1 + $0x350] sm:$0xff]  ;;  %v10581_v56 = vpack.c.bf16 %v173_v49, %v160_v48  ;;  %v1331_v46 = vlaneseq  ;;  %v13736_v47 = vmov 1983009808  }
   0xe   :  { %10380 = vmatpush1.bf16.msra.mxu0 %v10379_v34  ;;  %10576 = vmatpush1.bf16.msra.mxu1 %v10575_v38  ;;  %v172_v57 = vld [vmem:[%s23926_s1 + $0x3b8] sm:$0xff]  ;;  %v197_v59 = vld [vmem:[%s23926_s1 + $0x480] sm:$0xff]  ;;  %v186_v60 = vld [vmem:[%s23926_s1 + $0x428] sm:$0xff]  ;;  %v10387_v62 = vpack.c.bf16 %v170_v54, %v157_v53  ;;  %v1400_v48 = vunpack.c.l.s4 %v13736_v47 }
   0xf   :  { %10382 = vmatprep.subr.bf16.mxu0 %v10381_v39  ;;  %10578 = vmatprep.subr.bf16.mxu1 %v10577_v43  ;;  %v184_v58 = vld [vmem:[%s23926_s1 + $0x418] sm:$0xff]  ;;  %v199_v61 = vld [vmem:[%s23926_s1 + $0x490] sm:$0xff]  ;;  %v10583_v63 = vpack.c.bf16 %v172_v57, %v159_v55  ;;  %v185_v3 = vld [vmem:[%s23926_s1 + $0x420] sm:$0xff] }
  0x10   :  { %v10389_v0 = vpack.c.bf16 %v197_v59, %v184_v58  ;;  %v183_v1 = vld [vmem:[%s23926_s1 + $0x410] sm:$0xff]  ;;  %v196_v2 = vld [vmem:[%s23926_s1 + $0x478] sm:$0xff]  ;;  %v10585_v4 = vpack.c.bf16 %v199_v61, %v186_v60  ;;  %v198_v5 = vld [vmem:[%s23926_s1 + $0x488] sm:$0xff]  ;;  %v14073_v61 = vshrl.u32 %v1331_v46, 7 }
  0x11   :  { %v210_v6 = vld [vmem:[%s23926_s1 + $0x4e8] sm:$0xff]  ;;  %v223_v7 = vld [vmem:[%s23926_s1 + $0x550] sm:$0xff]  ;;  %v212_v8 = vld [vmem:[%s23926_s1 + $0x4f8] sm:$0xff]  ;;  %v10391_v10 = vpack.c.bf16 %v196_v2, %v183_v1  ;;  %v10587_v11 = vpack.c.bf16 %v198_v5, %v185_v3 }
  0x12   :  { %10384 = vmatpush1.bf16.msra.mxu0 %v10383_v50  ;;  %10580 = vmatpush1.bf16.msra.mxu1 %v10579_v51  ;;  %v225_v9 = vld [vmem:[%s23926_s1 + $0x560] sm:$0xff]  ;;  %v10393_v12 = vpack.c.bf16 %v223_v7, %v210_v6  ;;  %v222_v14 = vld [vmem:[%s23926_s1 + $0x548] sm:$0xff]  ;;  %v211_v15 = vld [vmem:[%s23926_s1 + $0x4f0] sm:$0xff] }
  0x13   :  { %10386 = vmatprep.subr.bf16.mxu0 %v10385_v52  ;;  %10582 = vmatprep.subr.bf16.mxu1 %v10581_v56  ;;  %v209_v13 = vld [vmem:[%s23926_s1 + $0x4e0] sm:$0xff]  ;;  %v10589_v16 = vpack.c.bf16 %v225_v9, %v212_v8  ;;  %v224_v17 = vld [vmem:[%s23926_s1 + $0x558] sm:$0xff]  ;;  %v238_v20 = vld [vmem:[%s23926_s1 + $0x5c8] sm:$0xff] }
  0x14   :  { %v236_v18 = vld [vmem:[%s23926_s1 + $0x5b8] sm:$0xff]  ;;  %v249_v19 = vld [vmem:[%s23926_s1 + $0x620] sm:$0xff]  ;;  %v251_v21 = vld [vmem:[%s23926_s1 + $0x630] sm:$0xff]  ;;  %v10395_v22 = vpack.c.bf16 %v222_v14, %v209_v13  ;;  %v10591_v23 = vpack.c.bf16 %v224_v17, %v211_v15 }
  0x15   :  { %v10397_v24 = vpack.c.bf16 %v249_v19, %v236_v18  ;;  %v235_v25 = vld [vmem:[%s23926_s1 + $0x5b0] sm:$0xff]  ;;  %v248_v26 = vld [vmem:[%s23926_s1 + $0x618] sm:$0xff]  ;;  %v237_v27 = vld [vmem:[%s23926_s1 + $0x5c0] sm:$0xff]  ;;  %v10593_v28 = vpack.c.bf16 %v251_v21, %v238_v20 }
  0x16   :  { %10388 = vmatpush1.bf16.msra.mxu0 %v10387_v62  ;;  %10584 = vmatpush1.bf16.msra.mxu1 %v10583_v63  ;;  %v250_v29 = vld [vmem:[%s23926_s1 + $0x628] sm:$0xff]  ;;  %v275_v31 = vld [vmem:[%s23926_s1 + $0x6f0] sm:$0xff]  ;;  %v264_v32 = vld [vmem:[%s23926_s1 + $0x698] sm:$0xff]  ;;  %v10399_v34 = vpack.c.bf16 %v248_v26, %v235_v25  ;;  %v1401_v62 = vunpack.c.0.s8 %v1400_v48 }
  0x17   :  { %10390 = vmatprep.subr.bf16.mxu0 %v10389_v0  ;;  %10586 = vmatprep.subr.bf16.mxu1 %v10585_v4  ;;  %v262_v30 = vld [vmem:[%s23926_s1 + $0x688] sm:$0xff]  ;;  %v277_v33 = vld [vmem:[%s23926_s1 + $0x700] sm:$0xff]  ;;  %v10595_v35 = vpack.c.bf16 %v250_v29, %v237_v27  ;;  %v263_v39 = vld [vmem:[%s23926_s1 + $0x690] sm:$0xff] }
  0x18   :  { %v10401_v36 = vpack.c.bf16 %v275_v31, %v262_v30  ;;  %v261_v37 = vld [vmem:[%s23926_s1 + $0x680] sm:$0xff]  ;;  %v274_v38 = vld [vmem:[%s23926_s1 + $0x6e8] sm:$0xff]  ;;  %v10597_v40 = vpack.c.bf16 %v277_v33, %v264_v32  ;;  %v276_v41 = vld [vmem:[%s23926_s1 + $0x6f8] sm:$0xff] }
  0x19   :  { %v288_v42 = vld [vmem:[%s23926_s1 + $0x758] sm:$0xff]  ;;  %v301_v43 = vld [vmem:[%s23926_s1 + $0x7c0] sm:$0xff]  ;;  %v290_v44 = vld [vmem:[%s23926_s1 + $0x768] sm:$0xff]  ;;  %v10403_v49 = vpack.c.bf16 %v274_v38, %v261_v37  ;;  %v10599_v50 = vpack.c.bf16 %v276_v41, %v263_v39 }
  0x1a   :  { %10392 = vmatpush1.bf16.msra.mxu0 %v10391_v10  ;;  %10588 = vmatpush1.bf16.msra.mxu1 %v10587_v11  ;;  %v303_v45 = vld [vmem:[%s23926_s1 + $0x7d0] sm:$0xff]  ;;  %v10405_v51 = vpack.c.bf16 %v301_v43, %v288_v42  ;;  %v300_v53 = vld [vmem:[%s23926_s1 + $0x7b8] sm:$0xff]  ;;  %v289_v54 = vld [vmem:[%s23926_s1 + $0x760] sm:$0xff]  ;;  %v14100_v11 = vsub.s32 %v1401_v62, %v14073_v61 }
  0x1b   :  { %10394 = vmatprep.subr.bf16.mxu0 %v10393_v12  ;;  %10590 = vmatprep.subr.bf16.mxu1 %v10589_v16  ;;  %v287_v52 = vld [vmem:[%s23926_s1 + $0x750] sm:$0xff]  ;;  %v10601_v55 = vpack.c.bf16 %v303_v45, %v290_v44  ;;  %v302_v56 = vld [vmem:[%s23926_s1 + $0x7c8] sm:$0xff]  ;;  %v316_v59 = vld [vmem:[%s23926_s1 + $0x838] sm:$0xff] }
  0x1c   :  { %v314_v57 = vld [vmem:[%s23926_s1 + $0x828] sm:$0xff]  ;;  %v327_v58 = vld [vmem:[%s23926_s1 + $0x890] sm:$0xff]  ;;  %v329_v60 = vld [vmem:[%s23926_s1 + $0x8a0] sm:$0xff]  ;;  %v10407_v63 = vpack.c.bf16 %v300_v53, %v287_v52  ;;  %v10603_v0 = vpack.c.bf16 %v302_v56, %v289_v54 }
  0x1d   :  { %v10409_v1 = vpack.c.bf16 %v327_v58, %v314_v57  ;;  %v313_v2 = vld [vmem:[%s23926_s1 + $0x820] sm:$0xff]  ;;  %v326_v3 = vld [vmem:[%s23926_s1 + $0x888] sm:$0xff]  ;;  %v315_v4 = vld [vmem:[%s23926_s1 + $0x830] sm:$0xff]  ;;  %v10605_v5 = vpack.c.bf16 %v329_v60, %v316_v59 }
  0x1e   :  { %10396 = vmatpush1.bf16.msra.mxu0 %v10395_v22  ;;  %10592 = vmatpush1.bf16.msra.mxu1 %v10591_v23  ;;  %v328_v6 = vld [vmem:[%s23926_s1 + $0x898] sm:$0xff]  ;;  %v353_v8 = vld [vmem:[%s23926_s1 + $0x960] sm:$0xff]  ;;  %v342_v9 = vld [vmem:[%s23926_s1 + $0x908] sm:$0xff]  ;;  %v10411_v12 = vpack.c.bf16 %v326_v3, %v313_v2 }
  0x1f   :  { %10398 = vmatprep.subr.bf16.mxu0 %v10397_v24  ;;  %10594 = vmatprep.subr.bf16.mxu1 %v10593_v28  ;;  %v340_v7 = vld [vmem:[%s23926_s1 + $0x8f8] sm:$0xff]  ;;  %v355_v10 = vld [vmem:[%s23926_s1 + $0x970] sm:$0xff]  ;;  %v10607_v14 = vpack.c.bf16 %v328_v6, %v315_v4  ;;  %v341_v17 = vld [vmem:[%s23926_s1 + $0x900] sm:$0xff] }
  0x20   :  { %v339_v13 = vld [vmem:[%s23926_s1 + $0x8f0] sm:$0xff]  ;;  %v10413_v15 = vpack.c.bf16 %v353_v8, %v340_v7  ;;  %v352_v16 = vld [vmem:[%s23926_s1 + $0x958] sm:$0xff]  ;;  %v354_v18 = vld [vmem:[%s23926_s1 + $0x968] sm:$0xff]  ;;  %v10609_v19 = vpack.c.bf16 %v355_v10, %v342_v9 }
  0x21   :  { %v366_v20 = vld [vmem:[%s23926_s1 + $0x9c8] sm:$0xff]  ;;  %v379_v21 = vld [vmem:[%s23926_s1 + $0xa30] sm:$0xff]  ;;  %v14123_v22 = vld [vmem:[%s23925_s0] sm:$0xff]  ;;  %v10415_v26 = vpack.c.bf16 %v352_v16, %v339_v13  ;;  %v10611_v27 = vpack.c.bf16 %v354_v18, %v341_v17 }
  0x22   :  { %10400 = vmatpush1.bf16.msra.mxu0 %v10399_v34  ;;  %10596 = vmatpush1.bf16.msra.mxu1 %v10595_v35  ;;  %v368_v23 = vld [vmem:[%s23926_s1 + $0x9d8] sm:$0xff]  ;;  %v381_v24 = vld [vmem:[%s23926_s1 + $0xa40] sm:$0xff]  ;;  %v14133_v25 = vrot.slane %v14123_v22, %v14100_v11  ;;  %v10417_v28 = vpack.c.bf16 %v379_v21, %v366_v20  ;;  %v378_v30 = vld [vmem:[%s23926_s1 + $0xa28] sm:$0xff]  ;;  %v1398_v10 = vcombine.high %v14123_v22, %v14123_v22 }
  0x23   :  { %10402 = vmatprep.subr.bf16.mxu0 %v10401_v36  ;;  %10598 = vmatprep.subr.bf16.mxu1 %v10597_v40  ;;  %v365_v29 = vld [vmem:[%s23926_s1 + $0x9c0] sm:$0xff]  ;;  %v367_v31 = vld [vmem:[%s23926_s1 + $0x9d0] sm:$0xff]  ;;  %v10613_v33 = vpack.c.bf16 %v381_v24, %v368_v23  ;;  %v380_v34 = vld [vmem:[%s23926_s1 + $0xa38] sm:$0xff] }
  0x24   :  { %v14146_v32 = vcombine.high %v14133_v25, %v14133_v25  ;;  %v392_v35 = vld [vmem:[%s23926_s1 + $0xa98] sm:$0xff]  ;;  %v405_v36 = vld [vmem:[%s23926_s1 + $0xb00] sm:$0xff]  ;;  %v394_v37 = vld [vmem:[%s23926_s1 + $0xaa8] sm:$0xff]  ;;  %v10419_v39 = vpack.c.bf16 %v378_v30, %v365_v29  ;;  %v10615_v40 = vpack.c.bf16 %v380_v34, %v367_v31  ;;  %v14258_v24 = vrot.slane %v1398_v10, %v14100_v11 }
  0x25   :  { %v407_v38 = vld [vmem:[%s23926_s1 + $0xb10] sm:$0xff]  ;;  %v10421_v41 = vpack.c.bf16 %v405_v36, %v392_v35  ;;  %v404_v43 = vld [vmem:[%s23926_s1 + $0xaf8] sm:$0xff]  ;;  %v393_v44 = vld [vmem:[%s23926_s1 + $0xaa0] sm:$0xff] }
  0x26   :  { %10404 = vmatpush1.bf16.msra.mxu0 %v10403_v49  ;;  %10600 = vmatpush1.bf16.msra.mxu1 %v10599_v50  ;;  %v391_v42 = vld [vmem:[%s23926_s1 + $0xa90] sm:$0xff]  ;;  %v10617_v45 = vpack.c.bf16 %v407_v38, %v394_v37  ;;  %v406_v46 = vld [vmem:[%s23926_s1 + $0xb08] sm:$0xff]  ;;  %v420_v49 = vld [vmem:[%s23926_s1 + $0xb78] sm:$0xff] }
  0x27   :  { %10406 = vmatprep.subr.bf16.mxu0 %v10405_v51  ;;  %10602 = vmatprep.subr.bf16.mxu1 %v10601_v55  ;;  %v418_v47 = vld [vmem:[%s23926_s1 + $0xb68] sm:$0xff]  ;;  %v431_v48 = vld [vmem:[%s23926_s1 + $0xbd0] sm:$0xff]  ;;  %v433_v50 = vld [vmem:[%s23926_s1 + $0xbe0] sm:$0xff]  ;;  %v10423_v51 = vpack.c.bf16 %v404_v43, %v391_v42  ;;  %v10619_v52 = vpack.c.bf16 %v406_v46, %v393_v44 }
  0x28   :  { %1504 = vmatprep.mubr.f32.mxu0 %v14146_v32  ;;  %1788 = vmatprep.mubr.f32.mxu1 %v14146_v32  ;;  %v10425_v53 = vpack.c.bf16 %v431_v48, %v418_v47  ;;  %v417_v54 = vld [vmem:[%s23926_s1 + $0xb60] sm:$0xff]  ;;  %v430_v55 = vld [vmem:[%s23926_s1 + $0xbc8] sm:$0xff]  ;;  %v419_v56 = vld [vmem:[%s23926_s1 + $0xb70] sm:$0xff]  ;;  %v10621_v57 = vpack.c.bf16 %v433_v50, %v420_v49 }
  0x29   :  { %v432_v58 = vld [vmem:[%s23926_s1 + $0xbd8] sm:$0xff]  ;;  %v457_v60 = vld [vmem:[%s23926_s1 + $0xca0] sm:$0xff]  ;;  %v446_v62 = vld [vmem:[%s23926_s1 + $0xc48] sm:$0xff] }
  0x2a   :  { %10408 = vmatpush1.bf16.msra.mxu0 %v10407_v63  ;;  %10604 = vmatpush1.bf16.msra.mxu1 %v10603_v0  ;;  %v444_v59 = vld [vmem:[%s23926_s1 + $0xc38] sm:$0xff]  ;;  %v459_v63 = vld [vmem:[%s23926_s1 + $0xcb0] sm:$0xff]  ;;  %v10427_v0 = vpack.c.bf16 %v430_v55, %v417_v54  ;;  %v458_v7 = vld [vmem:[%s23926_s1 + $0xca8] sm:$0xff] }
  0x2b   :  { %10410 = vmatprep.subr.bf16.mxu0 %v10409_v1  ;;  %10606 = vmatprep.subr.bf16.mxu1 %v10605_v5  ;;  %v10623_v1 = vpack.c.bf16 %v432_v58, %v419_v56  ;;  %v10429_v2 = vpack.c.bf16 %v457_v60, %v444_v59  ;;  %v443_v3 = vld [vmem:[%s23926_s1 + $0xc30] sm:$0xff]  ;;  %v456_v4 = vld [vmem:[%s23926_s1 + $0xc98] sm:$0xff]  ;;  %v445_v5 = vld [vmem:[%s23926_s1 + $0xc40] sm:$0xff]  ;;  %v10625_v6 = vpack.c.bf16 %v459_v63, %v446_v62 }
  0x2c   :  { %v470_v8 = vld [vmem:[%s23926_s1 + $0xd08] sm:$0xff]  ;;  %v483_v9 = vld [vmem:[%s23926_s1 + $0xd70] sm:$0xff]  ;;  %v485_v13 = vld [vmem:[%s23926_s1 + $0xd80] sm:$0xff] }
  0x2d   :  { %v10433_v16 = vpack.c.bf16 %v483_v9, %v470_v8  ;;  %v469_v17 = vld [vmem:[%s23926_s1 + $0xd00] sm:$0xff]  ;;  %v482_v18 = vld [vmem:[%s23926_s1 + $0xd68] sm:$0xff]  ;;  %v484_v21 = vld [vmem:[%s23926_s1 + $0xd78] sm:$0xff] }
  0x2e   :  { %10412 = vmatpush1.bf16.msra.mxu0 %v10411_v12  ;;  %10608 = vmatpush1.bf16.msra.mxu1 %v10607_v14  ;;  %v472_v12 = vld [vmem:[%s23926_s1 + $0xd18] sm:$0xff]  ;;  %v10431_v14 = vpack.c.bf16 %v456_v4, %v443_v3  ;;  %v509_v23 = vld [vmem:[%s23926_s1 + $0xe40] sm:$0xff]  ;;  %v495_v31 = vld [vmem:[%s23926_s1 + $0xdd0] sm:$0xff] }
  0x2f   :  { %10414 = vmatprep.subr.bf16.mxu0 %v10413_v15  ;;  %10610 = vmatprep.subr.bf16.mxu1 %v10609_v19  ;;  %v10627_v15 = vpack.c.bf16 %v458_v7, %v445_v5  ;;  %v471_v19 = vld [vmem:[%s23926_s1 + $0xd10] sm:$0xff]  ;;  %v10629_v20 = vpack.c.bf16 %v485_v13, %v472_v12  ;;  %v496_v22 = vld [vmem:[%s23926_s1 + $0xdd8] sm:$0xff]  ;;  %v497_v34 = vld [vmem:[%s23926_s1 + $0xde0] sm:$0xff] }
  0x30   :  { %v10631_v29 = vpack.c.bf16 %v484_v21, %v471_v19  ;;  %v10437_v30 = vpack.c.bf16 %v509_v23, %v496_v22  ;;  %v510_v36 = vld [vmem:[%s23926_s1 + $0xe48] sm:$0xff]  ;;  %v535_v38 = vld [vmem:[%s23926_s1 + $0xf10] sm:$0xff]  ;;  %v536_v49 = vld [vmem:[%s23926_s1 + $0xf18] sm:$0xff] }
  0x31   :  { %v522_v37 = vld [vmem:[%s23926_s1 + $0xea8] sm:$0xff]  ;;  %v10635_v43 = vpack.c.bf16 %v510_v36, %v497_v34  ;;  %v523_v47 = vld [vmem:[%s23926_s1 + $0xeb0] sm:$0xff]  ;;  %v548_v50 = vld [vmem:[%s23926_s1 + $0xf78] sm:$0xff] }
  0x32   :  { %10416 = vmatpush1.bf16.msra.mxu0 %v10415_v26  ;;  %10612 = vmatpush1.bf16.msra.mxu1 %v10611_v27  ;;  %v498_v26 = vld [vmem:[%s23926_s1 + $0xde8] sm:$0xff]  ;;  %v511_v27 = vld [vmem:[%s23926_s1 + $0xe50] sm:$0xff]  ;;  %v10441_v44 = vpack.c.bf16 %v535_v38, %v522_v37  ;;  %v10639_v55 = vpack.c.bf16 %v536_v49, %v523_v47  ;;  %v560_v58 = vld [vmem:[%s23926_s1 + $0xfd8] sm:$0xff] }
  0x33   :  { %10418 = vmatprep.subr.bf16.mxu0 %v10417_v28  ;;  %10614 = vmatprep.subr.bf16.mxu1 %v10613_v33  ;;  %v10435_v28 = vpack.c.bf16 %v482_v18, %v469_v17  ;;  %v508_v33 = vld [vmem:[%s23926_s1 + $0xe38] sm:$0xff]  ;;  %v10633_v35 = vpack.c.bf16 %v511_v27, %v498_v26  ;;  %v534_v46 = vld [vmem:[%s23926_s1 + $0xf08] sm:$0xff]  ;;  %v549_v59 = vld [vmem:[%s23926_s1 + $0xf80] sm:$0xff] }
  0x34   :  { %v10439_v42 = vpack.c.bf16 %v508_v33, %v495_v31  ;;  %v562_v62 = vld [vmem:[%s23926_s1 + $0xfe8] sm:$0xff]  ;;  %v575_v8 = vld [vmem:[%s23926_s1 + $0x1050] sm:$0xff]  ;;  %v588_v10 = vld [vmem:[%s23926_s1 + $0x10b8] sm:$0xff] }
  0x35   :  { %v574_v63 = vld [vmem:[%s23926_s1 + $0x1048] sm:$0xff]  ;;  %v10643_v4 = vpack.c.bf16 %v562_v62, %v549_v59  ;;  %v600_v12 = vld [vmem:[%s23926_s1 + $0x1118] sm:$0xff]  ;;  %v613_v13 = vld [vmem:[%s23926_s1 + $0x1180] sm:$0xff]  ;;  %v10647_v17 = vpack.c.bf16 %v588_v10, %v575_v8 }
  0x36   :  { %10420 = vmatpush1.bf16.msra.mxu0 %v10419_v39  ;;  %10616 = vmatpush1.bf16.msra.mxu1 %v10615_v40  ;;  %v14286_v39 = vcombine.high %v14258_v24, %v14258_v24  ;;  %v524_v40 = vld [vmem:[%s23926_s1 + $0xeb8] sm:$0xff]  ;;  %v586_v7 = vld [vmem:[%s23926_s1 + $0x10a8] sm:$0xff]  ;;  %v10453_v18 = vpack.c.bf16 %v613_v13, %v600_v12  ;;  %v599_v19 = vld [vmem:[%s23926_s1 + $0x1110] sm:$0xff] }
  0x37   :  { %10422 = vmatprep.subr.bf16.mxu0 %v10421_v41  ;;  %10618 = vmatprep.subr.bf16.mxu1 %v10617_v45  ;;  %v537_v41 = vld [vmem:[%s23926_s1 + $0xf20] sm:$0xff]  ;;  %v614_v23 = vld [vmem:[%s23926_s1 + $0x1188] sm:$0xff]  ;;  %v639_v27 = vld [vmem:[%s23926_s1 + $0x1250] sm:$0xff] }
  0x38   :  { %v521_v45 = vld [vmem:[%s23926_s1 + $0xea0] sm:$0xff]  ;;  %v10637_v48 = vpack.c.bf16 %v537_v41, %v524_v40  ;;  %v626_v26 = vld [vmem:[%s23926_s1 + $0x11e8] sm:$0xff]  ;;  %v627_v36 = vld [vmem:[%s23926_s1 + $0x11f0] sm:$0xff] }
  0x39   :  { %v10443_v54 = vpack.c.bf16 %v534_v46, %v521_v45  ;;  %v601_v21 = vld [vmem:[%s23926_s1 + $0x1120] sm:$0xff]  ;;  %v10457_v33 = vpack.c.bf16 %v639_v27, %v626_v26  ;;  %v640_v38 = vld [vmem:[%s23926_s1 + $0x1258] sm:$0xff]  ;;  %v651_v47 = vld [vmem:[%s23926_s1 + $0x12b0] sm:$0xff] }
  0x3a   :  { %10424 = vmatpush1.bf16.msra.mxu0 %v10423_v51  ;;  %10620 = vmatpush1.bf16.msra.mxu1 %v10619_v52  ;;  %v561_v51 = vld [vmem:[%s23926_s1 + $0xfe0] sm:$0xff]  ;;  %v550_v52 = vld [vmem:[%s23926_s1 + $0xf88] sm:$0xff]  ;;  %v10651_v31 = vpack.c.bf16 %v614_v23, %v601_v21  ;;  %v652_v40 = vld [vmem:[%s23926_s1 + $0x12b8] sm:$0xff]  ;;  %v10655_v45 = vpack.c.bf16 %v640_v38, %v627_v36 }
  0x3b   :  { %10426 = vmatprep.subr.bf16.mxu0 %v10425_v53  ;;  %10622 = vmatprep.subr.bf16.mxu1 %v10621_v57  ;;  %v563_v53 = vld [vmem:[%s23926_s1 + $0xff0] sm:$0xff]  ;;  %v10445_v56 = vpack.c.bf16 %v561_v51, %v548_v50  ;;  %v625_v34 = vld [vmem:[%s23926_s1 + $0x11e0] sm:$0xff]  ;;  %v666_v51 = vld [vmem:[%s23926_s1 + $0x1328] sm:$0xff] }
  0x3c   :  { %v547_v57 = vld [vmem:[%s23926_s1 + $0xf70] sm:$0xff]  ;;  %v10641_v60 = vpack.c.bf16 %v563_v53, %v550_v52  ;;  %v665_v41 = vld [vmem:[%s23926_s1 + $0x1320] sm:$0xff]  ;;  %v678_v52 = vld [vmem:[%s23926_s1 + $0x1388] sm:$0xff] }
  0x3d   :  { %v10447_v3 = vpack.c.bf16 %v560_v58, %v547_v57  ;;  %v10461_v46 = vpack.c.bf16 %v665_v41, %v652_v40  ;;  %v653_v49 = vld [vmem:[%s23926_s1 + $0x12c0] sm:$0xff]  ;;  %v691_v53 = vld [vmem:[%s23926_s1 + $0x13f0] sm:$0xff]  ;;  %v718_v13 = vld [vmem:[%s23926_s1 + $0x14c8] sm:$0xff] }
  0x3e   :  { %10428 = vmatpush1.bf16.msra.mxu0 %v10427_v0  ;;  %10624 = vmatpush1.bf16.msra.mxu1 %v10623_v1  ;;  %v587_v0 = vld [vmem:[%s23926_s1 + $0x10b0] sm:$0xff]  ;;  %v576_v1 = vld [vmem:[%s23926_s1 + $0x1058] sm:$0xff]  ;;  %v10659_v57 = vpack.c.bf16 %v666_v51, %v653_v49  ;;  %v10465_v58 = vpack.c.bf16 %v691_v53, %v678_v52  ;;  %v677_v59 = vld [vmem:[%s23926_s1 + $0x1380] sm:$0xff] }
  0x3f   :  { %10430 = vmatprep.subr.bf16.mxu0 %v10429_v2  ;;  %10626 = vmatprep.subr.bf16.mxu1 %v10625_v6  ;;  %v589_v2 = vld [vmem:[%s23926_s1 + $0x10c0] sm:$0xff]  ;;  %v10449_v5 = vpack.c.bf16 %v587_v0, %v574_v63  ;;  %v679_v62 = vld [vmem:[%s23926_s1 + $0x1390] sm:$0xff]  ;;  %v692_v0 = vld [vmem:[%s23926_s1 + $0x13f8] sm:$0xff] }
  0x40   :  { %v573_v6 = vld [vmem:[%s23926_s1 + $0x1040] sm:$0xff]  ;;  %v10645_v9 = vpack.c.bf16 %v589_v2, %v576_v1  ;;  %v704_v1 = vld [vmem:[%s23926_s1 + $0x1458] sm:$0xff]  ;;  %v703_v8 = vld [vmem:[%s23926_s1 + $0x1450] sm:$0xff] }
  0x41   :  { %v717_v2 = vld [vmem:[%s23926_s1 + $0x14c0] sm:$0xff]  ;;  %v731_v23 = vld [vmem:[%s23926_s1 + $0x1530] sm:$0xff]  ;;  %v744_v27 = vld [vmem:[%s23926_s1 + $0x1598] sm:$0xff] }
  0x42   :  { %10432 = vmatpush1.bf16.msra.mxu0 %v10431_v14  ;;  %10628 = vmatpush1.bf16.msra.mxu1 %v10627_v15  ;;  %v602_v14 = vld [vmem:[%s23926_s1 + $0x1128] sm:$0xff]  ;;  %v615_v15 = vld [vmem:[%s23926_s1 + $0x1190] sm:$0xff]  ;;  %v705_v10 = vld [vmem:[%s23926_s1 + $0x1460] sm:$0xff] }
  0x43   :  { %10434 = vmatprep.subr.bf16.mxu0 %v10433_v16  ;;  %10630 = vmatprep.subr.bf16.mxu1 %v10629_v20  ;;  %v10451_v16 = vpack.c.bf16 %v586_v7, %v573_v6  ;;  %v612_v20 = vld [vmem:[%s23926_s1 + $0x1178] sm:$0xff]  ;;  %v10649_v22 = vpack.c.bf16 %v615_v15, %v602_v14  ;;  %v10663_v6 = vpack.c.bf16 %v692_v0, %v679_v62  ;;  %v730_v14 = vld [vmem:[%s23926_s1 + $0x1528] sm:$0xff]  ;;  %v743_v15 = vld [vmem:[%s23926_s1 + $0x1590] sm:$0xff] }
  0x44   :  { %v10469_v7 = vpack.c.bf16 %v717_v2, %v704_v1  ;;  %v729_v21 = vld [vmem:[%s23926_s1 + $0x1520] sm:$0xff]  ;;  %v755_v36 = vld [vmem:[%s23926_s1 + $0x15f0] sm:$0xff]  ;;  %v770_v41 = vld [vmem:[%s23926_s1 + $0x1668] sm:$0xff] }
  0x45   :  { %1505 = vmatmul.mubr.f32.vlgmr.msra.gmra.mrb[0].mxu0 %v14133_v25  ;;  %1789 = vmatmul.mubr.f32.vlgmr.msra.gmra.mrb[0].mxu1 %v14133_v25  ;;  %v757_v38 = vld [vmem:[%s23926_s1 + $0x1600] sm:$0xff]  ;;  %v783_v51 = vld [vmem:[%s23926_s1 + $0x16d0] sm:$0xff]  ;;  %v796_v53 = vld [vmem:[%s23926_s1 + $0x1738] sm:$0xff] }
  0x46   :  { %10436 = vmatpush1.bf16.msra.mxu0 %v10435_v28  ;;  %10632 = vmatpush1.bf16.msra.mxu1 %v10631_v29  ;;  %v628_v28 = vld [vmem:[%s23926_s1 + $0x11f8] sm:$0xff]  ;;  %v641_v29 = vld [vmem:[%s23926_s1 + $0x1260] sm:$0xff]  ;;  %v807_v62 = vld [vmem:[%s23926_s1 + $0x1790] sm:$0xff] }
  0x47   :  { %10438 = vmatprep.subr.bf16.mxu0 %v10437_v30  ;;  %10634 = vmatprep.subr.bf16.mxu1 %v10633_v35  ;;  %v10455_v30 = vpack.c.bf16 %v612_v20, %v599_v19  ;;  %v638_v35 = vld [vmem:[%s23926_s1 + $0x1248] sm:$0xff]  ;;  %v10653_v37 = vpack.c.bf16 %v641_v29, %v628_v28  ;;  %v10667_v19 = vpack.c.bf16 %v718_v13, %v705_v10  ;;  %v756_v28 = vld [vmem:[%s23926_s1 + $0x15f8] sm:$0xff]  ;;  %v769_v29 = vld [vmem:[%s23926_s1 + $0x1660] sm:$0xff] }
  0x48   :  { %1575 = vmatprep.mubr.f32.mxu0 %v14286_v39  ;;  %1859 = vmatprep.mubr.f32.mxu1 %v14286_v39  ;;  %v10473_v20 = vpack.c.bf16 %v743_v15, %v730_v14  ;;  %v781_v49 = vld [vmem:[%s23926_s1 + $0x16c0] sm:$0xff]  ;;  %v822_v2 = vld [vmem:[%s23926_s1 + $0x1808] sm:$0xff]  ;;  %v835_v13 = vld [vmem:[%s23926_s1 + $0x1870] sm:$0xff] }
  0x49   :  { %v809_v0 = vld [vmem:[%s23926_s1 + $0x17a0] sm:$0xff]  ;;  %v848_v15 = vld [vmem:[%s23926_s1 + $0x18d8] sm:$0xff] }
  0x4a   :  { %10440 = vmatpush1.bf16.msra.mxu0 %v10439_v42  ;;  %10636 = vmatpush1.bf16.msra.mxu1 %v10635_v43  ;;  %v654_v42 = vld [vmem:[%s23926_s1 + $0x12c8] sm:$0xff]  ;;  %v667_v43 = vld [vmem:[%s23926_s1 + $0x1330] sm:$0xff]  ;;  %v833_v10 = vld [vmem:[%s23926_s1 + $0x1860] sm:$0xff] }
  0x4b   :  { %10442 = vmatprep.subr.bf16.mxu0 %v10441_v44  ;;  %10638 = vmatprep.subr.bf16.mxu1 %v10637_v48  ;;  %v10459_v44 = vpack.c.bf16 %v638_v35, %v625_v34  ;;  %v664_v48 = vld [vmem:[%s23926_s1 + $0x1318] sm:$0xff]  ;;  %v10657_v50 = vpack.c.bf16 %v667_v43, %v654_v42  ;;  %v10671_v34 = vpack.c.bf16 %v744_v27, %v731_v23  ;;  %v782_v42 = vld [vmem:[%s23926_s1 + $0x16c8] sm:$0xff]  ;;  %v795_v43 = vld [vmem:[%s23926_s1 + $0x1730] sm:$0xff] }
  0x4c   :  { %v10477_v35 = vpack.c.bf16 %v769_v29, %v756_v28  ;;  %v859_v23 = vld [vmem:[%s23926_s1 + $0x1930] sm:$0xff]  ;;  %v861_v27 = vld [vmem:[%s23926_s1 + $0x1940] sm:$0xff]  ;;  %v874_v29 = vld [vmem:[%s23926_s1 + $0x19a8] sm:$0xff] }
  0x4e   :  { %10444 = vmatpush1.bf16.msra.mxu0 %v10443_v54  ;;  %10640 = vmatpush1.bf16.msra.mxu1 %v10639_v55  ;;  %v680_v54 = vld [vmem:[%s23926_s1 + $0x1398] sm:$0xff]  ;;  %v693_v55 = vld [vmem:[%s23926_s1 + $0x1400] sm:$0xff] }
  0x4f   :  { %10446 = vmatprep.subr.bf16.mxu0 %v10445_v56  ;;  %10642 = vmatprep.subr.bf16.mxu1 %v10641_v60  ;;  %v10463_v56 = vpack.c.bf16 %v664_v48, %v651_v47  ;;  %v690_v60 = vld [vmem:[%s23926_s1 + $0x13e8] sm:$0xff]  ;;  %v10661_v63 = vpack.c.bf16 %v693_v55, %v680_v54  ;;  %v10675_v47 = vpack.c.bf16 %v770_v41, %v757_v38  ;;  %v808_v54 = vld [vmem:[%s23926_s1 + $0x1798] sm:$0xff]  ;;  %v821_v55 = vld [vmem:[%s23926_s1 + $0x1800] sm:$0xff] }
  0x50   :  { %v10481_v48 = vpack.c.bf16 %v795_v43, %v782_v42  ;;  %v885_v38 = vld [vmem:[%s23926_s1 + $0x1a00] sm:$0xff]  ;;  %v887_v41 = vld [vmem:[%s23926_s1 + $0x1a10] sm:$0xff]  ;;  %v900_v43 = vld [vmem:[%s23926_s1 + $0x1a78] sm:$0xff] }
  0x52   :  { %10448 = vmatpush1.bf16.msra.mxu0 %v10447_v3  ;;  %10644 = vmatpush1.bf16.msra.mxu1 %v10643_v4  ;;  %v706_v3 = vld [vmem:[%s23926_s1 + $0x1468] sm:$0xff]  ;;  %v719_v4 = vld [vmem:[%s23926_s1 + $0x14d0] sm:$0xff] }
  0x53   :  { %10450 = vmatprep.subr.bf16.mxu0 %v10449_v5  ;;  %10646 = vmatprep.subr.bf16.mxu1 %v10645_v9  ;;  %v10467_v5 = vpack.c.bf16 %v690_v60, %v677_v59  ;;  %v716_v9 = vld [vmem:[%s23926_s1 + $0x14b8] sm:$0xff]  ;;  %v10665_v12 = vpack.c.bf16 %v719_v4, %v706_v3  ;;  %v10679_v59 = vpack.c.bf16 %v796_v53, %v783_v51  ;;  %v834_v3 = vld [vmem:[%s23926_s1 + $0x1868] sm:$0xff]  ;;  %v847_v4 = vld [vmem:[%s23926_s1 + $0x18d0] sm:$0xff] }
  0x54   :  { %v10485_v60 = vpack.c.bf16 %v821_v55, %v808_v54  ;;  %v924_v53 = vld [vmem:[%s23926_s1 + $0x1b38] sm:$0xff]  ;;  %v913_v54 = vld [vmem:[%s23926_s1 + $0x1ae0] sm:$0xff] }
  0x56   :  { %10452 = vmatpush1.bf16.msra.mxu0 %v10451_v16  ;;  %10648 = vmatpush1.bf16.msra.mxu1 %v10647_v17  ;;  %v732_v16 = vld [vmem:[%s23926_s1 + $0x1538] sm:$0xff]  ;;  %v745_v17 = vld [vmem:[%s23926_s1 + $0x15a0] sm:$0xff] }
  0x57   :  { %10454 = vmatprep.subr.bf16.mxu0 %v10453_v18  ;;  %10650 = vmatprep.subr.bf16.mxu1 %v10649_v22  ;;  %v10471_v18 = vpack.c.bf16 %v716_v9, %v703_v8  ;;  %v742_v22 = vld [vmem:[%s23926_s1 + $0x1588] sm:$0xff]  ;;  %v10669_v26 = vpack.c.bf16 %v745_v17, %v732_v16  ;;  %v10683_v8 = vpack.c.bf16 %v822_v2, %v809_v0  ;;  %v860_v16 = vld [vmem:[%s23926_s1 + $0x1938] sm:$0xff]  ;;  %v873_v17 = vld [vmem:[%s23926_s1 + $0x19a0] sm:$0xff] }
  0x58   :  { %v10489_v9 = vpack.c.bf16 %v847_v4, %v834_v3  ;;  %v937_v3 = vld [vmem:[%s23926_s1 + $0x1ba0] sm:$0xff]  ;;  %v950_v4 = vld [vmem:[%s23926_s1 + $0x1c08] sm:$0xff] }
  0x5a   :  { %10456 = vmatpush1.bf16.msra.mxu0 %v10455_v30  ;;  %10652 = vmatpush1.bf16.msra.mxu1 %v10651_v31  ;;  %v758_v30 = vld [vmem:[%s23926_s1 + $0x1608] sm:$0xff]  ;;  %v771_v31 = vld [vmem:[%s23926_s1 + $0x1670] sm:$0xff] }
  0x5b   :  { %10458 = vmatprep.subr.bf16.mxu0 %v10457_v33  ;;  %10654 = vmatprep.subr.bf16.mxu1 %v10653_v37  ;;  %v10475_v33 = vpack.c.bf16 %v742_v22, %v729_v21  ;;  %v768_v37 = vld [vmem:[%s23926_s1 + $0x1658] sm:$0xff]  ;;  %v10673_v40 = vpack.c.bf16 %v771_v31, %v758_v30  ;;  %v10687_v21 = vpack.c.bf16 %v848_v15, %v835_v13  ;;  %v886_v30 = vld [vmem:[%s23926_s1 + $0x1a08] sm:$0xff]  ;;  %v899_v31 = vld [vmem:[%s23926_s1 + $0x1a70] sm:$0xff] }
  0x5c   :  { %v10493_v22 = vpack.c.bf16 %v873_v17, %v860_v16  ;;  %v10507_v13 = vpack.c.bf16 %v950_v4, %v937_v3  ;;  %v963_v16 = vld [vmem:[%s23926_s1 + $0x1c70] sm:$0xff]  ;;  %v976_v17 = vld [vmem:[%s23926_s1 + $0x1cd8] sm:$0xff]  ;;  %v1070_v3 = vld [vmem:[%s23926_s1 + $0x1fc8] sm:$0xff] }
  0x5d   :  { %v1083_v4 = vld [vmem:[%s23926_s1 + $0x2030] sm:$0xff] }
  0x5e   :  { %10460 = vmatpush1.bf16.msra.mxu0 %v10459_v44  ;;  %10656 = vmatpush1.bf16.msra.mxu1 %v10655_v45  ;;  %v784_v44 = vld [vmem:[%s23926_s1 + $0x16d8] sm:$0xff]  ;;  %v797_v45 = vld [vmem:[%s23926_s1 + $0x1740] sm:$0xff] }
  0x5f   :  { %10462 = vmatprep.subr.bf16.mxu0 %v10461_v46  ;;  %10658 = vmatprep.subr.bf16.mxu1 %v10657_v50  ;;  %v10479_v46 = vpack.c.bf16 %v768_v37, %v755_v36  ;;  %v794_v50 = vld [vmem:[%s23926_s1 + $0x1728] sm:$0xff]  ;;  %v10677_v52 = vpack.c.bf16 %v797_v45, %v784_v44  ;;  %v10691_v36 = vpack.c.bf16 %v874_v29, %v861_v27  ;;  %v912_v44 = vld [vmem:[%s23926_s1 + $0x1ad8] sm:$0xff]  ;;  %v925_v45 = vld [vmem:[%s23926_s1 + $0x1b40] sm:$0xff] }
  0x60   :  { %v10497_v37 = vpack.c.bf16 %v899_v31, %v886_v30  ;;  %v10501_v51 = vpack.c.bf16 %v925_v45, %v912_v44  ;;  %v10511_v27 = vpack.c.bf16 %v976_v17, %v963_v16  ;;  %v989_v30 = vld [vmem:[%s23926_s1 + $0x1d40] sm:$0xff]  ;;  %v1002_v31 = vld [vmem:[%s23926_s1 + $0x1da8] sm:$0xff]  ;;  %v1015_v44 = vld [vmem:[%s23926_s1 + $0x1e10] sm:$0xff] }
  0x61   :  { %v1028_v45 = vld [vmem:[%s23926_s1 + $0x1e78] sm:$0xff]  ;;  %v1109_v17 = vld [vmem:[%s23926_s1 + $0x2100] sm:$0xff] }
  0x62   :  { %10464 = vmatpush1.bf16.msra.mxu0 %v10463_v56  ;;  %10660 = vmatpush1.bf16.msra.mxu1 %v10659_v57  ;;  %v810_v56 = vld [vmem:[%s23926_s1 + $0x17a8] sm:$0xff]  ;;  %v823_v57 = vld [vmem:[%s23926_s1 + $0x1810] sm:$0xff]  ;;  %v1096_v16 = vld [vmem:[%s23926_s1 + $0x2098] sm:$0xff] }
  0x63   :  { %10466 = vmatprep.subr.bf16.mxu0 %v10465_v58  ;;  %10662 = vmatprep.subr.bf16.mxu1 %v10661_v63  ;;  %v10483_v58 = vpack.c.bf16 %v794_v50, %v781_v49  ;;  %v820_v63 = vld [vmem:[%s23926_s1 + $0x17f8] sm:$0xff]  ;;  %v10681_v1 = vpack.c.bf16 %v823_v57, %v810_v56  ;;  %v14661_v49 = vld [vmem:[%s23925_s0 + $0x8] sm:$0x3f]  ;;  %v10695_v50 = vpack.c.bf16 %v900_v43, %v887_v41 }
  0x64   :  { %v14674_v55 = vrot.slane %v14661_v49, %v14100_v11  ;;  %v926_v57 = vld [vmem:[%s23926_s1 + $0x1b48] sm:$0xff]  ;;  %v10515_v41 = vpack.c.bf16 %v1002_v31, %v989_v30  ;;  %v1135_v31 = vld [vmem:[%s23926_s1 + $0x21d0] sm:$0xff] }
  0x65   :  { %v1122_v30 = vld [vmem:[%s23926_s1 + $0x2168] sm:$0xff] }
  0x66   :  { %10468 = vmatpush1.bf16.msra.mxu0 %v10467_v5  ;;  %10664 = vmatpush1.bf16.msra.mxu1 %v10663_v6  ;;  %v836_v5 = vld [vmem:[%s23926_s1 + $0x1878] sm:$0xff]  ;;  %v849_v6 = vld [vmem:[%s23926_s1 + $0x18e0] sm:$0xff] }
  0x67   :  { %10470 = vmatprep.subr.bf16.mxu0 %v10469_v7  ;;  %10666 = vmatprep.subr.bf16.mxu1 %v10665_v12  ;;  %v10487_v7 = vpack.c.bf16 %v820_v63, %v807_v62  ;;  %v846_v12 = vld [vmem:[%s23926_s1 + $0x18c8] sm:$0xff]  ;;  %v10685_v14 = vpack.c.bf16 %v849_v6, %v836_v5  ;;  %v953_v62 = vld [vmem:[%s23926_s1 + $0x1c20] sm:$0xff]  ;;  %v14694_v63 = vcombine.high %v14674_v55, %v14674_v55  ;;  %v939_v5 = vld [vmem:[%s23926_s1 + $0x1bb0] sm:$0xff] }
  0x6a   :  { %10472 = vmatpush1.bf16.msra.mxu0 %v10471_v18  ;;  %10668 = vmatpush1.bf16.msra.mxu1 %v10667_v19  ;;  %v862_v18 = vld [vmem:[%s23926_s1 + $0x1948] sm:$0xff]  ;;  %v875_v19 = vld [vmem:[%s23926_s1 + $0x19b0] sm:$0xff] }
  0x6b   :  { %10474 = vmatprep.subr.bf16.mxu0 %v10473_v20  ;;  %10670 = vmatprep.subr.bf16.mxu1 %v10669_v26  ;;  %v10491_v20 = vpack.c.bf16 %v846_v12, %v833_v10  ;;  %v872_v26 = vld [vmem:[%s23926_s1 + $0x1998] sm:$0xff]  ;;  %v10689_v28 = vpack.c.bf16 %v875_v19, %v862_v18  ;;  %v966_v10 = vld [vmem:[%s23926_s1 + $0x1c88] sm:$0xff]  ;;  %v979_v12 = vld [vmem:[%s23926_s1 + $0x1cf0] sm:$0xff] }
  0x6c   :  { %v965_v18 = vld [vmem:[%s23926_s1 + $0x1c80] sm:$0xff]  ;;  %v10705_v19 = vpack.c.bf16 %v979_v12, %v966_v10  ;;  %v10721_v12 = vpack.c.bf16 %v1083_v4, %v1070_v3 }
  0x6d   :  { %v1069_v10 = vld [vmem:[%s23926_s1 + $0x1fc0] sm:$0xff] }
  0x6e   :  { %10476 = vmatpush1.bf16.msra.mxu0 %v10475_v33  ;;  %10672 = vmatpush1.bf16.msra.mxu1 %v10671_v34  ;;  %v888_v33 = vld [vmem:[%s23926_s1 + $0x1a18] sm:$0xff]  ;;  %v901_v34 = vld [vmem:[%s23926_s1 + $0x1a80] sm:$0xff] }
  0x6f   :  { %10478 = vmatprep.subr.bf16.mxu0 %v10477_v35  ;;  %10674 = vmatprep.subr.bf16.mxu1 %v10673_v40  ;;  %v10495_v35 = vpack.c.bf16 %v872_v26, %v859_v23  ;;  %v898_v40 = vld [vmem:[%s23926_s1 + $0x1a68] sm:$0xff]  ;;  %v10693_v42 = vpack.c.bf16 %v901_v34, %v888_v33  ;;  %v992_v23 = vld [vmem:[%s23926_s1 + $0x1d58] sm:$0xff]  ;;  %v1005_v26 = vld [vmem:[%s23926_s1 + $0x1dc0] sm:$0xff] }
  0x70   :  { %v991_v33 = vld [vmem:[%s23926_s1 + $0x1d50] sm:$0xff]  ;;  %v10709_v34 = vpack.c.bf16 %v1005_v26, %v992_v23  ;;  %v10725_v26 = vpack.c.bf16 %v1109_v17, %v1096_v16  ;;  %v1173_v3 = vld [vmem:[%s23926_s1 + $0x2300] sm:$0xff] }
  0x71   :  { %v1095_v23 = vld [vmem:[%s23926_s1 + $0x2090] sm:$0xff] }
  0x72   :  { %10480 = vmatpush1.bf16.msra.mxu0 %v10479_v46  ;;  %10676 = vmatpush1.bf16.msra.mxu1 %v10675_v47  ;;  %v914_v46 = vld [vmem:[%s23926_s1 + $0x1ae8] sm:$0xff]  ;;  %v927_v47 = vld [vmem:[%s23926_s1 + $0x1b50] sm:$0xff] }
  0x73   :  { %10482 = vmatprep.subr.bf16.mxu0 %v10481_v48  ;;  %10678 = vmatprep.subr.bf16.mxu1 %v10677_v52  ;;  %v10499_v48 = vpack.c.bf16 %v898_v40, %v885_v38  ;;  %v911_v52 = vld [vmem:[%s23926_s1 + $0x1ad0] sm:$0xff]  ;;  %v10697_v56 = vpack.c.bf16 %v927_v47, %v914_v46  ;;  %v1018_v38 = vld [vmem:[%s23926_s1 + $0x1e28] sm:$0xff]  ;;  %v1017_v46 = vld [vmem:[%s23926_s1 + $0x1e20] sm:$0xff] }
  0x74   :  { %v10503_v0 = vpack.c.bf16 %v924_v53, %v911_v52  ;;  %v1031_v40 = vld [vmem:[%s23926_s1 + $0x1e90] sm:$0xff]  ;;  %v1044_v52 = vld [vmem:[%s23926_s1 + $0x1ef8] sm:$0xff]  ;;  %v1057_v53 = vld [vmem:[%s23926_s1 + $0x1f60] sm:$0xff] }
  0x75   :  { %v10713_v47 = vpack.c.bf16 %v1031_v40, %v1018_v38  ;;  %v1121_v38 = vld [vmem:[%s23926_s1 + $0x2160] sm:$0xff]  ;;  %v10729_v40 = vpack.c.bf16 %v1135_v31, %v1122_v30  ;;  %v1199_v16 = vld [vmem:[%s23926_s1 + $0x23d0] sm:$0xff] }
  0x76   :  { %10484 = vmatpush1.bf16.msra.mxu0 %v10483_v58  ;;  %10680 = vmatpush1.bf16.msra.mxu1 %v10679_v59  ;;  %v938_v58 = vld [vmem:[%s23926_s1 + $0x1ba8] sm:$0xff]  ;;  %v951_v59 = vld [vmem:[%s23926_s1 + $0x1c10] sm:$0xff]  ;;  %v1225_v30 = vld [vmem:[%s23926_s1 + $0x24a0] sm:$0xff] }
  0x77   :  { %10486 = vmatprep.subr.bf16.mxu0 %v10485_v60  ;;  %10682 = vmatprep.subr.bf16.mxu1 %v10681_v1  ;;  %v940_v60 = vld [vmem:[%s23926_s1 + $0x1bb8] sm:$0xff]  ;;  %v10699_v1 = vpack.c.bf16 %v926_v57, %v913_v54  ;;  %v10505_v2 = vpack.c.bf16 %v951_v59, %v938_v58  ;;  %v10519_v54 = vpack.c.bf16 %v1028_v45, %v1015_v44  ;;  %v1041_v58 = vld [vmem:[%s23926_s1 + $0x1ee0] sm:$0xff]  ;;  %v1054_v59 = vld [vmem:[%s23926_s1 + $0x1f48] sm:$0xff] }
  0x78   :  { %v10701_v6 = vpack.c.bf16 %v953_v62, %v940_v60  ;;  %v1043_v60 = vld [vmem:[%s23926_s1 + $0x1ef0] sm:$0xff]  ;;  %v10717_v62 = vpack.c.bf16 %v1057_v53, %v1044_v52  ;;  %v1148_v44 = vld [vmem:[%s23926_s1 + $0x2238] sm:$0xff]  ;;  %v1161_v45 = vld [vmem:[%s23926_s1 + $0x22a0] sm:$0xff] }
  0x79   :  { %v1147_v52 = vld [vmem:[%s23926_s1 + $0x2230] sm:$0xff]  ;;  %v10733_v53 = vpack.c.bf16 %v1161_v45, %v1148_v44 }
  0x7a   :  { %10488 = vmatpush1.bf16.msra.mxu0 %v10487_v7  ;;  %10684 = vmatpush1.bf16.msra.mxu1 %v10683_v8  ;;  %v952_v7 = vld [vmem:[%s23926_s1 + $0x1c18] sm:$0xff]  ;;  %v1251_v44 = vld [vmem:[%s23926_s1 + $0x2570] sm:$0xff] }
  0x7b   :  { %10490 = vmatprep.subr.bf16.mxu0 %v10489_v9  ;;  %10686 = vmatprep.subr.bf16.mxu1 %v10685_v14  ;;  %v964_v8 = vld [vmem:[%s23926_s1 + $0x1c78] sm:$0xff]  ;;  %v977_v9 = vld [vmem:[%s23926_s1 + $0x1ce0] sm:$0xff]  ;;  %v10703_v14 = vpack.c.bf16 %v952_v7, %v939_v5  ;;  %v10523_v5 = vpack.c.bf16 %v1054_v59, %v1041_v58  ;;  %v1174_v58 = vld [vmem:[%s23926_s1 + $0x2308] sm:$0xff] }
  0x7c   :  { %v10509_v15 = vpack.c.bf16 %v977_v9, %v964_v8  ;;  %v1067_v8 = vld [vmem:[%s23926_s1 + $0x1fb0] sm:$0xff]  ;;  %v1080_v9 = vld [vmem:[%s23926_s1 + $0x2018] sm:$0xff] }
  0x7d   :  { %v1187_v59 = vld [vmem:[%s23926_s1 + $0x2370] sm:$0xff] }
  0x7e   :  { %10492 = vmatpush1.bf16.msra.mxu0 %v10491_v20  ;;  %10688 = vmatpush1.bf16.msra.mxu1 %v10687_v21  ;;  %v978_v20 = vld [vmem:[%s23926_s1 + $0x1ce8] sm:$0xff]  ;;  %v10737_v4 = vpack.c.bf16 %v1187_v59, %v1174_v58  ;;  %v1277_v58 = vld [vmem:[%s23926_s1 + $0x2640] sm:$0xff] }
  0x7f   :  { %10494 = vmatprep.subr.bf16.mxu0 %v10493_v22  ;;  %10690 = vmatprep.subr.bf16.mxu1 %v10689_v28  ;;  %v990_v21 = vld [vmem:[%s23926_s1 + $0x1d48] sm:$0xff]  ;;  %v1003_v22 = vld [vmem:[%s23926_s1 + $0x1db0] sm:$0xff]  ;;  %v10707_v28 = vpack.c.bf16 %v978_v20, %v965_v18  ;;  %v10527_v18 = vpack.c.bf16 %v1080_v9, %v1067_v8  ;;  %v1200_v8 = vld [vmem:[%s23926_s1 + $0x23d8] sm:$0xff] }
  0x80   :  { %v10513_v29 = vpack.c.bf16 %v1003_v22, %v990_v21  ;;  %v1093_v21 = vld [vmem:[%s23926_s1 + $0x2080] sm:$0xff]  ;;  %v1106_v22 = vld [vmem:[%s23926_s1 + $0x20e8] sm:$0xff] }
  0x81   :  { %v1213_v9 = vld [vmem:[%s23926_s1 + $0x2440] sm:$0xff] }
  0x82   :  { %10496 = vmatpush1.bf16.msra.mxu0 %v10495_v35  ;;  %10692 = vmatpush1.bf16.msra.mxu1 %v10691_v36  ;;  %v1004_v35 = vld [vmem:[%s23926_s1 + $0x1db8] sm:$0xff]  ;;  %v10741_v17 = vpack.c.bf16 %v1213_v9, %v1200_v8  ;;  %v1303_v9 = vld [vmem:[%s23926_s1 + $0x2710] sm:$0xff] }
  0x83   :  { %10498 = vmatprep.subr.bf16.mxu0 %v10497_v37  ;;  %10694 = vmatprep.subr.bf16.mxu1 %v10693_v42  ;;  %v1016_v36 = vld [vmem:[%s23926_s1 + $0x1e18] sm:$0xff]  ;;  %v1029_v37 = vld [vmem:[%s23926_s1 + $0x1e80] sm:$0xff]  ;;  %v10711_v42 = vpack.c.bf16 %v1004_v35, %v991_v33  ;;  %v10531_v33 = vpack.c.bf16 %v1106_v22, %v1093_v21  ;;  %v1226_v21 = vld [vmem:[%s23926_s1 + $0x24a8] sm:$0xff] }
  0x84   :  { %v10517_v43 = vpack.c.bf16 %v1029_v37, %v1016_v36  ;;  %v1119_v36 = vld [vmem:[%s23926_s1 + $0x2150] sm:$0xff]  ;;  %v1132_v37 = vld [vmem:[%s23926_s1 + $0x21b8] sm:$0xff] }
  0x85   :  { %1576 = vmatmul.mubr.f32.vlgmr.msra.gmra.mrb[0].mxu0 %v14258_v24  ;;  %1860 = vmatmul.mubr.f32.vlgmr.msra.gmra.mrb[0].mxu1 %v14258_v24  ;;  %v1239_v22 = vld [vmem:[%s23926_s1 + $0x2510] sm:$0xff] }
  0x86   :  { %10500 = vmatpush1.bf16.msra.mxu0 %v10499_v48  ;;  %10696 = vmatpush1.bf16.msra.mxu1 %v10695_v50  ;;  %v1030_v48 = vld [vmem:[%s23926_s1 + $0x1e88] sm:$0xff]  ;;  %v10745_v31 = vpack.c.bf16 %v1239_v22, %v1226_v21  ;;  %v23941_v21 = vmov 0.0   ;;  %v57_v22 = vld [vmem:[%s23926_s1 + $0x20] sm:$0xff] }
  0x87   :  { %10502 = vmatprep.subr.bf16.mxu0 %v10501_v51  ;;  %10698 = vmatprep.subr.bf16.mxu1 %v10697_v56  ;;  %v1042_v50 = vld [vmem:[%s23926_s1 + $0x1ee8] sm:$0xff]  ;;  %v1055_v51 = vld [vmem:[%s23926_s1 + $0x1f50] sm:$0xff]  ;;  %v10715_v56 = vpack.c.bf16 %v1030_v48, %v1017_v46  ;;  %v10535_v46 = vpack.c.bf16 %v1132_v37, %v1119_v36  ;;  %v1252_v36 = vld [vmem:[%s23926_s1 + $0x2578] sm:$0xff] }
  0x88   :  { %1646 = vmatprep.mubr.f32.mxu0 %v14694_v63  ;;  %1930 = vmatprep.mubr.f32.mxu1 %v14694_v63  ;;  %v10521_v57 = vpack.c.bf16 %v1055_v51, %v1042_v50  ;;  %v1145_v50 = vld [vmem:[%s23926_s1 + $0x2220] sm:$0xff]  ;;  %v1158_v51 = vld [vmem:[%s23926_s1 + $0x2288] sm:$0xff] }
  0x89   :  { %v1265_v37 = vld [vmem:[%s23926_s1 + $0x25e0] sm:$0xff] }
  0x8a   :  { %10504 = vmatpush1.bf16.msra.mxu0 %v10503_v0  ;;  %10700 = vmatpush1.bf16.msra.mxu1 %v10699_v1  ;;  %v1056_v0 = vld [vmem:[%s23926_s1 + $0x1f58] sm:$0xff]  ;;  %v10749_v45 = vpack.c.bf16 %v1265_v37, %v1252_v36  ;;  %v83_v36 = vld [vmem:[%s23926_s1 + $0xf0] sm:$0xff]  ;;  %v85_v37 = vld [vmem:[%s23926_s1 + $0x100] sm:$0xff] }
  0x8b   :  { %10506 = vmatprep.subr.bf16.mxu0 %v10505_v2  ;;  %10702 = vmatprep.subr.bf16.mxu1 %v10701_v6  ;;  %v1068_v1 = vld [vmem:[%s23926_s1 + $0x1fb8] sm:$0xff]  ;;  %v1081_v2 = vld [vmem:[%s23926_s1 + $0x2020] sm:$0xff]  ;;  %v10719_v6 = vpack.c.bf16 %v1056_v0, %v1043_v60  ;;  %v10539_v60 = vpack.c.bf16 %v1158_v51, %v1145_v50  ;;  %v1278_v50 = vld [vmem:[%s23926_s1 + $0x2648] sm:$0xff] }
  0x8c   :  { %v10525_v7 = vpack.c.bf16 %v1081_v2, %v1068_v1  ;;  %v1171_v1 = vld [vmem:[%s23926_s1 + $0x22f0] sm:$0xff]  ;;  %v1184_v2 = vld [vmem:[%s23926_s1 + $0x2358] sm:$0xff] }
  0x8d   :  { %v1291_v51 = vld [vmem:[%s23926_s1 + $0x26b0] sm:$0xff] }
  0x8e   :  { %10508 = vmatpush1.bf16.msra.mxu0 %v10507_v13  ;;  %10704 = vmatpush1.bf16.msra.mxu1 %v10703_v14  ;;  %v1082_v13 = vld [vmem:[%s23926_s1 + $0x2028] sm:$0xff]  ;;  %v10753_v59 = vpack.c.bf16 %v1291_v51, %v1278_v50  ;;  %v111_v51 = vld [vmem:[%s23926_s1 + $0x1d0] sm:$0xff] }
  0x8f   :  { %10510 = vmatprep.subr.bf16.mxu0 %v10509_v15  ;;  %10706 = vmatprep.subr.bf16.mxu1 %v10705_v19  ;;  %v1094_v14 = vld [vmem:[%s23926_s1 + $0x2088] sm:$0xff]  ;;  %v1107_v15 = vld [vmem:[%s23926_s1 + $0x20f0] sm:$0xff]  ;;  %v10723_v19 = vpack.c.bf16 %v1082_v13, %v1069_v10  ;;  %v10543_v10 = vpack.c.bf16 %v1184_v2, %v1171_v1  ;;  %v1304_v1 = vld [vmem:[%s23926_s1 + $0x2718] sm:$0xff] }
  0x90   :  { %v10529_v20 = vpack.c.bf16 %v1107_v15, %v1094_v14  ;;  %v1197_v14 = vld [vmem:[%s23926_s1 + $0x23c0] sm:$0xff]  ;;  %v1210_v15 = vld [vmem:[%s23926_s1 + $0x2428] sm:$0xff] }
  0x91   :  { %v1317_v2 = vld [vmem:[%s23926_s1 + $0x2780] sm:$0xff]  ;;  %v122_v50 = vld [vmem:[%s23926_s1 + $0x228] sm:$0xff] }
  0x92   :  { %10512 = vmatpush1.bf16.msra.mxu0 %v10511_v27  ;;  %10708 = vmatpush1.bf16.msra.mxu1 %v10707_v28  ;;  %v1108_v27 = vld [vmem:[%s23926_s1 + $0x20f8] sm:$0xff]  ;;  %v10757_v8 = vpack.c.bf16 %v1317_v2, %v1304_v1  ;;  %v137_v2 = vld [vmem:[%s23926_s1 + $0x2a0] sm:$0xff] }
  0x93   :  { %10514 = vmatprep.subr.bf16.mxu0 %v10513_v29  ;;  %10710 = vmatprep.subr.bf16.mxu1 %v10709_v34  ;;  %v1120_v28 = vld [vmem:[%s23926_s1 + $0x2158] sm:$0xff]  ;;  %v1133_v29 = vld [vmem:[%s23926_s1 + $0x21c0] sm:$0xff]  ;;  %v10727_v34 = vpack.c.bf16 %v1108_v27, %v1095_v23  ;;  %v10547_v23 = vpack.c.bf16 %v1210_v15, %v1197_v14 }
  0x94   :  { %v10533_v35 = vpack.c.bf16 %v1133_v29, %v1120_v28  ;;  %v1223_v28 = vld [vmem:[%s23926_s1 + $0x2490] sm:$0xff]  ;;  %v1236_v29 = vld [vmem:[%s23926_s1 + $0x24f8] sm:$0xff] }
  0x95   :  { %v60_v15 = vld [vmem:[%s23926_s1 + $0x38] sm:$0xff] }
  0x96   :  { %10516 = vmatpush1.bf16.msra.mxu0 %v10515_v41  ;;  %10712 = vmatpush1.bf16.msra.mxu1 %v10711_v42  ;;  %v1134_v41 = vld [vmem:[%s23926_s1 + $0x21c8] sm:$0xff]  ;;  %v148_v1 = vld [vmem:[%s23926_s1 + $0x2f8] sm:$0xff] }
  0x97   :  { %10518 = vmatprep.subr.bf16.mxu0 %v10517_v43  ;;  %10714 = vmatprep.subr.bf16.mxu1 %v10713_v47  ;;  %v1146_v42 = vld [vmem:[%s23926_s1 + $0x2228] sm:$0xff]  ;;  %v1159_v43 = vld [vmem:[%s23926_s1 + $0x2290] sm:$0xff]  ;;  %v10731_v47 = vpack.c.bf16 %v1134_v41, %v1121_v38  ;;  %v10551_v38 = vpack.c.bf16 %v1236_v29, %v1223_v28  ;;  %v97_v28 = vld [vmem:[%s23926_s1 + $0x160] sm:$0xff] }
  0x98   :  { %v10537_v48 = vpack.c.bf16 %v1159_v43, %v1146_v42  ;;  %v1249_v42 = vld [vmem:[%s23926_s1 + $0x2560] sm:$0xff]  ;;  %v1262_v43 = vld [vmem:[%s23926_s1 + $0x25c8] sm:$0xff] }
  0x9a   :  { %10520 = vmatpush1.bf16.msra.mxu0 %v10519_v54  ;;  %10716 = vmatpush1.bf16.msra.mxu1 %v10715_v56  ;;  %v1160_v54 = vld [vmem:[%s23926_s1 + $0x2298] sm:$0xff] }
  0x9b   :  { %10522 = vmatprep.subr.bf16.mxu0 %v10521_v57  ;;  %10718 = vmatprep.subr.bf16.mxu1 %v10717_v62  ;;  %v1172_v56 = vld [vmem:[%s23926_s1 + $0x22f8] sm:$0xff]  ;;  %v1185_v57 = vld [vmem:[%s23926_s1 + $0x2360] sm:$0xff]  ;;  %v10735_v62 = vpack.c.bf16 %v1160_v54, %v1147_v52  ;;  %v10555_v52 = vpack.c.bf16 %v1262_v43, %v1249_v42  ;;  %v123_v42 = vld [vmem:[%s23926_s1 + $0x230] sm:$0xff] }
  0x9c   :  { %v10541_v0 = vpack.c.bf16 %v1185_v57, %v1172_v56  ;;  %v1275_v56 = vld [vmem:[%s23926_s1 + $0x2630] sm:$0xff]  ;;  %v1288_v57 = vld [vmem:[%s23926_s1 + $0x2698] sm:$0xff] }
  0x9d   :  { %v112_v43 = vld [vmem:[%s23926_s1 + $0x1d8] sm:$0xff] }
  0x9e   :  { %10524 = vmatpush1.bf16.msra.mxu0 %v10523_v5  ;;  %10720 = vmatpush1.bf16.msra.mxu1 %v10719_v6  ;;  %v1186_v5 = vld [vmem:[%s23926_s1 + $0x2368] sm:$0xff] }
  0x9f   :  { %10526 = vmatprep.subr.bf16.mxu0 %v10525_v7  ;;  %10722 = vmatprep.subr.bf16.mxu1 %v10721_v12  ;;  %v1198_v6 = vld [vmem:[%s23926_s1 + $0x23c8] sm:$0xff]  ;;  %v1211_v7 = vld [vmem:[%s23926_s1 + $0x2430] sm:$0xff]  ;;  %v10739_v12 = vpack.c.bf16 %v1186_v5, %v1173_v3  ;;  %v10559_v3 = vpack.c.bf16 %v1288_v57, %v1275_v56  ;;  %v149_v56 = vld [vmem:[%s23926_s1 + $0x300] sm:$0xff] }
  0xa0   :  { %v10545_v13 = vpack.c.bf16 %v1211_v7, %v1198_v6  ;;  %v1301_v6 = vld [vmem:[%s23926_s1 + $0x2700] sm:$0xff]  ;;  %v1314_v7 = vld [vmem:[%s23926_s1 + $0x2768] sm:$0xff] }
  0xa1   :  { %v10563_v14 = vpack.c.bf16 %v1314_v7, %v1301_v6  ;;  %v138_v57 = vld [vmem:[%s23926_s1 + $0x2a8] sm:$0xff]  ;;  %v175_v6 = vld [vmem:[%s23926_s1 + $0x3d0] sm:$0xff]  ;;  %v164_v7 = vld [vmem:[%s23926_s1 + $0x378] sm:$0xff] }
  0xa2   :  { %10528 = vmatpush1.bf16.msra.mxu0 %v10527_v18  ;;  %10724 = vmatpush1.bf16.msra.mxu1 %v10723_v19  ;;  %v1212_v18 = vld [vmem:[%s23926_s1 + $0x2438] sm:$0xff] }
  0xa3   :  { %10530 = vmatprep.subr.bf16.mxu0 %v10529_v20  ;;  %10726 = vmatprep.subr.bf16.mxu1 %v10725_v26  ;;  %v1224_v19 = vld [vmem:[%s23926_s1 + $0x2498] sm:$0xff]  ;;  %v1237_v20 = vld [vmem:[%s23926_s1 + $0x2500] sm:$0xff]  ;;  %v10743_v26 = vpack.c.bf16 %v1212_v18, %v1199_v16 }
  0xa4   :  { %v10549_v27 = vpack.c.bf16 %v1237_v20, %v1224_v19  ;;  %v73_v16 = vld [vmem:[%s23926_s1 + $0xa0] sm:$0xff]  ;;  %v1415_v20 = vcombine.high %v14661_v49, %v14661_v49  ;;  %v72_v49 = vld [vmem:[%s23926_s1 + $0x98] sm:$0xff] }
  0xa5   :  { %v10957_v19 = vpack.c.bf16 %v73_v16, %v60_v15  ;;  %v163_v15 = vld [vmem:[%s23926_s1 + $0x370] sm:$0xff] }
  0xa6   :  { %10532 = vmatpush1.bf16.msra.mxu0 %v10531_v33  ;;  %10728 = vmatpush1.bf16.msra.mxu1 %v10727_v34  ;;  %v1238_v33 = vld [vmem:[%s23926_s1 + $0x2508] sm:$0xff]  ;;  %v15084_v29 = vrot.slane %v1415_v20, %v14100_v11  ;;  %v96_v11 = vld [vmem:[%s23926_s1 + $0x158] sm:$0xff] }
  0xa7   :  { %10534 = vmatprep.subr.bf16.mxu0 %v10533_v35  ;;  %10730 = vmatprep.subr.bf16.mxu1 %v10729_v40  ;;  %v1250_v34 = vld [vmem:[%s23926_s1 + $0x2568] sm:$0xff]  ;;  %v1263_v35 = vld [vmem:[%s23926_s1 + $0x25d0] sm:$0xff]  ;;  %v10747_v40 = vpack.c.bf16 %v1238_v33, %v1225_v30 }
  0xa8   :  { %v10553_v41 = vpack.c.bf16 %v1263_v35, %v1250_v34  ;;  %v86_v30 = vld [vmem:[%s23926_s1 + $0x108] sm:$0xff] }
  0xa9   :  { %v190_v20 = vld [vmem:[%s23926_s1 + $0x448] sm:$0xff] }
  0xaa   :  { %10536 = vmatpush1.bf16.msra.mxu0 %v10535_v46  ;;  %10732 = vmatpush1.bf16.msra.mxu1 %v10731_v47  ;;  %v1264_v46 = vld [vmem:[%s23926_s1 + $0x25d8] sm:$0xff] }
  0xab   :  { %10538 = vmatprep.subr.bf16.mxu0 %v10537_v48  ;;  %10734 = vmatprep.subr.bf16.mxu1 %v10733_v53  ;;  %v1276_v47 = vld [vmem:[%s23926_s1 + $0x2638] sm:$0xff]  ;;  %v1289_v48 = vld [vmem:[%s23926_s1 + $0x26a0] sm:$0xff]  ;;  %v10751_v53 = vpack.c.bf16 %v1264_v46, %v1251_v44 }
  0xac   :  { %v10557_v54 = vpack.c.bf16 %v1289_v48, %v1276_v47  ;;  %v125_v44 = vld [vmem:[%s23926_s1 + $0x240] sm:$0xff] }
  0xad   :  { %v109_v48 = vld [vmem:[%s23926_s1 + $0x1c0] sm:$0xff] }
  0xae   :  { %10540 = vmatpush1.bf16.msra.mxu0 %v10539_v60  ;;  %10736 = vmatpush1.bf16.msra.mxu1 %v10735_v62  ;;  %v1290_v60 = vld [vmem:[%s23926_s1 + $0x26a8] sm:$0xff] }
  0xaf   :  { %10542 = vmatprep.subr.bf16.mxu0 %v10541_v0  ;;  %10738 = vmatprep.subr.bf16.mxu1 %v10737_v4  ;;  %v1302_v62 = vld [vmem:[%s23926_s1 + $0x2708] sm:$0xff]  ;;  %v1315_v0 = vld [vmem:[%s23926_s1 + $0x2770] sm:$0xff]  ;;  %v10755_v4 = vpack.c.bf16 %v1290_v60, %v1277_v58 }
  0xb0   :  { %v10561_v5 = vpack.c.bf16 %v1315_v0, %v1302_v62  ;;  %v151_v58 = vld [vmem:[%s23926_s1 + $0x310] sm:$0xff] }
  0xb1   :  { %v135_v0 = vld [vmem:[%s23926_s1 + $0x290] sm:$0xff] }
  0xb2   :  { %10544 = vmatpush1.bf16.msra.mxu0 %v10543_v10  ;;  %10740 = vmatpush1.bf16.msra.mxu1 %v10739_v12  ;;  %v1316_v10 = vld [vmem:[%s23926_s1 + $0x2778] sm:$0xff]  ;;  %v58_v12 = vld [vmem:[%s23926_s1 + $0x28] sm:$0xff] }
  0xb3   :  { %10546 = vmatprep.subr.bf16.mxu0 %v10545_v13  ;;  %10742 = vmatprep.subr.bf16.mxu1 %v10741_v17  ;;  %v71_v13 = vld [vmem:[%s23926_s1 + $0x90] sm:$0xff]  ;;  %v10759_v17 = vpack.c.bf16 %v1316_v10, %v1303_v9  ;;  %v10775_v9 = vpack.c.bf16 %v148_v1, %v135_v0  ;;  %v268_v0 = vld [vmem:[%s23926_s1 + $0x6b8] sm:$0xff]  ;;  %v281_v1 = vld [vmem:[%s23926_s1 + $0x720] sm:$0xff] }
  0xb4   :  { %v10761_v18 = vpack.c.bf16 %v71_v13, %v58_v12  ;;  %v161_v13 = vld [vmem:[%s23926_s1 + $0x360] sm:$0xff] }
  0xb6   :  { %10548 = vmatpush1.bf16.msra.mxu0 %v10547_v23  ;;  %10744 = vmatpush1.bf16.msra.mxu1 %v10743_v26  ;;  %v70_v23 = vld [vmem:[%s23926_s1 + $0x88] sm:$0xff]  ;;  %v59_v26 = vld [vmem:[%s23926_s1 + $0x30] sm:$0xff] }
  0xb7   :  { %10550 = vmatprep.subr.bf16.mxu0 %v10549_v27  ;;  %10746 = vmatprep.subr.bf16.mxu1 %v10745_v31  ;;  %v84_v27 = vld [vmem:[%s23926_s1 + $0xf8] sm:$0xff]  ;;  %v99_v31 = vld [vmem:[%s23926_s1 + $0x170] sm:$0xff]  ;;  %v10763_v33 = vpack.c.bf16 %v70_v23, %v57_v22  ;;  %v10959_v34 = vpack.c.bf16 %v72_v49, %v59_v26 }
  0xb8   :  { %v10765_v35 = vpack.c.bf16 %v97_v28, %v84_v27  ;;  %v203_v22 = vld [vmem:[%s23926_s1 + $0x4b0] sm:$0xff]  ;;  %v200_v28 = vld [vmem:[%s23926_s1 + $0x498] sm:$0xff] }
  0xb9   :  { %v187_v27 = vld [vmem:[%s23926_s1 + $0x430] sm:$0xff] }
  0xba   :  { %10552 = vmatpush1.bf16.msra.mxu0 %v10551_v38  ;;  %10748 = vmatpush1.bf16.msra.mxu1 %v10747_v40  ;;  %v10961_v38 = vpack.c.bf16 %v99_v31, %v86_v30  ;;  %v98_v40 = vld [vmem:[%s23926_s1 + $0x168] sm:$0xff]  ;;  %v189_v30 = vld [vmem:[%s23926_s1 + $0x440] sm:$0xff]  ;;  %v10977_v31 = vpack.c.bf16 %v203_v22, %v190_v20 }
  0xbb   :  { %10554 = vmatprep.subr.bf16.mxu0 %v10553_v41  ;;  %10750 = vmatprep.subr.bf16.mxu1 %v10749_v45  ;;  %v110_v41 = vld [vmem:[%s23926_s1 + $0x1c8] sm:$0xff]  ;;  %v10767_v45 = vpack.c.bf16 %v96_v11, %v83_v36  ;;  %v10963_v46 = vpack.c.bf16 %v98_v40, %v85_v37  ;;  %v216_v36 = vld [vmem:[%s23926_s1 + $0x518] sm:$0xff]  ;;  %v229_v11 = vld [vmem:[%s23926_s1 + $0x580] sm:$0xff]  ;;  %v10783_v37 = vpack.c.bf16 %v200_v28, %v187_v27 }
  0xbc   :  { %v10769_v47 = vpack.c.bf16 %v123_v42, %v110_v41  ;;  %v213_v41 = vld [vmem:[%s23926_s1 + $0x500] sm:$0xff]  ;;  %v226_v42 = vld [vmem:[%s23926_s1 + $0x568] sm:$0xff]  ;;  %v320_v27 = vld [vmem:[%s23926_s1 + $0x858] sm:$0xff] }
  0xbd   :  { %v293_v20 = vld [vmem:[%s23926_s1 + $0x780] sm:$0xff] }
  0xbe   :  { %10556 = vmatpush1.bf16.msra.mxu0 %v10555_v52  ;;  %10752 = vmatpush1.bf16.msra.mxu1 %v10751_v53  ;;  %v10965_v52 = vpack.c.bf16 %v125_v44, %v112_v43  ;;  %v124_v53 = vld [vmem:[%s23926_s1 + $0x238] sm:$0xff]  ;;  %v215_v43 = vld [vmem:[%s23926_s1 + $0x510] sm:$0xff]  ;;  %v10981_v44 = vpack.c.bf16 %v229_v11, %v216_v36  ;;  %v333_v28 = vld [vmem:[%s23926_s1 + $0x8c0] sm:$0xff] }
  0xbf   :  { %10558 = vmatprep.subr.bf16.mxu0 %v10557_v54  ;;  %10754 = vmatprep.subr.bf16.mxu1 %v10753_v59  ;;  %v136_v54 = vld [vmem:[%s23926_s1 + $0x298] sm:$0xff]  ;;  %v10771_v59 = vpack.c.bf16 %v122_v50, %v109_v48  ;;  %v10967_v60 = vpack.c.bf16 %v124_v53, %v111_v51  ;;  %v242_v48 = vld [vmem:[%s23926_s1 + $0x5e8] sm:$0xff]  ;;  %v255_v50 = vld [vmem:[%s23926_s1 + $0x650] sm:$0xff]  ;;  %v10787_v51 = vpack.c.bf16 %v226_v42, %v213_v41 }
  0xc0   :  { %v10773_v62 = vpack.c.bf16 %v149_v56, %v136_v54  ;;  %v239_v54 = vld [vmem:[%s23926_s1 + $0x5d0] sm:$0xff]  ;;  %v252_v56 = vld [vmem:[%s23926_s1 + $0x638] sm:$0xff]  ;;  %v10997_v11 = vpack.c.bf16 %v333_v28, %v320_v27  ;;  %v346_v41 = vld [vmem:[%s23926_s1 + $0x928] sm:$0xff] }
  0xc1   :  { %v319_v36 = vld [vmem:[%s23926_s1 + $0x850] sm:$0xff] }
  0xc2   :  { %10560 = vmatpush1.bf16.msra.mxu0 %v10559_v3  ;;  %10756 = vmatpush1.bf16.msra.mxu1 %v10755_v4  ;;  %v10969_v3 = vpack.c.bf16 %v151_v58, %v138_v57  ;;  %v150_v4 = vld [vmem:[%s23926_s1 + $0x308] sm:$0xff]  ;;  %v241_v57 = vld [vmem:[%s23926_s1 + $0x5e0] sm:$0xff]  ;;  %v10985_v58 = vpack.c.bf16 %v255_v50, %v242_v48  ;;  %v359_v42 = vld [vmem:[%s23926_s1 + $0x990] sm:$0xff] }
  0xc3   :  { %10562 = vmatprep.subr.bf16.mxu0 %v10561_v5  ;;  %10758 = vmatprep.subr.bf16.mxu1 %v10757_v8  ;;  %v162_v5 = vld [vmem:[%s23926_s1 + $0x368] sm:$0xff]  ;;  %v177_v8 = vld [vmem:[%s23926_s1 + $0x3e0] sm:$0xff]  ;;  %v10971_v10 = vpack.c.bf16 %v150_v4, %v137_v2  ;;  %v10791_v2 = vpack.c.bf16 %v252_v56, %v239_v54  ;;  %v11001_v50 = vpack.c.bf16 %v359_v42, %v346_v41  ;;  %v372_v54 = vld [vmem:[%s23926_s1 + $0x9f8] sm:$0xff] }
  0xc4   :  { %v10777_v12 = vpack.c.bf16 %v175_v6, %v162_v5  ;;  %v10973_v16 = vpack.c.bf16 %v177_v8, %v164_v7  ;;  %v265_v5 = vld [vmem:[%s23926_s1 + $0x6a0] sm:$0xff]  ;;  %v278_v6 = vld [vmem:[%s23926_s1 + $0x708] sm:$0xff]  ;;  %v267_v7 = vld [vmem:[%s23926_s1 + $0x6b0] sm:$0xff]  ;;  %v10989_v8 = vpack.c.bf16 %v281_v1, %v268_v0 }
  0xc5   :  { %1647 = vmatmul.mubr.f32.vlgmr.msra.gmra.mrb[0].mxu0 %v14674_v55  ;;  %1931 = vmatmul.mubr.f32.vlgmr.msra.gmra.mrb[0].mxu1 %v14674_v55  ;;  %v345_v48 = vld [vmem:[%s23926_s1 + $0x920] sm:$0xff]  ;;  %v371_v0 = vld [vmem:[%s23926_s1 + $0x9f0] sm:$0xff] }
  0xc6   :  { %10564 = vmatpush1.bf16.msra.mxu0 %v10563_v14  ;;  %10760 = vmatpush1.bf16.msra.mxu1 %v10759_v17  ;;  %v174_v14 = vld [vmem:[%s23926_s1 + $0x3c8] sm:$0xff]  ;;  %v176_v17 = vld [vmem:[%s23926_s1 + $0x3d8] sm:$0xff]  ;;  %v385_v56 = vld [vmem:[%s23926_s1 + $0xa60] sm:$0xff] }
  0xc7   :  { %1717 = vmatprep.mubr.f32.mxu0 %v23941_v21  ;;  %2001 = vmatprep.mubr.f32.mxu1 %v23941_v21  ;;  %v10779_v23 = vpack.c.bf16 %v174_v14, %v161_v13  ;;  %v10975_v26 = vpack.c.bf16 %v176_v17, %v163_v15  ;;  %v294_v13 = vld [vmem:[%s23926_s1 + $0x788] sm:$0xff]  ;;  %v307_v14 = vld [vmem:[%s23926_s1 + $0x7f0] sm:$0xff]  ;;  %v10795_v15 = vpack.c.bf16 %v278_v6, %v265_v5 }
  0xc8   :  { %10762 = vmatprep.subr.bf16.mxu0 %v10761_v18  ;;  %10958 = vmatprep.subr.bf16.mxu1 %v10957_v19  ;;  %v188_v18 = vld [vmem:[%s23926_s1 + $0x438] sm:$0xff]  ;;  %v201_v19 = vld [vmem:[%s23926_s1 + $0x4a0] sm:$0xff]  ;;  %v10993_v22 = vpack.c.bf16 %v307_v14, %v294_v13  ;;  %v11005_v1 = vpack.c.bf16 %v385_v56, %v372_v54  ;;  %v398_v5 = vld [vmem:[%s23926_s1 + $0xac8] sm:$0xff] }
  0xc9   :  { %v10781_v49 = vpack.c.bf16 %v201_v19, %v188_v18  ;;  %v291_v18 = vld [vmem:[%s23926_s1 + $0x770] sm:$0xff]  ;;  %v304_v19 = vld [vmem:[%s23926_s1 + $0x7d8] sm:$0xff] }
  0xca   :  { %v411_v6 = vld [vmem:[%s23926_s1 + $0xb30] sm:$0xff] }
  0xcd   :  { %9534 = vmatmul.mubr.msk.f32.vlgmr.msra.gmra.mrb[0].mxu0 %vm1437_vm0, %v15084_v29  ;;  %9535 = vmatmul.mubr.msk.f32.vlgmr.msra.gmra.mrb[0].mxu1 %vm1437_vm0, %v15084_v29 }
  0xce   :  { %10764 = vmatpush1.bf16.msra.mxu0 %v10763_v33  ;;  %10960 = vmatpush1.bf16.msra.mxu1 %v10959_v34  ;;  %v202_v33 = vld [vmem:[%s23926_s1 + $0x4a8] sm:$0xff] }
  0xcf   :  { %10766 = vmatprep.subr.bf16.mxu0 %v10765_v35  ;;  %10962 = vmatprep.subr.bf16.mxu1 %v10961_v38  ;;  %v214_v34 = vld [vmem:[%s23926_s1 + $0x508] sm:$0xff]  ;;  %v227_v35 = vld [vmem:[%s23926_s1 + $0x570] sm:$0xff]  ;;  %v10979_v38 = vpack.c.bf16 %v202_v33, %v189_v30  ;;  %v10799_v30 = vpack.c.bf16 %v304_v19, %v291_v18 }
  0xd0   :  { %2072 = vmatprep.mubr.f32.mxu0 %v14146_v32  ;;  %2356 = vmatprep.mubr.f32.mxu1 %v14146_v32  ;;  %v10785_v40 = vpack.c.bf16 %v227_v35, %v214_v34  ;;  %v317_v34 = vld [vmem:[%s23926_s1 + $0x840] sm:$0xff]  ;;  %v330_v35 = vld [vmem:[%s23926_s1 + $0x8a8] sm:$0xff] }
  0xd2   :  { %10768 = vmatpush1.bf16.msra.mxu0 %v10767_v45  ;;  %10964 = vmatpush1.bf16.msra.mxu1 %v10963_v46  ;;  %v228_v45 = vld [vmem:[%s23926_s1 + $0x578] sm:$0xff] }
  0xd3   :  { %10770 = vmatprep.subr.bf16.mxu0 %v10769_v47  ;;  %10966 = vmatprep.subr.bf16.mxu1 %v10965_v52  ;;  %v240_v46 = vld [vmem:[%s23926_s1 + $0x5d8] sm:$0xff]  ;;  %v253_v47 = vld [vmem:[%s23926_s1 + $0x640] sm:$0xff]  ;;  %v10983_v52 = vpack.c.bf16 %v228_v45, %v215_v43  ;;  %v10803_v43 = vpack.c.bf16 %v330_v35, %v317_v34 }
  0xd4   :  { %v10789_v53 = vpack.c.bf16 %v253_v47, %v240_v46  ;;  %v343_v46 = vld [vmem:[%s23926_s1 + $0x910] sm:$0xff]  ;;  %v356_v47 = vld [vmem:[%s23926_s1 + $0x978] sm:$0xff] }
  0xd6   :  { %10772 = vmatpush1.bf16.msra.mxu0 %v10771_v59  ;;  %10968 = vmatpush1.bf16.msra.mxu1 %v10967_v60  ;;  %v254_v59 = vld [vmem:[%s23926_s1 + $0x648] sm:$0xff] }
  0xd7   :  { %10774 = vmatprep.subr.bf16.mxu0 %v10773_v62  ;;  %10970 = vmatprep.subr.bf16.mxu1 %v10969_v3  ;;  %v266_v60 = vld [vmem:[%s23926_s1 + $0x6a8] sm:$0xff]  ;;  %v279_v62 = vld [vmem:[%s23926_s1 + $0x710] sm:$0xff]  ;;  %v10987_v3 = vpack.c.bf16 %v254_v59, %v241_v57  ;;  %v10807_v57 = vpack.c.bf16 %v356_v47, %v343_v46 }
  0xd8   :  { %v10793_v4 = vpack.c.bf16 %v279_v62, %v266_v60  ;;  %v369_v60 = vld [vmem:[%s23926_s1 + $0x9e0] sm:$0xff]  ;;  %v382_v62 = vld [vmem:[%s23926_s1 + $0xa48] sm:$0xff] }
  0xda   :  { %10776 = vmatpush1.bf16.msra.mxu0 %v10775_v9  ;;  %10972 = vmatpush1.bf16.msra.mxu1 %v10971_v10  ;;  %v280_v9 = vld [vmem:[%s23926_s1 + $0x718] sm:$0xff] }
  0xdb   :  { %10778 = vmatprep.subr.bf16.mxu0 %v10777_v12  ;;  %10974 = vmatprep.subr.bf16.mxu1 %v10973_v16  ;;  %v292_v10 = vld [vmem:[%s23926_s1 + $0x778] sm:$0xff]  ;;  %v305_v12 = vld [vmem:[%s23926_s1 + $0x7e0] sm:$0xff]  ;;  %v10991_v16 = vpack.c.bf16 %v280_v9, %v267_v7  ;;  %v10811_v7 = vpack.c.bf16 %v382_v62, %v369_v60 }
  0xdc   :  { %v10797_v17 = vpack.c.bf16 %v305_v12, %v292_v10 }
  0xde   :  { %10780 = vmatpush1.bf16.msra.mxu0 %v10779_v23  ;;  %10976 = vmatpush1.bf16.msra.mxu1 %v10975_v26  ;;  %v306_v23 = vld [vmem:[%s23926_s1 + $0x7e8] sm:$0xff] }
  0xdf   :  { %10782 = vmatprep.subr.bf16.mxu0 %v10781_v49  ;;  %10978 = vmatprep.subr.bf16.mxu1 %v10977_v31  ;;  %v318_v26 = vld [vmem:[%s23926_s1 + $0x848] sm:$0xff]  ;;  %v331_v49 = vld [vmem:[%s23926_s1 + $0x8b0] sm:$0xff]  ;;  %v10995_v31 = vpack.c.bf16 %v306_v23, %v293_v20 }
  0xe0   :  { %v10801_v33 = vpack.c.bf16 %v331_v49, %v318_v26 }
  0xe2   :  { %10784 = vmatpush1.bf16.msra.mxu0 %v10783_v37  ;;  %10980 = vmatpush1.bf16.msra.mxu1 %v10979_v38  ;;  %v332_v37 = vld [vmem:[%s23926_s1 + $0x8b8] sm:$0xff] }
  0xe3   :  { %10786 = vmatprep.subr.bf16.mxu0 %v10785_v40  ;;  %10982 = vmatprep.subr.bf16.mxu1 %v10981_v44  ;;  %v344_v38 = vld [vmem:[%s23926_s1 + $0x918] sm:$0xff]  ;;  %v357_v40 = vld [vmem:[%s23926_s1 + $0x980] sm:$0xff]  ;;  %v10999_v44 = vpack.c.bf16 %v332_v37, %v319_v36 }
  0xe4   :  { %v10805_v45 = vpack.c.bf16 %v357_v40, %v344_v38 }
  0xe6   :  { %10788 = vmatpush1.bf16.msra.mxu0 %v10787_v51  ;;  %10984 = vmatpush1.bf16.msra.mxu1 %v10983_v52  ;;  %v358_v51 = vld [vmem:[%s23926_s1 + $0x988] sm:$0xff] }
  0xe7   :  { %10790 = vmatprep.subr.bf16.mxu0 %v10789_v53  ;;  %10986 = vmatprep.subr.bf16.mxu1 %v10985_v58  ;;  %v370_v52 = vld [vmem:[%s23926_s1 + $0x9e8] sm:$0xff]  ;;  %v383_v53 = vld [vmem:[%s23926_s1 + $0xa50] sm:$0xff]  ;;  %v11003_v58 = vpack.c.bf16 %v358_v51, %v345_v48 }
  0xe8   :  { %v10809_v59 = vpack.c.bf16 %v383_v53, %v370_v52 }
  0xea   :  { %10792 = vmatpush1.bf16.msra.mxu0 %v10791_v2  ;;  %10988 = vmatpush1.bf16.msra.mxu1 %v10987_v3  ;;  %v384_v2 = vld [vmem:[%s23926_s1 + $0xa58] sm:$0xff] }
  0xeb   :  { %10794 = vmatprep.subr.bf16.mxu0 %v10793_v4  ;;  %10990 = vmatprep.subr.bf16.mxu1 %v10989_v8  ;;  %v396_v3 = vld [vmem:[%s23926_s1 + $0xab8] sm:$0xff]  ;;  %v409_v4 = vld [vmem:[%s23926_s1 + $0xb20] sm:$0xff] }
  0xee   :  { %10796 = vmatpush1.bf16.msra.mxu0 %v10795_v15  ;;  %10992 = vmatpush1.bf16.msra.mxu1 %v10991_v16 }
  0xef   :  { %10798 = vmatprep.subr.bf16.mxu0 %v10797_v17  ;;  %10994 = vmatprep.subr.bf16.mxu1 %v10993_v22 }
  0xf2   :  { %10800 = vmatpush1.bf16.msra.mxu0 %v10799_v30  ;;  %10996 = vmatpush1.bf16.msra.mxu1 %v10995_v31 }
  0xf3   :  { %10802 = vmatprep.subr.bf16.mxu0 %v10801_v33  ;;  %10998 = vmatprep.subr.bf16.mxu1 %v10997_v11 }
  0xf6   :  { %10804 = vmatpush1.bf16.msra.mxu0 %v10803_v43  ;;  %11000 = vmatpush1.bf16.msra.mxu1 %v10999_v44 }
  0xf7   :  { %10806 = vmatprep.subr.bf16.mxu0 %v10805_v45  ;;  %11002 = vmatprep.subr.bf16.mxu1 %v11001_v50 }
  0xfa   :  { %10808 = vmatpush1.bf16.msra.mxu0 %v10807_v57 }
  0xfb   :  { %20 = vsyncpa [#allocation3], 0  ;;  %11004 = vmatpush1.bf16.msra.mxu1 %v11003_v58  ;;  %10810 = vmatprep.subr.bf16.mxu0 %v10809_v59  ;;  %v11007_v8 = vpack.c.bf16 %v384_v2, %v371_v0  ;;  %v10813_v9 = vpack.c.bf16 %v409_v4, %v396_v3  ;;  %v395_v10 = vld [vmem:[%s23926_s1 + $0xab0] sm:$0xff]  ;;  %v408_v12 = vld [vmem:[%s23926_s1 + $0xb18] sm:$0xff]  ;;  %v11009_v14 = vpack.c.bf16 %v411_v6, %v398_v5  ;;  %vm13739_vm1 = vmmov 0  }
  0xfc   :  { %v397_v13 = vld [vmem:[%s23926_s1 + $0xac0] sm:$0xff]  ;;  %11006 = vmatprep.subr.bf16.mxu1 %v11005_v1  ;;  %v410_v15 = vld [vmem:[%s23926_s1 + $0xb28] sm:$0xff]  ;;  %v435_v17 = vld [vmem:[%s23926_s1 + $0xbf0] sm:$0xff]  ;;  %v10815_v20 = vpack.c.bf16 %v408_v12, %v395_v10  ;;  %vm4846_vm2 = vcmask 261120   ;;  %vm6831_vm3 = vcmask 1041408   ;;  %vm6874_vm4 = vcmask 123904  }
  0xfd   :  { %v422_v16 = vld [vmem:[%s23926_s1 + $0xb88] sm:$0xff]  ;;  %v424_v18 = vld [vmem:[%s23926_s1 + $0xb98] sm:$0xff]  ;;  %v437_v19 = vld [vmem:[%s23926_s1 + $0xc00] sm:$0xff]  ;;  %v11011_v22 = vpack.c.bf16 %v410_v15, %v397_v13  ;;  %vm9518_vm5 = vcmask 254976  }
  0xfe   :  { %10812 = vmatpush1.bf16.msra.mxu0 %v10811_v7  ;;  %v10817_v23 = vpack.c.bf16 %v435_v17, %v422_v16  ;;  %v421_v26 = vld [vmem:[%s23926_s1 + $0xb80] sm:$0xff]  ;;  %v434_v49 = vld [vmem:[%s23926_s1 + $0xbe8] sm:$0xff]  ;;  %v423_v27 = vld [vmem:[%s23926_s1 + $0xb90] sm:$0xff]  ;;  %v11013_v28 = vpack.c.bf16 %v437_v19, %v424_v18 }
  0xff   :  { %11008 = vmatpush1.bf16.msra.mxu1 %v11007_v8  ;;  %10814 = vmatprep.subr.bf16.mxu0 %v10813_v9  ;;  %v436_v30 = vld [vmem:[%s23926_s1 + $0xbf8] sm:$0xff]  ;;  %v461_v33 = vld [vmem:[%s23926_s1 + $0xcc0] sm:$0xff]  ;;  %v450_v34 = vld [vmem:[%s23926_s1 + $0xc68] sm:$0xff]  ;;  %v10819_v36 = vpack.c.bf16 %v434_v49, %v421_v26 }
 0x100   :  { %11010 = vmatprep.subr.bf16.mxu1 %v11009_v14  ;;  %v448_v31 = vld [vmem:[%s23926_s1 + $0xc58] sm:$0xff]  ;;  %v463_v35 = vld [vmem:[%s23926_s1 + $0xcd0] sm:$0xff]  ;;  %v11015_v11 = vpack.c.bf16 %v436_v30, %v423_v27  ;;  %v449_v41 = vld [vmem:[%s23926_s1 + $0xc60] sm:$0xff] }
 0x101   :  { %v10821_v37 = vpack.c.bf16 %v461_v33, %v448_v31  ;;  %v447_v38 = vld [vmem:[%s23926_s1 + $0xc50] sm:$0xff]  ;;  %v460_v40 = vld [vmem:[%s23926_s1 + $0xcb8] sm:$0xff]  ;;  %v11017_v42 = vpack.c.bf16 %v463_v35, %v450_v34  ;;  %v462_v43 = vld [vmem:[%s23926_s1 + $0xcc8] sm:$0xff] }
 0x102   :  { %10816 = vmatpush1.bf16.msra.mxu0 %v10815_v20  ;;  %v474_v44 = vld [vmem:[%s23926_s1 + $0xd28] sm:$0xff]  ;;  %v487_v45 = vld [vmem:[%s23926_s1 + $0xd90] sm:$0xff]  ;;  %v476_v46 = vld [vmem:[%s23926_s1 + $0xd38] sm:$0xff]  ;;  %v10823_v48 = vpack.c.bf16 %v460_v40, %v447_v38  ;;  %v11019_v50 = vpack.c.bf16 %v462_v43, %v449_v41 }
 0x103   :  { %11012 = vmatpush1.bf16.msra.mxu1 %v11011_v22  ;;  %10818 = vmatprep.subr.bf16.mxu0 %v10817_v23  ;;  %v489_v47 = vld [vmem:[%s23926_s1 + $0xda0] sm:$0xff]  ;;  %v10825_v51 = vpack.c.bf16 %v487_v45, %v474_v44  ;;  %v486_v53 = vld [vmem:[%s23926_s1 + $0xd88] sm:$0xff]  ;;  %v475_v54 = vld [vmem:[%s23926_s1 + $0xd30] sm:$0xff] }
 0x104   :  { %11014 = vmatprep.subr.bf16.mxu1 %v11013_v28  ;;  %v473_v52 = vld [vmem:[%s23926_s1 + $0xd20] sm:$0xff]  ;;  %v11021_v56 = vpack.c.bf16 %v489_v47, %v476_v46  ;;  %v488_v57 = vld [vmem:[%s23926_s1 + $0xd98] sm:$0xff]  ;;  %v502_v60 = vld [vmem:[%s23926_s1 + $0xe08] sm:$0xff] }
 0x105   :  { %v500_v58 = vld [vmem:[%s23926_s1 + $0xdf8] sm:$0xff]  ;;  %v513_v59 = vld [vmem:[%s23926_s1 + $0xe60] sm:$0xff]  ;;  %v515_v62 = vld [vmem:[%s23926_s1 + $0xe70] sm:$0xff]  ;;  %v10827_v0 = vpack.c.bf16 %v486_v53, %v473_v52  ;;  %v11023_v1 = vpack.c.bf16 %v488_v57, %v475_v54 }
 0x106   :  { %10820 = vmatpush1.bf16.msra.mxu0 %v10819_v36  ;;  %v10829_v2 = vpack.c.bf16 %v513_v59, %v500_v58  ;;  %v499_v3 = vld [vmem:[%s23926_s1 + $0xdf0] sm:$0xff]  ;;  %v512_v4 = vld [vmem:[%s23926_s1 + $0xe58] sm:$0xff]  ;;  %v501_v5 = vld [vmem:[%s23926_s1 + $0xe00] sm:$0xff]  ;;  %v11025_v6 = vpack.c.bf16 %v515_v62, %v502_v60 }
 0x107   :  { %11016 = vmatpush1.bf16.msra.mxu1 %v11015_v11  ;;  %10822 = vmatprep.subr.bf16.mxu0 %v10821_v37  ;;  %v514_v7 = vld [vmem:[%s23926_s1 + $0xe68] sm:$0xff]  ;;  %v539_v9 = vld [vmem:[%s23926_s1 + $0xf30] sm:$0xff]  ;;  %v528_v10 = vld [vmem:[%s23926_s1 + $0xed8] sm:$0xff]  ;;  %v10831_v13 = vpack.c.bf16 %v512_v4, %v499_v3 }
 0x108   :  { %11018 = vmatprep.subr.bf16.mxu1 %v11017_v42  ;;  %v526_v8 = vld [vmem:[%s23926_s1 + $0xec8] sm:$0xff]  ;;  %v541_v12 = vld [vmem:[%s23926_s1 + $0xf40] sm:$0xff]  ;;  %v11027_v14 = vpack.c.bf16 %v514_v7, %v501_v5  ;;  %v527_v18 = vld [vmem:[%s23926_s1 + $0xed0] sm:$0xff] }
 0x109   :  { %v10833_v15 = vpack.c.bf16 %v539_v9, %v526_v8  ;;  %v525_v16 = vld [vmem:[%s23926_s1 + $0xec0] sm:$0xff]  ;;  %v538_v17 = vld [vmem:[%s23926_s1 + $0xf28] sm:$0xff]  ;;  %v11029_v19 = vpack.c.bf16 %v541_v12, %v528_v10  ;;  %v540_v20 = vld [vmem:[%s23926_s1 + $0xf38] sm:$0xff] }
 0x10a   :  { %10824 = vmatpush1.bf16.msra.mxu0 %v10823_v48  ;;  %v552_v22 = vld [vmem:[%s23926_s1 + $0xf98] sm:$0xff]  ;;  %v565_v23 = vld [vmem:[%s23926_s1 + $0x1000] sm:$0xff]  ;;  %v554_v26 = vld [vmem:[%s23926_s1 + $0xfa8] sm:$0xff]  ;;  %v10835_v27 = vpack.c.bf16 %v538_v17, %v525_v16  ;;  %v11031_v28 = vpack.c.bf16 %v540_v20, %v527_v18 }
 0x10b   :  { %11020 = vmatpush1.bf16.msra.mxu1 %v11019_v50  ;;  %10826 = vmatprep.subr.bf16.mxu0 %v10825_v51  ;;  %v567_v49 = vld [vmem:[%s23926_s1 + $0x1010] sm:$0xff]  ;;  %v10837_v30 = vpack.c.bf16 %v565_v23, %v552_v22  ;;  %v564_v33 = vld [vmem:[%s23926_s1 + $0xff8] sm:$0xff]  ;;  %v553_v34 = vld [vmem:[%s23926_s1 + $0xfa0] sm:$0xff] }
 0x10c   :  { %11022 = vmatprep.subr.bf16.mxu1 %v11021_v56  ;;  %v551_v31 = vld [vmem:[%s23926_s1 + $0xf90] sm:$0xff]  ;;  %v11033_v35 = vpack.c.bf16 %v567_v49, %v554_v26  ;;  %v566_v36 = vld [vmem:[%s23926_s1 + $0x1008] sm:$0xff]  ;;  %v580_v38 = vld [vmem:[%s23926_s1 + $0x1078] sm:$0xff] }
 0x10d   :  { %2073 = vmatmul.mubr.f32.vlgmr.msra.gmra.mrb[2].mxu0 %v14133_v25  ;;  %v578_v11 = vld [vmem:[%s23926_s1 + $0x1068] sm:$0xff]  ;;  %v591_v37 = vld [vmem:[%s23926_s1 + $0x10d0] sm:$0xff]  ;;  %v593_v40 = vld [vmem:[%s23926_s1 + $0x10e0] sm:$0xff]  ;;  %v10839_v41 = vpack.c.bf16 %v564_v33, %v551_v31  ;;  %v11035_v42 = vpack.c.bf16 %v566_v36, %v553_v34 }
 0x10e   :  { %10828 = vmatpush1.bf16.msra.mxu0 %v10827_v0  ;;  %2357 = vmatmul.mubr.f32.vlgmr.msra.gmra.mrb[2].mxu1 %v14133_v25  ;;  %v10841_v43 = vpack.c.bf16 %v591_v37, %v578_v11  ;;  %v577_v44 = vld [vmem:[%s23926_s1 + $0x1060] sm:$0xff]  ;;  %v590_v45 = vld [vmem:[%s23926_s1 + $0x10c8] sm:$0xff]  ;;  %v579_v46 = vld [vmem:[%s23926_s1 + $0x1070] sm:$0xff]  ;;  %v11037_v47 = vpack.c.bf16 %v593_v40, %v580_v38 }
 0x10f   :  { %11024 = vmatpush1.bf16.msra.mxu1 %v11023_v1  ;;  %10830 = vmatprep.subr.bf16.mxu0 %v10829_v2  ;;  %v592_v48 = vld [vmem:[%s23926_s1 + $0x10d8] sm:$0xff]  ;;  %v617_v51 = vld [vmem:[%s23926_s1 + $0x11a0] sm:$0xff]  ;;  %v606_v52 = vld [vmem:[%s23926_s1 + $0x1148] sm:$0xff]  ;;  %v10843_v54 = vpack.c.bf16 %v590_v45, %v577_v44 }
 0x110   :  { %11026 = vmatprep.subr.bf16.mxu1 %v11025_v6  ;;  %2143 = vmatprep.mubr.f32.mxu0 %v14286_v39  ;;  %v604_v50 = vld [vmem:[%s23926_s1 + $0x1138] sm:$0xff]  ;;  %v619_v53 = vld [vmem:[%s23926_s1 + $0x11b0] sm:$0xff]  ;;  %v11039_v56 = vpack.c.bf16 %v592_v48, %v579_v46  ;;  %v605_v60 = vld [vmem:[%s23926_s1 + $0x1140] sm:$0xff] }
 0x111   :  { %2427 = vmatprep.mubr.f32.mxu1 %v14286_v39  ;;  %v10845_v57 = vpack.c.bf16 %v617_v51, %v604_v50  ;;  %v603_v58 = vld [vmem:[%s23926_s1 + $0x1130] sm:$0xff]  ;;  %v616_v59 = vld [vmem:[%s23926_s1 + $0x1198] sm:$0xff]  ;;  %v11041_v62 = vpack.c.bf16 %v619_v53, %v606_v52  ;;  %v618_v0 = vld [vmem:[%s23926_s1 + $0x11a8] sm:$0xff] }
 0x112   :  { %10832 = vmatpush1.bf16.msra.mxu0 %v10831_v13  ;;  %v630_v1 = vld [vmem:[%s23926_s1 + $0x1208] sm:$0xff]  ;;  %v643_v2 = vld [vmem:[%s23926_s1 + $0x1270] sm:$0xff]  ;;  %v632_v3 = vld [vmem:[%s23926_s1 + $0x1218] sm:$0xff]  ;;  %v10847_v5 = vpack.c.bf16 %v616_v59, %v603_v58  ;;  %v11043_v6 = vpack.c.bf16 %v618_v0, %v605_v60 }
 0x113   :  { %11028 = vmatpush1.bf16.msra.mxu1 %v11027_v14  ;;  %10834 = vmatprep.subr.bf16.mxu0 %v10833_v15  ;;  %v645_v4 = vld [vmem:[%s23926_s1 + $0x1280] sm:$0xff]  ;;  %v10849_v7 = vpack.c.bf16 %v643_v2, %v630_v1  ;;  %v642_v9 = vld [vmem:[%s23926_s1 + $0x1268] sm:$0xff]  ;;  %v631_v10 = vld [vmem:[%s23926_s1 + $0x1210] sm:$0xff] }
 0x114   :  { %11030 = vmatprep.subr.bf16.mxu1 %v11029_v19  ;;  %v629_v8 = vld [vmem:[%s23926_s1 + $0x1200] sm:$0xff]  ;;  %v11045_v12 = vpack.c.bf16 %v645_v4, %v632_v3  ;;  %v644_v13 = vld [vmem:[%s23926_s1 + $0x1278] sm:$0xff]  ;;  %v658_v16 = vld [vmem:[%s23926_s1 + $0x12e8] sm:$0xff] }
 0x115   :  { %v656_v14 = vld [vmem:[%s23926_s1 + $0x12d8] sm:$0xff]  ;;  %v669_v15 = vld [vmem:[%s23926_s1 + $0x1340] sm:$0xff]  ;;  %v671_v17 = vld [vmem:[%s23926_s1 + $0x1350] sm:$0xff]  ;;  %v10851_v18 = vpack.c.bf16 %v642_v9, %v629_v8  ;;  %v11047_v19 = vpack.c.bf16 %v644_v13, %v631_v10 }
 0x116   :  { %10836 = vmatpush1.bf16.msra.mxu0 %v10835_v27  ;;  %v10853_v20 = vpack.c.bf16 %v669_v15, %v656_v14  ;;  %v655_v22 = vld [vmem:[%s23926_s1 + $0x12d0] sm:$0xff]  ;;  %v668_v23 = vld [vmem:[%s23926_s1 + $0x1338] sm:$0xff]  ;;  %v657_v26 = vld [vmem:[%s23926_s1 + $0x12e0] sm:$0xff]  ;;  %v11049_v49 = vpack.c.bf16 %v671_v17, %v658_v16 }
 0x117   :  { %11032 = vmatpush1.bf16.msra.mxu1 %v11031_v28  ;;  %10838 = vmatprep.subr.bf16.mxu0 %v10837_v30  ;;  %v670_v27 = vld [vmem:[%s23926_s1 + $0x1348] sm:$0xff]  ;;  %v695_v30 = vld [vmem:[%s23926_s1 + $0x1410] sm:$0xff]  ;;  %v684_v31 = vld [vmem:[%s23926_s1 + $0x13b8] sm:$0xff]  ;;  %v10855_v34 = vpack.c.bf16 %v668_v23, %v655_v22 }
 0x118   :  { %11034 = vmatprep.subr.bf16.mxu1 %v11033_v35  ;;  %v682_v28 = vld [vmem:[%s23926_s1 + $0x13a8] sm:$0xff]  ;;  %v697_v33 = vld [vmem:[%s23926_s1 + $0x1420] sm:$0xff]  ;;  %v11051_v35 = vpack.c.bf16 %v670_v27, %v657_v26  ;;  %v683_v38 = vld [vmem:[%s23926_s1 + $0x13b0] sm:$0xff] }
 0x119   :  { %v10857_v36 = vpack.c.bf16 %v695_v30, %v682_v28  ;;  %v681_v11 = vld [vmem:[%s23926_s1 + $0x13a0] sm:$0xff]  ;;  %v694_v37 = vld [vmem:[%s23926_s1 + $0x1408] sm:$0xff]  ;;  %v11053_v40 = vpack.c.bf16 %v697_v33, %v684_v31  ;;  %v723_v45 = vld [vmem:[%s23926_s1 + $0x14f0] sm:$0xff] }
 0x11a   :  { %10840 = vmatpush1.bf16.msra.mxu0 %v10839_v41  ;;  %v696_v41 = vld [vmem:[%s23926_s1 + $0x1418] sm:$0xff]  ;;  %v710_v44 = vld [vmem:[%s23926_s1 + $0x1488] sm:$0xff]  ;;  %v10859_v46 = vpack.c.bf16 %v694_v37, %v681_v11  ;;  %v707_v50 = vld [vmem:[%s23926_s1 + $0x1470] sm:$0xff] }
 0x11b   :  { %11036 = vmatpush1.bf16.msra.mxu1 %v11035_v42  ;;  %10842 = vmatprep.subr.bf16.mxu0 %v10841_v43  ;;  %v708_v42 = vld [vmem:[%s23926_s1 + $0x1478] sm:$0xff]  ;;  %v721_v43 = vld [vmem:[%s23926_s1 + $0x14e0] sm:$0xff]  ;;  %v11057_v53 = vpack.c.bf16 %v723_v45, %v710_v44  ;;  %v746_v2 = vld [vmem:[%s23926_s1 + $0x15a8] sm:$0xff] }
 0x11c   :  { %11038 = vmatprep.subr.bf16.mxu1 %v11037_v47  ;;  %v11055_v47 = vpack.c.bf16 %v696_v41, %v683_v38  ;;  %v10861_v48 = vpack.c.bf16 %v721_v43, %v708_v42  ;;  %v720_v51 = vld [vmem:[%s23926_s1 + $0x14d8] sm:$0xff]  ;;  %v709_v52 = vld [vmem:[%s23926_s1 + $0x1480] sm:$0xff]  ;;  %v735_v3 = vld [vmem:[%s23926_s1 + $0x1550] sm:$0xff] }
 0x11d   :  { %v736_v58 = vld [vmem:[%s23926_s1 + $0x1558] sm:$0xff]  ;;  %v749_v59 = vld [vmem:[%s23926_s1 + $0x15c0] sm:$0xff]  ;;  %v10863_v60 = vpack.c.bf16 %v720_v51, %v707_v50  ;;  %v762_v8 = vld [vmem:[%s23926_s1 + $0x1628] sm:$0xff] }
 0x11e   :  { %10844 = vmatpush1.bf16.msra.mxu0 %v10843_v54  ;;  %v722_v54 = vld [vmem:[%s23926_s1 + $0x14e8] sm:$0xff]  ;;  %v733_v1 = vld [vmem:[%s23926_s1 + $0x1540] sm:$0xff]  ;;  %v11061_v4 = vpack.c.bf16 %v749_v59, %v736_v58  ;;  %v775_v9 = vld [vmem:[%s23926_s1 + $0x1690] sm:$0xff] }
 0x11f   :  { %11040 = vmatpush1.bf16.msra.mxu1 %v11039_v56  ;;  %10846 = vmatprep.subr.bf16.mxu0 %v10845_v57  ;;  %v734_v56 = vld [vmem:[%s23926_s1 + $0x1548] sm:$0xff]  ;;  %v747_v57 = vld [vmem:[%s23926_s1 + $0x15b0] sm:$0xff]  ;;  %v10867_v10 = vpack.c.bf16 %v746_v2, %v733_v1  ;;  %v772_v15 = vld [vmem:[%s23926_s1 + $0x1678] sm:$0xff]  ;;  %v11065_v17 = vpack.c.bf16 %v775_v9, %v762_v8 }
 0x120   :  { %11042 = vmatprep.subr.bf16.mxu1 %v11041_v62  ;;  %v11059_v62 = vpack.c.bf16 %v722_v54, %v709_v52  ;;  %v10865_v0 = vpack.c.bf16 %v747_v57, %v734_v56  ;;  %v759_v14 = vld [vmem:[%s23926_s1 + $0x1610] sm:$0xff]  ;;  %v761_v16 = vld [vmem:[%s23926_s1 + $0x1620] sm:$0xff]  ;;  %v788_v22 = vld [vmem:[%s23926_s1 + $0x16f8] sm:$0xff] }
 0x121   :  { %v801_v23 = vld [vmem:[%s23926_s1 + $0x1760] sm:$0xff]  ;;  %v10871_v26 = vpack.c.bf16 %v772_v15, %v759_v14  ;;  %v798_v30 = vld [vmem:[%s23926_s1 + $0x1748] sm:$0xff]  ;;  %v787_v31 = vld [vmem:[%s23926_s1 + $0x16f0] sm:$0xff] }
 0x122   :  { %10848 = vmatpush1.bf16.msra.mxu0 %v10847_v5  ;;  %v748_v5 = vld [vmem:[%s23926_s1 + $0x15b8] sm:$0xff]  ;;  %v785_v28 = vld [vmem:[%s23926_s1 + $0x16e0] sm:$0xff]  ;;  %v11069_v33 = vpack.c.bf16 %v801_v23, %v788_v22  ;;  %v814_v11 = vld [vmem:[%s23926_s1 + $0x17c8] sm:$0xff] }
 0x123   :  { %11044 = vmatpush1.bf16.msra.mxu1 %v11043_v6  ;;  %10850 = vmatprep.subr.bf16.mxu0 %v10849_v7  ;;  %v760_v6 = vld [vmem:[%s23926_s1 + $0x1618] sm:$0xff]  ;;  %v773_v7 = vld [vmem:[%s23926_s1 + $0x1680] sm:$0xff]  ;;  %v827_v37 = vld [vmem:[%s23926_s1 + $0x1830] sm:$0xff]  ;;  %v10875_v38 = vpack.c.bf16 %v798_v30, %v785_v28 }
 0x124   :  { %11046 = vmatprep.subr.bf16.mxu1 %v11045_v12  ;;  %v11063_v12 = vpack.c.bf16 %v748_v5, %v735_v3  ;;  %v10869_v13 = vpack.c.bf16 %v773_v7, %v760_v6  ;;  %v811_v42 = vld [vmem:[%s23926_s1 + $0x17b0] sm:$0xff]  ;;  %v824_v43 = vld [vmem:[%s23926_s1 + $0x1818] sm:$0xff]  ;;  %v813_v44 = vld [vmem:[%s23926_s1 + $0x17c0] sm:$0xff]  ;;  %v11073_v45 = vpack.c.bf16 %v827_v37, %v814_v11 }
 0x125   :  { %v840_v50 = vld [vmem:[%s23926_s1 + $0x1898] sm:$0xff]  ;;  %v853_v51 = vld [vmem:[%s23926_s1 + $0x1900] sm:$0xff]  ;;  %v10879_v52 = vpack.c.bf16 %v824_v43, %v811_v42  ;;  %v850_v57 = vld [vmem:[%s23926_s1 + $0x18e8] sm:$0xff] }
 0x126   :  { %10852 = vmatpush1.bf16.msra.mxu0 %v10851_v18  ;;  %v774_v18 = vld [vmem:[%s23926_s1 + $0x1688] sm:$0xff]  ;;  %v837_v56 = vld [vmem:[%s23926_s1 + $0x1880] sm:$0xff]  ;;  %v839_v58 = vld [vmem:[%s23926_s1 + $0x1890] sm:$0xff]  ;;  %v11077_v59 = vpack.c.bf16 %v853_v51, %v840_v50 }
 0x127   :  { %11048 = vmatpush1.bf16.msra.mxu1 %v11047_v19  ;;  %10854 = vmatprep.subr.bf16.mxu0 %v10853_v20  ;;  %v786_v19 = vld [vmem:[%s23926_s1 + $0x16e8] sm:$0xff]  ;;  %v799_v20 = vld [vmem:[%s23926_s1 + $0x1750] sm:$0xff]  ;;  %v10883_v3 = vpack.c.bf16 %v850_v57, %v837_v56  ;;  %v876_v7 = vld [vmem:[%s23926_s1 + $0x19b8] sm:$0xff] }
 0x128   :  { %11050 = vmatprep.subr.bf16.mxu1 %v11049_v49  ;;  %v11067_v49 = vpack.c.bf16 %v774_v18, %v761_v16  ;;  %v10873_v27 = vpack.c.bf16 %v799_v20, %v786_v19  ;;  %v866_v1 = vld [vmem:[%s23926_s1 + $0x1968] sm:$0xff]  ;;  %v879_v2 = vld [vmem:[%s23926_s1 + $0x19d0] sm:$0xff]  ;;  %v865_v8 = vld [vmem:[%s23926_s1 + $0x1960] sm:$0xff] }
 0x129   :  { %v863_v6 = vld [vmem:[%s23926_s1 + $0x1950] sm:$0xff]  ;;  %v11081_v9 = vpack.c.bf16 %v879_v2, %v866_v1  ;;  %v892_v14 = vld [vmem:[%s23926_s1 + $0x1a38] sm:$0xff]  ;;  %v905_v15 = vld [vmem:[%s23926_s1 + $0x1aa0] sm:$0xff] }
 0x12a   :  { %10856 = vmatpush1.bf16.msra.mxu0 %v10855_v34  ;;  %v800_v34 = vld [vmem:[%s23926_s1 + $0x1758] sm:$0xff]  ;;  %v10887_v16 = vpack.c.bf16 %v876_v7, %v863_v6  ;;  %v889_v19 = vld [vmem:[%s23926_s1 + $0x1a20] sm:$0xff]  ;;  %v902_v20 = vld [vmem:[%s23926_s1 + $0x1a88] sm:$0xff]  ;;  %v11085_v23 = vpack.c.bf16 %v905_v15, %v892_v14 }
 0x12b   :  { %11052 = vmatpush1.bf16.msra.mxu1 %v11051_v35  ;;  %10858 = vmatprep.subr.bf16.mxu0 %v10857_v36  ;;  %v812_v35 = vld [vmem:[%s23926_s1 + $0x17b8] sm:$0xff]  ;;  %v825_v36 = vld [vmem:[%s23926_s1 + $0x1820] sm:$0xff]  ;;  %v891_v22 = vld [vmem:[%s23926_s1 + $0x1a30] sm:$0xff] }
 0x12c   :  { %11054 = vmatprep.subr.bf16.mxu1 %v11053_v40  ;;  %v11071_v40 = vpack.c.bf16 %v800_v34, %v787_v31  ;;  %v10877_v41 = vpack.c.bf16 %v825_v36, %v812_v35  ;;  %v918_v28 = vld [vmem:[%s23926_s1 + $0x1b08] sm:$0xff]  ;;  %v931_v30 = vld [vmem:[%s23926_s1 + $0x1b70] sm:$0xff]  ;;  %v10891_v31 = vpack.c.bf16 %v902_v20, %v889_v19  ;;  %v928_v36 = vld [vmem:[%s23926_s1 + $0x1b58] sm:$0xff] }
 0x12d   :  { %v915_v35 = vld [vmem:[%s23926_s1 + $0x1af0] sm:$0xff]  ;;  %v917_v11 = vld [vmem:[%s23926_s1 + $0x1b00] sm:$0xff]  ;;  %v11089_v37 = vpack.c.bf16 %v931_v30, %v918_v28  ;;  %v944_v42 = vld [vmem:[%s23926_s1 + $0x1bd8] sm:$0xff] }
 0x12e   :  { %10860 = vmatpush1.bf16.msra.mxu0 %v10859_v46  ;;  %v826_v46 = vld [vmem:[%s23926_s1 + $0x1828] sm:$0xff]  ;;  %v957_v43 = vld [vmem:[%s23926_s1 + $0x1c40] sm:$0xff]  ;;  %v943_v50 = vld [vmem:[%s23926_s1 + $0x1bd0] sm:$0xff] }
 0x12f   :  { %11056 = vmatpush1.bf16.msra.mxu1 %v11055_v47  ;;  %10862 = vmatprep.subr.bf16.mxu0 %v10861_v48  ;;  %v838_v47 = vld [vmem:[%s23926_s1 + $0x1888] sm:$0xff]  ;;  %v851_v48 = vld [vmem:[%s23926_s1 + $0x18f0] sm:$0xff]  ;;  %v11093_v51 = vpack.c.bf16 %v957_v43, %v944_v42  ;;  %v969_v1 = vld [vmem:[%s23926_s1 + $0x1ca0] sm:$0xff] }
 0x130   :  { %11058 = vmatprep.subr.bf16.mxu1 %v11057_v53  ;;  %v11075_v53 = vpack.c.bf16 %v826_v46, %v813_v44  ;;  %v10881_v54 = vpack.c.bf16 %v851_v48, %v838_v47  ;;  %v10895_v44 = vpack.c.bf16 %v928_v36, %v915_v35  ;;  %v941_v47 = vld [vmem:[%s23926_s1 + $0x1bc0] sm:$0xff]  ;;  %v954_v48 = vld [vmem:[%s23926_s1 + $0x1c28] sm:$0xff]  ;;  %v983_v57 = vld [vmem:[%s23926_s1 + $0x1d10] sm:$0xff] }
 0x131   :  { %v970_v56 = vld [vmem:[%s23926_s1 + $0x1ca8] sm:$0xff]  ;;  %v996_v6 = vld [vmem:[%s23926_s1 + $0x1d78] sm:$0xff]  ;;  %v1009_v7 = vld [vmem:[%s23926_s1 + $0x1de0] sm:$0xff] }
 0x132   :  { %10864 = vmatpush1.bf16.msra.mxu0 %v10863_v60  ;;  %v852_v60 = vld [vmem:[%s23926_s1 + $0x18f8] sm:$0xff]  ;;  %v11097_v2 = vpack.c.bf16 %v983_v57, %v970_v56  ;;  %v995_v14 = vld [vmem:[%s23926_s1 + $0x1d70] sm:$0xff]  ;;  %v11101_v15 = vpack.c.bf16 %v1009_v7, %v996_v6  ;;  %v1022_v19 = vld [vmem:[%s23926_s1 + $0x1e48] sm:$0xff] }
 0x133   :  { %11060 = vmatpush1.bf16.msra.mxu1 %v11059_v62  ;;  %10866 = vmatprep.subr.bf16.mxu0 %v10865_v0  ;;  %v864_v62 = vld [vmem:[%s23926_s1 + $0x1958] sm:$0xff]  ;;  %v877_v0 = vld [vmem:[%s23926_s1 + $0x19c0] sm:$0xff]  ;;  %v1035_v20 = vld [vmem:[%s23926_s1 + $0x1eb0] sm:$0xff] }
 0x134   :  { %11062 = vmatprep.subr.bf16.mxu1 %v11061_v4  ;;  %v11079_v4 = vpack.c.bf16 %v852_v60, %v839_v58  ;;  %v10885_v5 = vpack.c.bf16 %v877_v0, %v864_v62  ;;  %v10899_v58 = vpack.c.bf16 %v954_v48, %v941_v47  ;;  %v967_v62 = vld [vmem:[%s23926_s1 + $0x1c90] sm:$0xff]  ;;  %v980_v0 = vld [vmem:[%s23926_s1 + $0x1cf8] sm:$0xff]  ;;  %v1021_v28 = vld [vmem:[%s23926_s1 + $0x1e40] sm:$0xff]  ;;  %v11105_v30 = vpack.c.bf16 %v1035_v20, %v1022_v19 }
 0x135   :  { %v1048_v35 = vld [vmem:[%s23926_s1 + $0x1f18] sm:$0xff]  ;;  %v1061_v36 = vld [vmem:[%s23926_s1 + $0x1f80] sm:$0xff]  ;;  %v1047_v42 = vld [vmem:[%s23926_s1 + $0x1f10] sm:$0xff] }
 0x136   :  { %10868 = vmatpush1.bf16.msra.mxu0 %v10867_v10  ;;  %v878_v10 = vld [vmem:[%s23926_s1 + $0x19c8] sm:$0xff]  ;;  %v11109_v43 = vpack.c.bf16 %v1061_v36, %v1048_v35  ;;  %v1087_v48 = vld [vmem:[%s23926_s1 + $0x2050] sm:$0xff]  ;;  %v1073_v56 = vld [vmem:[%s23926_s1 + $0x1fe0] sm:$0xff] }
 0x137   :  { %11064 = vmatpush1.bf16.msra.mxu1 %v11063_v12  ;;  %10870 = vmatprep.subr.bf16.mxu0 %v10869_v13  ;;  %v890_v12 = vld [vmem:[%s23926_s1 + $0x1a28] sm:$0xff]  ;;  %v903_v13 = vld [vmem:[%s23926_s1 + $0x1a90] sm:$0xff]  ;;  %v1125_v19 = vld [vmem:[%s23926_s1 + $0x2180] sm:$0xff] }
 0x138   :  { %11066 = vmatprep.subr.bf16.mxu1 %v11065_v17  ;;  %v11083_v17 = vpack.c.bf16 %v878_v10, %v865_v8  ;;  %v10889_v18 = vpack.c.bf16 %v903_v13, %v890_v12  ;;  %v10903_v8 = vpack.c.bf16 %v980_v0, %v967_v62  ;;  %v993_v12 = vld [vmem:[%s23926_s1 + $0x1d60] sm:$0xff]  ;;  %v1006_v13 = vld [vmem:[%s23926_s1 + $0x1dc8] sm:$0xff]  ;;  %v1100_v62 = vld [vmem:[%s23926_s1 + $0x20b8] sm:$0xff] }
 0x139   :  { %v1074_v47 = vld [vmem:[%s23926_s1 + $0x1fe8] sm:$0xff]  ;;  %v1113_v0 = vld [vmem:[%s23926_s1 + $0x2120] sm:$0xff]  ;;  %v1099_v6 = vld [vmem:[%s23926_s1 + $0x20b0] sm:$0xff] }
 0x13a   :  { %10872 = vmatpush1.bf16.msra.mxu0 %v10871_v26  ;;  %v904_v26 = vld [vmem:[%s23926_s1 + $0x1a98] sm:$0xff]  ;;  %v11113_v57 = vpack.c.bf16 %v1087_v48, %v1074_v47  ;;  %v11117_v7 = vpack.c.bf16 %v1113_v0, %v1100_v62  ;;  %v1151_v35 = vld [vmem:[%s23926_s1 + $0x2250] sm:$0xff]  ;;  %v1177_v47 = vld [vmem:[%s23926_s1 + $0x2320] sm:$0xff] }
 0x13b   :  { %11068 = vmatpush1.bf16.msra.mxu1 %v11067_v49  ;;  %10874 = vmatprep.subr.bf16.mxu0 %v10873_v27  ;;  %v916_v49 = vld [vmem:[%s23926_s1 + $0x1af8] sm:$0xff]  ;;  %v929_v27 = vld [vmem:[%s23926_s1 + $0x1b60] sm:$0xff]  ;;  %v1203_v62 = vld [vmem:[%s23926_s1 + $0x23f0] sm:$0xff] }
 0x13c   :  { %11070 = vmatprep.subr.bf16.mxu1 %v11069_v33  ;;  %v11087_v33 = vpack.c.bf16 %v904_v26, %v891_v22  ;;  %v10893_v34 = vpack.c.bf16 %v929_v27, %v916_v49  ;;  %v10907_v22 = vpack.c.bf16 %v1006_v13, %v993_v12  ;;  %v1019_v49 = vld [vmem:[%s23926_s1 + $0x1e30] sm:$0xff]  ;;  %v1032_v27 = vld [vmem:[%s23926_s1 + $0x1e98] sm:$0xff]  ;;  %v1126_v12 = vld [vmem:[%s23926_s1 + $0x2188] sm:$0xff] }
 0x13d   :  { %v1139_v13 = vld [vmem:[%s23926_s1 + $0x21f0] sm:$0xff] }
 0x13e   :  { %10876 = vmatpush1.bf16.msra.mxu0 %v10875_v38  ;;  %v930_v38 = vld [vmem:[%s23926_s1 + $0x1b68] sm:$0xff]  ;;  %v11121_v20 = vpack.c.bf16 %v1139_v13, %v1126_v12  ;;  %v1229_v12 = vld [vmem:[%s23926_s1 + $0x24c0] sm:$0xff] }
 0x13f   :  { %11072 = vmatpush1.bf16.msra.mxu1 %v11071_v40  ;;  %10878 = vmatprep.subr.bf16.mxu0 %v10877_v41  ;;  %v942_v40 = vld [vmem:[%s23926_s1 + $0x1bc8] sm:$0xff]  ;;  %v955_v41 = vld [vmem:[%s23926_s1 + $0x1c30] sm:$0xff] }
 0x140   :  { %11074 = vmatprep.subr.bf16.mxu1 %v11073_v45  ;;  %v11091_v45 = vpack.c.bf16 %v930_v38, %v917_v11  ;;  %v10897_v46 = vpack.c.bf16 %v955_v41, %v942_v40  ;;  %v10911_v11 = vpack.c.bf16 %v1032_v27, %v1019_v49  ;;  %v1045_v40 = vld [vmem:[%s23926_s1 + $0x1f00] sm:$0xff]  ;;  %v1058_v41 = vld [vmem:[%s23926_s1 + $0x1f68] sm:$0xff]  ;;  %v1152_v49 = vld [vmem:[%s23926_s1 + $0x2258] sm:$0xff] }
 0x141   :  { %v1165_v27 = vld [vmem:[%s23926_s1 + $0x22c0] sm:$0xff] }
 0x142   :  { %10880 = vmatpush1.bf16.msra.mxu0 %v10879_v52  ;;  %v956_v52 = vld [vmem:[%s23926_s1 + $0x1c38] sm:$0xff]  ;;  %v11125_v36 = vpack.c.bf16 %v1165_v27, %v1152_v49  ;;  %v1255_v49 = vld [vmem:[%s23926_s1 + $0x2590] sm:$0xff] }
 0x143   :  { %11076 = vmatpush1.bf16.msra.mxu1 %v11075_v53  ;;  %10882 = vmatprep.subr.bf16.mxu0 %v10881_v54  ;;  %v968_v53 = vld [vmem:[%s23926_s1 + $0x1c98] sm:$0xff]  ;;  %v981_v54 = vld [vmem:[%s23926_s1 + $0x1d00] sm:$0xff] }
 0x144   :  { %11078 = vmatprep.subr.bf16.mxu1 %v11077_v59  ;;  %v11095_v59 = vpack.c.bf16 %v956_v52, %v943_v50  ;;  %v10901_v60 = vpack.c.bf16 %v981_v54, %v968_v53  ;;  %v10915_v50 = vpack.c.bf16 %v1058_v41, %v1045_v40  ;;  %v1071_v53 = vld [vmem:[%s23926_s1 + $0x1fd0] sm:$0xff]  ;;  %v1084_v54 = vld [vmem:[%s23926_s1 + $0x2038] sm:$0xff]  ;;  %v1178_v40 = vld [vmem:[%s23926_s1 + $0x2328] sm:$0xff] }
 0x145   :  { %v1191_v41 = vld [vmem:[%s23926_s1 + $0x2390] sm:$0xff] }
 0x146   :  { %10884 = vmatpush1.bf16.msra.mxu0 %v10883_v3  ;;  %v982_v3 = vld [vmem:[%s23926_s1 + $0x1d08] sm:$0xff]  ;;  %v11129_v48 = vpack.c.bf16 %v1191_v41, %v1178_v40  ;;  %v1281_v40 = vld [vmem:[%s23926_s1 + $0x2660] sm:$0xff] }
 0x147   :  { %11080 = vmatpush1.bf16.msra.mxu1 %v11079_v4  ;;  %10886 = vmatprep.subr.bf16.mxu0 %v10885_v5  ;;  %v994_v4 = vld [vmem:[%s23926_s1 + $0x1d68] sm:$0xff]  ;;  %v1007_v5 = vld [vmem:[%s23926_s1 + $0x1dd0] sm:$0xff] }
 0x148   :  { %11082 = vmatprep.subr.bf16.mxu1 %v11081_v9  ;;  %v11099_v9 = vpack.c.bf16 %v982_v3, %v969_v1  ;;  %v10905_v10 = vpack.c.bf16 %v1007_v5, %v994_v4  ;;  %v10919_v1 = vpack.c.bf16 %v1084_v54, %v1071_v53  ;;  %v1097_v4 = vld [vmem:[%s23926_s1 + $0x20a0] sm:$0xff]  ;;  %v1110_v5 = vld [vmem:[%s23926_s1 + $0x2108] sm:$0xff]  ;;  %v1204_v53 = vld [vmem:[%s23926_s1 + $0x23f8] sm:$0xff] }
 0x149   :  { %v1217_v54 = vld [vmem:[%s23926_s1 + $0x2460] sm:$0xff] }
 0x14a   :  { %10888 = vmatpush1.bf16.msra.mxu0 %v10887_v16  ;;  %v1008_v16 = vld [vmem:[%s23926_s1 + $0x1dd8] sm:$0xff]  ;;  %v11133_v0 = vpack.c.bf16 %v1217_v54, %v1204_v53  ;;  %v1307_v54 = vld [vmem:[%s23926_s1 + $0x2730] sm:$0xff] }
 0x14b   :  { %11084 = vmatpush1.bf16.msra.mxu1 %v11083_v17  ;;  %10890 = vmatprep.subr.bf16.mxu0 %v10889_v18  ;;  %v1020_v17 = vld [vmem:[%s23926_s1 + $0x1e38] sm:$0xff]  ;;  %v1033_v18 = vld [vmem:[%s23926_s1 + $0x1ea0] sm:$0xff] }
 0x14c   :  { %11086 = vmatprep.subr.bf16.mxu1 %v11085_v23  ;;  %v11103_v23 = vpack.c.bf16 %v1008_v16, %v995_v14  ;;  %v10909_v26 = vpack.c.bf16 %v1033_v18, %v1020_v17  ;;  %v10923_v14 = vpack.c.bf16 %v1110_v5, %v1097_v4  ;;  %v1123_v17 = vld [vmem:[%s23926_s1 + $0x2170] sm:$0xff]  ;;  %v1136_v18 = vld [vmem:[%s23926_s1 + $0x21d8] sm:$0xff]  ;;  %v1230_v4 = vld [vmem:[%s23926_s1 + $0x24c8] sm:$0xff] }
 0x14d   :  { %2144 = vmatmul.mubr.f32.vlgmr.msra.gmra.mrb[2].mxu0 %v14258_v24  ;;  %v1243_v5 = vld [vmem:[%s23926_s1 + $0x2530] sm:$0xff] }
 0x14e   :  { %10892 = vmatpush1.bf16.msra.mxu0 %v10891_v31  ;;  %2428 = vmatmul.mubr.f32.vlgmr.msra.gmra.mrb[2].mxu1 %v14258_v24  ;;  %v1034_v31 = vld [vmem:[%s23926_s1 + $0x1ea8] sm:$0xff]  ;;  %v11137_v13 = vpack.c.bf16 %v1243_v5, %v1230_v4  ;;  %v63_v5 = vld [vmem:[%s23926_s1 + $0x50] sm:$0xff] }
 0x14f   :  { %11088 = vmatpush1.bf16.msra.mxu1 %v11087_v33  ;;  %10894 = vmatprep.subr.bf16.mxu0 %v10893_v34  ;;  %v1046_v33 = vld [vmem:[%s23926_s1 + $0x1f08] sm:$0xff]  ;;  %v1059_v34 = vld [vmem:[%s23926_s1 + $0x1f70] sm:$0xff] }
 0x150   :  { %11090 = vmatprep.subr.bf16.mxu1 %v11089_v37  ;;  %2214 = vmatprep.mubr.f32.mxu0 %v14694_v63  ;;  %v11107_v37 = vpack.c.bf16 %v1034_v31, %v1021_v28  ;;  %v10913_v38 = vpack.c.bf16 %v1059_v34, %v1046_v33  ;;  %v10927_v28 = vpack.c.bf16 %v1136_v18, %v1123_v17  ;;  %v1149_v33 = vld [vmem:[%s23926_s1 + $0x2240] sm:$0xff]  ;;  %v1162_v34 = vld [vmem:[%s23926_s1 + $0x22a8] sm:$0xff]  ;;  %v1256_v17 = vld [vmem:[%s23926_s1 + $0x2598] sm:$0xff] }
 0x151   :  { %2498 = vmatprep.mubr.f32.mxu1 %v14694_v63  ;;  %v1269_v18 = vld [vmem:[%s23926_s1 + $0x2600] sm:$0xff]  ;;  %v74_v4 = vld [vmem:[%s23926_s1 + $0xa8] sm:$0xff] }
 0x152   :  { %10896 = vmatpush1.bf16.msra.mxu0 %v10895_v44  ;;  %v1060_v44 = vld [vmem:[%s23926_s1 + $0x1f78] sm:$0xff]  ;;  %v11141_v27 = vpack.c.bf16 %v1269_v18, %v1256_v17  ;;  %v89_v17 = vld [vmem:[%s23926_s1 + $0x120] sm:$0xff] }
 0x153   :  { %11092 = vmatpush1.bf16.msra.mxu1 %v11091_v45  ;;  %10898 = vmatprep.subr.bf16.mxu0 %v10897_v46  ;;  %v1072_v45 = vld [vmem:[%s23926_s1 + $0x1fd8] sm:$0xff]  ;;  %v1085_v46 = vld [vmem:[%s23926_s1 + $0x2040] sm:$0xff] }
 0x154   :  { %11094 = vmatprep.subr.bf16.mxu1 %v11093_v51  ;;  %v11111_v51 = vpack.c.bf16 %v1060_v44, %v1047_v42  ;;  %v10917_v52 = vpack.c.bf16 %v1085_v46, %v1072_v45  ;;  %v10931_v42 = vpack.c.bf16 %v1162_v34, %v1149_v33  ;;  %v1175_v45 = vld [vmem:[%s23926_s1 + $0x2310] sm:$0xff]  ;;  %v1188_v46 = vld [vmem:[%s23926_s1 + $0x2378] sm:$0xff]  ;;  %v1282_v33 = vld [vmem:[%s23926_s1 + $0x2668] sm:$0xff] }
 0x155   :  { %v1295_v34 = vld [vmem:[%s23926_s1 + $0x26d0] sm:$0xff] }
 0x156   :  { %10900 = vmatpush1.bf16.msra.mxu0 %v10899_v58  ;;  %v1086_v58 = vld [vmem:[%s23926_s1 + $0x2048] sm:$0xff]  ;;  %v11145_v41 = vpack.c.bf16 %v1295_v34, %v1282_v33  ;;  %v115_v33 = vld [vmem:[%s23926_s1 + $0x1f0] sm:$0xff] }
 0x157   :  { %11096 = vmatpush1.bf16.msra.mxu1 %v11095_v59  ;;  %10902 = vmatprep.subr.bf16.mxu0 %v10901_v60  ;;  %v1098_v59 = vld [vmem:[%s23926_s1 + $0x20a8] sm:$0xff]  ;;  %v1111_v60 = vld [vmem:[%s23926_s1 + $0x2110] sm:$0xff] }
 0x158   :  { %11098 = vmatprep.subr.bf16.mxu1 %v11097_v2  ;;  %v11115_v2 = vpack.c.bf16 %v1086_v58, %v1073_v56  ;;  %v10921_v3 = vpack.c.bf16 %v1111_v60, %v1098_v59  ;;  %v10935_v56 = vpack.c.bf16 %v1188_v46, %v1175_v45  ;;  %v1201_v59 = vld [vmem:[%s23926_s1 + $0x23e0] sm:$0xff]  ;;  %v1214_v60 = vld [vmem:[%s23926_s1 + $0x2448] sm:$0xff]  ;;  %v1308_v45 = vld [vmem:[%s23926_s1 + $0x2738] sm:$0xff] }
 0x159   :  { %v1321_v46 = vld [vmem:[%s23926_s1 + $0x27a0] sm:$0xff] }
 0x15a   :  { %10904 = vmatpush1.bf16.msra.mxu0 %v10903_v8  ;;  %v1112_v8 = vld [vmem:[%s23926_s1 + $0x2118] sm:$0xff]  ;;  %v11149_v53 = vpack.c.bf16 %v1321_v46, %v1308_v45  ;;  %v141_v45 = vld [vmem:[%s23926_s1 + $0x2c0] sm:$0xff] }
 0x15b   :  { %11100 = vmatpush1.bf16.msra.mxu1 %v11099_v9  ;;  %10906 = vmatprep.subr.bf16.mxu0 %v10905_v10  ;;  %v1124_v9 = vld [vmem:[%s23926_s1 + $0x2178] sm:$0xff]  ;;  %v1137_v10 = vld [vmem:[%s23926_s1 + $0x21e0] sm:$0xff] }
 0x15c   :  { %11102 = vmatprep.subr.bf16.mxu1 %v11101_v15  ;;  %v11119_v15 = vpack.c.bf16 %v1112_v8, %v1099_v6  ;;  %v10925_v16 = vpack.c.bf16 %v1137_v10, %v1124_v9  ;;  %v10939_v6 = vpack.c.bf16 %v1214_v60, %v1201_v59  ;;  %v1227_v9 = vld [vmem:[%s23926_s1 + $0x24b0] sm:$0xff]  ;;  %v1240_v10 = vld [vmem:[%s23926_s1 + $0x2518] sm:$0xff] }
 0x15d   :  { %v64_v60 = vld [vmem:[%s23926_s1 + $0x58] sm:$0xff] }
 0x15e   :  { %10908 = vmatpush1.bf16.msra.mxu0 %v10907_v22  ;;  %v1138_v22 = vld [vmem:[%s23926_s1 + $0x21e8] sm:$0xff] }
 0x15f   :  { %11104 = vmatpush1.bf16.msra.mxu1 %v11103_v23  ;;  %10910 = vmatprep.subr.bf16.mxu0 %v10909_v26  ;;  %v1150_v23 = vld [vmem:[%s23926_s1 + $0x2248] sm:$0xff]  ;;  %v1163_v26 = vld [vmem:[%s23926_s1 + $0x22b0] sm:$0xff] }
 0x160   :  { %11106 = vmatprep.subr.bf16.mxu1 %v11105_v30  ;;  %v11123_v30 = vpack.c.bf16 %v1138_v22, %v1125_v19  ;;  %v10929_v31 = vpack.c.bf16 %v1163_v26, %v1150_v23  ;;  %v10943_v19 = vpack.c.bf16 %v1240_v10, %v1227_v9  ;;  %v1253_v23 = vld [vmem:[%s23926_s1 + $0x2580] sm:$0xff]  ;;  %v1266_v26 = vld [vmem:[%s23926_s1 + $0x25e8] sm:$0xff]  ;;  %v103_v10 = vld [vmem:[%s23926_s1 + $0x190] sm:$0xff] }
 0x161   :  { %v90_v9 = vld [vmem:[%s23926_s1 + $0x128] sm:$0xff] }
 0x162   :  { %10912 = vmatpush1.bf16.msra.mxu0 %v10911_v11  ;;  %v1164_v11 = vld [vmem:[%s23926_s1 + $0x22b8] sm:$0xff]  ;;  %v11353_v18 = vpack.c.bf16 %v103_v10, %v90_v9 }
 0x163   :  { %11108 = vmatpush1.bf16.msra.mxu1 %v11107_v37  ;;  %10914 = vmatprep.subr.bf16.mxu0 %v10913_v38  ;;  %v1176_v37 = vld [vmem:[%s23926_s1 + $0x2318] sm:$0xff]  ;;  %v1189_v38 = vld [vmem:[%s23926_s1 + $0x2380] sm:$0xff] }
 0x164   :  { %11110 = vmatprep.subr.bf16.mxu1 %v11109_v43  ;;  %v11127_v43 = vpack.c.bf16 %v1164_v11, %v1151_v35  ;;  %v10933_v44 = vpack.c.bf16 %v1189_v38, %v1176_v37  ;;  %v10947_v35 = vpack.c.bf16 %v1266_v26, %v1253_v23  ;;  %v1279_v37 = vld [vmem:[%s23926_s1 + $0x2650] sm:$0xff]  ;;  %v1292_v38 = vld [vmem:[%s23926_s1 + $0x26b8] sm:$0xff]  ;;  %v129_v26 = vld [vmem:[%s23926_s1 + $0x260] sm:$0xff] }
 0x165   :  { %v116_v23 = vld [vmem:[%s23926_s1 + $0x1f8] sm:$0xff] }
 0x166   :  { %10916 = vmatpush1.bf16.msra.mxu0 %v10915_v50  ;;  %v1190_v50 = vld [vmem:[%s23926_s1 + $0x2388] sm:$0xff]  ;;  %v11357_v34 = vpack.c.bf16 %v129_v26, %v116_v23 }
 0x167   :  { %11112 = vmatpush1.bf16.msra.mxu1 %v11111_v51  ;;  %10918 = vmatprep.subr.bf16.mxu0 %v10917_v52  ;;  %v1202_v51 = vld [vmem:[%s23926_s1 + $0x23e8] sm:$0xff]  ;;  %v1215_v52 = vld [vmem:[%s23926_s1 + $0x2450] sm:$0xff] }
 0x168   :  { %11114 = vmatprep.subr.bf16.mxu1 %v11113_v57  ;;  %v11131_v57 = vpack.c.bf16 %v1190_v50, %v1177_v47  ;;  %v10937_v58 = vpack.c.bf16 %v1215_v52, %v1202_v51  ;;  %v10951_v47 = vpack.c.bf16 %v1292_v38, %v1279_v37  ;;  %v1305_v51 = vld [vmem:[%s23926_s1 + $0x2720] sm:$0xff]  ;;  %v1318_v52 = vld [vmem:[%s23926_s1 + $0x2788] sm:$0xff]  ;;  %v155_v38 = vld [vmem:[%s23926_s1 + $0x330] sm:$0xff] }
 0x169   :  { %v10955_v59 = vpack.c.bf16 %v1318_v52, %v1305_v51  ;;  %v142_v37 = vld [vmem:[%s23926_s1 + $0x2c8] sm:$0xff]  ;;  %v168_v51 = vld [vmem:[%s23926_s1 + $0x398] sm:$0xff]  ;;  %v181_v52 = vld [vmem:[%s23926_s1 + $0x400] sm:$0xff] }
 0x16a   :  { %10920 = vmatpush1.bf16.msra.mxu0 %v10919_v1  ;;  %v1216_v1 = vld [vmem:[%s23926_s1 + $0x2458] sm:$0xff]  ;;  %v11361_v46 = vpack.c.bf16 %v155_v38, %v142_v37 }
 0x16b   :  { %11116 = vmatpush1.bf16.msra.mxu1 %v11115_v2  ;;  %10922 = vmatprep.subr.bf16.mxu0 %v10921_v3  ;;  %v1228_v2 = vld [vmem:[%s23926_s1 + $0x24b8] sm:$0xff]  ;;  %v1241_v3 = vld [vmem:[%s23926_s1 + $0x2520] sm:$0xff] }
 0x16c   :  { %11118 = vmatprep.subr.bf16.mxu1 %v11117_v7  ;;  %v11135_v7 = vpack.c.bf16 %v1216_v1, %v1203_v62  ;;  %v10941_v8 = vpack.c.bf16 %v1241_v3, %v1228_v2  ;;  %v77_v62 = vld [vmem:[%s23926_s1 + $0xc0] sm:$0xff] }
 0x16d   :  { %v11349_v2 = vpack.c.bf16 %v77_v62, %v64_v60  ;;  %v61_v3 = vld [vmem:[%s23926_s1 + $0x40] sm:$0xff]  ;;  %v11365_v62 = vpack.c.bf16 %v181_v52, %v168_v51 }
 0x16e   :  { %10924 = vmatpush1.bf16.msra.mxu0 %v10923_v14  ;;  %v1242_v14 = vld [vmem:[%s23926_s1 + $0x2528] sm:$0xff] }
 0x16f   :  { %11120 = vmatpush1.bf16.msra.mxu1 %v11119_v15  ;;  %10926 = vmatprep.subr.bf16.mxu0 %v10925_v16  ;;  %v1254_v15 = vld [vmem:[%s23926_s1 + $0x2588] sm:$0xff]  ;;  %v1267_v16 = vld [vmem:[%s23926_s1 + $0x25f0] sm:$0xff] }
 0x170   :  { %11122 = vmatprep.subr.bf16.mxu1 %v11121_v20  ;;  %v11139_v20 = vpack.c.bf16 %v1242_v14, %v1229_v12  ;;  %v10945_v22 = vpack.c.bf16 %v1267_v16, %v1254_v15  ;;  %v11155_v12 = vpack.c.bf16 %v74_v4, %v61_v3  ;;  %v87_v15 = vld [vmem:[%s23926_s1 + $0x110] sm:$0xff]  ;;  %v100_v16 = vld [vmem:[%s23926_s1 + $0x178] sm:$0xff] }
 0x172   :  { %10928 = vmatpush1.bf16.msra.mxu0 %v10927_v28  ;;  %v1268_v28 = vld [vmem:[%s23926_s1 + $0x25f8] sm:$0xff] }
 0x173   :  { %11124 = vmatpush1.bf16.msra.mxu1 %v11123_v30  ;;  %10930 = vmatprep.subr.bf16.mxu0 %v10929_v31  ;;  %v1280_v30 = vld [vmem:[%s23926_s1 + $0x2658] sm:$0xff]  ;;  %v1293_v31 = vld [vmem:[%s23926_s1 + $0x26c0] sm:$0xff] }
 0x174   :  { %11126 = vmatprep.subr.bf16.mxu1 %v11125_v36  ;;  %v11143_v36 = vpack.c.bf16 %v1268_v28, %v1255_v49  ;;  %v10949_v11 = vpack.c.bf16 %v1293_v31, %v1280_v30  ;;  %v11159_v49 = vpack.c.bf16 %v100_v16, %v87_v15  ;;  %v113_v30 = vld [vmem:[%s23926_s1 + $0x1e0] sm:$0xff]  ;;  %v126_v31 = vld [vmem:[%s23926_s1 + $0x248] sm:$0xff] }
 0x175   :  { %v206_v16 = vld [vmem:[%s23926_s1 + $0x4c8] sm:$0xff] }
 0x176   :  { %10932 = vmatpush1.bf16.msra.mxu0 %v10931_v42  ;;  %v1294_v42 = vld [vmem:[%s23926_s1 + $0x26c8] sm:$0xff] }
 0x177   :  { %11128 = vmatpush1.bf16.msra.mxu1 %v11127_v43  ;;  %10934 = vmatprep.subr.bf16.mxu0 %v10933_v44  ;;  %v1306_v43 = vld [vmem:[%s23926_s1 + $0x2728] sm:$0xff]  ;;  %v1319_v44 = vld [vmem:[%s23926_s1 + $0x2790] sm:$0xff] }
 0x178   :  { %11130 = vmatprep.subr.bf16.mxu1 %v11129_v48  ;;  %v11147_v48 = vpack.c.bf16 %v1294_v42, %v1281_v40  ;;  %v10953_v50 = vpack.c.bf16 %v1319_v44, %v1306_v43  ;;  %v11163_v40 = vpack.c.bf16 %v126_v31, %v113_v30  ;;  %v139_v43 = vld [vmem:[%s23926_s1 + $0x2b0] sm:$0xff]  ;;  %v152_v44 = vld [vmem:[%s23926_s1 + $0x318] sm:$0xff] }
 0x179   :  { %v232_v31 = vld [vmem:[%s23926_s1 + $0x598] sm:$0xff] }
 0x17a   :  { %10936 = vmatpush1.bf16.msra.mxu0 %v10935_v56  ;;  %v1320_v56 = vld [vmem:[%s23926_s1 + $0x2798] sm:$0xff] }
 0x17b   :  { %11132 = vmatpush1.bf16.msra.mxu1 %v11131_v57  ;;  %10938 = vmatprep.subr.bf16.mxu0 %v10937_v58  ;;  %v62_v57 = vld [vmem:[%s23926_s1 + $0x48] sm:$0xff]  ;;  %v75_v58 = vld [vmem:[%s23926_s1 + $0xb0] sm:$0xff] }
 0x17c   :  { %11134 = vmatprep.subr.bf16.mxu1 %v11133_v0  ;;  %v11151_v0 = vpack.c.bf16 %v1320_v56, %v1307_v54  ;;  %v11153_v1 = vpack.c.bf16 %v75_v58, %v62_v57  ;;  %v165_v57 = vld [vmem:[%s23926_s1 + $0x380] sm:$0xff]  ;;  %v178_v58 = vld [vmem:[%s23926_s1 + $0x3e8] sm:$0xff] }
 0x17e   :  { %10940 = vmatpush1.bf16.msra.mxu0 %v10939_v6  ;;  %v76_v6 = vld [vmem:[%s23926_s1 + $0xb8] sm:$0xff] }
 0x17f   :  { %11136 = vmatpush1.bf16.msra.mxu1 %v11135_v7  ;;  %10942 = vmatprep.subr.bf16.mxu0 %v10941_v8  ;;  %v88_v7 = vld [vmem:[%s23926_s1 + $0x118] sm:$0xff]  ;;  %v101_v8 = vld [vmem:[%s23926_s1 + $0x180] sm:$0xff] }
 0x180   :  { %11138 = vmatprep.subr.bf16.mxu1 %v11137_v13  ;;  %v11351_v13 = vpack.c.bf16 %v76_v6, %v63_v5  ;;  %v11157_v14 = vpack.c.bf16 %v101_v8, %v88_v7  ;;  %v194_v5 = vld [vmem:[%s23926_s1 + $0x468] sm:$0xff]  ;;  %v207_v6 = vld [vmem:[%s23926_s1 + $0x4d0] sm:$0xff]  ;;  %v11171_v8 = vpack.c.bf16 %v178_v58, %v165_v57  ;;  %v284_v58 = vld [vmem:[%s23926_s1 + $0x738] sm:$0xff] }
 0x181   :  { %v11369_v15 = vpack.c.bf16 %v207_v6, %v194_v5 }
 0x182   :  { %10944 = vmatpush1.bf16.msra.mxu0 %v10943_v19  ;;  %v102_v19 = vld [vmem:[%s23926_s1 + $0x188] sm:$0xff] }
 0x183   :  { %11140 = vmatpush1.bf16.msra.mxu1 %v11139_v20  ;;  %10946 = vmatprep.subr.bf16.mxu0 %v10945_v22  ;;  %v114_v20 = vld [vmem:[%s23926_s1 + $0x1e8] sm:$0xff]  ;;  %v127_v22 = vld [vmem:[%s23926_s1 + $0x250] sm:$0xff] }
 0x184   :  { %11142 = vmatprep.subr.bf16.mxu1 %v11141_v27  ;;  %v11355_v27 = vpack.c.bf16 %v102_v19, %v89_v17  ;;  %v11161_v28 = vpack.c.bf16 %v127_v22, %v114_v20  ;;  %v218_v17 = vld [vmem:[%s23926_s1 + $0x528] sm:$0xff]  ;;  %v220_v19 = vld [vmem:[%s23926_s1 + $0x538] sm:$0xff]  ;;  %v233_v20 = vld [vmem:[%s23926_s1 + $0x5a0] sm:$0xff] }
 0x185   :  { %v11373_v30 = vpack.c.bf16 %v233_v20, %v220_v19 }
 0x186   :  { %10948 = vmatpush1.bf16.msra.mxu0 %v10947_v35  ;;  %v128_v35 = vld [vmem:[%s23926_s1 + $0x258] sm:$0xff] }
 0x187   :  { %11144 = vmatpush1.bf16.msra.mxu1 %v11143_v36  ;;  %10950 = vmatprep.subr.bf16.mxu0 %v10949_v11  ;;  %v140_v36 = vld [vmem:[%s23926_s1 + $0x2b8] sm:$0xff]  ;;  %v153_v11 = vld [vmem:[%s23926_s1 + $0x320] sm:$0xff] }
 0x188   :  { %11146 = vmatprep.subr.bf16.mxu1 %v11145_v41  ;;  %v11359_v41 = vpack.c.bf16 %v128_v35, %v115_v33  ;;  %v11165_v42 = vpack.c.bf16 %v153_v11, %v140_v36  ;;  %v244_v33 = vld [vmem:[%s23926_s1 + $0x5f8] sm:$0xff]  ;;  %v246_v35 = vld [vmem:[%s23926_s1 + $0x608] sm:$0xff]  ;;  %v259_v36 = vld [vmem:[%s23926_s1 + $0x670] sm:$0xff] }
 0x18a   :  { %10952 = vmatpush1.bf16.msra.mxu0 %v10951_v47  ;;  %v154_v47 = vld [vmem:[%s23926_s1 + $0x328] sm:$0xff] }
 0x18b   :  { %11148 = vmatpush1.bf16.msra.mxu1 %v11147_v48  ;;  %10954 = vmatprep.subr.bf16.mxu0 %v10953_v50  ;;  %v166_v48 = vld [vmem:[%s23926_s1 + $0x388] sm:$0xff]  ;;  %v179_v50 = vld [vmem:[%s23926_s1 + $0x3f0] sm:$0xff]  ;;  %v11363_v54 = vpack.c.bf16 %v154_v47, %v141_v45  ;;  %v272_v47 = vld [vmem:[%s23926_s1 + $0x6d8] sm:$0xff] }
 0x18c   :  { %11150 = vmatprep.subr.bf16.mxu1 %v11149_v53  ;;  %v11167_v53 = vpack.c.bf16 %v152_v44, %v139_v43  ;;  %v11169_v56 = vpack.c.bf16 %v179_v50, %v166_v48  ;;  %v11377_v43 = vpack.c.bf16 %v259_v36, %v246_v35  ;;  %v258_v44 = vld [vmem:[%s23926_s1 + $0x668] sm:$0xff]  ;;  %v285_v48 = vld [vmem:[%s23926_s1 + $0x740] sm:$0xff] }
 0x18d   :  { %2215 = vmatmul.mubr.f32.vlgmr.msra.gmra.mrb[2].mxu0 %v14674_v55  ;;  %v270_v45 = vld [vmem:[%s23926_s1 + $0x6c8] sm:$0xff]  ;;  %v11381_v57 = vpack.c.bf16 %v285_v48, %v272_v47 }
 0x18e   :  { %2499 = vmatmul.mubr.f32.vlgmr.msra.gmra.mrb[2].mxu1 %v14674_v55  ;;  %10956 = vmatpush1.bf16.msra.mxu0 %v10955_v59  ;;  %v167_v59 = vld [vmem:[%s23926_s1 + $0x390] sm:$0xff] }
 0x18f   :  { %11152 = vmatpush1.bf16.msra.mxu1 %v11151_v0  ;;  %2285 = vmatprep.mubr.f32.mxu0 %v23941_v21  ;;  %v180_v0 = vld [vmem:[%s23926_s1 + $0x3f8] sm:$0xff] }
 0x190   :  { %2569 = vmatprep.mubr.f32.mxu1 %v23941_v21  ;;  %11154 = vmatprep.subr.bf16.mxu0 %v11153_v1  ;;  %v192_v1 = vld [vmem:[%s23926_s1 + $0x458] sm:$0xff]  ;;  %v11367_v9 = vpack.c.bf16 %v180_v0, %v167_v59  ;;  %v298_v0 = vld [vmem:[%s23926_s1 + $0x7a8] sm:$0xff] }
 0x191   :  { %11350 = vmatprep.subr.bf16.mxu1 %v11349_v2  ;;  %v205_v2 = vld [vmem:[%s23926_s1 + $0x4c0] sm:$0xff]  ;;  %v296_v59 = vld [vmem:[%s23926_s1 + $0x798] sm:$0xff] }
 0x192   :  { %v11173_v10 = vpack.c.bf16 %v205_v2, %v192_v1  ;;  %v311_v1 = vld [vmem:[%s23926_s1 + $0x810] sm:$0xff] }
 0x195   :  { %9536 = vmatmul.mubr.msk.f32.vlgmr.msra.gmra.mrb[2].mxu0 %vm1437_vm0, %v15084_v29 }
 0x196   :  { %9537 = vmatmul.mubr.msk.f32.vlgmr.msra.gmra.mrb[2].mxu1 %vm1437_vm0, %v15084_v29  ;;  %11156 = vmatpush1.bf16.msra.mxu0 %v11155_v12  ;;  %v191_v12 = vld [vmem:[%s23926_s1 + $0x450] sm:$0xff] }
 0x197   :  { %11352 = vmatpush1.bf16.msra.mxu1 %v11351_v13  ;;  %11158 = vmatprep.subr.bf16.mxu0 %v11157_v14  ;;  %v204_v13 = vld [vmem:[%s23926_s1 + $0x4b8] sm:$0xff]  ;;  %v193_v14 = vld [vmem:[%s23926_s1 + $0x460] sm:$0xff] }
 0x198   :  { %11354 = vmatprep.subr.bf16.mxu1 %v11353_v18  ;;  %2640 = vmatprep.mubr.f32.mxu0 %v14146_v32  ;;  %v231_v18 = vld [vmem:[%s23926_s1 + $0x590] sm:$0xff]  ;;  %v11175_v22 = vpack.c.bf16 %v204_v13, %v191_v12  ;;  %v11371_v23 = vpack.c.bf16 %v206_v16, %v193_v14  ;;  %v11385_v12 = vpack.c.bf16 %v311_v1, %v298_v0  ;;  %v310_v13 = vld [vmem:[%s23926_s1 + $0x808] sm:$0xff]  ;;  %v324_v16 = vld [vmem:[%s23926_s1 + $0x878] sm:$0xff] }
 0x199   :  { %2924 = vmatprep.mubr.f32.mxu1 %v14146_v32  ;;  %v11177_v26 = vpack.c.bf16 %v231_v18, %v218_v17  ;;  %v322_v14 = vld [vmem:[%s23926_s1 + $0x868] sm:$0xff]  ;;  %v337_v17 = vld [vmem:[%s23926_s1 + $0x8e0] sm:$0xff] }
 0x19a   :  { %11160 = vmatpush1.bf16.msra.mxu0 %v11159_v49  ;;  %v217_v49 = vld [vmem:[%s23926_s1 + $0x520] sm:$0xff] }
 0x19b   :  { %11356 = vmatpush1.bf16.msra.mxu1 %v11355_v27  ;;  %11162 = vmatprep.subr.bf16.mxu0 %v11161_v28  ;;  %v230_v27 = vld [vmem:[%s23926_s1 + $0x588] sm:$0xff]  ;;  %v219_v28 = vld [vmem:[%s23926_s1 + $0x530] sm:$0xff] }
 0x19c   :  { %11358 = vmatprep.subr.bf16.mxu1 %v11357_v34  ;;  %v257_v34 = vld [vmem:[%s23926_s1 + $0x660] sm:$0xff]  ;;  %v11179_v11 = vpack.c.bf16 %v230_v27, %v217_v49  ;;  %v11375_v37 = vpack.c.bf16 %v232_v31, %v219_v28  ;;  %v11389_v49 = vpack.c.bf16 %v337_v17, %v324_v16  ;;  %v336_v27 = vld [vmem:[%s23926_s1 + $0x8d8] sm:$0xff]  ;;  %v350_v31 = vld [vmem:[%s23926_s1 + $0x948] sm:$0xff] }
 0x19d   :  { %v11181_v38 = vpack.c.bf16 %v257_v34, %v244_v33  ;;  %v348_v28 = vld [vmem:[%s23926_s1 + $0x938] sm:$0xff]  ;;  %v363_v33 = vld [vmem:[%s23926_s1 + $0x9b0] sm:$0xff] }
 0x19e   :  { %11164 = vmatpush1.bf16.msra.mxu0 %v11163_v40  ;;  %v243_v40 = vld [vmem:[%s23926_s1 + $0x5f0] sm:$0xff] }
 0x19f   :  { %11360 = vmatpush1.bf16.msra.mxu1 %v11359_v41  ;;  %11166 = vmatprep.subr.bf16.mxu0 %v11165_v42  ;;  %v256_v41 = vld [vmem:[%s23926_s1 + $0x658] sm:$0xff]  ;;  %v245_v42 = vld [vmem:[%s23926_s1 + $0x600] sm:$0xff] }
 0x1a0   :  { %11362 = vmatprep.subr.bf16.mxu1 %v11361_v46  ;;  %v16373_v60 = vpop.f32.mrb[0].mxu0  ;;  %v16384_v3 = vpop.f32.mrb[0].mxu1  ;;  %v283_v46 = vld [vmem:[%s23926_s1 + $0x730] sm:$0xff]  ;;  %v11183_v50 = vpack.c.bf16 %v256_v41, %v243_v40  ;;  %v11379_v51 = vpack.c.bf16 %v258_v44, %v245_v42  ;;  %v11393_v40 = vpack.c.bf16 %v363_v33, %v350_v31  ;;  %v362_v41 = vld [vmem:[%s23926_s1 + $0x9a8] sm:$0xff]  ;;  %v376_v44 = vld [vmem:[%s23926_s1 + $0xa18] sm:$0xff] }
 0x1a1   :  { %v16386_v4 = vpop.f32.mrb[1].mxu0  ;;  %v16394_v7 = vpop.f32.mrb[1].mxu1  ;;  %v11185_v52 = vpack.c.bf16 %v283_v46, %v270_v45  ;;  %v374_v42 = vld [vmem:[%s23926_s1 + $0xa08] sm:$0xff]  ;;  %v389_v45 = vld [vmem:[%s23926_s1 + $0xa80] sm:$0xff] }
 0x1a2   :  { %11168 = vmatpush1.bf16.msra.mxu0 %v11167_v53  ;;  %v269_v53 = vld [vmem:[%s23926_s1 + $0x6c0] sm:$0xff] }
 0x1a3   :  { %11364 = vmatpush1.bf16.msra.mxu1 %v11363_v54  ;;  %11170 = vmatprep.subr.bf16.mxu0 %v11169_v56  ;;  %v282_v54 = vld [vmem:[%s23926_s1 + $0x728] sm:$0xff]  ;;  %v271_v56 = vld [vmem:[%s23926_s1 + $0x6d0] sm:$0xff] }
 0x1a4   :  { %11366 = vmatprep.subr.bf16.mxu1 %v11365_v62  ;;  %v309_v62 = vld [vmem:[%s23926_s1 + $0x800] sm:$0xff]  ;;  %v11187_v2 = vpack.c.bf16 %v282_v54, %v269_v53  ;;  %v11383_v5 = vpack.c.bf16 %v284_v58, %v271_v56  ;;  %v11397_v53 = vpack.c.bf16 %v389_v45, %v376_v44  ;;  %v388_v54 = vld [vmem:[%s23926_s1 + $0xa78] sm:$0xff]  ;;  %v402_v58 = vld [vmem:[%s23926_s1 + $0xae8] sm:$0xff] }
 0x1a5   :  { %v11189_v6 = vpack.c.bf16 %v309_v62, %v296_v59  ;;  %v400_v56 = vld [vmem:[%s23926_s1 + $0xad8] sm:$0xff]  ;;  %v415_v59 = vld [vmem:[%s23926_s1 + $0xb50] sm:$0xff] }
 0x1a6   :  { %11172 = vmatpush1.bf16.msra.mxu0 %v11171_v8  ;;  %v295_v8 = vld [vmem:[%s23926_s1 + $0x790] sm:$0xff] }
 0x1a7   :  { %11368 = vmatpush1.bf16.msra.mxu1 %v11367_v9  ;;  %11174 = vmatprep.subr.bf16.mxu0 %v11173_v10  ;;  %v308_v9 = vld [vmem:[%s23926_s1 + $0x7f8] sm:$0xff]  ;;  %v297_v10 = vld [vmem:[%s23926_s1 + $0x7a0] sm:$0xff] }
 0x1a8   :  { %11370 = vmatprep.subr.bf16.mxu1 %v11369_v15  ;;  %v335_v15 = vld [vmem:[%s23926_s1 + $0x8d0] sm:$0xff]  ;;  %v11191_v18 = vpack.c.bf16 %v308_v9, %v295_v8  ;;  %v11387_v19 = vpack.c.bf16 %v310_v13, %v297_v10  ;;  %v11401_v8 = vpack.c.bf16 %v415_v59, %v402_v58  ;;  %v414_v9 = vld [vmem:[%s23926_s1 + $0xb48] sm:$0xff]  ;;  %v428_v13 = vld [vmem:[%s23926_s1 + $0xbb8] sm:$0xff] }
 0x1a9   :  { %v11193_v20 = vpack.c.bf16 %v335_v15, %v322_v14  ;;  %v426_v10 = vld [vmem:[%s23926_s1 + $0xba8] sm:$0xff]  ;;  %v441_v14 = vld [vmem:[%s23926_s1 + $0xc20] sm:$0xff] }
 0x1aa   :  { %11176 = vmatpush1.bf16.msra.mxu0 %v11175_v22  ;;  %v321_v22 = vld [vmem:[%s23926_s1 + $0x860] sm:$0xff] }
 0x1ab   :  { %11372 = vmatpush1.bf16.msra.mxu1 %v11371_v23  ;;  %11178 = vmatprep.subr.bf16.mxu0 %v11177_v26  ;;  %v334_v23 = vld [vmem:[%s23926_s1 + $0x8c8] sm:$0xff]  ;;  %v323_v26 = vld [vmem:[%s23926_s1 + $0x870] sm:$0xff] }
 0x1ac   :  { %11374 = vmatprep.subr.bf16.mxu1 %v11373_v30  ;;  %v361_v30 = vld [vmem:[%s23926_s1 + $0x9a0] sm:$0xff]  ;;  %v11195_v34 = vpack.c.bf16 %v334_v23, %v321_v22  ;;  %v11391_v35 = vpack.c.bf16 %v336_v27, %v323_v26  ;;  %v11405_v22 = vpack.c.bf16 %v441_v14, %v428_v13  ;;  %v440_v23 = vld [vmem:[%s23926_s1 + $0xc18] sm:$0xff]  ;;  %v454_v27 = vld [vmem:[%s23926_s1 + $0xc88] sm:$0xff] }
 0x1ad   :  { %v11197_v36 = vpack.c.bf16 %v361_v30, %v348_v28  ;;  %v452_v26 = vld [vmem:[%s23926_s1 + $0xc78] sm:$0xff]  ;;  %v467_v28 = vld [vmem:[%s23926_s1 + $0xcf0] sm:$0xff] }
 0x1ae   :  { %11180 = vmatpush1.bf16.msra.mxu0 %v11179_v11  ;;  %v347_v11 = vld [vmem:[%s23926_s1 + $0x930] sm:$0xff] }
 0x1af   :  { %11376 = vmatpush1.bf16.msra.mxu1 %v11375_v37  ;;  %11182 = vmatprep.subr.bf16.mxu0 %v11181_v38  ;;  %v360_v37 = vld [vmem:[%s23926_s1 + $0x998] sm:$0xff]  ;;  %v349_v38 = vld [vmem:[%s23926_s1 + $0x940] sm:$0xff] }
 0x1b0   :  { %11378 = vmatprep.subr.bf16.mxu1 %v11377_v43  ;;  %v387_v43 = vld [vmem:[%s23926_s1 + $0xa70] sm:$0xff]  ;;  %v11199_v46 = vpack.c.bf16 %v360_v37, %v347_v11  ;;  %v11395_v47 = vpack.c.bf16 %v362_v41, %v349_v38  ;;  %v11409_v11 = vpack.c.bf16 %v467_v28, %v454_v27  ;;  %v466_v37 = vld [vmem:[%s23926_s1 + $0xce8] sm:$0xff]  ;;  %v480_v41 = vld [vmem:[%s23926_s1 + $0xd58] sm:$0xff] }
 0x1b1   :  { %v11201_v48 = vpack.c.bf16 %v387_v43, %v374_v42  ;;  %v478_v38 = vld [vmem:[%s23926_s1 + $0xd48] sm:$0xff]  ;;  %v493_v42 = vld [vmem:[%s23926_s1 + $0xdc0] sm:$0xff] }
 0x1b2   :  { %11184 = vmatpush1.bf16.msra.mxu0 %v11183_v50  ;;  %v373_v50 = vld [vmem:[%s23926_s1 + $0xa00] sm:$0xff] }
 0x1b3   :  { %11380 = vmatpush1.bf16.msra.mxu1 %v11379_v51  ;;  %11186 = vmatprep.subr.bf16.mxu0 %v11185_v52  ;;  %v386_v51 = vld [vmem:[%s23926_s1 + $0xa68] sm:$0xff]  ;;  %v375_v52 = vld [vmem:[%s23926_s1 + $0xa10] sm:$0xff] }
 0x1b4   :  { %11382 = vmatprep.subr.bf16.mxu1 %v11381_v57  ;;  %v413_v57 = vld [vmem:[%s23926_s1 + $0xb40] sm:$0xff]  ;;  %v11203_v62 = vpack.c.bf16 %v386_v51, %v373_v50  ;;  %v11399_v0 = vpack.c.bf16 %v388_v54, %v375_v52  ;;  %v11413_v50 = vpack.c.bf16 %v493_v42, %v480_v41  ;;  %v492_v51 = vld [vmem:[%s23926_s1 + $0xdb8] sm:$0xff]  ;;  %v506_v54 = vld [vmem:[%s23926_s1 + $0xe28] sm:$0xff] }
 0x1b5   :  { %v11205_v1 = vpack.c.bf16 %v413_v57, %v400_v56  ;;  %v504_v52 = vld [vmem:[%s23926_s1 + $0xe18] sm:$0xff]  ;;  %v519_v56 = vld [vmem:[%s23926_s1 + $0xe90] sm:$0xff] }
 0x1b6   :  { %11188 = vmatpush1.bf16.msra.mxu0 %v11187_v2  ;;  %v399_v2 = vld [vmem:[%s23926_s1 + $0xad0] sm:$0xff] }
 0x1b7   :  { %11384 = vmatpush1.bf16.msra.mxu1 %v11383_v5  ;;  %11190 = vmatprep.subr.bf16.mxu0 %v11189_v6  ;;  %v412_v5 = vld [vmem:[%s23926_s1 + $0xb38] sm:$0xff]  ;;  %v401_v6 = vld [vmem:[%s23926_s1 + $0xae0] sm:$0xff] }
 0x1b8   :  { %11386 = vmatprep.subr.bf16.mxu1 %v11385_v12  ;;  %v439_v12 = vld [vmem:[%s23926_s1 + $0xc10] sm:$0xff]  ;;  %v11207_v15 = vpack.c.bf16 %v412_v5, %v399_v2  ;;  %v11403_v16 = vpack.c.bf16 %v414_v9, %v401_v6  ;;  %v11417_v2 = vpack.c.bf16 %v519_v56, %v506_v54  ;;  %v518_v5 = vld [vmem:[%s23926_s1 + $0xe88] sm:$0xff]  ;;  %v532_v9 = vld [vmem:[%s23926_s1 + $0xef8] sm:$0xff] }
 0x1b9   :  { %v11209_v17 = vpack.c.bf16 %v439_v12, %v426_v10  ;;  %v530_v6 = vld [vmem:[%s23926_s1 + $0xee8] sm:$0xff]  ;;  %v545_v10 = vld [vmem:[%s23926_s1 + $0xf60] sm:$0xff] }
 0x1ba   :  { %11192 = vmatpush1.bf16.msra.mxu0 %v11191_v18  ;;  %v425_v18 = vld [vmem:[%s23926_s1 + $0xba0] sm:$0xff] }
 0x1bb   :  { %11388 = vmatpush1.bf16.msra.mxu1 %v11387_v19  ;;  %11194 = vmatprep.subr.bf16.mxu0 %v11193_v20  ;;  %v438_v19 = vld [vmem:[%s23926_s1 + $0xc08] sm:$0xff]  ;;  %v427_v20 = vld [vmem:[%s23926_s1 + $0xbb0] sm:$0xff] }
 0x1bc   :  { %11390 = vmatprep.subr.bf16.mxu1 %v11389_v49  ;;  %v465_v49 = vld [vmem:[%s23926_s1 + $0xce0] sm:$0xff]  ;;  %v11211_v30 = vpack.c.bf16 %v438_v19, %v425_v18  ;;  %v11407_v31 = vpack.c.bf16 %v440_v23, %v427_v20  ;;  %v11421_v18 = vpack.c.bf16 %v545_v10, %v532_v9  ;;  %v544_v19 = vld [vmem:[%s23926_s1 + $0xf58] sm:$0xff]  ;;  %v558_v23 = vld [vmem:[%s23926_s1 + $0xfc8] sm:$0xff] }
 0x1bd   :  { %v11213_v33 = vpack.c.bf16 %v465_v49, %v452_v26  ;;  %v556_v20 = vld [vmem:[%s23926_s1 + $0xfb8] sm:$0xff]  ;;  %v571_v26 = vld [vmem:[%s23926_s1 + $0x1030] sm:$0xff] }
 0x1be   :  { %11196 = vmatpush1.bf16.msra.mxu0 %v11195_v34  ;;  %v451_v34 = vld [vmem:[%s23926_s1 + $0xc70] sm:$0xff] }
 0x1bf   :  { %11392 = vmatpush1.bf16.msra.mxu1 %v11391_v35  ;;  %11198 = vmatprep.subr.bf16.mxu0 %v11197_v36  ;;  %v464_v35 = vld [vmem:[%s23926_s1 + $0xcd8] sm:$0xff]  ;;  %v453_v36 = vld [vmem:[%s23926_s1 + $0xc80] sm:$0xff] }
 0x1c0   :  { %11394 = vmatprep.subr.bf16.mxu1 %v11393_v40  ;;  %v491_v40 = vld [vmem:[%s23926_s1 + $0xdb0] sm:$0xff]  ;;  %v11215_v43 = vpack.c.bf16 %v464_v35, %v451_v34  ;;  %v11411_v44 = vpack.c.bf16 %v466_v37, %v453_v36  ;;  %v11425_v34 = vpack.c.bf16 %v571_v26, %v558_v23  ;;  %v570_v35 = vld [vmem:[%s23926_s1 + $0x1028] sm:$0xff]  ;;  %v584_v37 = vld [vmem:[%s23926_s1 + $0x1098] sm:$0xff] }
 0x1c1   :  { %v11217_v45 = vpack.c.bf16 %v491_v40, %v478_v38  ;;  %v582_v36 = vld [vmem:[%s23926_s1 + $0x1088] sm:$0xff]  ;;  %v597_v38 = vld [vmem:[%s23926_s1 + $0x1100] sm:$0xff] }
 0x1c2   :  { %11200 = vmatpush1.bf16.msra.mxu0 %v11199_v46  ;;  %v477_v46 = vld [vmem:[%s23926_s1 + $0xd40] sm:$0xff] }
 0x1c3   :  { %11396 = vmatpush1.bf16.msra.mxu1 %v11395_v47  ;;  %11202 = vmatprep.subr.bf16.mxu0 %v11201_v48  ;;  %v490_v47 = vld [vmem:[%s23926_s1 + $0xda8] sm:$0xff]  ;;  %v479_v48 = vld [vmem:[%s23926_s1 + $0xd50] sm:$0xff] }
 0x1c4   :  { %11398 = vmatprep.subr.bf16.mxu1 %v11397_v53  ;;  %v517_v53 = vld [vmem:[%s23926_s1 + $0xe80] sm:$0xff]  ;;  %v11219_v57 = vpack.c.bf16 %v490_v47, %v477_v46  ;;  %v11415_v58 = vpack.c.bf16 %v492_v51, %v479_v48  ;;  %v11429_v46 = vpack.c.bf16 %v597_v38, %v584_v37  ;;  %v596_v47 = vld [vmem:[%s23926_s1 + $0x10f8] sm:$0xff]  ;;  %v610_v51 = vld [vmem:[%s23926_s1 + $0x1168] sm:$0xff] }
 0x1c5   :  { %v11221_v59 = vpack.c.bf16 %v517_v53, %v504_v52  ;;  %v608_v48 = vld [vmem:[%s23926_s1 + $0x1158] sm:$0xff]  ;;  %v623_v52 = vld [vmem:[%s23926_s1 + $0x11d0] sm:$0xff] }
 0x1c6   :  { %11204 = vmatpush1.bf16.msra.mxu0 %v11203_v62  ;;  %v503_v62 = vld [vmem:[%s23926_s1 + $0xe10] sm:$0xff] }
 0x1c7   :  { %11400 = vmatpush1.bf16.msra.mxu1 %v11399_v0  ;;  %11206 = vmatprep.subr.bf16.mxu0 %v11205_v1  ;;  %v516_v0 = vld [vmem:[%s23926_s1 + $0xe78] sm:$0xff]  ;;  %v505_v1 = vld [vmem:[%s23926_s1 + $0xe20] sm:$0xff] }
 0x1c8   :  { %11402 = vmatprep.subr.bf16.mxu1 %v11401_v8  ;;  %v543_v8 = vld [vmem:[%s23926_s1 + $0xf50] sm:$0xff]  ;;  %v11223_v12 = vpack.c.bf16 %v516_v0, %v503_v62  ;;  %v11419_v13 = vpack.c.bf16 %v518_v5, %v505_v1  ;;  %v11433_v62 = vpack.c.bf16 %v623_v52, %v610_v51  ;;  %v622_v0 = vld [vmem:[%s23926_s1 + $0x11c8] sm:$0xff]  ;;  %v636_v5 = vld [vmem:[%s23926_s1 + $0x1238] sm:$0xff] }
 0x1c9   :  { %v11225_v14 = vpack.c.bf16 %v543_v8, %v530_v6  ;;  %v634_v1 = vld [vmem:[%s23926_s1 + $0x1228] sm:$0xff]  ;;  %v649_v6 = vld [vmem:[%s23926_s1 + $0x12a0] sm:$0xff] }
 0x1ca   :  { %11208 = vmatpush1.bf16.msra.mxu0 %v11207_v15  ;;  %v529_v15 = vld [vmem:[%s23926_s1 + $0xee0] sm:$0xff] }
 0x1cb   :  { %11404 = vmatpush1.bf16.msra.mxu1 %v11403_v16  ;;  %11210 = vmatprep.subr.bf16.mxu0 %v11209_v17  ;;  %v542_v16 = vld [vmem:[%s23926_s1 + $0xf48] sm:$0xff]  ;;  %v531_v17 = vld [vmem:[%s23926_s1 + $0xef0] sm:$0xff] }
 0x1cc   :  { %11406 = vmatprep.subr.bf16.mxu1 %v11405_v22  ;;  %v569_v22 = vld [vmem:[%s23926_s1 + $0x1020] sm:$0xff]  ;;  %v11227_v49 = vpack.c.bf16 %v542_v16, %v529_v15  ;;  %v11423_v27 = vpack.c.bf16 %v544_v19, %v531_v17  ;;  %v11437_v15 = vpack.c.bf16 %v649_v6, %v636_v5  ;;  %v648_v16 = vld [vmem:[%s23926_s1 + $0x1298] sm:$0xff]  ;;  %v662_v19 = vld [vmem:[%s23926_s1 + $0x1308] sm:$0xff] }
 0x1cd   :  { %v11229_v28 = vpack.c.bf16 %v569_v22, %v556_v20  ;;  %v660_v17 = vld [vmem:[%s23926_s1 + $0x12f8] sm:$0xff]  ;;  %v675_v20 = vld [vmem:[%s23926_s1 + $0x1370] sm:$0xff] }
 0x1ce   :  { %11212 = vmatpush1.bf16.msra.mxu0 %v11211_v30  ;;  %v555_v30 = vld [vmem:[%s23926_s1 + $0xfb0] sm:$0xff] }
 0x1cf   :  { %11408 = vmatpush1.bf16.msra.mxu1 %v11407_v31  ;;  %11214 = vmatprep.subr.bf16.mxu0 %v11213_v33  ;;  %v568_v31 = vld [vmem:[%s23926_s1 + $0x1018] sm:$0xff]  ;;  %v557_v33 = vld [vmem:[%s23926_s1 + $0xfc0] sm:$0xff] }
 0x1d0   :  { %11410 = vmatprep.subr.bf16.mxu1 %v11409_v11  ;;  %v595_v11 = vld [vmem:[%s23926_s1 + $0x10f0] sm:$0xff]  ;;  %v11231_v40 = vpack.c.bf16 %v568_v31, %v555_v30  ;;  %v11427_v41 = vpack.c.bf16 %v570_v35, %v557_v33  ;;  %v11441_v30 = vpack.c.bf16 %v675_v20, %v662_v19  ;;  %v674_v31 = vld [vmem:[%s23926_s1 + $0x1368] sm:$0xff]  ;;  %v688_v35 = vld [vmem:[%s23926_s1 + $0x13d8] sm:$0xff] }
 0x1d1   :  { %v11233_v42 = vpack.c.bf16 %v595_v11, %v582_v36  ;;  %v686_v33 = vld [vmem:[%s23926_s1 + $0x13c8] sm:$0xff]  ;;  %v701_v36 = vld [vmem:[%s23926_s1 + $0x1440] sm:$0xff] }
 0x1d2   :  { %11216 = vmatpush1.bf16.msra.mxu0 %v11215_v43  ;;  %v581_v43 = vld [vmem:[%s23926_s1 + $0x1080] sm:$0xff] }
 0x1d3   :  { %11412 = vmatpush1.bf16.msra.mxu1 %v11411_v44  ;;  %11218 = vmatprep.subr.bf16.mxu0 %v11217_v45  ;;  %v594_v44 = vld [vmem:[%s23926_s1 + $0x10e8] sm:$0xff]  ;;  %v583_v45 = vld [vmem:[%s23926_s1 + $0x1090] sm:$0xff] }
 0x1d4   :  { %11414 = vmatprep.subr.bf16.mxu1 %v11413_v50  ;;  %v621_v50 = vld [vmem:[%s23926_s1 + $0x11c0] sm:$0xff]  ;;  %v11235_v53 = vpack.c.bf16 %v594_v44, %v581_v43  ;;  %v11431_v54 = vpack.c.bf16 %v596_v47, %v583_v45  ;;  %v11445_v43 = vpack.c.bf16 %v701_v36, %v688_v35  ;;  %v700_v44 = vld [vmem:[%s23926_s1 + $0x1438] sm:$0xff]  ;;  %v714_v47 = vld [vmem:[%s23926_s1 + $0x14a8] sm:$0xff] }
 0x1d5   :  { %2641 = vmatmul.mubr.f32.vlgmr.msra.gmra.mrb[4].mxu0 %v14133_v25  ;;  %v11237_v56 = vpack.c.bf16 %v621_v50, %v608_v48  ;;  %v712_v45 = vld [vmem:[%s23926_s1 + $0x1498] sm:$0xff]  ;;  %v727_v48 = vld [vmem:[%s23926_s1 + $0x1510] sm:$0xff] }
 0x1d6   :  { %11220 = vmatpush1.bf16.msra.mxu0 %v11219_v57  ;;  %2925 = vmatmul.mubr.f32.vlgmr.msra.gmra.mrb[4].mxu1 %v14133_v25  ;;  %v607_v57 = vld [vmem:[%s23926_s1 + $0x1150] sm:$0xff] }
 0x1d7   :  { %11416 = vmatpush1.bf16.msra.mxu1 %v11415_v58  ;;  %11222 = vmatprep.subr.bf16.mxu0 %v11221_v59  ;;  %v620_v58 = vld [vmem:[%s23926_s1 + $0x11b8] sm:$0xff]  ;;  %v609_v59 = vld [vmem:[%s23926_s1 + $0x1160] sm:$0xff] }
 0x1d8   :  { %11418 = vmatprep.subr.bf16.mxu1 %v11417_v2  ;;  %2711 = vmatprep.mubr.f32.mxu0 %v14286_v39  ;;  %v647_v2 = vld [vmem:[%s23926_s1 + $0x1290] sm:$0xff]  ;;  %v11239_v8 = vpack.c.bf16 %v620_v58, %v607_v57  ;;  %v11435_v9 = vpack.c.bf16 %v622_v0, %v609_v59  ;;  %v11449_v57 = vpack.c.bf16 %v727_v48, %v714_v47  ;;  %v726_v58 = vld [vmem:[%s23926_s1 + $0x1508] sm:$0xff]  ;;  %v740_v0 = vld [vmem:[%s23926_s1 + $0x1578] sm:$0xff] }
 0x1d9   :  { %2995 = vmatprep.mubr.f32.mxu1 %v14286_v39  ;;  %v11241_v10 = vpack.c.bf16 %v647_v2, %v634_v1  ;;  %v738_v59 = vld [vmem:[%s23926_s1 + $0x1568] sm:$0xff]  ;;  %v753_v1 = vld [vmem:[%s23926_s1 + $0x15e0] sm:$0xff] }
 0x1da   :  { %11224 = vmatpush1.bf16.msra.mxu0 %v11223_v12  ;;  %v633_v12 = vld [vmem:[%s23926_s1 + $0x1220] sm:$0xff] }
 0x1db   :  { %11420 = vmatpush1.bf16.msra.mxu1 %v11419_v13  ;;  %11226 = vmatprep.subr.bf16.mxu0 %v11225_v14  ;;  %v646_v13 = vld [vmem:[%s23926_s1 + $0x1288] sm:$0xff]  ;;  %v635_v14 = vld [vmem:[%s23926_s1 + $0x1230] sm:$0xff] }
 0x1dc   :  { %11422 = vmatprep.subr.bf16.mxu1 %v11421_v18  ;;  %v673_v18 = vld [vmem:[%s23926_s1 + $0x1360] sm:$0xff]  ;;  %v11243_v22 = vpack.c.bf16 %v646_v13, %v633_v12  ;;  %v11439_v23 = vpack.c.bf16 %v648_v16, %v635_v14  ;;  %v11453_v12 = vpack.c.bf16 %v753_v1, %v740_v0  ;;  %v752_v13 = vld [vmem:[%s23926_s1 + $0x15d8] sm:$0xff]  ;;  %v766_v16 = vld [vmem:[%s23926_s1 + $0x1648] sm:$0xff] }
 0x1dd   :  { %v11245_v26 = vpack.c.bf16 %v673_v18, %v660_v17  ;;  %v764_v14 = vld [vmem:[%s23926_s1 + $0x1638] sm:$0xff]  ;;  %v779_v17 = vld [vmem:[%s23926_s1 + $0x16b0] sm:$0xff] }
 0x1de   :  { %11228 = vmatpush1.bf16.msra.mxu0 %v11227_v49  ;;  %v659_v49 = vld [vmem:[%s23926_s1 + $0x12f0] sm:$0xff] }
 0x1df   :  { %11424 = vmatpush1.bf16.msra.mxu1 %v11423_v27  ;;  %11230 = vmatprep.subr.bf16.mxu0 %v11229_v28  ;;  %v672_v27 = vld [vmem:[%s23926_s1 + $0x1358] sm:$0xff]  ;;  %v661_v28 = vld [vmem:[%s23926_s1 + $0x1300] sm:$0xff] }
 0x1e0   :  { %11426 = vmatprep.subr.bf16.mxu1 %v11425_v34  ;;  %v699_v34 = vld [vmem:[%s23926_s1 + $0x1430] sm:$0xff]  ;;  %v11247_v11 = vpack.c.bf16 %v672_v27, %v659_v49  ;;  %v11443_v37 = vpack.c.bf16 %v674_v31, %v661_v28  ;;  %v11457_v49 = vpack.c.bf16 %v779_v17, %v766_v16  ;;  %v778_v27 = vld [vmem:[%s23926_s1 + $0x16a8] sm:$0xff]  ;;  %v792_v31 = vld [vmem:[%s23926_s1 + $0x1718] sm:$0xff] }
 0x1e1   :  { %v11249_v38 = vpack.c.bf16 %v699_v34, %v686_v33  ;;  %v790_v28 = vld [vmem:[%s23926_s1 + $0x1708] sm:$0xff]  ;;  %v805_v33 = vld [vmem:[%s23926_s1 + $0x1780] sm:$0xff] }
 0x1e2   :  { %11232 = vmatpush1.bf16.msra.mxu0 %v11231_v40  ;;  %v685_v40 = vld [vmem:[%s23926_s1 + $0x13c0] sm:$0xff] }
 0x1e3   :  { %11428 = vmatpush1.bf16.msra.mxu1 %v11427_v41  ;;  %11234 = vmatprep.subr.bf16.mxu0 %v11233_v42  ;;  %v698_v41 = vld [vmem:[%s23926_s1 + $0x1428] sm:$0xff]  ;;  %v687_v42 = vld [vmem:[%s23926_s1 + $0x13d0] sm:$0xff] }
 0x1e4   :  { %11430 = vmatprep.subr.bf16.mxu1 %v11429_v46  ;;  %v725_v46 = vld [vmem:[%s23926_s1 + $0x1500] sm:$0xff]  ;;  %v11251_v50 = vpack.c.bf16 %v698_v41, %v685_v40  ;;  %v11447_v51 = vpack.c.bf16 %v700_v44, %v687_v42  ;;  %v11461_v40 = vpack.c.bf16 %v805_v33, %v792_v31  ;;  %v804_v41 = vld [vmem:[%s23926_s1 + $0x1778] sm:$0xff]  ;;  %v818_v44 = vld [vmem:[%s23926_s1 + $0x17e8] sm:$0xff] }
 0x1e5   :  { %v11253_v52 = vpack.c.bf16 %v725_v46, %v712_v45  ;;  %v816_v42 = vld [vmem:[%s23926_s1 + $0x17d8] sm:$0xff]  ;;  %v831_v45 = vld [vmem:[%s23926_s1 + $0x1850] sm:$0xff] }
 0x1e6   :  { %11236 = vmatpush1.bf16.msra.mxu0 %v11235_v53  ;;  %v711_v53 = vld [vmem:[%s23926_s1 + $0x1490] sm:$0xff] }
 0x1e7   :  { %11432 = vmatpush1.bf16.msra.mxu1 %v11431_v54  ;;  %11238 = vmatprep.subr.bf16.mxu0 %v11237_v56  ;;  %v724_v54 = vld [vmem:[%s23926_s1 + $0x14f8] sm:$0xff]  ;;  %v713_v56 = vld [vmem:[%s23926_s1 + $0x14a0] sm:$0xff] }
 0x1e8   :  { %11434 = vmatprep.subr.bf16.mxu1 %v11433_v62  ;;  %v751_v62 = vld [vmem:[%s23926_s1 + $0x15d0] sm:$0xff]  ;;  %v11255_v2 = vpack.c.bf16 %v724_v54, %v711_v53  ;;  %v11451_v5 = vpack.c.bf16 %v726_v58, %v713_v56  ;;  %v11465_v53 = vpack.c.bf16 %v831_v45, %v818_v44  ;;  %v830_v54 = vld [vmem:[%s23926_s1 + $0x1848] sm:$0xff]  ;;  %v844_v58 = vld [vmem:[%s23926_s1 + $0x18b8] sm:$0xff] }
 0x1e9   :  { %v11257_v6 = vpack.c.bf16 %v751_v62, %v738_v59  ;;  %v842_v56 = vld [vmem:[%s23926_s1 + $0x18a8] sm:$0xff]  ;;  %v857_v59 = vld [vmem:[%s23926_s1 + $0x1920] sm:$0xff] }
 0x1ea   :  { %11240 = vmatpush1.bf16.msra.mxu0 %v11239_v8  ;;  %v737_v8 = vld [vmem:[%s23926_s1 + $0x1560] sm:$0xff] }
 0x1eb   :  { %11436 = vmatpush1.bf16.msra.mxu1 %v11435_v9  ;;  %11242 = vmatprep.subr.bf16.mxu0 %v11241_v10  ;;  %v750_v9 = vld [vmem:[%s23926_s1 + $0x15c8] sm:$0xff]  ;;  %v739_v10 = vld [vmem:[%s23926_s1 + $0x1570] sm:$0xff] }
 0x1ec   :  { %11438 = vmatprep.subr.bf16.mxu1 %v11437_v15  ;;  %v777_v15 = vld [vmem:[%s23926_s1 + $0x16a0] sm:$0xff]  ;;  %v11259_v18 = vpack.c.bf16 %v750_v9, %v737_v8  ;;  %v11455_v19 = vpack.c.bf16 %v752_v13, %v739_v10  ;;  %v11469_v8 = vpack.c.bf16 %v857_v59, %v844_v58  ;;  %v856_v9 = vld [vmem:[%s23926_s1 + $0x1918] sm:$0xff]  ;;  %v870_v13 = vld [vmem:[%s23926_s1 + $0x1988] sm:$0xff] }
 0x1ed   :  { %v11261_v20 = vpack.c.bf16 %v777_v15, %v764_v14  ;;  %v868_v10 = vld [vmem:[%s23926_s1 + $0x1978] sm:$0xff]  ;;  %v883_v14 = vld [vmem:[%s23926_s1 + $0x19f0] sm:$0xff] }
 0x1ee   :  { %11244 = vmatpush1.bf16.msra.mxu0 %v11243_v22  ;;  %v763_v22 = vld [vmem:[%s23926_s1 + $0x1630] sm:$0xff] }
 0x1ef   :  { %11440 = vmatpush1.bf16.msra.mxu1 %v11439_v23  ;;  %11246 = vmatprep.subr.bf16.mxu0 %v11245_v26  ;;  %v776_v23 = vld [vmem:[%s23926_s1 + $0x1698] sm:$0xff]  ;;  %v765_v26 = vld [vmem:[%s23926_s1 + $0x1640] sm:$0xff] }
 0x1f0   :  { %11442 = vmatprep.subr.bf16.mxu1 %v11441_v30  ;;  %v803_v30 = vld [vmem:[%s23926_s1 + $0x1770] sm:$0xff]  ;;  %v11263_v34 = vpack.c.bf16 %v776_v23, %v763_v22  ;;  %v11459_v35 = vpack.c.bf16 %v778_v27, %v765_v26  ;;  %v11473_v22 = vpack.c.bf16 %v883_v14, %v870_v13  ;;  %v882_v23 = vld [vmem:[%s23926_s1 + $0x19e8] sm:$0xff]  ;;  %v896_v27 = vld [vmem:[%s23926_s1 + $0x1a58] sm:$0xff] }
 0x1f1   :  { %v11265_v36 = vpack.c.bf16 %v803_v30, %v790_v28  ;;  %v894_v26 = vld [vmem:[%s23926_s1 + $0x1a48] sm:$0xff]  ;;  %v909_v28 = vld [vmem:[%s23926_s1 + $0x1ac0] sm:$0xff] }
 0x1f2   :  { %11248 = vmatpush1.bf16.msra.mxu0 %v11247_v11  ;;  %v789_v11 = vld [vmem:[%s23926_s1 + $0x1700] sm:$0xff] }
 0x1f3   :  { %11444 = vmatpush1.bf16.msra.mxu1 %v11443_v37  ;;  %11250 = vmatprep.subr.bf16.mxu0 %v11249_v38  ;;  %v802_v37 = vld [vmem:[%s23926_s1 + $0x1768] sm:$0xff]  ;;  %v791_v38 = vld [vmem:[%s23926_s1 + $0x1710] sm:$0xff] }
 0x1f4   :  { %11446 = vmatprep.subr.bf16.mxu1 %v11445_v43  ;;  %v829_v43 = vld [vmem:[%s23926_s1 + $0x1840] sm:$0xff]  ;;  %v11267_v46 = vpack.c.bf16 %v802_v37, %v789_v11  ;;  %v11463_v47 = vpack.c.bf16 %v804_v41, %v791_v38  ;;  %v11477_v11 = vpack.c.bf16 %v909_v28, %v896_v27  ;;  %v908_v37 = vld [vmem:[%s23926_s1 + $0x1ab8] sm:$0xff]  ;;  %v922_v41 = vld [vmem:[%s23926_s1 + $0x1b28] sm:$0xff] }
 0x1f5   :  { %v11269_v48 = vpack.c.bf16 %v829_v43, %v816_v42  ;;  %v920_v38 = vld [vmem:[%s23926_s1 + $0x1b18] sm:$0xff]  ;;  %v935_v42 = vld [vmem:[%s23926_s1 + $0x1b90] sm:$0xff] }
 0x1f6   :  { %11252 = vmatpush1.bf16.msra.mxu0 %v11251_v50  ;;  %v815_v50 = vld [vmem:[%s23926_s1 + $0x17d0] sm:$0xff] }
 0x1f7   :  { %11448 = vmatpush1.bf16.msra.mxu1 %v11447_v51  ;;  %11254 = vmatprep.subr.bf16.mxu0 %v11253_v52  ;;  %v828_v51 = vld [vmem:[%s23926_s1 + $0x1838] sm:$0xff]  ;;  %v817_v52 = vld [vmem:[%s23926_s1 + $0x17e0] sm:$0xff] }
 0x1f8   :  { %11450 = vmatprep.subr.bf16.mxu1 %v11449_v57  ;;  %v855_v57 = vld [vmem:[%s23926_s1 + $0x1910] sm:$0xff]  ;;  %v11271_v62 = vpack.c.bf16 %v828_v51, %v815_v50  ;;  %v11467_v0 = vpack.c.bf16 %v830_v54, %v817_v52  ;;  %v11481_v50 = vpack.c.bf16 %v935_v42, %v922_v41  ;;  %v934_v51 = vld [vmem:[%s23926_s1 + $0x1b88] sm:$0xff]  ;;  %v948_v54 = vld [vmem:[%s23926_s1 + $0x1bf8] sm:$0xff] }
 0x1f9   :  { %v11273_v1 = vpack.c.bf16 %v855_v57, %v842_v56  ;;  %v946_v52 = vld [vmem:[%s23926_s1 + $0x1be8] sm:$0xff]  ;;  %v961_v56 = vld [vmem:[%s23926_s1 + $0x1c60] sm:$0xff] }
 0x1fa   :  { %11256 = vmatpush1.bf16.msra.mxu0 %v11255_v2  ;;  %v841_v2 = vld [vmem:[%s23926_s1 + $0x18a0] sm:$0xff] }
 0x1fb   :  { %11452 = vmatpush1.bf16.msra.mxu1 %v11451_v5  ;;  %11258 = vmatprep.subr.bf16.mxu0 %v11257_v6  ;;  %v854_v5 = vld [vmem:[%s23926_s1 + $0x1908] sm:$0xff]  ;;  %v843_v6 = vld [vmem:[%s23926_s1 + $0x18b0] sm:$0xff] }
 0x1fc   :  { %11454 = vmatprep.subr.bf16.mxu1 %v11453_v12  ;;  %v881_v12 = vld [vmem:[%s23926_s1 + $0x19e0] sm:$0xff]  ;;  %v11275_v15 = vpack.c.bf16 %v854_v5, %v841_v2  ;;  %v11471_v16 = vpack.c.bf16 %v856_v9, %v843_v6  ;;  %v11485_v2 = vpack.c.bf16 %v961_v56, %v948_v54  ;;  %v960_v5 = vld [vmem:[%s23926_s1 + $0x1c58] sm:$0xff]  ;;  %v974_v9 = vld [vmem:[%s23926_s1 + $0x1cc8] sm:$0xff] }
 0x1fd   :  { %v11277_v17 = vpack.c.bf16 %v881_v12, %v868_v10  ;;  %v972_v6 = vld [vmem:[%s23926_s1 + $0x1cb8] sm:$0xff]  ;;  %v987_v10 = vld [vmem:[%s23926_s1 + $0x1d30] sm:$0xff] }
 0x1fe   :  { %11260 = vmatpush1.bf16.msra.mxu0 %v11259_v18  ;;  %v867_v18 = vld [vmem:[%s23926_s1 + $0x1970] sm:$0xff] }
 0x1ff   :  { %11456 = vmatpush1.bf16.msra.mxu1 %v11455_v19  ;;  %11262 = vmatprep.subr.bf16.mxu0 %v11261_v20  ;;  %v880_v19 = vld [vmem:[%s23926_s1 + $0x19d8] sm:$0xff]  ;;  %v869_v20 = vld [vmem:[%s23926_s1 + $0x1980] sm:$0xff] }
 0x200   :  { %11458 = vmatprep.subr.bf16.mxu1 %v11457_v49  ;;  %v907_v49 = vld [vmem:[%s23926_s1 + $0x1ab0] sm:$0xff]  ;;  %v11279_v30 = vpack.c.bf16 %v880_v19, %v867_v18  ;;  %v11475_v31 = vpack.c.bf16 %v882_v23, %v869_v20  ;;  %v11489_v18 = vpack.c.bf16 %v987_v10, %v974_v9  ;;  %v986_v19 = vld [vmem:[%s23926_s1 + $0x1d28] sm:$0xff]  ;;  %v1000_v23 = vld [vmem:[%s23926_s1 + $0x1d98] sm:$0xff] }
 0x201   :  { %v11281_v33 = vpack.c.bf16 %v907_v49, %v894_v26  ;;  %v998_v20 = vld [vmem:[%s23926_s1 + $0x1d88] sm:$0xff]  ;;  %v1013_v26 = vld [vmem:[%s23926_s1 + $0x1e00] sm:$0xff] }
 0x202   :  { %11264 = vmatpush1.bf16.msra.mxu0 %v11263_v34  ;;  %v893_v34 = vld [vmem:[%s23926_s1 + $0x1a40] sm:$0xff] }
 0x203   :  { %11460 = vmatpush1.bf16.msra.mxu1 %v11459_v35  ;;  %11266 = vmatprep.subr.bf16.mxu0 %v11265_v36  ;;  %v906_v35 = vld [vmem:[%s23926_s1 + $0x1aa8] sm:$0xff]  ;;  %v895_v36 = vld [vmem:[%s23926_s1 + $0x1a50] sm:$0xff] }
 0x204   :  { %11462 = vmatprep.subr.bf16.mxu1 %v11461_v40  ;;  %v933_v40 = vld [vmem:[%s23926_s1 + $0x1b80] sm:$0xff]  ;;  %v11283_v43 = vpack.c.bf16 %v906_v35, %v893_v34  ;;  %v11479_v44 = vpack.c.bf16 %v908_v37, %v895_v36  ;;  %v11493_v34 = vpack.c.bf16 %v1013_v26, %v1000_v23  ;;  %v1012_v35 = vld [vmem:[%s23926_s1 + $0x1df8] sm:$0xff]  ;;  %v1026_v37 = vld [vmem:[%s23926_s1 + $0x1e68] sm:$0xff] }
 0x205   :  { %v11285_v45 = vpack.c.bf16 %v933_v40, %v920_v38  ;;  %v1024_v36 = vld [vmem:[%s23926_s1 + $0x1e58] sm:$0xff]  ;;  %v1039_v38 = vld [vmem:[%s23926_s1 + $0x1ed0] sm:$0xff] }
 0x206   :  { %11268 = vmatpush1.bf16.msra.mxu0 %v11267_v46  ;;  %v919_v46 = vld [vmem:[%s23926_s1 + $0x1b10] sm:$0xff] }
 0x207   :  { %11464 = vmatpush1.bf16.msra.mxu1 %v11463_v47  ;;  %11270 = vmatprep.subr.bf16.mxu0 %v11269_v48  ;;  %v932_v47 = vld [vmem:[%s23926_s1 + $0x1b78] sm:$0xff]  ;;  %v921_v48 = vld [vmem:[%s23926_s1 + $0x1b20] sm:$0xff] }
 0x208   :  { %11466 = vmatprep.subr.bf16.mxu1 %v11465_v53  ;;  %v959_v53 = vld [vmem:[%s23926_s1 + $0x1c50] sm:$0xff]  ;;  %v11287_v57 = vpack.c.bf16 %v932_v47, %v919_v46  ;;  %v11483_v58 = vpack.c.bf16 %v934_v51, %v921_v48  ;;  %v11497_v46 = vpack.c.bf16 %v1039_v38, %v1026_v37  ;;  %v1038_v47 = vld [vmem:[%s23926_s1 + $0x1ec8] sm:$0xff]  ;;  %v1052_v51 = vld [vmem:[%s23926_s1 + $0x1f38] sm:$0xff] }
 0x209   :  { %v11289_v59 = vpack.c.bf16 %v959_v53, %v946_v52  ;;  %v1050_v48 = vld [vmem:[%s23926_s1 + $0x1f28] sm:$0xff]  ;;  %v1065_v52 = vld [vmem:[%s23926_s1 + $0x1fa0] sm:$0xff] }
 0x20a   :  { %11272 = vmatpush1.bf16.msra.mxu0 %v11271_v62  ;;  %v945_v62 = vld [vmem:[%s23926_s1 + $0x1be0] sm:$0xff] }
 0x20b   :  { %11468 = vmatpush1.bf16.msra.mxu1 %v11467_v0  ;;  %11274 = vmatprep.subr.bf16.mxu0 %v11273_v1  ;;  %v958_v0 = vld [vmem:[%s23926_s1 + $0x1c48] sm:$0xff]  ;;  %v947_v1 = vld [vmem:[%s23926_s1 + $0x1bf0] sm:$0xff] }
 0x20c   :  { %11470 = vmatprep.subr.bf16.mxu1 %v11469_v8  ;;  %v985_v8 = vld [vmem:[%s23926_s1 + $0x1d20] sm:$0xff]  ;;  %v11291_v12 = vpack.c.bf16 %v958_v0, %v945_v62  ;;  %v11487_v13 = vpack.c.bf16 %v960_v5, %v947_v1  ;;  %v11501_v62 = vpack.c.bf16 %v1065_v52, %v1052_v51  ;;  %v1064_v0 = vld [vmem:[%s23926_s1 + $0x1f98] sm:$0xff]  ;;  %v1078_v5 = vld [vmem:[%s23926_s1 + $0x2008] sm:$0xff] }
 0x20d   :  { %v11293_v14 = vpack.c.bf16 %v985_v8, %v972_v6  ;;  %v1076_v1 = vld [vmem:[%s23926_s1 + $0x1ff8] sm:$0xff]  ;;  %v1091_v6 = vld [vmem:[%s23926_s1 + $0x2070] sm:$0xff] }
 0x20e   :  { %11276 = vmatpush1.bf16.msra.mxu0 %v11275_v15  ;;  %v971_v15 = vld [vmem:[%s23926_s1 + $0x1cb0] sm:$0xff] }
 0x20f   :  { %11472 = vmatpush1.bf16.msra.mxu1 %v11471_v16  ;;  %11278 = vmatprep.subr.bf16.mxu0 %v11277_v17  ;;  %v984_v16 = vld [vmem:[%s23926_s1 + $0x1d18] sm:$0xff]  ;;  %v973_v17 = vld [vmem:[%s23926_s1 + $0x1cc0] sm:$0xff] }
 0x210   :  { %11474 = vmatprep.subr.bf16.mxu1 %v11473_v22  ;;  %v1011_v22 = vld [vmem:[%s23926_s1 + $0x1df0] sm:$0xff]  ;;  %v11295_v49 = vpack.c.bf16 %v984_v16, %v971_v15  ;;  %v11491_v27 = vpack.c.bf16 %v986_v19, %v973_v17  ;;  %v11505_v15 = vpack.c.bf16 %v1091_v6, %v1078_v5  ;;  %v1090_v16 = vld [vmem:[%s23926_s1 + $0x2068] sm:$0xff]  ;;  %v1104_v19 = vld [vmem:[%s23926_s1 + $0x20d8] sm:$0xff] }
 0x211   :  { %v11297_v28 = vpack.c.bf16 %v1011_v22, %v998_v20  ;;  %v1102_v17 = vld [vmem:[%s23926_s1 + $0x20c8] sm:$0xff]  ;;  %v1117_v20 = vld [vmem:[%s23926_s1 + $0x2140] sm:$0xff] }
 0x212   :  { %11280 = vmatpush1.bf16.msra.mxu0 %v11279_v30  ;;  %v997_v30 = vld [vmem:[%s23926_s1 + $0x1d80] sm:$0xff] }
 0x213   :  { %11476 = vmatpush1.bf16.msra.mxu1 %v11475_v31  ;;  %11282 = vmatprep.subr.bf16.mxu0 %v11281_v33  ;;  %v1010_v31 = vld [vmem:[%s23926_s1 + $0x1de8] sm:$0xff]  ;;  %v999_v33 = vld [vmem:[%s23926_s1 + $0x1d90] sm:$0xff] }
 0x214   :  { %11478 = vmatprep.subr.bf16.mxu1 %v11477_v11  ;;  %v1037_v11 = vld [vmem:[%s23926_s1 + $0x1ec0] sm:$0xff]  ;;  %v11299_v40 = vpack.c.bf16 %v1010_v31, %v997_v30  ;;  %v11495_v41 = vpack.c.bf16 %v1012_v35, %v999_v33  ;;  %v11509_v30 = vpack.c.bf16 %v1117_v20, %v1104_v19  ;;  %v1116_v31 = vld [vmem:[%s23926_s1 + $0x2138] sm:$0xff]  ;;  %v1130_v35 = vld [vmem:[%s23926_s1 + $0x21a8] sm:$0xff] }
 0x215   :  { %2712 = vmatmul.mubr.f32.vlgmr.msra.gmra.mrb[4].mxu0 %v14258_v24  ;;  %v11301_v42 = vpack.c.bf16 %v1037_v11, %v1024_v36  ;;  %v1128_v33 = vld [vmem:[%s23926_s1 + $0x2198] sm:$0xff]  ;;  %v1143_v36 = vld [vmem:[%s23926_s1 + $0x2210] sm:$0xff] }
 0x216   :  { %11284 = vmatpush1.bf16.msra.mxu0 %v11283_v43  ;;  %2996 = vmatmul.mubr.f32.vlgmr.msra.gmra.mrb[4].mxu1 %v14258_v24  ;;  %v1023_v43 = vld [vmem:[%s23926_s1 + $0x1e50] sm:$0xff] }
 0x217   :  { %11480 = vmatpush1.bf16.msra.mxu1 %v11479_v44  ;;  %11286 = vmatprep.subr.bf16.mxu0 %v11285_v45  ;;  %v1036_v44 = vld [vmem:[%s23926_s1 + $0x1eb8] sm:$0xff]  ;;  %v1025_v45 = vld [vmem:[%s23926_s1 + $0x1e60] sm:$0xff] }
 0x218   :  { %11482 = vmatprep.subr.bf16.mxu1 %v11481_v50  ;;  %2782 = vmatprep.mubr.f32.mxu0 %v14694_v63  ;;  %v1063_v50 = vld [vmem:[%s23926_s1 + $0x1f90] sm:$0xff]  ;;  %v11303_v53 = vpack.c.bf16 %v1036_v44, %v1023_v43  ;;  %v11499_v54 = vpack.c.bf16 %v1038_v47, %v1025_v45  ;;  %v11513_v43 = vpack.c.bf16 %v1143_v36, %v1130_v35  ;;  %v1142_v44 = vld [vmem:[%s23926_s1 + $0x2208] sm:$0xff]  ;;  %v1156_v47 = vld [vmem:[%s23926_s1 + $0x2278] sm:$0xff] }
 0x219   :  { %3066 = vmatprep.mubr.f32.mxu1 %v14694_v63  ;;  %v11305_v56 = vpack.c.bf16 %v1063_v50, %v1050_v48  ;;  %v1154_v45 = vld [vmem:[%s23926_s1 + $0x2268] sm:$0xff]  ;;  %v1169_v48 = vld [vmem:[%s23926_s1 + $0x22e0] sm:$0xff] }
 0x21a   :  { %11288 = vmatpush1.bf16.msra.mxu0 %v11287_v57  ;;  %v1049_v57 = vld [vmem:[%s23926_s1 + $0x1f20] sm:$0xff] }
 0x21b   :  { %11484 = vmatpush1.bf16.msra.mxu1 %v11483_v58  ;;  %11290 = vmatprep.subr.bf16.mxu0 %v11289_v59  ;;  %v1062_v58 = vld [vmem:[%s23926_s1 + $0x1f88] sm:$0xff]  ;;  %v1051_v59 = vld [vmem:[%s23926_s1 + $0x1f30] sm:$0xff] }
 0x21c   :  { %11486 = vmatprep.subr.bf16.mxu1 %v11485_v2  ;;  %v1089_v2 = vld [vmem:[%s23926_s1 + $0x2060] sm:$0xff]  ;;  %v11307_v8 = vpack.c.bf16 %v1062_v58, %v1049_v57  ;;  %v11503_v9 = vpack.c.bf16 %v1064_v0, %v1051_v59  ;;  %v11517_v57 = vpack.c.bf16 %v1169_v48, %v1156_v47  ;;  %v1168_v58 = vld [vmem:[%s23926_s1 + $0x22d8] sm:$0xff]  ;;  %v1182_v0 = vld [vmem:[%s23926_s1 + $0x2348] sm:$0xff] }
 0x21d   :  { %v11309_v10 = vpack.c.bf16 %v1089_v2, %v1076_v1  ;;  %v1180_v59 = vld [vmem:[%s23926_s1 + $0x2338] sm:$0xff]  ;;  %v1195_v1 = vld [vmem:[%s23926_s1 + $0x23b0] sm:$0xff] }
 0x21e   :  { %11292 = vmatpush1.bf16.msra.mxu0 %v11291_v12  ;;  %v1075_v12 = vld [vmem:[%s23926_s1 + $0x1ff0] sm:$0xff] }
 0x21f   :  { %11488 = vmatpush1.bf16.msra.mxu1 %v11487_v13  ;;  %11294 = vmatprep.subr.bf16.mxu0 %v11293_v14  ;;  %v1088_v13 = vld [vmem:[%s23926_s1 + $0x2058] sm:$0xff]  ;;  %v1077_v14 = vld [vmem:[%s23926_s1 + $0x2000] sm:$0xff] }
 0x220   :  { %11490 = vmatprep.subr.bf16.mxu1 %v11489_v18  ;;  %v1115_v18 = vld [vmem:[%s23926_s1 + $0x2130] sm:$0xff]  ;;  %v11311_v22 = vpack.c.bf16 %v1088_v13, %v1075_v12  ;;  %v11507_v23 = vpack.c.bf16 %v1090_v16, %v1077_v14  ;;  %v11521_v12 = vpack.c.bf16 %v1195_v1, %v1182_v0  ;;  %v1194_v13 = vld [vmem:[%s23926_s1 + $0x23a8] sm:$0xff]  ;;  %v1208_v16 = vld [vmem:[%s23926_s1 + $0x2418] sm:$0xff] }
 0x221   :  { %v11313_v26 = vpack.c.bf16 %v1115_v18, %v1102_v17  ;;  %v1206_v14 = vld [vmem:[%s23926_s1 + $0x2408] sm:$0xff]  ;;  %v1221_v17 = vld [vmem:[%s23926_s1 + $0x2480] sm:$0xff] }
 0x222   :  { %11296 = vmatpush1.bf16.msra.mxu0 %v11295_v49  ;;  %v1101_v49 = vld [vmem:[%s23926_s1 + $0x20c0] sm:$0xff] }
 0x223   :  { %11492 = vmatpush1.bf16.msra.mxu1 %v11491_v27  ;;  %11298 = vmatprep.subr.bf16.mxu0 %v11297_v28  ;;  %v1114_v27 = vld [vmem:[%s23926_s1 + $0x2128] sm:$0xff]  ;;  %v1103_v28 = vld [vmem:[%s23926_s1 + $0x20d0] sm:$0xff] }
 0x224   :  { %11494 = vmatprep.subr.bf16.mxu1 %v11493_v34  ;;  %v1141_v34 = vld [vmem:[%s23926_s1 + $0x2200] sm:$0xff]  ;;  %v11315_v11 = vpack.c.bf16 %v1114_v27, %v1101_v49  ;;  %v11511_v37 = vpack.c.bf16 %v1116_v31, %v1103_v28  ;;  %v11525_v49 = vpack.c.bf16 %v1221_v17, %v1208_v16  ;;  %v1220_v27 = vld [vmem:[%s23926_s1 + $0x2478] sm:$0xff]  ;;  %v1234_v31 = vld [vmem:[%s23926_s1 + $0x24e8] sm:$0xff] }
 0x225   :  { %v11317_v38 = vpack.c.bf16 %v1141_v34, %v1128_v33  ;;  %v1232_v28 = vld [vmem:[%s23926_s1 + $0x24d8] sm:$0xff]  ;;  %v1247_v33 = vld [vmem:[%s23926_s1 + $0x2550] sm:$0xff] }
 0x226   :  { %11300 = vmatpush1.bf16.msra.mxu0 %v11299_v40  ;;  %v1127_v40 = vld [vmem:[%s23926_s1 + $0x2190] sm:$0xff] }
 0x227   :  { %11496 = vmatpush1.bf16.msra.mxu1 %v11495_v41  ;;  %11302 = vmatprep.subr.bf16.mxu0 %v11301_v42  ;;  %v1140_v41 = vld [vmem:[%s23926_s1 + $0x21f8] sm:$0xff]  ;;  %v1129_v42 = vld [vmem:[%s23926_s1 + $0x21a0] sm:$0xff] }
 0x228   :  { %11498 = vmatprep.subr.bf16.mxu1 %v11497_v46  ;;  %v1167_v46 = vld [vmem:[%s23926_s1 + $0x22d0] sm:$0xff]  ;;  %v11319_v50 = vpack.c.bf16 %v1140_v41, %v1127_v40  ;;  %v11515_v51 = vpack.c.bf16 %v1142_v44, %v1129_v42  ;;  %v11529_v40 = vpack.c.bf16 %v1247_v33, %v1234_v31  ;;  %v1246_v41 = vld [vmem:[%s23926_s1 + $0x2548] sm:$0xff]  ;;  %v1260_v44 = vld [vmem:[%s23926_s1 + $0x25b8] sm:$0xff] }
 0x229   :  { %v11321_v52 = vpack.c.bf16 %v1167_v46, %v1154_v45  ;;  %v1258_v42 = vld [vmem:[%s23926_s1 + $0x25a8] sm:$0xff]  ;;  %v1273_v45 = vld [vmem:[%s23926_s1 + $0x2620] sm:$0xff] }
 0x22a   :  { %11304 = vmatpush1.bf16.msra.mxu0 %v11303_v53  ;;  %v1153_v53 = vld [vmem:[%s23926_s1 + $0x2260] sm:$0xff] }
 0x22b   :  { %11500 = vmatpush1.bf16.msra.mxu1 %v11499_v54  ;;  %11306 = vmatprep.subr.bf16.mxu0 %v11305_v56  ;;  %v1166_v54 = vld [vmem:[%s23926_s1 + $0x22c8] sm:$0xff]  ;;  %v1155_v56 = vld [vmem:[%s23926_s1 + $0x2270] sm:$0xff] }
 0x22c   :  { %11502 = vmatprep.subr.bf16.mxu1 %v11501_v62  ;;  %v1193_v62 = vld [vmem:[%s23926_s1 + $0x23a0] sm:$0xff]  ;;  %v11323_v2 = vpack.c.bf16 %v1166_v54, %v1153_v53  ;;  %v11519_v5 = vpack.c.bf16 %v1168_v58, %v1155_v56  ;;  %v11533_v53 = vpack.c.bf16 %v1273_v45, %v1260_v44  ;;  %v1272_v54 = vld [vmem:[%s23926_s1 + $0x2618] sm:$0xff]  ;;  %v1286_v58 = vld [vmem:[%s23926_s1 + $0x2688] sm:$0xff] }
 0x22d   :  { %v11325_v6 = vpack.c.bf16 %v1193_v62, %v1180_v59  ;;  %v1284_v56 = vld [vmem:[%s23926_s1 + $0x2678] sm:$0xff]  ;;  %v1299_v59 = vld [vmem:[%s23926_s1 + $0x26f0] sm:$0xff] }
 0x22e   :  { %11308 = vmatpush1.bf16.msra.mxu0 %v11307_v8  ;;  %v1179_v8 = vld [vmem:[%s23926_s1 + $0x2330] sm:$0xff] }
 0x22f   :  { %11504 = vmatpush1.bf16.msra.mxu1 %v11503_v9  ;;  %11310 = vmatprep.subr.bf16.mxu0 %v11309_v10  ;;  %v1192_v9 = vld [vmem:[%s23926_s1 + $0x2398] sm:$0xff]  ;;  %v1181_v10 = vld [vmem:[%s23926_s1 + $0x2340] sm:$0xff] }
 0x230   :  { %11506 = vmatprep.subr.bf16.mxu1 %v11505_v15  ;;  %v1219_v15 = vld [vmem:[%s23926_s1 + $0x2470] sm:$0xff]  ;;  %v11327_v18 = vpack.c.bf16 %v1192_v9, %v1179_v8  ;;  %v11523_v19 = vpack.c.bf16 %v1194_v13, %v1181_v10  ;;  %v11537_v8 = vpack.c.bf16 %v1299_v59, %v1286_v58  ;;  %v1298_v9 = vld [vmem:[%s23926_s1 + $0x26e8] sm:$0xff]  ;;  %v1312_v13 = vld [vmem:[%s23926_s1 + $0x2758] sm:$0xff] }
 0x231   :  { %v11329_v20 = vpack.c.bf16 %v1219_v15, %v1206_v14  ;;  %v1310_v10 = vld [vmem:[%s23926_s1 + $0x2748] sm:$0xff]  ;;  %v1325_v14 = vld [vmem:[%s23926_s1 + $0x27c0] sm:$0xff] }
 0x232   :  { %11312 = vmatpush1.bf16.msra.mxu0 %v11311_v22  ;;  %v1205_v22 = vld [vmem:[%s23926_s1 + $0x2400] sm:$0xff] }
 0x233   :  { %11508 = vmatpush1.bf16.msra.mxu1 %v11507_v23  ;;  %11314 = vmatprep.subr.bf16.mxu0 %v11313_v26  ;;  %v1218_v23 = vld [vmem:[%s23926_s1 + $0x2468] sm:$0xff]  ;;  %v1207_v26 = vld [vmem:[%s23926_s1 + $0x2410] sm:$0xff] }
 0x234   :  { %11510 = vmatprep.subr.bf16.mxu1 %v11509_v30  ;;  %v1245_v30 = vld [vmem:[%s23926_s1 + $0x2540] sm:$0xff]  ;;  %v11331_v34 = vpack.c.bf16 %v1218_v23, %v1205_v22  ;;  %v11527_v35 = vpack.c.bf16 %v1220_v27, %v1207_v26  ;;  %v1311_v22 = vld [vmem:[%s23926_s1 + $0x2750] sm:$0xff]  ;;  %v1324_v23 = vld [vmem:[%s23926_s1 + $0x27b8] sm:$0xff] }
 0x235   :  { %v11333_v36 = vpack.c.bf16 %v1245_v30, %v1232_v28  ;;  %v273_v26 = vld [vmem:[%s23926_s1 + $0x6e0] sm:$0xff]  ;;  %v702_v30 = vld [vmem:[%s23926_s1 + $0x1448] sm:$0xff]  ;;  %v11543_v31 = vpack.c.bf16 %v1324_v23, %v1311_v22 }
 0x236   :  { %11316 = vmatpush1.bf16.msra.mxu0 %v11315_v11  ;;  %v1231_v11 = vld [vmem:[%s23926_s1 + $0x24d0] sm:$0xff]  ;;  %v689_v28 = vld [vmem:[%s23926_s1 + $0x13e0] sm:$0xff]  ;;  %v806_v22 = vld [vmem:[%s23926_s1 + $0x1788] sm:$0xff] }
 0x237   :  { %11512 = vmatpush1.bf16.msra.mxu1 %v11511_v37  ;;  %11318 = vmatprep.subr.bf16.mxu0 %v11317_v38  ;;  %v1244_v37 = vld [vmem:[%s23926_s1 + $0x2538] sm:$0xff]  ;;  %v1233_v38 = vld [vmem:[%s23926_s1 + $0x24e0] sm:$0xff] }
 0x238   :  { %11514 = vmatprep.subr.bf16.mxu1 %v11513_v43  ;;  %v1271_v43 = vld [vmem:[%s23926_s1 + $0x2610] sm:$0xff]  ;;  %v11335_v46 = vpack.c.bf16 %v1244_v37, %v1231_v11  ;;  %v11531_v47 = vpack.c.bf16 %v1246_v41, %v1233_v38  ;;  %v481_v11 = vld [vmem:[%s23926_s1 + $0xd60] sm:$0xff]  ;;  %v494_v37 = vld [vmem:[%s23926_s1 + $0xdc8] sm:$0xff] }
 0x239   :  { %v11337_v48 = vpack.c.bf16 %v1271_v43, %v1258_v42  ;;  %v299_v38 = vld [vmem:[%s23926_s1 + $0x7b0] sm:$0xff]  ;;  %v728_v42 = vld [vmem:[%s23926_s1 + $0x1518] sm:$0xff]  ;;  %v11579_v44 = vpack.c.bf16 %v494_v37, %v481_v11 }
 0x23a   :  { %11320 = vmatpush1.bf16.msra.mxu0 %v11319_v50  ;;  %v1257_v50 = vld [vmem:[%s23926_s1 + $0x25a0] sm:$0xff]  ;;  %v715_v41 = vld [vmem:[%s23926_s1 + $0x14b0] sm:$0xff] }
 0x23b   :  { %11516 = vmatpush1.bf16.msra.mxu1 %v11515_v51  ;;  %11322 = vmatprep.subr.bf16.mxu0 %v11321_v52  ;;  %v1270_v51 = vld [vmem:[%s23926_s1 + $0x2608] sm:$0xff]  ;;  %v1259_v52 = vld [vmem:[%s23926_s1 + $0x25b0] sm:$0xff] }
 0x23c   :  { %11518 = vmatprep.subr.bf16.mxu1 %v11517_v57  ;;  %v1297_v57 = vld [vmem:[%s23926_s1 + $0x26e0] sm:$0xff]  ;;  %v11339_v62 = vpack.c.bf16 %v1270_v51, %v1257_v50  ;;  %v11535_v0 = vpack.c.bf16 %v1272_v54, %v1259_v52  ;;  %v11581_v50 = vpack.c.bf16 %v728_v42, %v715_v41  ;;  %v520_v51 = vld [vmem:[%s23926_s1 + $0xe98] sm:$0xff] }
 0x23d   :  { %v11341_v1 = vpack.c.bf16 %v1297_v57, %v1284_v56  ;;  %v325_v52 = vld [vmem:[%s23926_s1 + $0x880] sm:$0xff]  ;;  %v754_v56 = vld [vmem:[%s23926_s1 + $0x15e8] sm:$0xff] }
 0x23e   :  { %11324 = vmatpush1.bf16.msra.mxu0 %v11323_v2  ;;  %v1283_v2 = vld [vmem:[%s23926_s1 + $0x2670] sm:$0xff]  ;;  %v741_v54 = vld [vmem:[%s23926_s1 + $0x1580] sm:$0xff] }
 0x23f   :  { %11520 = vmatpush1.bf16.msra.mxu1 %v11519_v5  ;;  %11326 = vmatprep.subr.bf16.mxu0 %v11325_v6  ;;  %v1296_v5 = vld [vmem:[%s23926_s1 + $0x26d8] sm:$0xff]  ;;  %v1285_v6 = vld [vmem:[%s23926_s1 + $0x2680] sm:$0xff] }
 0x240   :  { %11522 = vmatprep.subr.bf16.mxu1 %v11521_v12  ;;  %v1323_v12 = vld [vmem:[%s23926_s1 + $0x27b0] sm:$0xff]  ;;  %v11343_v15 = vpack.c.bf16 %v1296_v5, %v1283_v2  ;;  %v11539_v16 = vpack.c.bf16 %v1298_v9, %v1285_v6  ;;  %v11585_v2 = vpack.c.bf16 %v754_v56, %v741_v54  ;;  %v546_v5 = vld [vmem:[%s23926_s1 + $0xf68] sm:$0xff] }
 0x241   :  { %v11345_v17 = vpack.c.bf16 %v1323_v12, %v1310_v10  ;;  %v351_v6 = vld [vmem:[%s23926_s1 + $0x950] sm:$0xff]  ;;  %v780_v10 = vld [vmem:[%s23926_s1 + $0x16b8] sm:$0xff]  ;;  %v858_v54 = vld [vmem:[%s23926_s1 + $0x1928] sm:$0xff] }
 0x242   :  { %11328 = vmatpush1.bf16.msra.mxu0 %v11327_v18  ;;  %v1309_v18 = vld [vmem:[%s23926_s1 + $0x2740] sm:$0xff]  ;;  %v767_v9 = vld [vmem:[%s23926_s1 + $0x1650] sm:$0xff] }
 0x243   :  { %11524 = vmatpush1.bf16.msra.mxu1 %v11523_v19  ;;  %11330 = vmatprep.subr.bf16.mxu0 %v11329_v20  ;;  %v1322_v19 = vld [vmem:[%s23926_s1 + $0x27a8] sm:$0xff]  ;;  %v11541_v20 = vpack.c.bf16 %v1325_v14, %v1312_v13 }
 0x244   :  { %11526 = vmatprep.subr.bf16.mxu1 %v11525_v49  ;;  %v286_v49 = vld [vmem:[%s23926_s1 + $0x748] sm:$0xff]  ;;  %v11347_v27 = vpack.c.bf16 %v1322_v19, %v1309_v18  ;;  %v377_v18 = vld [vmem:[%s23926_s1 + $0xa20] sm:$0xff] }
 0x245   :  { %v11545_v33 = vpack.c.bf16 %v286_v49, %v273_v26  ;;  %v390_v19 = vld [vmem:[%s23926_s1 + $0xa88] sm:$0xff] }
 0x246   :  { %11332 = vmatpush1.bf16.msra.mxu0 %v11331_v34  ;;  %v11577_v34 = vpack.c.bf16 %v702_v30, %v689_v28  ;;  %v11561_v49 = vpack.c.bf16 %v390_v19, %v377_v18  ;;  %v182_v28 = vld [vmem:[%s23926_s1 + $0x408] sm:$0xff]  ;;  %v585_v30 = vld [vmem:[%s23926_s1 + $0x10a0] sm:$0xff]  ;;  %v17665_v19 = vsub.s32 1, %v14073_v61 }
 0x247   :  { %11528 = vmatpush1.bf16.msra.mxu1 %v11527_v35  ;;  %11334 = vmatprep.subr.bf16.mxu0 %v11333_v36  ;;  %v65_v35 = vld [vmem:[%s23926_s1 + $0x60] sm:$0xff]  ;;  %v78_v36 = vld [vmem:[%s23926_s1 + $0xc8] sm:$0xff] }
 0x248   :  { %11530 = vmatprep.subr.bf16.mxu1 %v11529_v40  ;;  %v312_v40 = vld [vmem:[%s23926_s1 + $0x818] sm:$0xff]  ;;  %v11547_v43 = vpack.c.bf16 %v78_v36, %v65_v35  ;;  %v403_v35 = vld [vmem:[%s23926_s1 + $0xaf0] sm:$0xff]  ;;  %v1118_v18 = vld [vmem:[%s23926_s1 + $0x2148] sm:$0xff]  ;;  %23955 = vst [vmem:[#allocation5_spill] sm:$0xff] %v17665_v19 }
 0x249   :  { %v11549_v45 = vpack.c.bf16 %v312_v40, %v299_v38  ;;  %v416_v36 = vld [vmem:[%s23926_s1 + $0xb58] sm:$0xff]  ;;  %v819_v38 = vld [vmem:[%s23926_s1 + $0x17f0] sm:$0xff] }
 0x24a   :  { %11336 = vmatpush1.bf16.msra.mxu0 %v11335_v46  ;;  %v91_v46 = vld [vmem:[%s23926_s1 + $0x130] sm:$0xff]  ;;  %v832_v40 = vld [vmem:[%s23926_s1 + $0x1858] sm:$0xff] }
 0x24b   :  { %11532 = vmatpush1.bf16.msra.mxu1 %v11531_v47  ;;  %11338 = vmatprep.subr.bf16.mxu0 %v11337_v48  ;;  %v104_v47 = vld [vmem:[%s23926_s1 + $0x198] sm:$0xff]  ;;  %v507_v48 = vld [vmem:[%s23926_s1 + $0xe30] sm:$0xff] }
 0x24c   :  { %11534 = vmatprep.subr.bf16.mxu1 %v11533_v53  ;;  %v338_v53 = vld [vmem:[%s23926_s1 + $0x8e8] sm:$0xff]  ;;  %v11551_v57 = vpack.c.bf16 %v104_v47, %v91_v46  ;;  %v11583_v58 = vpack.c.bf16 %v520_v51, %v507_v48  ;;  %v208_v46 = vld [vmem:[%s23926_s1 + $0x4d8] sm:$0xff]  ;;  %v611_v47 = vld [vmem:[%s23926_s1 + $0x1170] sm:$0xff]  ;;  %v11597_v48 = vpack.c.bf16 %v832_v40, %v819_v38 }
 0x24d   :  { %v11553_v59 = vpack.c.bf16 %v338_v53, %v325_v52  ;;  %v429_v51 = vld [vmem:[%s23926_s1 + $0xbc0] sm:$0xff]  ;;  %v442_v52 = vld [vmem:[%s23926_s1 + $0xc28] sm:$0xff] }
 0x24e   :  { %11340 = vmatpush1.bf16.msra.mxu0 %v11339_v62  ;;  %v117_v62 = vld [vmem:[%s23926_s1 + $0x200] sm:$0xff] }
 0x24f   :  { %11536 = vmatpush1.bf16.msra.mxu1 %v11535_v0  ;;  %11342 = vmatprep.subr.bf16.mxu0 %v11341_v1  ;;  %v130_v0 = vld [vmem:[%s23926_s1 + $0x268] sm:$0xff]  ;;  %v533_v1 = vld [vmem:[%s23926_s1 + $0xf00] sm:$0xff] }
 0x250   :  { %11538 = vmatprep.subr.bf16.mxu1 %v11537_v8  ;;  %v364_v8 = vld [vmem:[%s23926_s1 + $0x9b8] sm:$0xff]  ;;  %v11555_v12 = vpack.c.bf16 %v130_v0, %v117_v62  ;;  %v11587_v13 = vpack.c.bf16 %v546_v5, %v533_v1  ;;  %v845_v53 = vld [vmem:[%s23926_s1 + $0x18c0] sm:$0xff]  ;;  %v234_v62 = vld [vmem:[%s23926_s1 + $0x5a8] sm:$0xff] }
 0x251   :  { %v11557_v14 = vpack.c.bf16 %v364_v8, %v351_v6  ;;  %v637_v0 = vld [vmem:[%s23926_s1 + $0x1240] sm:$0xff]  ;;  %v11601_v1 = vpack.c.bf16 %v858_v54, %v845_v53  ;;  %v455_v5 = vld [vmem:[%s23926_s1 + $0xc90] sm:$0xff]  ;;  %v468_v6 = vld [vmem:[%s23926_s1 + $0xcf8] sm:$0xff] }
 0x252   :  { %11344 = vmatpush1.bf16.msra.mxu0 %v11343_v15  ;;  %v156_v15 = vld [vmem:[%s23926_s1 + $0x338] sm:$0xff]  ;;  %v871_v8 = vld [vmem:[%s23926_s1 + $0x1990] sm:$0xff]  ;;  %v3445_v38 = vld [vmem:[%s23928_s3 + $0x40] sm:$0xff] }
 0x253   :  { %11540 = vmatpush1.bf16.msra.mxu1 %v11539_v16  ;;  %11346 = vmatprep.subr.bf16.mxu0 %v11345_v17  ;;  %v559_v16 = vld [vmem:[%s23926_s1 + $0xfd0] sm:$0xff]  ;;  %v572_v17 = vld [vmem:[%s23926_s1 + $0x1038] sm:$0xff]  ;;  %v1170_v53 = vld [vmem:[%s23926_s1 + $0x22e8] sm:$0xff] }
 0x254   :  { %11542 = vmatprep.subr.bf16.mxu1 %v11541_v20  ;;  %v793_v20 = vld [vmem:[%s23926_s1 + $0x1720] sm:$0xff]  ;;  %v11591_v26 = vpack.c.bf16 %v572_v17, %v559_v16  ;;  %v3452_v54 = vld [vmem:[%s23928_s3 + $0x78] sm:$0xff] }
 0x255   :  { %2783 = vmatmul.mubr.f32.vlgmr.msra.gmra.mrb[4].mxu0 %v14674_v55  ;;  %v1105_v17 = vld [vmem:[%s23926_s1 + $0x20e0] sm:$0xff] }
 0x256   :  { %3067 = vmatmul.mubr.f32.vlgmr.msra.gmra.mrb[4].mxu1 %v14674_v55  ;;  %11348 = vmatpush1.bf16.msra.mxu0 %v11347_v27  ;;  %v169_v27 = vld [vmem:[%s23926_s1 + $0x3a0] sm:$0xff] }
 0x257   :  { %11544 = vmatpush1.bf16.msra.mxu1 %v11543_v31  ;;  %2853 = vmatprep.mubr.f32.mxu0 %v23941_v21  ;;  %v11563_v42 = vpack.c.bf16 %v182_v28, %v169_v27  ;;  %v910_v27 = vld [vmem:[%s23926_s1 + $0x1ac8] sm:$0xff]  ;;  %v1313_v28 = vld [vmem:[%s23926_s1 + $0x2760] sm:$0xff] }
 0x258   :  { %3137 = vmatprep.mubr.f32.mxu1 %v23941_v21  ;;  %11546 = vmatprep.subr.bf16.mxu0 %v11545_v33  ;;  %v11593_v33 = vpack.c.bf16 %v806_v22, %v793_v20  ;;  %v17670_v20 = vld [vmem:[%s23927_s2] sm:$0xff] }
 0x259   :  { %11578 = vmatprep.subr.bf16.mxu1 %v11577_v34  ;;  %v598_v34 = vld [vmem:[%s23926_s1 + $0x1108] sm:$0xff] }
 0x25d   :  { %9538 = vmatmul.mubr.msk.f32.vlgmr.msra.gmra.mrb[4].mxu0 %vm1437_vm0, %v15084_v29 }
 0x25e   :  { %9539 = vmatmul.mubr.msk.f32.vlgmr.msra.gmra.mrb[4].mxu1 %vm1437_vm0, %v15084_v29  ;;  %11548 = vmatpush3.bf16.msra.mxu0 %v11547_v43  ;;  %v11595_v43 = vpack.c.bf16 %v598_v34, %v585_v30  ;;  %v1326_v30 = vld [vmem:[%s23926_s1 + $0x27c8] sm:$0xff]  ;;  %v1338_v34 = vrot.slane %v17670_v20, %v17665_v19 }
 0x25f   :  { %11580 = vmatpush3.bf16.msra.mxu1 %v11579_v44  ;;  %11550 = vmatprep.subr.bf16.mxu0 %v11549_v45  ;;  %v11565_v44 = vpack.c.bf16 %v416_v36, %v403_v35  ;;  %v195_v45 = vld [vmem:[%s23926_s1 + $0x470] sm:$0xff]  ;;  %v1144_v35 = vld [vmem:[%s23926_s1 + $0x2218] sm:$0xff]  ;;  %v3438_v36 = vld [vmem:[%s23928_s3 + $0x8] sm:$0xff] }
 0x260   :  { %11582 = vmatprep.subr.bf16.mxu1 %v11581_v50  ;;  %3208 = vmatprep.mubr.f32.mxu0 %v14146_v32  ;;  %v143_v32 = vld [vmem:[%s23926_s1 + $0x2d0] sm:$0xff]  ;;  %v624_v50 = vld [vmem:[%s23926_s1 + $0x11d8] sm:$0xff]  ;;  %v11567_v56 = vpack.c.bf16 %v208_v46, %v195_v45  ;;  %v23943_v45 = vmov 0.0|0.0  }
 0x261   :  { %3278 = vmatprep.mubr.f32.mxu1 %v14286_v39  ;;  %v11589_v39 = vpack.c.bf16 %v780_v10, %v767_v9  ;;  %v11559_v23 = vpack.c.bf16 %v156_v15, %v143_v32  ;;  %v884_v9 = vld [vmem:[%s23926_s1 + $0x19f8] sm:$0xff]  ;;  %v663_v15 = vld [vmem:[%s23926_s1 + $0x1310] sm:$0xff] }
 0x262   :  { %11552 = vmatpush3.bf16.msra.mxu0 %v11551_v57  ;;  %v11599_v57 = vpack.c.bf16 %v624_v50, %v611_v47  ;;  %v260_v32 = vld [vmem:[%s23926_s1 + $0x678] sm:$0xff]  ;;  %v11605_v16 = vpack.c.bf16 %v884_v9, %v871_v8  ;;  %v11644_v47 = vpack.c.bf16 %v3445_v38, %v3438_v36  ;;  %v3473_v8 = vld [vmem:[%s23928_s3 + $0x120] sm:$0xff] }
 0x263   :  { %11584 = vmatpush3.bf16.msra.mxu1 %v11583_v58  ;;  %11554 = vmatprep.subr.bf16.mxu0 %v11553_v59  ;;  %v11569_v58 = vpack.c.bf16 %v442_v52, %v429_v51  ;;  %v221_v59 = vld [vmem:[%s23926_s1 + $0x540] sm:$0xff]  ;;  %v3444_v50 = vld [vmem:[%s23928_s3 + $0x38] sm:$0xff]  ;;  %v13604_v52 = vadd.f32 %v16386_v4, %v1338_v34 }
 0x264   :  { %11586 = vmatprep.subr.bf16.mxu1 %v11585_v2  ;;  %v650_v2 = vld [vmem:[%s23926_s1 + $0x12a8] sm:$0xff]  ;;  %v11571_v10 = vpack.c.bf16 %v234_v62, %v221_v59  ;;  %v1157_v51 = vld [vmem:[%s23926_s1 + $0x2280] sm:$0xff]  ;;  %v1248_v34 = vld [vmem:[%s23926_s1 + $0x2558] sm:$0xff] }
 0x265   :  { %v949_v4 = vld [vmem:[%s23926_s1 + $0x1c00] sm:$0xff]  ;;  %v11617_v59 = vpack.c.bf16 %v1170_v53, %v1157_v51  ;;  %v1274_v51 = vld [vmem:[%s23926_s1 + $0x2628] sm:$0xff]  ;;  %v3515_v53 = vld [vmem:[%s23928_s3 + $0x270] sm:$0xff] }
 0x266   :  { %11556 = vmatpush3.bf16.msra.mxu0 %v11555_v12  ;;  %v11603_v12 = vpack.c.bf16 %v650_v2, %v637_v0  ;;  %v3458_v0 = vld [vmem:[%s23928_s3 + $0xa8] sm:$0xff]  ;;  %v1196_v2 = vld [vmem:[%s23926_s1 + $0x23b8] sm:$0xff]  ;;  %v3501_v36 = vld [vmem:[%s23928_s3 + $0x200] sm:$0xff] }
 0x267   :  { %11588 = vmatpush3.bf16.msra.mxu1 %v11587_v13  ;;  %11558 = vmatprep.subr.bf16.mxu0 %v11557_v14  ;;  %v11573_v13 = vpack.c.bf16 %v468_v6, %v455_v5  ;;  %v247_v14 = vld [vmem:[%s23926_s1 + $0x610] sm:$0xff]  ;;  %v17746_v5 = vmax.f32 %v13604_v52, 0.0  ;;  %v3466_v6 = vld [vmem:[%s23928_s3 + $0xe8] sm:$0xff]  ;;  %v3508_v52 = vld [vmem:[%s23928_s3 + $0x238] sm:$0xff] }
 0x268   :  { %11590 = vmatprep.subr.bf16.mxu1 %v11589_v39  ;;  %v17575_v31 = vpop.f32.mrb[2].mxu0  ;;  %v676_v39 = vld [vmem:[%s23926_s1 + $0x1378] sm:$0xff]  ;;  %v11575_v22 = vpack.c.bf16 %v260_v32, %v247_v14 }
 0x269   :  { %v17586_v11 = vpop.f32.mrb[2].mxu1  ;;  %v17588_v37 = vpop.f32.mrb[3].mxu0  ;;  %v988_v14 = vld [vmem:[%s23926_s1 + $0x1d38] sm:$0xff] }
 0x26a   :  { %11560 = vmatpush3.bf16.msra.mxu0 %v11559_v23  ;;  %v17596_v41 = vpop.f32.mrb[3].mxu1  ;;  %v11607_v23 = vpack.c.bf16 %v676_v39, %v663_v15  ;;  %v3472_v32 = vld [vmem:[%s23928_s3 + $0x118] sm:$0xff]  ;;  %v1209_v15 = vld [vmem:[%s23926_s1 + $0x2420] sm:$0xff] }
 0x26b   :  { %11592 = vmatpush3.bf16.msra.mxu1 %v11591_v26  ;;  %11562 = vmatprep.subr.bf16.mxu0 %v11561_v49  ;;  %v11609_v26 = vpack.c.bf16 %v1118_v18, %v1105_v17  ;;  %v897_v49 = vld [vmem:[%s23926_s1 + $0x1a60] sm:$0xff]  ;;  %v3480_v39 = vld [vmem:[%s23928_s3 + $0x158] sm:$0xff]  ;;  %v3487_v17 = vld [vmem:[%s23928_s3 + $0x190] sm:$0xff] }
 0x26c   :  { %11594 = vmatprep.subr.bf16.mxu1 %v11593_v33  ;;  %v1131_v33 = vld [vmem:[%s23926_s1 + $0x21b0] sm:$0xff]  ;;  %v11611_v40 = vpack.c.bf16 %v910_v27, %v897_v49  ;;  %v1014_v49 = vld [vmem:[%s23926_s1 + $0x1e08] sm:$0xff] }
 0x26d   :  { %v11613_v46 = vpack.c.bf16 %v1144_v35, %v1131_v33  ;;  %v3479_v27 = vld [vmem:[%s23928_s3 + $0x150] sm:$0xff]  ;;  %v3494_v35 = vld [vmem:[%s23928_s3 + $0x1c8] sm:$0xff] }
 0x26e   :  { %11564 = vmatpush3.bf16.msra.mxu0 %v11563_v42  ;;  %v11642_v42 = vpack.c.bf16 %v1326_v30, %v1313_v28  ;;  %v11656_v28 = vpack.c.bf16 %v3487_v17, %v3480_v39  ;;  %v3486_v30 = vld [vmem:[%s23928_s3 + $0x188] sm:$0xff]  ;;  %v1235_v33 = vld [vmem:[%s23926_s1 + $0x24f0] sm:$0xff] }
 0x26f   :  { %11596 = vmatpush3.bf16.msra.mxu1 %v11595_v43  ;;  %11566 = vmatprep.subr.bf16.mxu0 %v11565_v44  ;;  %v923_v43 = vld [vmem:[%s23926_s1 + $0x1b30] sm:$0xff]  ;;  %v936_v44 = vld [vmem:[%s23926_s1 + $0x1b98] sm:$0xff] }
 0x270   :  { %11598 = vmatprep.subr.bf16.mxu1 %v11597_v48  ;;  %v3437_v48 = vld [vmem:[%s23928_s3] sm:$0xff]  ;;  %v3535_v17 = vld [vmem:[%s23928_s3 + $0x310] sm:$0xff] }
 0x272   :  { %11568 = vmatpush3.bf16.msra.mxu0 %v11567_v56  ;;  %v3459_v56 = vld [vmem:[%s23928_s3 + $0xb0] sm:$0xff] }
 0x273   :  { %11600 = vmatpush3.bf16.msra.mxu1 %v11599_v57  ;;  %11570 = vmatprep.subr.bf16.mxu0 %v11569_v58  ;;  %v11615_v57 = vpack.c.bf16 %v936_v44, %v923_v43  ;;  %v962_v58 = vld [vmem:[%s23926_s1 + $0x1c68] sm:$0xff]  ;;  %v11648_v62 = vpack.c.bf16 %v3459_v56, %v3452_v54  ;;  %v1027_v43 = vld [vmem:[%s23926_s1 + $0x1e70] sm:$0xff]  ;;  %v1040_v44 = vld [vmem:[%s23926_s1 + $0x1ed8] sm:$0xff] }
 0x274   :  { %11602 = vmatprep.subr.bf16.mxu1 %v11601_v1  ;;  %v1183_v1 = vld [vmem:[%s23926_s1 + $0x2350] sm:$0xff]  ;;  %v11619_v9 = vpack.c.bf16 %v962_v58, %v949_v4  ;;  %v11631_v54 = vpack.c.bf16 %v1040_v44, %v1027_v43  ;;  %v1066_v4 = vld [vmem:[%s23926_s1 + $0x1fa8] sm:$0xff]  ;;  %v3577_v44 = vld [vmem:[%s23928_s3 + $0x460] sm:$0xff] }
 0x275   :  { %v3507_v58 = vld [vmem:[%s23928_s3 + $0x230] sm:$0xff] }
 0x276   :  { %11572 = vmatpush3.bf16.msra.mxu0 %v11571_v10 }
 0x277   :  { %11604 = vmatpush3.bf16.msra.mxu1 %v11603_v12  ;;  %11574 = vmatprep.subr.bf16.mxu0 %v11573_v13  ;;  %v11621_v12 = vpack.c.bf16 %v1196_v2, %v1183_v1  ;;  %v975_v13 = vld [vmem:[%s23926_s1 + $0x1cd0] sm:$0xff]  ;;  %v3522_v1 = vld [vmem:[%s23928_s3 + $0x2a8] sm:$0xff]  ;;  %v3529_v2 = vld [vmem:[%s23928_s3 + $0x2e0] sm:$0xff] }
 0x278   :  { %11606 = vmatprep.subr.bf16.mxu1 %v11605_v16  ;;  %v1222_v16 = vld [vmem:[%s23926_s1 + $0x2488] sm:$0xff]  ;;  %v11623_v18 = vpack.c.bf16 %v988_v14, %v975_v13  ;;  %v11668_v13 = vpack.c.bf16 %v3529_v2, %v3522_v1  ;;  %v3521_v14 = vld [vmem:[%s23928_s3 + $0x2a0] sm:$0xff]  ;;  %v3619_v1 = vld [vmem:[%s23928_s3 + $0x5b0] sm:$0xff] }
 0x279   :  { %v3626_v2 = vld [vmem:[%s23928_s3 + $0x5e8] sm:$0xff] }
 0x27a   :  { %11576 = vmatpush3.bf16.msra.mxu0 %v11575_v22 }
 0x27b   :  { %11608 = vmatpush3.bf16.msra.mxu1 %v11607_v23  ;;  %11610 = vmatprep.subr.bf16.mxu0 %v11609_v26  ;;  %v11625_v23 = vpack.c.bf16 %v1222_v16, %v1209_v15  ;;  %v1001_v26 = vld [vmem:[%s23926_s1 + $0x1da0] sm:$0xff] }
 0x27c   :  { %11641 = vmatprep.subr.bf16.mxu1 %v23943_v45  ;;  %v11627_v38 = vpack.c.bf16 %v1014_v49, %v1001_v26 }
 0x27d   :  { %3209 = vmatmul.mubr.f32.vlgmr.msra.gmra.mrb[6].mxu0 %v14133_v25  ;;  %v11646_v25 = vpack.c.bf16 %v3444_v50, %v3437_v48  ;;  %v3500_v48 = vld [vmem:[%s23928_s3 + $0x1f8] sm:$0xff]  ;;  %v1261_v50 = vld [vmem:[%s23926_s1 + $0x25c0] sm:$0xff] }
 0x27e   :  { %3279 = vmatmul.mubr.f32.vlgmr.msra.gmra.mrb[6].mxu1 %v14258_v24  ;;  %11612 = vmatpush3.bf16.msra.mxu0 %v11611_v40  ;;  %v3451_v24 = vld [vmem:[%s23928_s3 + $0x70] sm:$0xff]  ;;  %v11658_v40 = vpack.c.bf16 %v3486_v30, %v3479_v27  ;;  %v3549_v27 = vld [vmem:[%s23928_s3 + $0x380] sm:$0xff]  ;;  %v3564_v30 = vld [vmem:[%s23928_s3 + $0x3f8] sm:$0xff] }
 0x27f   :  { %11643 = vmatpush3.bf16.msra.mxu1 %v11642_v42  ;;  %10274 = vmatprep.mubr.msk.f32.mxu1 %vm13739_vm1, %v23941_v21  ;;  %v11650_v10 = vpack.c.bf16 %v3458_v0, %v3451_v24  ;;  %v11629_v42 = vpack.c.bf16 %v1248_v34, %v1235_v33  ;;  %v11664_v24 = vpack.c.bf16 %v3515_v53, %v3508_v52  ;;  %v1300_v0 = vld [vmem:[%s23926_s1 + $0x26f8] sm:$0xff]  ;;  %v3571_v33 = vld [vmem:[%s23928_s3 + $0x430] sm:$0xff]  ;;  %v3598_v53 = vld [vmem:[%s23928_s3 + $0x508] sm:$0xff] }
 0x280   :  { %11614 = vmatprep.subr.bf16.mxu0 %v11613_v46  ;;  %11645 = vmatprep.subr.bf16.mxu1 %v11644_v47  ;;  %v3493_v46 = vld [vmem:[%s23928_s3 + $0x1c0] sm:$0xff]  ;;  %v11660_v47 = vpack.c.bf16 %v3501_v36, %v3494_v35  ;;  %v11680_v35 = vpack.c.bf16 %v3571_v33, %v3564_v30  ;;  %v3563_v36 = vld [vmem:[%s23928_s3 + $0x3f0] sm:$0xff]  ;;  %v3668_v33 = vld [vmem:[%s23928_s3 + $0x738] sm:$0xff] }
 0x281   :  { %3348 = vmatprep.mubr.f32.mxu0 %v14694_v63  ;;  %v3465_v63 = vld [vmem:[%s23928_s3 + $0xe0] sm:$0xff]  ;;  %v11662_v56 = vpack.c.bf16 %v3500_v48, %v3493_v46  ;;  %v3584_v46 = vld [vmem:[%s23928_s3 + $0x498] sm:$0xff]  ;;  %v3599_v48 = vld [vmem:[%s23928_s3 + $0x510] sm:$0xff] }
 0x282   :  { %10275 = vmatmul.mubr.msk.f32.vlgmr.msra.gmra.mrb[8].mxu1 %vm1437_vm0, %v15084_v29  ;;  %11616 = vmatpush3.bf16.msra.mxu0 %v11615_v57  ;;  %v11652_v29 = vpack.c.bf16 %v3473_v8, %v3466_v6  ;;  %v11654_v22 = vpack.c.bf16 %v3472_v32, %v3465_v63  ;;  %v11633_v57 = vpack.c.bf16 %v1274_v51, %v1261_v50  ;;  %v3528_v63 = vld [vmem:[%s23928_s3 + $0x2d8] sm:$0xff]  ;;  %v3543_v32 = vld [vmem:[%s23928_s3 + $0x350] sm:$0xff]  ;;  %v3661_v30 = vld [vmem:[%s23928_s3 + $0x700] sm:$0xff] }
 0x283   :  { %11647 = vmatpush1.bf16.msra.mxu1 %v11646_v25  ;;  %4914 = vmatprep.mubr.f32.mxu1 %v17746_v5  ;;  %v1053_v25 = vld [vmem:[%s23926_s1 + $0x1f40] sm:$0xff]  ;;  %v11670_v16 = vpack.c.bf16 %v3528_v63, %v3521_v14  ;;  %v11686_v50 = vpack.c.bf16 %v3584_v46, %v3577_v44  ;;  %v3591_v52 = vld [vmem:[%s23928_s3 + $0x4d0] sm:$0xff]  ;;  %v3640_v14 = vld [vmem:[%s23928_s3 + $0x658] sm:$0xff]  ;;  %v17968_v63 = vsub.s32 3, %v14073_v61 }
 0x284   :  { %11618 = vmatprep.subr.bf16.mxu0 %v11617_v59  ;;  %11649 = vmatprep.subr.bf16.mxu1 %v11648_v62  ;;  %v3514_v59 = vld [vmem:[%s23928_s3 + $0x268] sm:$0xff]  ;;  %v1287_v62 = vld [vmem:[%s23926_s1 + $0x2690] sm:$0xff]  ;;  %v11635_v6 = vpack.c.bf16 %v1066_v4, %v1053_v25  ;;  %v3605_v4 = vld [vmem:[%s23928_s3 + $0x540] sm:$0xff] }
 0x285   :  { %v11666_v8 = vpack.c.bf16 %v3514_v59, %v3507_v58  ;;  %v3612_v58 = vld [vmem:[%s23928_s3 + $0x578] sm:$0xff]  ;;  %v3627_v59 = vld [vmem:[%s23928_s3 + $0x5f0] sm:$0xff]  ;;  %23956 = vst [vmem:[#allocation6_spill] sm:$0xff] %v17968_v63  ;;  %v3697_v44 = vld [vmem:[%s23928_s3 + $0x820] sm:$0xff] }
 0x286   :  { %11620 = vmatpush3.bf16.msra.mxu0 %v11619_v9  ;;  %v11637_v9 = vpack.c.bf16 %v1300_v0, %v1287_v62  ;;  %v11694_v62 = vpack.c.bf16 %v3612_v58, %v3605_v4  ;;  %v3725_v4 = vld [vmem:[%s23928_s3 + $0x900] sm:$0xff] }
 0x287   :  { %11651 = vmatpush1.bf16.msra.mxu1 %v11650_v10  ;;  %11622 = vmatprep.subr.bf16.mxu0 %v11621_v12  ;;  %v1079_v10 = vld [vmem:[%s23926_s1 + $0x2010] sm:$0xff]  ;;  %v1092_v12 = vld [vmem:[%s23926_s1 + $0x2078] sm:$0xff] }
 0x288   :  { %11653 = vmatprep.subr.bf16.mxu1 %v11652_v29  ;;  %v3536_v29 = vld [vmem:[%s23928_s3 + $0x318] sm:$0xff]  ;;  %v11639_v15 = vpack.c.bf16 %v1092_v12, %v1079_v10  ;;  %v17959_v10 = vsub.s32 0, %v14073_v61 }
 0x289   :  { %v11672_v39 = vpack.c.bf16 %v3543_v32, %v3536_v29  ;;  %v3648_v29 = vld [vmem:[%s23928_s3 + $0x698] sm:$0xff]  ;;  %v3655_v32 = vld [vmem:[%s23928_s3 + $0x6d0] sm:$0xff] }
 0x28a   :  { %11624 = vmatpush3.bf16.msra.mxu0 %v11623_v18  ;;  %v3542_v18 = vld [vmem:[%s23928_s3 + $0x348] sm:$0xff] }
 0x28b   :  { %11655 = vmatpush1.bf16.msra.mxu1 %v11654_v22  ;;  %11626 = vmatprep.subr.bf16.mxu0 %v11625_v23  ;;  %v3550_v22 = vld [vmem:[%s23928_s3 + $0x388] sm:$0xff]  ;;  %v3557_v23 = vld [vmem:[%s23928_s3 + $0x3c0] sm:$0xff]  ;;  %v11674_v26 = vpack.c.bf16 %v3542_v18, %v3535_v17  ;;  %v3647_v17 = vld [vmem:[%s23928_s3 + $0x690] sm:$0xff] }
 0x28c   :  { %11657 = vmatprep.subr.bf16.mxu1 %v11656_v28  ;;  %v11676_v49 = vpack.c.bf16 %v3557_v23, %v3550_v22  ;;  %v3556_v28 = vld [vmem:[%s23928_s3 + $0x3b8] sm:$0xff]  ;;  %v3654_v18 = vld [vmem:[%s23928_s3 + $0x6c8] sm:$0xff]  ;;  %v1346_v22 = vrot.slane %v17670_v20, %v17968_v63 }
 0x28d   :  { %v11678_v34 = vpack.c.bf16 %v3556_v28, %v3549_v27  ;;  %v3662_v23 = vld [vmem:[%s23928_s3 + $0x708] sm:$0xff] }
 0x28e   :  { %11628 = vmatpush3.bf16.msra.mxu0 %v11627_v38  ;;  %v3578_v38 = vld [vmem:[%s23928_s3 + $0x468] sm:$0xff] }
 0x28f   :  { %11659 = vmatpush1.bf16.msra.mxu1 %v11658_v40  ;;  %11630 = vmatprep.subr.bf16.mxu0 %v11629_v42  ;;  %v3585_v40 = vld [vmem:[%s23928_s3 + $0x4a0] sm:$0xff] }
 0x290   :  { %11661 = vmatprep.subr.bf16.mxu1 %v11660_v47  ;;  %v11684_v43 = vpack.c.bf16 %v3585_v40, %v3578_v38  ;;  %v3592_v47 = vld [vmem:[%s23928_s3 + $0x4d8] sm:$0xff]  ;;  %v3675_v40 = vld [vmem:[%s23928_s3 + $0x770] sm:$0xff] }
 0x291   :  { %v11688_v51 = vpack.c.bf16 %v3599_v48, %v3592_v47  ;;  %v3689_v48 = vld [vmem:[%s23928_s3 + $0x7e0] sm:$0xff] }
 0x292   :  { %11632 = vmatpush3.bf16.msra.mxu0 %v11631_v54  ;;  %v3606_v54 = vld [vmem:[%s23928_s3 + $0x548] sm:$0xff] }
 0x293   :  { %11663 = vmatpush1.bf16.msra.mxu1 %v11662_v56  ;;  %11634 = vmatprep.subr.bf16.mxu0 %v11633_v57  ;;  %v3613_v56 = vld [vmem:[%s23928_s3 + $0x580] sm:$0xff]  ;;  %v11690_v57 = vpack.c.bf16 %v3598_v53, %v3591_v52  ;;  %v3711_v52 = vld [vmem:[%s23928_s3 + $0x890] sm:$0xff] }
 0x294   :  { %11665 = vmatprep.subr.bf16.mxu1 %v11664_v24  ;;  %v11692_v25 = vpack.c.bf16 %v3613_v56, %v3606_v54  ;;  %v3620_v24 = vld [vmem:[%s23928_s3 + $0x5b8] sm:$0xff]  ;;  %v3703_v56 = vld [vmem:[%s23928_s3 + $0x850] sm:$0xff] }
 0x295   :  { %v11696_v0 = vpack.c.bf16 %v3627_v59, %v3620_v24  ;;  %v3717_v59 = vld [vmem:[%s23928_s3 + $0x8c0] sm:$0xff] }
 0x296   :  { %11636 = vmatpush3.bf16.msra.mxu0 %v11635_v6  ;;  %v3634_v6 = vld [vmem:[%s23928_s3 + $0x628] sm:$0xff] }
 0x297   :  { %11667 = vmatpush1.bf16.msra.mxu1 %v11666_v8  ;;  %11638 = vmatprep.subr.bf16.mxu0 %v11637_v9  ;;  %v3641_v8 = vld [vmem:[%s23928_s3 + $0x660] sm:$0xff]  ;;  %v11698_v9 = vpack.c.bf16 %v3626_v2, %v3619_v1  ;;  %v3739_v1 = vld [vmem:[%s23928_s3 + $0x970] sm:$0xff] }
 0x298   :  { %11669 = vmatprep.subr.bf16.mxu1 %v11668_v13  ;;  %v11700_v12 = vpack.c.bf16 %v3641_v8, %v3634_v6  ;;  %v3633_v13 = vld [vmem:[%s23928_s3 + $0x620] sm:$0xff]  ;;  %v3731_v8 = vld [vmem:[%s23928_s3 + $0x930] sm:$0xff] }
 0x29a   :  { %11640 = vmatpush3.bf16.msra.mxu0 %v11639_v15  ;;  %v11702_v15 = vpack.c.bf16 %v3640_v14, %v3633_v13  ;;  %v3753_v13 = vld [vmem:[%s23928_s3 + $0x9e0] sm:$0xff] }
 0x29b   :  { %11671 = vmatpush1.bf16.msra.mxu1 %v11670_v16  ;;  %v1334_v16 = vrot.slane %v17670_v20, %v17959_v10 }
 0x29c   :  { %11673 = vmatprep.subr.bf16.mxu1 %v11672_v39  ;;  %v11704_v39 = vpack.c.bf16 %v3655_v32, %v3648_v29  ;;  %v3745_v32 = vld [vmem:[%s23928_s3 + $0x9a0] sm:$0xff] }
 0x29d   :  { %3349 = vmatmul.mubr.f32.vlgmr.msra.gmra.mrb[8].mxu0 %v14674_v55  ;;  %v3570_v55 = vld [vmem:[%s23928_s3 + $0x428] sm:$0xff]  ;;  %v13603_v27 = vadd.f32 %v16373_v60, %v1334_v16  ;;  %v3683_v60 = vld [vmem:[%s23928_s3 + $0x7b0] sm:$0xff]  ;;  %v3760_v16 = vld [vmem:[%s23928_s3 + $0xa18] sm:$0xff] }
 0x29e   :  { %5340 = vmatprep.mubr.f32.mxu0 %v23941_v21  ;;  %v11682_v42 = vpack.c.bf16 %v3570_v55, %v3563_v36  ;;  %v11710_v36 = vpack.c.bf16 %v3668_v33, %v3661_v30  ;;  %v3773_v30 = vld [vmem:[%s23928_s3 + $0xa80] sm:$0xff]  ;;  %v3780_v33 = vld [vmem:[%s23928_s3 + $0xab8] sm:$0xff] }
 0x29f   :  { %11675 = vmatpush1.bf16.msra.mxu1 %v11674_v26  ;;  %v3669_v26 = vld [vmem:[%s23928_s3 + $0x740] sm:$0xff]  ;;  %v18006_v55 = vmax.f32 %v13603_v27, 0.0 }
 0x2a0   :  { %11677 = vmatprep.subr.bf16.mxu1 %v11676_v49  ;;  %v11706_v49 = vpack.c.bf16 %v3654_v18, %v3647_v17  ;;  %v11708_v28 = vpack.c.bf16 %v3669_v26, %v3662_v23  ;;  %v3766_v23 = vld [vmem:[%s23928_s3 + $0xa48] sm:$0xff] }
 0x2a1   :  { %v3774_v26 = vld [vmem:[%s23928_s3 + $0xa88] sm:$0xff] }
 0x2a3   :  { %11679 = vmatpush1.bf16.msra.mxu1 %v11678_v34  ;;  %v13606_v34 = vadd.f32 %v16394_v7, %v1346_v22  ;;  %v3682_v7 = vld [vmem:[%s23928_s3 + $0x7a8] sm:$0xff]  ;;  %v3759_v22 = vld [vmem:[%s23928_s3 + $0xa10] sm:$0xff] }
 0x2a4   :  { %11681 = vmatprep.subr.bf16.mxu1 %v11680_v35  ;;  %v3676_v35 = vld [vmem:[%s23928_s3 + $0x778] sm:$0xff]  ;;  %v11714_v46 = vpack.c.bf16 %v3682_v7, %v3675_v40  ;;  %v11738_v27 = vpack.c.bf16 %v3766_v23, %v3759_v22  ;;  %v3794_v40 = vld [vmem:[%s23928_s3 + $0xb28] sm:$0xff]  ;;  %v18187_v22 = vsub.s32 2, %v14073_v61 }
 0x2a5   :  { %v11712_v38 = vpack.c.bf16 %v3683_v60, %v3676_v35  ;;  %v3795_v35 = vld [vmem:[%s23928_s3 + $0xb30] sm:$0xff]  ;;  %v11742_v60 = vpack.c.bf16 %v3780_v33, %v3773_v30  ;;  %v3802_v7 = vld [vmem:[%s23928_s3 + $0xb68] sm:$0xff] }
 0x2a6   :  { %23957 = vst [vmem:[#allocation7_spill] sm:$0xff] %v18187_v22  ;;  %v3879_v30 = vld [vmem:[%s23928_s3 + $0xdd0] sm:$0xff] }
 0x2a7   :  { %11683 = vmatpush1.bf16.msra.mxu1 %v11682_v42  ;;  %v18014_v42 = vmax.f32 %v13606_v34, 0.0  ;;  %v3788_v34 = vld [vmem:[%s23928_s3 + $0xaf8] sm:$0xff] }
 0x2a8   :  { %11685 = vmatprep.subr.bf16.mxu1 %v11684_v43  ;;  %v3690_v43 = vld [vmem:[%s23928_s3 + $0x7e8] sm:$0xff] }
 0x2a9   :  { %v11716_v47 = vpack.c.bf16 %v3697_v44, %v3690_v43  ;;  %v3809_v43 = vld [vmem:[%s23928_s3 + $0xba0] sm:$0xff] }
 0x2ab   :  { %11687 = vmatpush1.bf16.msra.mxu1 %v11686_v50  ;;  %v3696_v50 = vld [vmem:[%s23928_s3 + $0x818] sm:$0xff] }
 0x2ac   :  { %11689 = vmatprep.subr.bf16.mxu1 %v11688_v51  ;;  %v3704_v51 = vld [vmem:[%s23928_s3 + $0x858] sm:$0xff]  ;;  %v11718_v53 = vpack.c.bf16 %v3696_v50, %v3689_v48 }
 0x2ad   :  { %v11720_v54 = vpack.c.bf16 %v3711_v52, %v3704_v51  ;;  %v3808_v48 = vld [vmem:[%s23928_s3 + $0xb98] sm:$0xff]  ;;  %v3823_v51 = vld [vmem:[%s23928_s3 + $0xc10] sm:$0xff] }
 0x2ae   :  { %v3816_v50 = vld [vmem:[%s23928_s3 + $0xbd8] sm:$0xff] }
 0x2af   :  { %11691 = vmatpush1.bf16.msra.mxu1 %v11690_v57  ;;  %v3710_v57 = vld [vmem:[%s23928_s3 + $0x888] sm:$0xff] }
 0x2b0   :  { %11693 = vmatprep.subr.bf16.mxu1 %v11692_v25  ;;  %v3718_v25 = vld [vmem:[%s23928_s3 + $0x8c8] sm:$0xff]  ;;  %v11722_v58 = vpack.c.bf16 %v3710_v57, %v3703_v56 }
 0x2b1   :  { %v11724_v24 = vpack.c.bf16 %v3725_v4, %v3718_v25  ;;  %v3822_v56 = vld [vmem:[%s23928_s3 + $0xc08] sm:$0xff]  ;;  %v3837_v25 = vld [vmem:[%s23928_s3 + $0xc80] sm:$0xff] }
 0x2b2   :  { %v3830_v57 = vld [vmem:[%s23928_s3 + $0xc48] sm:$0xff] }
 0x2b3   :  { %11695 = vmatpush1.bf16.msra.mxu1 %v11694_v62  ;;  %v3724_v62 = vld [vmem:[%s23928_s3 + $0x8f8] sm:$0xff] }
 0x2b4   :  { %11697 = vmatprep.subr.bf16.mxu1 %v11696_v0  ;;  %v3732_v0 = vld [vmem:[%s23928_s3 + $0x938] sm:$0xff]  ;;  %v11726_v2 = vpack.c.bf16 %v3724_v62, %v3717_v59 }
 0x2b5   :  { %v11728_v6 = vpack.c.bf16 %v3739_v1, %v3732_v0  ;;  %v3836_v59 = vld [vmem:[%s23928_s3 + $0xc78] sm:$0xff]  ;;  %v3851_v0 = vld [vmem:[%s23928_s3 + $0xcf0] sm:$0xff] }
 0x2b6   :  { %v3844_v62 = vld [vmem:[%s23928_s3 + $0xcb8] sm:$0xff] }
 0x2b7   :  { %11699 = vmatpush1.bf16.msra.mxu1 %v11698_v9  ;;  %v3738_v9 = vld [vmem:[%s23928_s3 + $0x968] sm:$0xff] }
 0x2b8   :  { %11701 = vmatprep.subr.bf16.mxu1 %v11700_v12  ;;  %v3746_v12 = vld [vmem:[%s23928_s3 + $0x9a8] sm:$0xff]  ;;  %v11730_v14 = vpack.c.bf16 %v3738_v9, %v3731_v8  ;;  %v11760_v8 = vpack.c.bf16 %v3851_v0, %v3844_v62 }
 0x2b9   :  { %v11732_v29 = vpack.c.bf16 %v3753_v13, %v3746_v12  ;;  %v3850_v9 = vld [vmem:[%s23928_s3 + $0xce8] sm:$0xff]  ;;  %v4789_v13 = vld [vmem:[%s23928_s3 + $0x2a40] sm:$0xff] }
 0x2ba   :  { %v3858_v12 = vld [vmem:[%s23928_s3 + $0xd28] sm:$0xff] }
 0x2bb   :  { %11703 = vmatpush1.bf16.msra.mxu1 %v11702_v15  ;;  %v3752_v15 = vld [vmem:[%s23928_s3 + $0x9d8] sm:$0xff]  ;;  %v3914_v0 = vld [vmem:[%s23928_s3 + $0xee8] sm:$0xff] }
 0x2bc   :  { %11705 = vmatprep.subr.bf16.mxu1 %v11704_v39  ;;  %v3767_v39 = vld [vmem:[%s23928_s3 + $0xa50] sm:$0xff]  ;;  %v11734_v17 = vpack.c.bf16 %v3752_v15, %v3745_v32  ;;  %v4781_v32 = vld [vmem:[%s23928_s3 + $0x2a00] sm:$0xff]  ;;  %v4788_v15 = vld [vmem:[%s23928_s3 + $0x2a38] sm:$0xff] }
 0x2bd   :  { %v11736_v18 = vpack.c.bf16 %v3767_v39, %v3760_v16  ;;  %v12030_v16 = vpack.c.bf16 %v4788_v15, %v4781_v32  ;;  %v3927_v32 = vld [vmem:[%s23928_s3 + $0xf50] sm:$0xff]  ;;  %v3934_v15 = vld [vmem:[%s23928_s3 + $0xf88] sm:$0xff] }
 0x2bf   :  { %11707 = vmatpush1.bf16.msra.mxu1 %v11706_v49  ;;  %v3781_v49 = vld [vmem:[%s23928_s3 + $0xac0] sm:$0xff] }
 0x2c0   :  { %11709 = vmatprep.subr.bf16.mxu1 %v11708_v28  ;;  %v11740_v28 = vpack.c.bf16 %v3781_v49, %v3774_v26  ;;  %v3864_v26 = vld [vmem:[%s23928_s3 + $0xd58] sm:$0xff] }
 0x2c1   :  { %v3872_v49 = vld [vmem:[%s23928_s3 + $0xd98] sm:$0xff] }
 0x2c2   :  { %4915 = vmatmul.mubr.f32.vlgmr.msra.gmra.mrb[10].mxu1 %v18006_v55 }
 0x2c3   :  { %11711 = vmatpush1.bf16.msra.mxu1 %v11710_v36  ;;  %4985 = vmatprep.mubr.f32.mxu1 %v18014_v42  ;;  %v11744_v36 = vpack.c.bf16 %v3795_v35, %v3788_v34  ;;  %v4795_v34 = vld [vmem:[%s23928_s3 + $0x2a70] sm:$0xff]  ;;  %v4802_v35 = vld [vmem:[%s23928_s3 + $0x2aa8] sm:$0xff] }
 0x2c4   :  { %11713 = vmatprep.subr.bf16.mxu1 %v11712_v38  ;;  %v3787_v38 = vld [vmem:[%s23928_s3 + $0xaf0] sm:$0xff] }
 0x2c5   :  { %v11746_v44 = vpack.c.bf16 %v3794_v40, %v3787_v38  ;;  %v3440_v38 = vld [vmem:[%s23928_s3 + $0x18] sm:$0xff]  ;;  %v1342_v40 = vrot.slane %v17670_v20, %v18187_v22 }
 0x2c7   :  { %11715 = vmatpush1.bf16.msra.mxu1 %v11714_v46  ;;  %v11748_v46 = vpack.c.bf16 %v3809_v43, %v3802_v7  ;;  %v11768_v7 = vpack.c.bf16 %v3879_v30, %v3872_v49  ;;  %v3871_v43 = vld [vmem:[%s23928_s3 + $0xd90] sm:$0xff]  ;;  %v3956_v49 = vld [vmem:[%s23928_s3 + $0x1038] sm:$0xff] }
 0x2c8   :  { %11717 = vmatprep.subr.bf16.mxu1 %v11716_v47  ;;  %v3801_v47 = vld [vmem:[%s23928_s3 + $0xb60] sm:$0xff] }
 0x2c9   :  { %v11750_v52 = vpack.c.bf16 %v3808_v48, %v3801_v47  ;;  %v3886_v48 = vld [vmem:[%s23928_s3 + $0xe08] sm:$0xff] }
 0x2cb   :  { %11719 = vmatpush1.bf16.msra.mxu1 %v11718_v53  ;;  %v11752_v53 = vpack.c.bf16 %v3823_v51, %v3816_v50  ;;  %v3893_v50 = vld [vmem:[%s23928_s3 + $0xe40] sm:$0xff] }
 0x2cc   :  { %11721 = vmatprep.subr.bf16.mxu1 %v11720_v54  ;;  %v3815_v54 = vld [vmem:[%s23928_s3 + $0xbd0] sm:$0xff] }
 0x2cd   :  { %v11754_v4 = vpack.c.bf16 %v3822_v56, %v3815_v54  ;;  %v11772_v54 = vpack.c.bf16 %v3893_v50, %v3886_v48  ;;  %v3892_v56 = vld [vmem:[%s23928_s3 + $0xe38] sm:$0xff]  ;;  %v3983_v50 = vld [vmem:[%s23928_s3 + $0x1110] sm:$0xff] }
 0x2cf   :  { %11723 = vmatpush1.bf16.msra.mxu1 %v11722_v58  ;;  %v11756_v58 = vpack.c.bf16 %v3837_v25, %v3830_v57  ;;  %v3900_v25 = vld [vmem:[%s23928_s3 + $0xe78] sm:$0xff] }
 0x2d0   :  { %11725 = vmatprep.subr.bf16.mxu1 %v11724_v24  ;;  %v3829_v24 = vld [vmem:[%s23928_s3 + $0xc40] sm:$0xff] }
 0x2d1   :  { %v11758_v1 = vpack.c.bf16 %v3836_v59, %v3829_v24  ;;  %v3899_v59 = vld [vmem:[%s23928_s3 + $0xe70] sm:$0xff] }
 0x2d3   :  { %11727 = vmatpush1.bf16.msra.mxu1 %v11726_v2  ;;  %v3843_v2 = vld [vmem:[%s23928_s3 + $0xcb0] sm:$0xff] }
 0x2d4   :  { %11729 = vmatprep.subr.bf16.mxu1 %v11728_v6  ;;  %v4782_v6 = vld [vmem:[%s23928_s3 + $0x2a08] sm:$0xff]  ;;  %v11762_v39 = vpack.c.bf16 %v3850_v9, %v3843_v2  ;;  %v3920_v9 = vld [vmem:[%s23928_s3 + $0xf18] sm:$0xff] }
 0x2d7   :  { %11731 = vmatpush1.bf16.msra.mxu1 %v11730_v14  ;;  %v3865_v14 = vld [vmem:[%s23928_s3 + $0xd60] sm:$0xff] }
 0x2d8   :  { %11733 = vmatprep.subr.bf16.mxu1 %v11732_v29  ;;  %v12028_v29 = vpack.c.bf16 %v4789_v13, %v4782_v6  ;;  %v11764_v23 = vpack.c.bf16 %v3865_v14, %v3858_v12  ;;  %v3928_v12 = vld [vmem:[%s23928_s3 + $0xf58] sm:$0xff]  ;;  %v3935_v13 = vld [vmem:[%s23928_s3 + $0xf90] sm:$0xff] }
 0x2da   :  { %12029 = vmatprep.subr.bf16.mxu0 %v12028_v29  ;;  %v11784_v29 = vpack.c.bf16 %v3935_v13, %v3928_v12  ;;  %v4040_v12 = vld [vmem:[%s23928_s3 + $0x12d8] sm:$0xff]  ;;  %v4047_v13 = vld [vmem:[%s23928_s3 + $0x1310] sm:$0xff] }
 0x2db   :  { %11735 = vmatpush1.bf16.msra.mxu1 %v11734_v17  ;;  %v3857_v17 = vld [vmem:[%s23928_s3 + $0xd20] sm:$0xff]  ;;  %12031 = vmatpush1.bf16.msra.mxu0 %v12030_v16  ;;  %v3942_v16 = vld [vmem:[%s23928_s3 + $0xfc8] sm:$0xff] }
 0x2dc   :  { %11737 = vmatprep.subr.bf16.mxu1 %v11736_v18  ;;  %v4796_v18 = vld [vmem:[%s23928_s3 + $0x2a78] sm:$0xff] }
 0x2df   :  { %11739 = vmatpush1.bf16.msra.mxu1 %v11738_v27  ;;  %v4803_v27 = vld [vmem:[%s23928_s3 + $0x2ab0] sm:$0xff] }
 0x2e0   :  { %11741 = vmatprep.subr.bf16.mxu1 %v11740_v28  ;;  %v18199_v28 = vsub.s32 5, %v14073_v61  ;;  %v12032_v33 = vpack.c.bf16 %v4803_v27, %v4796_v18  ;;  %v3963_v27 = vld [vmem:[%s23928_s3 + $0x1070] sm:$0xff] }
 0x2e2   :  { %12033 = vmatprep.subr.bf16.mxu0 %v12032_v33  ;;  %v1354_v47 = vrot.slane %v17670_v20, %v18199_v28  ;;  %v3885_v20 = vld [vmem:[%s23928_s3 + $0xe00] sm:$0xff]  ;;  %v11792_v33 = vpack.c.bf16 %v3963_v27, %v3956_v49  ;;  %v4060_v49 = vld [vmem:[%s23928_s3 + $0x1378] sm:$0xff] }
 0x2e3   :  { %11743 = vmatpush1.bf16.msra.mxu1 %v11742_v60  ;;  %v12034_v60 = vpack.c.bf16 %v4802_v35, %v4795_v34  ;;  %v3955_v34 = vld [vmem:[%s23928_s3 + $0x1030] sm:$0xff]  ;;  %v3962_v35 = vld [vmem:[%s23928_s3 + $0x1068] sm:$0xff] }
 0x2e4   :  { %11745 = vmatprep.subr.bf16.mxu1 %v11744_v36  ;;  %v11766_v36 = vpack.c.bf16 %v3864_v26, %v3857_v17  ;;  %v13608_v57 = vadd.f32 %v17588_v37, %v1354_v47  ;;  %v3906_v37 = vld [vmem:[%s23928_s3 + $0xea8] sm:$0xff]  ;;  %v11786_v17 = vpack.c.bf16 %v3934_v15, %v3927_v32  ;;  %v3948_v26 = vld [vmem:[%s23928_s3 + $0xff8] sm:$0xff]  ;;  %v4039_v32 = vld [vmem:[%s23928_s3 + $0x12d0] sm:$0xff] }
 0x2e5   :  { %12035 = vmatpush1.bf16.msra.mxu0 %v12034_v60  ;;  %v11778_v2 = vpack.c.bf16 %v3906_v37, %v3899_v59  ;;  %v3970_v60 = vld [vmem:[%s23928_s3 + $0x10a8] sm:$0xff]  ;;  %v4011_v59 = vld [vmem:[%s23928_s3 + $0x11f0] sm:$0xff] }
 0x2e6   :  { %v18254_v62 = vmax.f32 %v13608_v57, 0.0  ;;  %v4004_v57 = vld [vmem:[%s23928_s3 + $0x11b8] sm:$0xff]  ;;  %v4018_v37 = vld [vmem:[%s23928_s3 + $0x1228] sm:$0xff] }
 0x2e7   :  { %11747 = vmatpush1.bf16.msra.mxu1 %v11746_v44  ;;  %v3878_v44 = vld [vmem:[%s23928_s3 + $0xdc8] sm:$0xff] }
 0x2e8   :  { %11749 = vmatprep.subr.bf16.mxu1 %v11748_v46  ;;  %v3447_v46 = vld [vmem:[%s23928_s3 + $0x50] sm:$0xff]  ;;  %v4046_v15 = vld [vmem:[%s23928_s3 + $0x1308] sm:$0xff] }
 0x2e9   :  { %v12036_v51 = vpack.c.bf16 %v3447_v46, %v3440_v38  ;;  %v11794_v38 = vpack.c.bf16 %v3962_v35, %v3955_v34  ;;  %v3991_v46 = vld [vmem:[%s23928_s3 + $0x1150] sm:$0xff] }
 0x2eb   :  { %11751 = vmatpush1.bf16.msra.mxu1 %v11750_v52  ;;  %v11770_v52 = vpack.c.bf16 %v3878_v44, %v3871_v43  ;;  %12037 = vmatprep.subr.bf16.mxu0 %v12036_v51  ;;  %v3976_v43 = vld [vmem:[%s23928_s3 + $0x10d8] sm:$0xff]  ;;  %v3990_v51 = vld [vmem:[%s23928_s3 + $0x1148] sm:$0xff] }
 0x2ec   :  { %11753 = vmatprep.subr.bf16.mxu1 %v11752_v53  ;;  %v13605_v53 = vadd.f32 %v16384_v3, %v1342_v40  ;;  %v3907_v3 = vld [vmem:[%s23928_s3 + $0xeb0] sm:$0xff]  ;;  %v3984_v44 = vld [vmem:[%s23928_s3 + $0x1118] sm:$0xff] }
 0x2ed   :  { %v11776_v24 = vpack.c.bf16 %v3907_v3, %v3900_v25  ;;  %v11800_v48 = vpack.c.bf16 %v3991_v46, %v3984_v44  ;;  %v4012_v25 = vld [vmem:[%s23928_s3 + $0x11f8] sm:$0xff]  ;;  %v4019_v3 = vld [vmem:[%s23928_s3 + $0x1230] sm:$0xff] }
 0x2ef   :  { %11755 = vmatpush1.bf16.msra.mxu1 %v11754_v4  ;;  %v11774_v4 = vpack.c.bf16 %v3892_v56, %v3885_v20  ;;  %v3997_v56 = vld [vmem:[%s23928_s3 + $0x1180] sm:$0xff] }
 0x2f0   :  { %11757 = vmatprep.subr.bf16.mxu1 %v11756_v58  ;;  %v18246_v58 = vmax.f32 %v13605_v53, 0.0  ;;  %v4005_v53 = vld [vmem:[%s23928_s3 + $0x11c0] sm:$0xff] }
 0x2f3   :  { %11759 = vmatpush1.bf16.msra.mxu1 %v11758_v1  ;;  %v3921_v1 = vld [vmem:[%s23928_s3 + $0xf20] sm:$0xff] }
 0x2f4   :  { %11761 = vmatprep.subr.bf16.mxu1 %v11760_v8  ;;  %v11780_v6 = vpack.c.bf16 %v3921_v1, %v3914_v0  ;;  %v3913_v8 = vld [vmem:[%s23928_s3 + $0xee0] sm:$0xff]  ;;  %v4026_v0 = vld [vmem:[%s23928_s3 + $0x1268] sm:$0xff] }
 0x2f5   :  { %v11782_v14 = vpack.c.bf16 %v3920_v9, %v3913_v8  ;;  %v4033_v1 = vld [vmem:[%s23928_s3 + $0x12a0] sm:$0xff]  ;;  %v4032_v9 = vld [vmem:[%s23928_s3 + $0x1298] sm:$0xff] }
 0x2f6   :  { %v4025_v8 = vld [vmem:[%s23928_s3 + $0x1260] sm:$0xff] }
 0x2f7   :  { %11763 = vmatpush1.bf16.msra.mxu1 %v11762_v39  ;;  %v3949_v39 = vld [vmem:[%s23928_s3 + $0x1000] sm:$0xff] }
 0x2f8   :  { %11765 = vmatprep.subr.bf16.mxu1 %v11764_v23  ;;  %v11788_v18 = vpack.c.bf16 %v3949_v39, %v3942_v16  ;;  %v3941_v23 = vld [vmem:[%s23928_s3 + $0xfc0] sm:$0xff]  ;;  %v4054_v16 = vld [vmem:[%s23928_s3 + $0x1348] sm:$0xff] }
 0x2f9   :  { %v11790_v30 = vpack.c.bf16 %v3948_v26, %v3941_v23  ;;  %v4061_v39 = vld [vmem:[%s23928_s3 + $0x1380] sm:$0xff] }
 0x2fa   :  { %v11820_v23 = vpack.c.bf16 %v4061_v39, %v4054_v16  ;;  %v4053_v26 = vld [vmem:[%s23928_s3 + $0x1340] sm:$0xff]  ;;  %v4124_v16 = vld [vmem:[%s23928_s3 + $0x1578] sm:$0xff] }
 0x2fb   :  { %11767 = vmatpush1.bf16.msra.mxu1 %v11766_v36  ;;  %v3977_v36 = vld [vmem:[%s23928_s3 + $0x10e0] sm:$0xff] }
 0x2fc   :  { %11769 = vmatprep.subr.bf16.mxu1 %v11768_v7  ;;  %v11796_v40 = vpack.c.bf16 %v3977_v36, %v3970_v60  ;;  %v3969_v7 = vld [vmem:[%s23928_s3 + $0x10a0] sm:$0xff]  ;;  %v11822_v60 = vpack.c.bf16 %v4060_v49, %v4053_v26  ;;  %v4123_v26 = vld [vmem:[%s23928_s3 + $0x1570] sm:$0xff] }
 0x2fd   :  { %v11798_v47 = vpack.c.bf16 %v3976_v43, %v3969_v7  ;;  %v4074_v7 = vld [vmem:[%s23928_s3 + $0x13e8] sm:$0xff] }
 0x2ff   :  { %11771 = vmatpush1.bf16.msra.mxu1 %v11770_v52  ;;  %v3998_v52 = vld [vmem:[%s23928_s3 + $0x1188] sm:$0xff] }
 0x300   :  { %11773 = vmatprep.subr.bf16.mxu1 %v11772_v54  ;;  %v11802_v54 = vpack.c.bf16 %v3990_v51, %v3983_v50  ;;  %v11804_v20 = vpack.c.bf16 %v4005_v53, %v3998_v52 }
 0x302   :  { %4986 = vmatmul.mubr.f32.vlgmr.msra.gmra.mrb[10].mxu1 %v18246_v58 }
 0x303   :  { %11775 = vmatpush1.bf16.msra.mxu1 %v11774_v4  ;;  %5056 = vmatprep.mubr.f32.mxu1 %v18254_v62  ;;  %v11806_v4 = vpack.c.bf16 %v4004_v57, %v3997_v56  ;;  %v4081_v56 = vld [vmem:[%s23928_s3 + $0x1420] sm:$0xff]  ;;  %v4088_v57 = vld [vmem:[%s23928_s3 + $0x1458] sm:$0xff] }
 0x304   :  { %11777 = vmatprep.subr.bf16.mxu1 %v11776_v24  ;;  %v11808_v24 = vpack.c.bf16 %v4019_v3, %v4012_v25  ;;  %v1361_v25 = vsub.s32 7, %v14073_v61  ;;  %v4096_v3 = vld [vmem:[%s23928_s3 + $0x1498] sm:$0xff] }
 0x307   :  { %11779 = vmatpush1.bf16.msra.mxu1 %v11778_v2  ;;  %v11810_v2 = vpack.c.bf16 %v4018_v37, %v4011_v59  ;;  %v18446_v59 = vld [vmem:[%s23927_s2] sm:$0xff] }
 0x308   :  { %11781 = vmatprep.subr.bf16.mxu1 %v11780_v6  ;;  %v11812_v6 = vpack.c.bf16 %v4033_v1, %v4026_v0  ;;  %v4095_v1 = vld [vmem:[%s23928_s3 + $0x1490] sm:$0xff] }
 0x30b   :  { %11783 = vmatpush1.bf16.msra.mxu1 %v11782_v14  ;;  %v11814_v14 = vpack.c.bf16 %v4032_v9, %v4025_v8  ;;  %v4110_v8 = vld [vmem:[%s23928_s3 + $0x1508] sm:$0xff]  ;;  %v4117_v9 = vld [vmem:[%s23928_s3 + $0x1540] sm:$0xff] }
 0x30c   :  { %11785 = vmatprep.subr.bf16.mxu1 %v11784_v29  ;;  %v11816_v29 = vpack.c.bf16 %v4047_v13, %v4040_v12 }
 0x30f   :  { %11787 = vmatpush1.bf16.msra.mxu1 %v11786_v17  ;;  %v18387_v17 = vld [vmem:[%s23927_s2 + $0x8] sm:$0x1f] }
 0x310   :  { %11789 = vmatprep.subr.bf16.mxu1 %v11788_v18  ;;  %v11818_v18 = vpack.c.bf16 %v4046_v15, %v4039_v32  ;;  %v1366_v27 = vrot.slane %v18387_v17, %v17959_v10  ;;  %v1374_v34 = vrot.slane %v18387_v17, %v18187_v22  ;;  %v1378_v35 = vrot.slane %v18387_v17, %v17968_v63  ;;  %v4116_v32 = vld [vmem:[%s23928_s3 + $0x1538] sm:$0xff] }
 0x313   :  { %11791 = vmatpush1.bf16.msra.mxu1 %v11790_v30  ;;  %v4068_v30 = vld [vmem:[%s23928_s3 + $0x13b8] sm:$0xff] }
 0x314   :  { %11793 = vmatprep.subr.bf16.mxu1 %v11792_v33  ;;  %v4075_v33 = vld [vmem:[%s23928_s3 + $0x13f0] sm:$0xff] }
 0x317   :  { %11795 = vmatpush1.bf16.msra.mxu1 %v11794_v38  ;;  %v11824_v38 = vpack.c.bf16 %v4075_v33, %v4068_v30  ;;  %v4145_v30 = vld [vmem:[%s23928_s3 + $0x1620] sm:$0xff] }
 0x318   :  { %11797 = vmatprep.subr.bf16.mxu1 %v11796_v40  ;;  %v4067_v40 = vld [vmem:[%s23928_s3 + $0x13b0] sm:$0xff] }
 0x319   :  { %v11826_v53 = vpack.c.bf16 %v4074_v7, %v4067_v40 }
 0x31b   :  { %11799 = vmatpush1.bf16.msra.mxu1 %v11798_v47  ;;  %v4082_v47 = vld [vmem:[%s23928_s3 + $0x1428] sm:$0xff] }
 0x31c   :  { %11801 = vmatprep.subr.bf16.mxu1 %v11800_v48  ;;  %v4089_v48 = vld [vmem:[%s23928_s3 + $0x1460] sm:$0xff] }
 0x31f   :  { %11803 = vmatpush1.bf16.msra.mxu1 %v11802_v54  ;;  %v18428_v54 = vsub.s32 4, %v14073_v61 }
 0x320   :  { %11805 = vmatprep.subr.bf16.mxu1 %v11804_v20  ;;  %v11828_v20 = vpack.c.bf16 %v4089_v48, %v4082_v47  ;;  %v4158_v47 = vld [vmem:[%s23928_s3 + $0x1688] sm:$0xff] }
 0x321   :  { %v1350_v37 = vrot.slane %v18446_v59, %v18428_v54  ;;  %v4166_v48 = vld [vmem:[%s23928_s3 + $0x16c8] sm:$0xff] }
 0x323   :  { %11807 = vmatpush1.bf16.msra.mxu1 %v11806_v4  ;;  %v4103_v4 = vld [vmem:[%s23928_s3 + $0x14d0] sm:$0xff]  ;;  %v13607_v13 = vadd.f32 %v17575_v31, %v1350_v37  ;;  %v1382_v37 = vrot.slane %v18387_v17, %v18428_v54 }
 0x324   :  { %11809 = vmatprep.subr.bf16.mxu1 %v11808_v24  ;;  %v11830_v24 = vpack.c.bf16 %v4088_v57, %v4081_v56  ;;  %v11832_v0 = vpack.c.bf16 %v4103_v4, %v4096_v3  ;;  %v4131_v31 = vld [vmem:[%s23928_s3 + $0x15b0] sm:$0xff]  ;;  %v4165_v56 = vld [vmem:[%s23928_s3 + $0x16c0] sm:$0xff]  ;;  %v4172_v57 = vld [vmem:[%s23928_s3 + $0x16f8] sm:$0xff] }
 0x325   :  { %v4187_v3 = vld [vmem:[%s23928_s3 + $0x1770] sm:$0xff]  ;;  %v11854_v4 = vpack.c.bf16 %v4172_v57, %v4165_v56  ;;  %v4242_v57 = vld [vmem:[%s23928_s3 + $0x1928] sm:$0xff] }
 0x326   :  { %v4235_v56 = vld [vmem:[%s23928_s3 + $0x18f0] sm:$0xff] }
 0x327   :  { %11811 = vmatpush1.bf16.msra.mxu1 %v11810_v2  ;;  %v4102_v2 = vld [vmem:[%s23928_s3 + $0x14c8] sm:$0xff] }
 0x328   :  { %11813 = vmatprep.subr.bf16.mxu1 %v11812_v6  ;;  %v1362_v6 = vrot.slane %v18446_v59, %v1361_v25  ;;  %v11834_v12 = vpack.c.bf16 %v4102_v2, %v4095_v1  ;;  %v4180_v25 = vld [vmem:[%s23928_s3 + $0x1738] sm:$0xff]  ;;  %v4179_v1 = vld [vmem:[%s23928_s3 + $0x1730] sm:$0xff]  ;;  %v4186_v2 = vld [vmem:[%s23928_s3 + $0x1768] sm:$0xff] }
 0x32a   :  { %v13610_v15 = vadd.f32 %v17596_v41, %v1362_v6  ;;  %v4130_v41 = vld [vmem:[%s23928_s3 + $0x15a8] sm:$0xff] }
 0x32b   :  { %11815 = vmatpush1.bf16.msra.mxu1 %v11814_v14  ;;  %v11836_v14 = vpack.c.bf16 %v4117_v9, %v4110_v8  ;;  %v11842_v33 = vpack.c.bf16 %v4130_v41, %v4123_v26  ;;  %v4194_v9 = vld [vmem:[%s23928_s3 + $0x17a8] sm:$0xff]  ;;  %v4215_v26 = vld [vmem:[%s23928_s3 + $0x1850] sm:$0xff] }
 0x32c   :  { %11817 = vmatprep.subr.bf16.mxu1 %v11816_v29  ;;  %v4109_v29 = vld [vmem:[%s23928_s3 + $0x1500] sm:$0xff]  ;;  %v18485_v49 = vmax.f32 %v13610_v15, 0.0 }
 0x32d   :  { %v11838_v39 = vpack.c.bf16 %v4116_v32, %v4109_v29  ;;  %v11858_v32 = vpack.c.bf16 %v4186_v2, %v4179_v1  ;;  %v4264_v1 = vld [vmem:[%s23928_s3 + $0x19d8] sm:$0xff]  ;;  %v4271_v2 = vld [vmem:[%s23928_s3 + $0x1a10] sm:$0xff] }
 0x32f   :  { %11819 = vmatpush1.bf16.msra.mxu1 %v11818_v18  ;;  %v18477_v18 = vmax.f32 %v13607_v13, 0.0 }
 0x330   :  { %v2855_v36 = vpop.f32.mrb[4].mxu0  ;;  %11821 = vmatprep.subr.bf16.mxu1 %v11820_v23  ;;  %v11840_v23 = vpack.c.bf16 %v4131_v31, %v4124_v16  ;;  %v4193_v31 = vld [vmem:[%s23928_s3 + $0x17a0] sm:$0xff] }
 0x331   :  { %v18413_v43 = vadd.f32 %v2855_v36, %v1366_v27  ;;  %v3139_v44 = vpop.f32.mrb[4].mxu1  ;;  %v18415_v46 = vpop.f32.mrb[5].mxu0  ;;  %v4138_v27 = vld [vmem:[%s23928_s3 + $0x15e8] sm:$0xff]  ;;  %v4152_v36 = vld [vmem:[%s23928_s3 + $0x1658] sm:$0xff] }
 0x332   :  { %v18423_v50 = vadd.f32 %v3139_v44, %v1374_v34  ;;  %v3141_v51 = vpop.f32.mrb[5].mxu1  ;;  %v11844_v34 = vpack.c.bf16 %v4145_v30, %v4138_v27  ;;  %v4151_v44 = vld [vmem:[%s23928_s3 + $0x1650] sm:$0xff] }
 0x333   :  { %v18425_v52 = vadd.f32 %v3141_v51, %v1378_v35  ;;  %11823 = vmatpush1.bf16.msra.mxu1 %v11822_v60  ;;  %v4137_v35 = vld [vmem:[%s23928_s3 + $0x15e0] sm:$0xff]  ;;  %v4144_v60 = vld [vmem:[%s23928_s3 + $0x1618] sm:$0xff] }
 0x334   :  { %11825 = vmatprep.subr.bf16.mxu1 %v11824_v38  ;;  %v4159_v38 = vld [vmem:[%s23928_s3 + $0x1690] sm:$0xff]  ;;  %v11846_v40 = vpack.c.bf16 %v4144_v60, %v4137_v35  ;;  %v4173_v51 = vld [vmem:[%s23928_s3 + $0x1700] sm:$0xff]  ;;  %v4214_v60 = vld [vmem:[%s23928_s3 + $0x1848] sm:$0xff] }
 0x335   :  { %v11848_v7 = vpack.c.bf16 %v4159_v38, %v4152_v36  ;;  %v4207_v35 = vld [vmem:[%s23928_s3 + $0x1810] sm:$0xff]  ;;  %v4222_v36 = vld [vmem:[%s23928_s3 + $0x1888] sm:$0xff]  ;;  %v4229_v38 = vld [vmem:[%s23928_s3 + $0x18c0] sm:$0xff] }
 0x337   :  { %11827 = vmatpush1.bf16.msra.mxu1 %v11826_v53  ;;  %v11850_v53 = vpack.c.bf16 %v4158_v47, %v4151_v44  ;;  %v4221_v44 = vld [vmem:[%s23928_s3 + $0x1880] sm:$0xff]  ;;  %v4228_v47 = vld [vmem:[%s23928_s3 + $0x18b8] sm:$0xff] }
 0x338   :  { %11829 = vmatprep.subr.bf16.mxu1 %v11828_v20  ;;  %v11852_v20 = vpack.c.bf16 %v4173_v51, %v4166_v48  ;;  %v4236_v48 = vld [vmem:[%s23928_s3 + $0x18f8] sm:$0xff]  ;;  %v4243_v51 = vld [vmem:[%s23928_s3 + $0x1930] sm:$0xff] }
 0x33b   :  { %11831 = vmatpush1.bf16.msra.mxu1 %v11830_v24 }
 0x33c   :  { %11833 = vmatprep.subr.bf16.mxu1 %v11832_v0  ;;  %v11856_v0 = vpack.c.bf16 %v4187_v3, %v4180_v25  ;;  %v4250_v25 = vld [vmem:[%s23928_s3 + $0x1968] sm:$0xff]  ;;  %v4257_v3 = vld [vmem:[%s23928_s3 + $0x19a0] sm:$0xff] }
 0x33f   :  { %11835 = vmatpush1.bf16.msra.mxu1 %v11834_v12  ;;  %v4201_v12 = vld [vmem:[%s23928_s3 + $0x17e0] sm:$0xff] }
 0x340   :  { %11837 = vmatprep.subr.bf16.mxu1 %v11836_v14  ;;  %v11860_v16 = vpack.c.bf16 %v4201_v12, %v4194_v9  ;;  %v4263_v9 = vld [vmem:[%s23928_s3 + $0x19d0] sm:$0xff]  ;;  %v4270_v12 = vld [vmem:[%s23928_s3 + $0x1a08] sm:$0xff] }
 0x342   :  { %5057 = vmatmul.mubr.f32.vlgmr.msra.gmra.mrb[10].mxu1 %v18477_v18 }
 0x343   :  { %11839 = vmatpush1.bf16.msra.mxu1 %v11838_v39  ;;  %5127 = vmatprep.mubr.f32.mxu1 %v18485_v49  ;;  %v4200_v39 = vld [vmem:[%s23928_s3 + $0x17d8] sm:$0xff] }
 0x344   :  { %11841 = vmatprep.subr.bf16.mxu1 %v11840_v23  ;;  %v4208_v23 = vld [vmem:[%s23928_s3 + $0x1818] sm:$0xff] }
 0x347   :  { %11843 = vmatpush1.bf16.msra.mxu1 %v11842_v33  ;;  %v11862_v33 = vpack.c.bf16 %v4200_v39, %v4193_v31  ;;  %v4292_v31 = vld [vmem:[%s23928_s3 + $0x1ab8] sm:$0xff]  ;;  %v4299_v39 = vld [vmem:[%s23928_s3 + $0x1af0] sm:$0xff] }
 0x348   :  { %11845 = vmatprep.subr.bf16.mxu1 %v11844_v34  ;;  %v11864_v34 = vpack.c.bf16 %v4215_v26, %v4208_v23 }
 0x34b   :  { %11847 = vmatpush1.bf16.msra.mxu1 %v11846_v40  ;;  %v11866_v40 = vpack.c.bf16 %v4214_v60, %v4207_v35  ;;  %v4306_v60 = vld [vmem:[%s23928_s3 + $0x1b28] sm:$0xff] }
 0x34c   :  { %11849 = vmatprep.subr.bf16.mxu1 %v11848_v7  ;;  %v11868_v7 = vpack.c.bf16 %v4229_v38, %v4222_v36  ;;  %v4313_v36 = vld [vmem:[%s23928_s3 + $0x1b60] sm:$0xff] }
 0x34f   :  { %11851 = vmatpush1.bf16.msra.mxu1 %v11850_v53  ;;  %v11870_v53 = vpack.c.bf16 %v4228_v47, %v4221_v44  ;;  %v18649_v44 = vsub.s32 6, %v14073_v61  ;;  %v4320_v61 = vld [vmem:[%s23928_s3 + $0x1b98] sm:$0xff] }
 0x350   :  { %v9592_v24 = vpop.f32.mrb[6].mxu0  ;;  %11853 = vmatprep.subr.bf16.mxu1 %v11852_v20  ;;  %v11872_v20 = vpack.c.bf16 %v4243_v51, %v4236_v48  ;;  %v11892_v48 = vpack.c.bf16 %v4313_v36, %v4306_v60  ;;  %v4312_v51 = vld [vmem:[%s23928_s3 + $0x1b58] sm:$0xff] }
 0x351   :  { %v9593_v6 = vpop.f32.mrb[7].mxu0  ;;  %v9627_v8 = vpop.f32.mrb[6].mxu1 }
 0x352   :  { %v9594_v13 = vadd.f32 %v9593_v6, %v9592_v24  ;;  %v9628_v14 = vpop.f32.mrb[7].mxu1  ;;  %v11876_v24 = vpack.c.bf16 %v4257_v3, %v4250_v25  ;;  %v3461_v25 = vld [vmem:[%s23928_s3 + $0xc0] sm:$0xff] }
 0x353   :  { %11855 = vmatpush1.bf16.msra.mxu1 %v11854_v4  ;;  %v9629_v29 = vadd.f32 %v9628_v14, %v9627_v8  ;;  %v11874_v4 = vpack.c.bf16 %v4242_v57, %v4235_v56  ;;  %v11880_v8 = vpack.c.bf16 %v4271_v2, %v4264_v1  ;;  %v4285_v14 = vld [vmem:[%s23928_s3 + $0x1a80] sm:$0xff]  ;;  %v3454_v57 = vld [vmem:[%s23928_s3 + $0x88] sm:$0xff] }
 0x354   :  { %v3211_v15 = vadd.f32 %v9594_v13, %v1382_v37  ;;  %11857 = vmatprep.subr.bf16.mxu1 %v11856_v0  ;;  %v4249_v37 = vld [vmem:[%s23928_s3 + $0x1960] sm:$0xff]  ;;  %v4256_v0 = vld [vmem:[%s23928_s3 + $0x1998] sm:$0xff]  ;;  %v4278_v13 = vld [vmem:[%s23928_s3 + $0x1a48] sm:$0xff] }
 0x355   :  { %v18557_v41 = vpop.f32.mrb[8].mxu1  ;;  %v11878_v6 = vpack.c.bf16 %v4256_v0, %v4249_v37  ;;  %v1358_v37 = vrot.slane %v18446_v59, %v18649_v44  ;;  %v3453_v2 = vld [vmem:[%s23928_s3 + $0x80] sm:$0xff]  ;;  %v12040_v59 = vpack.c.bf16 %v3461_v25, %v3454_v57 }
 0x356   :  { %v18559_v27 = vadd.f32 %v9629_v29, %v3211_v15  ;;  %v10276_v30 = vpop.f32.mrb[9].mxu1  ;;  %v11882_v29 = vpack.c.bf16 %v4270_v12, %v4263_v9  ;;  %v4277_v15 = vld [vmem:[%s23928_s3 + $0x1a40] sm:$0xff]  ;;  %v1370_v9 = vrot.slane %v18387_v17, %v17665_v19 }
 0x357   :  { %11859 = vmatpush1.bf16.msra.mxu1 %v11858_v32  ;;  %v11884_v32 = vpack.c.bf16 %v4285_v14, %v4278_v13  ;;  %v11888_v30 = vpack.c.bf16 %v4299_v39, %v4292_v31  ;;  %v4341_v12 = vld [vmem:[%s23928_s3 + $0x1c40] sm:$0xff]  ;;  %v3468_v13 = vld [vmem:[%s23928_s3 + $0xf8] sm:$0xff]  ;;  %v3475_v14 = vld [vmem:[%s23928_s3 + $0x130] sm:$0xff] }
 0x358   :  { %11861 = vmatprep.subr.bf16.mxu1 %v11860_v16  ;;  %v4284_v16 = vld [vmem:[%s23928_s3 + $0x1a78] sm:$0xff]  ;;  %v4333_v31 = vld [vmem:[%s23928_s3 + $0x1c00] sm:$0xff] }
 0x359   :  { %v11886_v23 = vpack.c.bf16 %v4284_v16, %v4277_v15  ;;  %v12044_v16 = vpack.c.bf16 %v3475_v14, %v3468_v13  ;;  %v4340_v39 = vld [vmem:[%s23928_s3 + $0x1c38] sm:$0xff]  ;;  %v4375_v14 = vld [vmem:[%s23928_s3 + $0x1d50] sm:$0xff] }
 0x35b   :  { %11863 = vmatpush1.bf16.msra.mxu1 %v11862_v33  ;;  %v4291_v33 = vld [vmem:[%s23928_s3 + $0x1ab0] sm:$0xff] }
 0x35c   :  { %11865 = vmatprep.subr.bf16.mxu1 %v11864_v34  ;;  %v4298_v34 = vld [vmem:[%s23928_s3 + $0x1ae8] sm:$0xff] }
 0x35f   :  { %11867 = vmatpush1.bf16.msra.mxu1 %v11866_v40  ;;  %v11890_v40 = vpack.c.bf16 %v4298_v34, %v4291_v33  ;;  %v4355_v33 = vld [vmem:[%s23928_s3 + $0x1cb0] sm:$0xff]  ;;  %v3482_v34 = vld [vmem:[%s23928_s3 + $0x168] sm:$0xff] }
 0x360   :  { %11869 = vmatprep.subr.bf16.mxu1 %v11868_v7  ;;  %v4305_v7 = vld [vmem:[%s23928_s3 + $0x1b20] sm:$0xff] }
 0x361   :  { %v11894_v3 = vpack.c.bf16 %v4312_v51, %v4305_v7  ;;  %v4354_v7 = vld [vmem:[%s23928_s3 + $0x1ca8] sm:$0xff] }
 0x363   :  { %11871 = vmatpush1.bf16.msra.mxu1 %v11870_v53  ;;  %v3439_v53 = vld [vmem:[%s23928_s3 + $0x10] sm:$0xff] }
 0x364   :  { %11873 = vmatprep.subr.bf16.mxu1 %v11872_v20  ;;  %v3446_v20 = vld [vmem:[%s23928_s3 + $0x48] sm:$0xff] }
 0x367   :  { %11875 = vmatpush1.bf16.msra.mxu1 %v11874_v4  ;;  %v12038_v4 = vpack.c.bf16 %v3446_v20, %v3439_v53  ;;  %v3488_v53 = vld [vmem:[%s23928_s3 + $0x198] sm:$0xff]  ;;  %v4362_v20 = vld [vmem:[%s23928_s3 + $0x1ce8] sm:$0xff] }
 0x368   :  { %11877 = vmatprep.subr.bf16.mxu1 %v11876_v24  ;;  %v4319_v24 = vld [vmem:[%s23928_s3 + $0x1b90] sm:$0xff] }
 0x36b   :  { %11879 = vmatpush1.bf16.msra.mxu1 %v11878_v6  ;;  %v3460_v6 = vld [vmem:[%s23928_s3 + $0xb8] sm:$0xff] }
 0x36c   :  { %11881 = vmatprep.subr.bf16.mxu1 %v11880_v8  ;;  %v4334_v8 = vld [vmem:[%s23928_s3 + $0x1c08] sm:$0xff]  ;;  %v12042_v17 = vpack.c.bf16 %v3460_v6, %v3453_v2  ;;  %v4376_v2 = vld [vmem:[%s23928_s3 + $0x1d58] sm:$0xff]  ;;  %v4383_v6 = vld [vmem:[%s23928_s3 + $0x1d90] sm:$0xff] }
 0x36d   :  { %v11900_v15 = vpack.c.bf16 %v4341_v12, %v4334_v8  ;;  %v3510_v8 = vld [vmem:[%s23928_s3 + $0x248] sm:$0xff]  ;;  %v11912_v13 = vpack.c.bf16 %v4383_v6, %v4376_v2  ;;  %v4417_v6 = vld [vmem:[%s23928_s3 + $0x1ea0] sm:$0xff] }
 0x36f   :  { %11883 = vmatpush1.bf16.msra.mxu1 %v11882_v29 }
 0x370   :  { %v9662_v26 = vpop.f32.mrb[8].mxu0  ;;  %11885 = vmatprep.subr.bf16.mxu1 %v11884_v32  ;;  %v13609_v32 = vadd.f32 %v17586_v11, %v1358_v37  ;;  %v3474_v11 = vld [vmem:[%s23928_s3 + $0x128] sm:$0xff] }
 0x371   :  { %v9663_v35 = vpop.f32.mrb[9].mxu0 }
 0x372   :  { %v9664_v38 = vadd.f32 %v9663_v35, %v9662_v26  ;;  %v13612_v26 = vadd.f32 %v18415_v46, %v1370_v9  ;;  %v3489_v46 = vld [vmem:[%s23928_s3 + $0x1a0] sm:$0xff]  ;;  %v11902_v35 = vpack.c.bf16 %v4340_v39, %v4333_v31  ;;  %v18733_v60 = vmax.f32 %v13609_v32, 0.0  ;;  %v3524_v39 = vld [vmem:[%s23928_s3 + $0x2b8] sm:$0xff] }
 0x373   :  { %11887 = vmatpush1.bf16.msra.mxu1 %v11886_v23  ;;  %v3467_v23 = vld [vmem:[%s23928_s3 + $0xf0] sm:$0xff]  ;;  %v12048_v51 = vpack.c.bf16 %v3489_v46, %v3482_v34  ;;  %v3517_v9 = vld [vmem:[%s23928_s3 + $0x280] sm:$0xff]  ;;  %v4396_v34 = vld [vmem:[%s23928_s3 + $0x1df8] sm:$0xff] }
 0x374   :  { %v3351_v47 = vadd.f32 %v9664_v38, %v18559_v27  ;;  %11889 = vmatprep.subr.bf16.mxu1 %v11888_v30  ;;  %v4327_v27 = vld [vmem:[%s23928_s3 + $0x1bd0] sm:$0xff]  ;;  %v4348_v30 = vld [vmem:[%s23928_s3 + $0x1c78] sm:$0xff]  ;;  %v12046_v36 = vpack.c.bf16 %v3474_v11, %v3467_v23  ;;  %v12056_v32 = vpack.c.bf16 %v3517_v9, %v3510_v8  ;;  %v4397_v31 = vld [vmem:[%s23928_s3 + $0x1e00] sm:$0xff] }
 0x375   :  { %v11896_v1 = vpack.c.bf16 %v4327_v27, %v4320_v61  ;;  %v11904_v38 = vpack.c.bf16 %v4355_v33, %v4348_v30  ;;  %v4369_v61 = vld [vmem:[%s23928_s3 + $0x1d20] sm:$0xff]  ;;  %v3496_v27 = vld [vmem:[%s23928_s3 + $0x1d8] sm:$0xff]  ;;  %v3531_v23 = vld [vmem:[%s23928_s3 + $0x2f0] sm:$0xff] }
 0x376   :  { %v3421_v56 = vadd.f32 %v18557_v41, %v3351_v47  ;;  %v4326_v41 = vld [vmem:[%s23928_s3 + $0x1bc8] sm:$0xff]  ;;  %v3481_v47 = vld [vmem:[%s23928_s3 + $0x160] sm:$0xff]  ;;  %v3523_v46 = vld [vmem:[%s23928_s3 + $0x2b0] sm:$0xff] }
 0x377   :  { %11891 = vmatpush1.bf16.msra.mxu1 %v11890_v40  ;;  %v11898_v29 = vpack.c.bf16 %v4326_v41, %v4319_v24  ;;  %v4347_v40 = vld [vmem:[%s23928_s3 + $0x1c70] sm:$0xff]  ;;  %v12050_v25 = vpack.c.bf16 %v3488_v53, %v3481_v47  ;;  %v4368_v24 = vld [vmem:[%s23928_s3 + $0x1d18] sm:$0xff]  ;;  %v4389_v33 = vld [vmem:[%s23928_s3 + $0x1dc0] sm:$0xff] }
 0x378   :  { %v18682_v0 = vmax.f32 %v3421_v56, 0.0  ;;  %11893 = vmatprep.subr.bf16.mxu1 %v11892_v48  ;;  %v18744_v48 = vmax.f32 %v13612_v26, 0.0  ;;  %v3503_v56 = vld [vmem:[%s23928_s3 + $0x210] sm:$0xff]  ;;  %v11906_v57 = vpack.c.bf16 %v4354_v7, %v4347_v40  ;;  %v3538_v7 = vld [vmem:[%s23928_s3 + $0x328] sm:$0xff]  ;;  %v3545_v47 = vld [vmem:[%s23928_s3 + $0x360] sm:$0xff] }
 0x379   :  { %v3495_v41 = vld [vmem:[%s23928_s3 + $0x1d0] sm:$0xff]  ;;  %v12052_v37 = vpack.c.bf16 %v3503_v56, %v3496_v27  ;;  %v4410_v27 = vld [vmem:[%s23928_s3 + $0x1e68] sm:$0xff]  ;;  %v3537_v56 = vld [vmem:[%s23928_s3 + $0x320] sm:$0xff] }
 0x37a   :  { %9541 = vmatmul.mubr.msk.f32.vlgmr.msra.gmra.mrb[10].mxu0 %vm4846_vm2, %v18682_v0  ;;  %v4411_v40 = vld [vmem:[%s23928_s3 + $0x1e70] sm:$0xff]  ;;  %v4424_v8 = vld [vmem:[%s23928_s3 + $0x1ed8] sm:$0xff] }
 0x37b   :  { %11895 = vmatpush1.bf16.msra.mxu1 %v11894_v3  ;;  %12039 = vmatpush1.bf16.msra.mxu0 %v12038_v4  ;;  %v11908_v3 = vpack.c.bf16 %v4369_v61, %v4362_v20  ;;  %v4361_v4 = vld [vmem:[%s23928_s3 + $0x1ce0] sm:$0xff]  ;;  %v4403_v61 = vld [vmem:[%s23928_s3 + $0x1e30] sm:$0xff] }
 0x37c   :  { %5411 = vmatprep.mubr.f32.mxu0 %v17746_v5  ;;  %11897 = vmatprep.subr.bf16.mxu1 %v11896_v1  ;;  %v3502_v1 = vld [vmem:[%s23928_s3 + $0x208] sm:$0xff]  ;;  %v3551_v9 = vld [vmem:[%s23928_s3 + $0x390] sm:$0xff] }
 0x37d   :  { %12041 = vmatprep.subr.bf16.mxu0 %v12040_v59  ;;  %v11910_v59 = vpack.c.bf16 %v4368_v24, %v4361_v4  ;;  %v12054_v12 = vpack.c.bf16 %v3502_v1, %v3495_v41  ;;  %v4425_v4 = vld [vmem:[%s23928_s3 + $0x1ee0] sm:$0xff]  ;;  %v3552_v24 = vld [vmem:[%s23928_s3 + $0x398] sm:$0xff]  ;;  %v3559_v41 = vld [vmem:[%s23928_s3 + $0x3d0] sm:$0xff] }
 0x37f   :  { %11899 = vmatpush1.bf16.msra.mxu1 %v11898_v29  ;;  %12043 = vmatpush1.bf16.msra.mxu0 %v12042_v17  ;;  %v4382_v29 = vld [vmem:[%s23928_s3 + $0x1d88] sm:$0xff]  ;;  %v3509_v17 = vld [vmem:[%s23928_s3 + $0x240] sm:$0xff] }
 0x380   :  { %11901 = vmatprep.subr.bf16.mxu1 %v11900_v15  ;;  %12045 = vmatprep.subr.bf16.mxu0 %v12044_v16  ;;  %v3516_v15 = vld [vmem:[%s23928_s3 + $0x278] sm:$0xff]  ;;  %v4390_v16 = vld [vmem:[%s23928_s3 + $0x1dc8] sm:$0xff]  ;;  %v11914_v26 = vpack.c.bf16 %v4382_v29, %v4375_v14  ;;  %v4439_v14 = vld [vmem:[%s23928_s3 + $0x1f50] sm:$0xff] }
 0x381   :  { %v12058_v11 = vpack.c.bf16 %v3516_v15, %v3509_v17  ;;  %v11916_v30 = vpack.c.bf16 %v4397_v31, %v4390_v16  ;;  %v3566_v29 = vld [vmem:[%s23928_s3 + $0x408] sm:$0xff]  ;;  %v3573_v17 = vld [vmem:[%s23928_s3 + $0x440] sm:$0xff]  ;;  %v4431_v31 = vld [vmem:[%s23928_s3 + $0x1f10] sm:$0xff] }
 0x382   :  { %5128 = vmatmul.mubr.f32.vlgmr.msra.gmra.mrb[10].mxu1 %v18733_v60 }
 0x383   :  { %11903 = vmatpush1.bf16.msra.mxu1 %v11902_v35  ;;  %5198 = vmatprep.mubr.f32.mxu1 %v18744_v48  ;;  %v12060_v35 = vpack.c.bf16 %v3531_v23, %v3524_v39  ;;  %v4438_v39 = vld [vmem:[%s23928_s3 + $0x1f48] sm:$0xff]  ;;  %v3565_v23 = vld [vmem:[%s23928_s3 + $0x400] sm:$0xff] }
 0x384   :  { %12047 = vmatpush1.bf16.msra.mxu0 %v12046_v36  ;;  %11905 = vmatprep.subr.bf16.mxu1 %v11904_v38  ;;  %v3530_v36 = vld [vmem:[%s23928_s3 + $0x2e8] sm:$0xff]  ;;  %v4404_v38 = vld [vmem:[%s23928_s3 + $0x1e38] sm:$0xff] }
 0x385   :  { %12049 = vmatprep.subr.bf16.mxu0 %v12048_v51  ;;  %v11918_v51 = vpack.c.bf16 %v4396_v34, %v4389_v33  ;;  %v12062_v53 = vpack.c.bf16 %v3530_v36, %v3523_v46  ;;  %v11920_v20 = vpack.c.bf16 %v4411_v40, %v4404_v38  ;;  %v4453_v33 = vld [vmem:[%s23928_s3 + $0x1fc0] sm:$0xff]  ;;  %v3580_v34 = vld [vmem:[%s23928_s3 + $0x478] sm:$0xff]  ;;  %v3587_v46 = vld [vmem:[%s23928_s3 + $0x4b0] sm:$0xff] }
 0x386   :  { %v4445_v40 = vld [vmem:[%s23928_s3 + $0x1f80] sm:$0xff] }
 0x387   :  { %11907 = vmatpush1.bf16.msra.mxu1 %v11906_v57  ;;  %v12064_v57 = vpack.c.bf16 %v3545_v47, %v3538_v7  ;;  %v4452_v7 = vld [vmem:[%s23928_s3 + $0x1fb8] sm:$0xff]  ;;  %v3579_v47 = vld [vmem:[%s23928_s3 + $0x470] sm:$0xff] }
 0x388   :  { %12051 = vmatpush1.bf16.msra.mxu0 %v12050_v25  ;;  %11909 = vmatprep.subr.bf16.mxu1 %v11908_v3  ;;  %v3544_v25 = vld [vmem:[%s23928_s3 + $0x358] sm:$0xff]  ;;  %v4418_v3 = vld [vmem:[%s23928_s3 + $0x1ea8] sm:$0xff] }
 0x389   :  { %12053 = vmatprep.subr.bf16.mxu0 %v12052_v37  ;;  %v11922_v37 = vpack.c.bf16 %v4410_v27, %v4403_v61  ;;  %v12066_v1 = vpack.c.bf16 %v3544_v25, %v3537_v56  ;;  %v11924_v2 = vpack.c.bf16 %v4425_v4, %v4418_v3  ;;  %v4467_v61 = vld [vmem:[%s23928_s3 + $0x2030] sm:$0xff]  ;;  %v3594_v27 = vld [vmem:[%s23928_s3 + $0x4e8] sm:$0xff]  ;;  %v3601_v56 = vld [vmem:[%s23928_s3 + $0x520] sm:$0xff] }
 0x38a   :  { %v4459_v4 = vld [vmem:[%s23928_s3 + $0x1ff0] sm:$0xff] }
 0x38b   :  { %11911 = vmatpush1.bf16.msra.mxu1 %v11910_v59  ;;  %v12068_v59 = vpack.c.bf16 %v3559_v41, %v3552_v24  ;;  %v4466_v24 = vld [vmem:[%s23928_s3 + $0x2028] sm:$0xff]  ;;  %v3593_v41 = vld [vmem:[%s23928_s3 + $0x4e0] sm:$0xff] }
 0x38c   :  { %12055 = vmatpush1.bf16.msra.mxu0 %v12054_v12  ;;  %11913 = vmatprep.subr.bf16.mxu1 %v11912_v13  ;;  %v3558_v12 = vld [vmem:[%s23928_s3 + $0x3c8] sm:$0xff]  ;;  %v4432_v13 = vld [vmem:[%s23928_s3 + $0x1f18] sm:$0xff] }
 0x38d   :  { %12057 = vmatprep.subr.bf16.mxu0 %v12056_v32  ;;  %v11926_v32 = vpack.c.bf16 %v4424_v8, %v4417_v6  ;;  %v12070_v15 = vpack.c.bf16 %v3558_v12, %v3551_v9  ;;  %v11928_v16 = vpack.c.bf16 %v4439_v14, %v4432_v13  ;;  %v4481_v6 = vld [vmem:[%s23928_s3 + $0x20a0] sm:$0xff]  ;;  %v3608_v8 = vld [vmem:[%s23928_s3 + $0x558] sm:$0xff]  ;;  %v3615_v9 = vld [vmem:[%s23928_s3 + $0x590] sm:$0xff] }
 0x38e   :  { %v4473_v14 = vld [vmem:[%s23928_s3 + $0x2060] sm:$0xff] }
 0x38f   :  { %11915 = vmatpush1.bf16.msra.mxu1 %v11914_v26  ;;  %v12072_v26 = vpack.c.bf16 %v3573_v17, %v3566_v29  ;;  %v4480_v29 = vld [vmem:[%s23928_s3 + $0x2098] sm:$0xff]  ;;  %v3607_v17 = vld [vmem:[%s23928_s3 + $0x550] sm:$0xff] }
 0x390   :  { %12059 = vmatpush1.bf16.msra.mxu0 %v12058_v11  ;;  %11917 = vmatprep.subr.bf16.mxu1 %v11916_v30  ;;  %v3572_v11 = vld [vmem:[%s23928_s3 + $0x438] sm:$0xff]  ;;  %v4446_v30 = vld [vmem:[%s23928_s3 + $0x1f88] sm:$0xff] }
 0x391   :  { %12061 = vmatprep.subr.bf16.mxu0 %v12060_v35  ;;  %v11930_v35 = vpack.c.bf16 %v4438_v39, %v4431_v31  ;;  %v12074_v36 = vpack.c.bf16 %v3572_v11, %v3565_v23  ;;  %v11932_v38 = vpack.c.bf16 %v4453_v33, %v4446_v30  ;;  %v4495_v31 = vld [vmem:[%s23928_s3 + $0x2110] sm:$0xff]  ;;  %v3622_v39 = vld [vmem:[%s23928_s3 + $0x5c8] sm:$0xff]  ;;  %v3629_v23 = vld [vmem:[%s23928_s3 + $0x600] sm:$0xff] }
 0x392   :  { %v4487_v33 = vld [vmem:[%s23928_s3 + $0x20d0] sm:$0xff] }
 0x393   :  { %11919 = vmatpush1.bf16.msra.mxu1 %v11918_v51  ;;  %v12076_v51 = vpack.c.bf16 %v3587_v46, %v3580_v34  ;;  %v4494_v34 = vld [vmem:[%s23928_s3 + $0x2108] sm:$0xff]  ;;  %v3621_v46 = vld [vmem:[%s23928_s3 + $0x5c0] sm:$0xff] }
 0x394   :  { %12063 = vmatpush1.bf16.msra.mxu0 %v12062_v53  ;;  %11921 = vmatprep.subr.bf16.mxu1 %v11920_v20  ;;  %v3586_v53 = vld [vmem:[%s23928_s3 + $0x4a8] sm:$0xff]  ;;  %v4460_v20 = vld [vmem:[%s23928_s3 + $0x1ff8] sm:$0xff] }
 0x395   :  { %12065 = vmatprep.subr.bf16.mxu0 %v12064_v57  ;;  %v11934_v57 = vpack.c.bf16 %v4452_v7, %v4445_v40  ;;  %v12078_v25 = vpack.c.bf16 %v3586_v53, %v3579_v47  ;;  %v11936_v3 = vpack.c.bf16 %v4467_v61, %v4460_v20  ;;  %v4509_v40 = vld [vmem:[%s23928_s3 + $0x2180] sm:$0xff]  ;;  %v3636_v7 = vld [vmem:[%s23928_s3 + $0x638] sm:$0xff]  ;;  %v3643_v47 = vld [vmem:[%s23928_s3 + $0x670] sm:$0xff] }
 0x396   :  { %v4501_v61 = vld [vmem:[%s23928_s3 + $0x2140] sm:$0xff] }
 0x397   :  { %11923 = vmatpush1.bf16.msra.mxu1 %v11922_v37  ;;  %v12080_v37 = vpack.c.bf16 %v3601_v56, %v3594_v27  ;;  %v4508_v27 = vld [vmem:[%s23928_s3 + $0x2178] sm:$0xff]  ;;  %v3635_v56 = vld [vmem:[%s23928_s3 + $0x630] sm:$0xff] }
 0x398   :  { %12067 = vmatpush1.bf16.msra.mxu0 %v12066_v1  ;;  %11925 = vmatprep.subr.bf16.mxu1 %v11924_v2  ;;  %v3600_v1 = vld [vmem:[%s23928_s3 + $0x518] sm:$0xff]  ;;  %v4474_v2 = vld [vmem:[%s23928_s3 + $0x2068] sm:$0xff] }
 0x399   :  { %12069 = vmatprep.subr.bf16.mxu0 %v12068_v59  ;;  %v11938_v59 = vpack.c.bf16 %v4466_v24, %v4459_v4  ;;  %v12082_v12 = vpack.c.bf16 %v3600_v1, %v3593_v41  ;;  %v11940_v13 = vpack.c.bf16 %v4481_v6, %v4474_v2  ;;  %v4523_v4 = vld [vmem:[%s23928_s3 + $0x21f0] sm:$0xff]  ;;  %v3650_v24 = vld [vmem:[%s23928_s3 + $0x6a8] sm:$0xff]  ;;  %v3657_v41 = vld [vmem:[%s23928_s3 + $0x6e0] sm:$0xff] }
 0x39a   :  { %v4515_v6 = vld [vmem:[%s23928_s3 + $0x21b0] sm:$0xff] }
 0x39b   :  { %11927 = vmatpush1.bf16.msra.mxu1 %v11926_v32  ;;  %v12084_v32 = vpack.c.bf16 %v3615_v9, %v3608_v8  ;;  %v4522_v8 = vld [vmem:[%s23928_s3 + $0x21e8] sm:$0xff]  ;;  %v3649_v9 = vld [vmem:[%s23928_s3 + $0x6a0] sm:$0xff] }
 0x39c   :  { %12071 = vmatpush1.bf16.msra.mxu0 %v12070_v15  ;;  %11929 = vmatprep.subr.bf16.mxu1 %v11928_v16  ;;  %v3614_v15 = vld [vmem:[%s23928_s3 + $0x588] sm:$0xff]  ;;  %v4488_v16 = vld [vmem:[%s23928_s3 + $0x20d8] sm:$0xff] }
 0x39d   :  { %12073 = vmatprep.subr.bf16.mxu0 %v12072_v26  ;;  %v11942_v26 = vpack.c.bf16 %v4480_v29, %v4473_v14  ;;  %v12086_v11 = vpack.c.bf16 %v3614_v15, %v3607_v17  ;;  %v11944_v30 = vpack.c.bf16 %v4495_v31, %v4488_v16  ;;  %v4537_v14 = vld [vmem:[%s23928_s3 + $0x2260] sm:$0xff]  ;;  %v3664_v29 = vld [vmem:[%s23928_s3 + $0x718] sm:$0xff]  ;;  %v3671_v17 = vld [vmem:[%s23928_s3 + $0x750] sm:$0xff] }
 0x39e   :  { %v4529_v31 = vld [vmem:[%s23928_s3 + $0x2220] sm:$0xff] }
 0x39f   :  { %11931 = vmatpush1.bf16.msra.mxu1 %v11930_v35  ;;  %v12088_v35 = vpack.c.bf16 %v3629_v23, %v3622_v39  ;;  %v4536_v39 = vld [vmem:[%s23928_s3 + $0x2258] sm:$0xff]  ;;  %v12100_v23 = vpack.c.bf16 %v3671_v17, %v3664_v29  ;;  %v4571_v29 = vld [vmem:[%s23928_s3 + $0x2370] sm:$0xff]  ;;  %v4578_v17 = vld [vmem:[%s23928_s3 + $0x23a8] sm:$0xff] }
 0x3a0   :  { %12075 = vmatpush1.bf16.msra.mxu0 %v12074_v36  ;;  %11933 = vmatprep.subr.bf16.mxu1 %v11932_v38  ;;  %v3628_v36 = vld [vmem:[%s23928_s3 + $0x5f8] sm:$0xff]  ;;  %v4502_v38 = vld [vmem:[%s23928_s3 + $0x2148] sm:$0xff] }
 0x3a1   :  { %12077 = vmatprep.subr.bf16.mxu0 %v12076_v51  ;;  %v11946_v51 = vpack.c.bf16 %v4494_v34, %v4487_v33  ;;  %v12090_v53 = vpack.c.bf16 %v3628_v36, %v3621_v46  ;;  %v11948_v20 = vpack.c.bf16 %v4509_v40, %v4502_v38  ;;  %v4551_v33 = vld [vmem:[%s23928_s3 + $0x22d0] sm:$0xff]  ;;  %v3678_v34 = vld [vmem:[%s23928_s3 + $0x788] sm:$0xff]  ;;  %v3685_v46 = vld [vmem:[%s23928_s3 + $0x7c0] sm:$0xff] }
 0x3a2   :  { %v4543_v38 = vld [vmem:[%s23928_s3 + $0x2290] sm:$0xff]  ;;  %v4550_v40 = vld [vmem:[%s23928_s3 + $0x22c8] sm:$0xff] }
 0x3a3   :  { %11935 = vmatpush1.bf16.msra.mxu1 %v11934_v57  ;;  %v12092_v57 = vpack.c.bf16 %v3643_v47, %v3636_v7  ;;  %v3677_v7 = vld [vmem:[%s23928_s3 + $0x780] sm:$0xff] }
 0x3a4   :  { %12079 = vmatpush1.bf16.msra.mxu0 %v12078_v25  ;;  %11937 = vmatprep.subr.bf16.mxu1 %v11936_v3  ;;  %v3642_v25 = vld [vmem:[%s23928_s3 + $0x668] sm:$0xff]  ;;  %v4516_v3 = vld [vmem:[%s23928_s3 + $0x21b8] sm:$0xff] }
 0x3a5   :  { %12081 = vmatprep.subr.bf16.mxu0 %v12080_v37  ;;  %v11950_v37 = vpack.c.bf16 %v4508_v27, %v4501_v61  ;;  %v12094_v1 = vpack.c.bf16 %v3642_v25, %v3635_v56  ;;  %v11952_v2 = vpack.c.bf16 %v4523_v4, %v4516_v3  ;;  %v4565_v61 = vld [vmem:[%s23928_s3 + $0x2340] sm:$0xff]  ;;  %v3692_v27 = vld [vmem:[%s23928_s3 + $0x7f8] sm:$0xff]  ;;  %v3699_v56 = vld [vmem:[%s23928_s3 + $0x830] sm:$0xff] }
 0x3a6   :  { %v4557_v4 = vld [vmem:[%s23928_s3 + $0x2300] sm:$0xff] }
 0x3a7   :  { %11939 = vmatpush1.bf16.msra.mxu1 %v11938_v59  ;;  %v12096_v59 = vpack.c.bf16 %v3657_v41, %v3650_v24  ;;  %v4564_v24 = vld [vmem:[%s23928_s3 + $0x2338] sm:$0xff]  ;;  %v3691_v41 = vld [vmem:[%s23928_s3 + $0x7f0] sm:$0xff] }
 0x3a8   :  { %12083 = vmatpush1.bf16.msra.mxu0 %v12082_v12  ;;  %11941 = vmatprep.subr.bf16.mxu1 %v11940_v13  ;;  %v3656_v12 = vld [vmem:[%s23928_s3 + $0x6d8] sm:$0xff]  ;;  %v4530_v13 = vld [vmem:[%s23928_s3 + $0x2228] sm:$0xff] }
 0x3a9   :  { %12085 = vmatprep.subr.bf16.mxu0 %v12084_v32  ;;  %v11954_v32 = vpack.c.bf16 %v4522_v8, %v4515_v6  ;;  %v12098_v15 = vpack.c.bf16 %v3656_v12, %v3649_v9  ;;  %v11956_v16 = vpack.c.bf16 %v4537_v14, %v4530_v13  ;;  %v4579_v6 = vld [vmem:[%s23928_s3 + $0x23b0] sm:$0xff]  ;;  %v3706_v8 = vld [vmem:[%s23928_s3 + $0x868] sm:$0xff]  ;;  %v3713_v9 = vld [vmem:[%s23928_s3 + $0x8a0] sm:$0xff]  ;;  %v19126_v12 = vmax.f32 %v18413_v43, 0.0 }
 0x3aa   :  { %v12112_v43 = vpack.c.bf16 %v3713_v9, %v3706_v8  ;;  %v4620_v8 = vld [vmem:[%s23928_s3 + $0x24f8] sm:$0xff]  ;;  %v3747_v9 = vld [vmem:[%s23928_s3 + $0x9b0] sm:$0xff] }
 0x3ab   :  { %11943 = vmatpush1.bf16.msra.mxu1 %v11942_v26  ;;  %v3663_v26 = vld [vmem:[%s23928_s3 + $0x710] sm:$0xff] }
 0x3ac   :  { %12087 = vmatpush1.bf16.msra.mxu0 %v12086_v11  ;;  %11945 = vmatprep.subr.bf16.mxu1 %v11944_v30  ;;  %v3670_v11 = vld [vmem:[%s23928_s3 + $0x748] sm:$0xff]  ;;  %v4544_v30 = vld [vmem:[%s23928_s3 + $0x2298] sm:$0xff] }
 0x3ad   :  { %12089 = vmatprep.subr.bf16.mxu0 %v12088_v35  ;;  %v11958_v35 = vpack.c.bf16 %v4536_v39, %v4529_v31  ;;  %v12102_v36 = vpack.c.bf16 %v3670_v11, %v3663_v26  ;;  %v11960_v47 = vpack.c.bf16 %v4551_v33, %v4544_v30  ;;  %v4586_v31 = vld [vmem:[%s23928_s3 + $0x23e8] sm:$0xff]  ;;  %v4593_v39 = vld [vmem:[%s23928_s3 + $0x2420] sm:$0xff]  ;;  %v11970_v26 = vpack.c.bf16 %v4578_v17, %v4571_v29  ;;  %v4635_v29 = vld [vmem:[%s23928_s3 + $0x2570] sm:$0xff] }
 0x3ae   :  { %v11972_v30 = vpack.c.bf16 %v4593_v39, %v4586_v31  ;;  %v4585_v33 = vld [vmem:[%s23928_s3 + $0x23e0] sm:$0xff]  ;;  %v3762_v17 = vld [vmem:[%s23928_s3 + $0xa28] sm:$0xff]  ;;  %v4627_v39 = vld [vmem:[%s23928_s3 + $0x2530] sm:$0xff] }
 0x3af   :  { %11947 = vmatpush1.bf16.msra.mxu1 %v11946_v51  ;;  %v12104_v51 = vpack.c.bf16 %v3685_v46, %v3678_v34  ;;  %v4592_v34 = vld [vmem:[%s23928_s3 + $0x2418] sm:$0xff]  ;;  %v3719_v46 = vld [vmem:[%s23928_s3 + $0x8d0] sm:$0xff] }
 0x3b0   :  { %12091 = vmatpush1.bf16.msra.mxu0 %v12090_v53  ;;  %11949 = vmatprep.subr.bf16.mxu1 %v11948_v20  ;;  %v3684_v53 = vld [vmem:[%s23928_s3 + $0x7b8] sm:$0xff]  ;;  %v4558_v20 = vld [vmem:[%s23928_s3 + $0x2308] sm:$0xff] }
 0x3b1   :  { %12093 = vmatprep.subr.bf16.mxu0 %v12092_v57  ;;  %v11962_v57 = vpack.c.bf16 %v4550_v40, %v4543_v38  ;;  %v12106_v25 = vpack.c.bf16 %v3684_v53, %v3677_v7  ;;  %v11964_v3 = vpack.c.bf16 %v4565_v61, %v4558_v20  ;;  %v4600_v38 = vld [vmem:[%s23928_s3 + $0x2458] sm:$0xff]  ;;  %v4607_v40 = vld [vmem:[%s23928_s3 + $0x2490] sm:$0xff]  ;;  %v3734_v7 = vld [vmem:[%s23928_s3 + $0x948] sm:$0xff] }
 0x3b2   :  { %v11976_v20 = vpack.c.bf16 %v4607_v40, %v4600_v38  ;;  %v4599_v61 = vld [vmem:[%s23928_s3 + $0x2450] sm:$0xff]  ;;  %v4641_v40 = vld [vmem:[%s23928_s3 + $0x25a0] sm:$0xff] }
 0x3b3   :  { %11951 = vmatpush1.bf16.msra.mxu1 %v11950_v37  ;;  %v12108_v37 = vpack.c.bf16 %v3699_v56, %v3692_v27  ;;  %v4606_v27 = vld [vmem:[%s23928_s3 + $0x2488] sm:$0xff]  ;;  %v3733_v56 = vld [vmem:[%s23928_s3 + $0x940] sm:$0xff] }
 0x3b4   :  { %12095 = vmatpush1.bf16.msra.mxu0 %v12094_v1  ;;  %11953 = vmatprep.subr.bf16.mxu1 %v11952_v2  ;;  %v3698_v1 = vld [vmem:[%s23928_s3 + $0x828] sm:$0xff]  ;;  %v4572_v2 = vld [vmem:[%s23928_s3 + $0x2378] sm:$0xff] }
 0x3b5   :  { %12097 = vmatprep.subr.bf16.mxu0 %v12096_v59  ;;  %v11966_v59 = vpack.c.bf16 %v4564_v24, %v4557_v4  ;;  %v12110_v13 = vpack.c.bf16 %v3698_v1, %v3691_v41  ;;  %v11968_v14 = vpack.c.bf16 %v4579_v6, %v4572_v2  ;;  %v4621_v4 = vld [vmem:[%s23928_s3 + $0x2500] sm:$0xff]  ;;  %v3748_v24 = vld [vmem:[%s23928_s3 + $0x9b8] sm:$0xff]  ;;  %v3755_v41 = vld [vmem:[%s23928_s3 + $0x9f0] sm:$0xff] }
 0x3b6   :  { %v4613_v6 = vld [vmem:[%s23928_s3 + $0x24c0] sm:$0xff] }
 0x3b7   :  { %11955 = vmatpush1.bf16.msra.mxu1 %v11954_v32  ;;  %v3705_v32 = vld [vmem:[%s23928_s3 + $0x860] sm:$0xff] }
 0x3b8   :  { %12099 = vmatpush1.bf16.msra.mxu0 %v12098_v15  ;;  %11957 = vmatprep.subr.bf16.mxu1 %v11956_v16  ;;  %v19138_v15 = vmax.f32 %v18425_v52, 0.0  ;;  %v3712_v16 = vld [vmem:[%s23928_s3 + $0x898] sm:$0xff] }
 0x3b9   :  { %12101 = vmatprep.subr.bf16.mxu0 %v12100_v23  ;;  %v3720_v52 = vld [vmem:[%s23928_s3 + $0x8d8] sm:$0xff]  ;;  %v3727_v23 = vld [vmem:[%s23928_s3 + $0x910] sm:$0xff]  ;;  %v12114_v11 = vpack.c.bf16 %v3712_v16, %v3705_v32  ;;  %v3769_v32 = vld [vmem:[%s23928_s3 + $0xa60] sm:$0xff] }
 0x3bb   :  { %5412 = vmatmul.mubr.f32.vlgmr.msra.gmra.mrb[12].mxu0 %v18006_v55  ;;  %11959 = vmatpush1.bf16.msra.mxu1 %v11958_v35  ;;  %v12116_v35 = vpack.c.bf16 %v3727_v23, %v3720_v52  ;;  %v4634_v52 = vld [vmem:[%s23928_s3 + $0x2568] sm:$0xff]  ;;  %v3761_v23 = vld [vmem:[%s23928_s3 + $0xa20] sm:$0xff] }
 0x3bc   :  { %12103 = vmatpush1.bf16.msra.mxu0 %v12102_v36  ;;  %5482 = vmatprep.mubr.f32.mxu0 %v18014_v42  ;;  %v3726_v36 = vld [vmem:[%s23928_s3 + $0x908] sm:$0xff] }
 0x3bd   :  { %11961 = vmatprep.subr.bf16.mxu1 %v11960_v47  ;;  %12105 = vmatprep.subr.bf16.mxu0 %v12104_v51  ;;  %v3741_v47 = vld [vmem:[%s23928_s3 + $0x980] sm:$0xff]  ;;  %v11974_v51 = vpack.c.bf16 %v4592_v34, %v4585_v33  ;;  %v12118_v53 = vpack.c.bf16 %v3726_v36, %v3719_v46  ;;  %v3776_v34 = vld [vmem:[%s23928_s3 + $0xa98] sm:$0xff]  ;;  %v3783_v46 = vld [vmem:[%s23928_s3 + $0xad0] sm:$0xff] }
 0x3be   :  { %v4649_v33 = vld [vmem:[%s23928_s3 + $0x25e0] sm:$0xff] }
 0x3bf   :  { %11963 = vmatpush1.bf16.msra.mxu1 %v11962_v57  ;;  %v12120_v57 = vpack.c.bf16 %v3741_v47, %v3734_v7  ;;  %v4648_v7 = vld [vmem:[%s23928_s3 + $0x25d8] sm:$0xff]  ;;  %v3775_v47 = vld [vmem:[%s23928_s3 + $0xa90] sm:$0xff] }
 0x3c0   :  { %12107 = vmatpush1.bf16.msra.mxu0 %v12106_v25  ;;  %11965 = vmatprep.subr.bf16.mxu1 %v11964_v3  ;;  %v3740_v25 = vld [vmem:[%s23928_s3 + $0x978] sm:$0xff]  ;;  %v4614_v3 = vld [vmem:[%s23928_s3 + $0x24c8] sm:$0xff] }
 0x3c1   :  { %12109 = vmatprep.subr.bf16.mxu0 %v12108_v37  ;;  %v11978_v37 = vpack.c.bf16 %v4606_v27, %v4599_v61  ;;  %v12122_v1 = vpack.c.bf16 %v3740_v25, %v3733_v56  ;;  %v11980_v2 = vpack.c.bf16 %v4621_v4, %v4614_v3  ;;  %v4663_v61 = vld [vmem:[%s23928_s3 + $0x2650] sm:$0xff]  ;;  %v3790_v27 = vld [vmem:[%s23928_s3 + $0xb08] sm:$0xff]  ;;  %v3797_v56 = vld [vmem:[%s23928_s3 + $0xb40] sm:$0xff] }
 0x3c2   :  { %5199 = vmatmul.mubr.f32.vlgmr.msra.gmra.mrb[10].mxu1 %v19126_v12  ;;  %v4655_v4 = vld [vmem:[%s23928_s3 + $0x2610] sm:$0xff] }
 0x3c3   :  { %11967 = vmatpush1.bf16.msra.mxu1 %v11966_v59  ;;  %5269 = vmatprep.mubr.f32.mxu1 %v19138_v15  ;;  %v12124_v59 = vpack.c.bf16 %v3755_v41, %v3748_v24  ;;  %v4662_v24 = vld [vmem:[%s23928_s3 + $0x2648] sm:$0xff]  ;;  %v3789_v41 = vld [vmem:[%s23928_s3 + $0xb00] sm:$0xff] }
 0x3c4   :  { %12111 = vmatpush1.bf16.msra.mxu0 %v12110_v13  ;;  %11969 = vmatprep.subr.bf16.mxu1 %v11968_v14  ;;  %v3754_v13 = vld [vmem:[%s23928_s3 + $0x9e8] sm:$0xff]  ;;  %v4628_v14 = vld [vmem:[%s23928_s3 + $0x2538] sm:$0xff] }
 0x3c5   :  { %12113 = vmatprep.subr.bf16.mxu0 %v12112_v43  ;;  %v11982_v43 = vpack.c.bf16 %v4620_v8, %v4613_v6  ;;  %v12126_v16 = vpack.c.bf16 %v3754_v13, %v3747_v9  ;;  %v11984_v31 = vpack.c.bf16 %v4635_v29, %v4628_v14  ;;  %v4677_v6 = vld [vmem:[%s23928_s3 + $0x26c0] sm:$0xff]  ;;  %v3804_v8 = vld [vmem:[%s23928_s3 + $0xb78] sm:$0xff]  ;;  %v3811_v9 = vld [vmem:[%s23928_s3 + $0xbb0] sm:$0xff] }
 0x3c6   :  { %v4669_v29 = vld [vmem:[%s23928_s3 + $0x2680] sm:$0xff] }
 0x3c7   :  { %11971 = vmatpush1.bf16.msra.mxu1 %v11970_v26  ;;  %v12128_v26 = vpack.c.bf16 %v3769_v32, %v3762_v17  ;;  %v4676_v17 = vld [vmem:[%s23928_s3 + $0x26b8] sm:$0xff]  ;;  %v3803_v32 = vld [vmem:[%s23928_s3 + $0xb70] sm:$0xff] }
 0x3c8   :  { %12115 = vmatpush1.bf16.msra.mxu0 %v12114_v11  ;;  %11973 = vmatprep.subr.bf16.mxu1 %v11972_v30  ;;  %v3768_v11 = vld [vmem:[%s23928_s3 + $0xa58] sm:$0xff]  ;;  %v4642_v30 = vld [vmem:[%s23928_s3 + $0x25a8] sm:$0xff] }
 0x3c9   :  { %12117 = vmatprep.subr.bf16.mxu0 %v12116_v35  ;;  %v11986_v35 = vpack.c.bf16 %v4634_v52, %v4627_v39  ;;  %v12130_v36 = vpack.c.bf16 %v3768_v11, %v3761_v23  ;;  %v11988_v38 = vpack.c.bf16 %v4649_v33, %v4642_v30  ;;  %v4691_v39 = vld [vmem:[%s23928_s3 + $0x2730] sm:$0xff]  ;;  %v3818_v52 = vld [vmem:[%s23928_s3 + $0xbe8] sm:$0xff]  ;;  %v3825_v23 = vld [vmem:[%s23928_s3 + $0xc20] sm:$0xff] }
 0x3ca   :  { %v4683_v33 = vld [vmem:[%s23928_s3 + $0x26f0] sm:$0xff] }
 0x3cb   :  { %11975 = vmatpush1.bf16.msra.mxu1 %v11974_v51  ;;  %v12132_v51 = vpack.c.bf16 %v3783_v46, %v3776_v34  ;;  %v4690_v34 = vld [vmem:[%s23928_s3 + $0x2728] sm:$0xff]  ;;  %v3817_v46 = vld [vmem:[%s23928_s3 + $0xbe0] sm:$0xff] }
 0x3cc   :  { %12119 = vmatpush1.bf16.msra.mxu0 %v12118_v53  ;;  %11977 = vmatprep.subr.bf16.mxu1 %v11976_v20  ;;  %v3782_v53 = vld [vmem:[%s23928_s3 + $0xac8] sm:$0xff]  ;;  %v4656_v20 = vld [vmem:[%s23928_s3 + $0x2618] sm:$0xff] }
 0x3cd   :  { %12121 = vmatprep.subr.bf16.mxu0 %v12120_v57  ;;  %v11990_v57 = vpack.c.bf16 %v4648_v7, %v4641_v40  ;;  %v12134_v25 = vpack.c.bf16 %v3782_v53, %v3775_v47  ;;  %v11992_v3 = vpack.c.bf16 %v4663_v61, %v4656_v20  ;;  %v4705_v40 = vld [vmem:[%s23928_s3 + $0x27a0] sm:$0xff]  ;;  %v3832_v7 = vld [vmem:[%s23928_s3 + $0xc58] sm:$0xff]  ;;  %v3839_v47 = vld [vmem:[%s23928_s3 + $0xc90] sm:$0xff] }
 0x3ce   :  { %v4697_v61 = vld [vmem:[%s23928_s3 + $0x2760] sm:$0xff] }
 0x3cf   :  { %11979 = vmatpush1.bf16.msra.mxu1 %v11978_v37  ;;  %v12136_v37 = vpack.c.bf16 %v3797_v56, %v3790_v27  ;;  %v4704_v27 = vld [vmem:[%s23928_s3 + $0x2798] sm:$0xff]  ;;  %v3831_v56 = vld [vmem:[%s23928_s3 + $0xc50] sm:$0xff] }
 0x3d0   :  { %12123 = vmatpush1.bf16.msra.mxu0 %v12122_v1  ;;  %11981 = vmatprep.subr.bf16.mxu1 %v11980_v2  ;;  %v3796_v1 = vld [vmem:[%s23928_s3 + $0xb38] sm:$0xff]  ;;  %v4670_v2 = vld [vmem:[%s23928_s3 + $0x2688] sm:$0xff] }
 0x3d1   :  { %12125 = vmatprep.subr.bf16.mxu0 %v12124_v59  ;;  %v11994_v59 = vpack.c.bf16 %v4662_v24, %v4655_v4  ;;  %v12138_v13 = vpack.c.bf16 %v3796_v1, %v3789_v41  ;;  %v11996_v14 = vpack.c.bf16 %v4677_v6, %v4670_v2  ;;  %v4719_v4 = vld [vmem:[%s23928_s3 + $0x2810] sm:$0xff]  ;;  %v3846_v24 = vld [vmem:[%s23928_s3 + $0xcc8] sm:$0xff]  ;;  %v3853_v41 = vld [vmem:[%s23928_s3 + $0xd00] sm:$0xff] }
 0x3d2   :  { %v4711_v6 = vld [vmem:[%s23928_s3 + $0x27d0] sm:$0xff] }
 0x3d3   :  { %11983 = vmatpush1.bf16.msra.mxu1 %v11982_v43  ;;  %v12140_v43 = vpack.c.bf16 %v3811_v9, %v3804_v8  ;;  %v4718_v8 = vld [vmem:[%s23928_s3 + $0x2808] sm:$0xff]  ;;  %v3845_v9 = vld [vmem:[%s23928_s3 + $0xcc0] sm:$0xff] }
 0x3d4   :  { %12127 = vmatpush1.bf16.msra.mxu0 %v12126_v16  ;;  %11985 = vmatprep.subr.bf16.mxu1 %v11984_v31  ;;  %v3810_v16 = vld [vmem:[%s23928_s3 + $0xba8] sm:$0xff]  ;;  %v4684_v31 = vld [vmem:[%s23928_s3 + $0x26f8] sm:$0xff] }
 0x3d5   :  { %12129 = vmatprep.subr.bf16.mxu0 %v12128_v26  ;;  %v11998_v26 = vpack.c.bf16 %v4676_v17, %v4669_v29  ;;  %v12142_v11 = vpack.c.bf16 %v3810_v16, %v3803_v32  ;;  %v12000_v30 = vpack.c.bf16 %v4691_v39, %v4684_v31  ;;  %v4733_v29 = vld [vmem:[%s23928_s3 + $0x2880] sm:$0xff]  ;;  %v3860_v17 = vld [vmem:[%s23928_s3 + $0xd38] sm:$0xff]  ;;  %v3867_v32 = vld [vmem:[%s23928_s3 + $0xd70] sm:$0xff] }
 0x3d6   :  { %v4725_v39 = vld [vmem:[%s23928_s3 + $0x2840] sm:$0xff] }
 0x3d7   :  { %11987 = vmatpush1.bf16.msra.mxu1 %v11986_v35  ;;  %v12144_v35 = vpack.c.bf16 %v3825_v23, %v3818_v52  ;;  %v4732_v52 = vld [vmem:[%s23928_s3 + $0x2878] sm:$0xff]  ;;  %v3859_v23 = vld [vmem:[%s23928_s3 + $0xd30] sm:$0xff] }
 0x3d8   :  { %12131 = vmatpush1.bf16.msra.mxu0 %v12130_v36  ;;  %11989 = vmatprep.subr.bf16.mxu1 %v11988_v38  ;;  %v3824_v36 = vld [vmem:[%s23928_s3 + $0xc18] sm:$0xff]  ;;  %v4698_v38 = vld [vmem:[%s23928_s3 + $0x2768] sm:$0xff] }
 0x3d9   :  { %12133 = vmatprep.subr.bf16.mxu0 %v12132_v51  ;;  %v12002_v51 = vpack.c.bf16 %v4690_v34, %v4683_v33  ;;  %v12146_v53 = vpack.c.bf16 %v3824_v36, %v3817_v46  ;;  %v12004_v20 = vpack.c.bf16 %v4705_v40, %v4698_v38  ;;  %v4747_v33 = vld [vmem:[%s23928_s3 + $0x28f0] sm:$0xff]  ;;  %v3874_v34 = vld [vmem:[%s23928_s3 + $0xda8] sm:$0xff]  ;;  %v3881_v46 = vld [vmem:[%s23928_s3 + $0xde0] sm:$0xff] }
 0x3da   :  { %v4739_v40 = vld [vmem:[%s23928_s3 + $0x28b0] sm:$0xff] }
 0x3db   :  { %11991 = vmatpush1.bf16.msra.mxu1 %v11990_v57  ;;  %v12148_v57 = vpack.c.bf16 %v3839_v47, %v3832_v7  ;;  %v4746_v7 = vld [vmem:[%s23928_s3 + $0x28e8] sm:$0xff]  ;;  %v3873_v47 = vld [vmem:[%s23928_s3 + $0xda0] sm:$0xff] }
 0x3dc   :  { %12135 = vmatpush1.bf16.msra.mxu0 %v12134_v25  ;;  %11993 = vmatprep.subr.bf16.mxu1 %v11992_v3  ;;  %v3838_v25 = vld [vmem:[%s23928_s3 + $0xc88] sm:$0xff]  ;;  %v4712_v3 = vld [vmem:[%s23928_s3 + $0x27d8] sm:$0xff] }
 0x3dd   :  { %12137 = vmatprep.subr.bf16.mxu0 %v12136_v37  ;;  %v12006_v37 = vpack.c.bf16 %v4704_v27, %v4697_v61  ;;  %v12150_v1 = vpack.c.bf16 %v3838_v25, %v3831_v56  ;;  %v12008_v2 = vpack.c.bf16 %v4719_v4, %v4712_v3  ;;  %v4761_v61 = vld [vmem:[%s23928_s3 + $0x2960] sm:$0xff]  ;;  %v3888_v27 = vld [vmem:[%s23928_s3 + $0xe18] sm:$0xff]  ;;  %v3895_v56 = vld [vmem:[%s23928_s3 + $0xe50] sm:$0xff] }
 0x3de   :  { %v4753_v4 = vld [vmem:[%s23928_s3 + $0x2920] sm:$0xff] }
 0x3df   :  { %11995 = vmatpush1.bf16.msra.mxu1 %v11994_v59  ;;  %v12152_v59 = vpack.c.bf16 %v3853_v41, %v3846_v24  ;;  %v4760_v24 = vld [vmem:[%s23928_s3 + $0x2958] sm:$0xff]  ;;  %v12164_v41 = vpack.c.bf16 %v3895_v56, %v3888_v27  ;;  %v3929_v27 = vld [vmem:[%s23928_s3 + $0xf60] sm:$0xff]  ;;  %v3455_v56 = vld [vmem:[%s23928_s3 + $0x90] sm:$0xff] }
 0x3e0   :  { %12139 = vmatpush1.bf16.msra.mxu0 %v12138_v13  ;;  %11997 = vmatprep.subr.bf16.mxu1 %v11996_v14  ;;  %v3852_v13 = vld [vmem:[%s23928_s3 + $0xcf8] sm:$0xff]  ;;  %v4726_v14 = vld [vmem:[%s23928_s3 + $0x2848] sm:$0xff] }
 0x3e1   :  { %12141 = vmatprep.subr.bf16.mxu0 %v12140_v43  ;;  %v12010_v43 = vpack.c.bf16 %v4718_v8, %v4711_v6  ;;  %v12154_v16 = vpack.c.bf16 %v3852_v13, %v3845_v9  ;;  %v12012_v31 = vpack.c.bf16 %v4733_v29, %v4726_v14  ;;  %v4775_v6 = vld [vmem:[%s23928_s3 + $0x29d0] sm:$0xff]  ;;  %v3902_v8 = vld [vmem:[%s23928_s3 + $0xe88] sm:$0xff]  ;;  %v3909_v9 = vld [vmem:[%s23928_s3 + $0xec0] sm:$0xff] }
 0x3e2   :  { %v4767_v14 = vld [vmem:[%s23928_s3 + $0x2990] sm:$0xff]  ;;  %v4774_v29 = vld [vmem:[%s23928_s3 + $0x29c8] sm:$0xff] }
 0x3e3   :  { %11999 = vmatpush1.bf16.msra.mxu1 %v11998_v26  ;;  %v12156_v26 = vpack.c.bf16 %v3867_v32, %v3860_v17  ;;  %v3901_v17 = vld [vmem:[%s23928_s3 + $0xe80] sm:$0xff] }
 0x3e4   :  { %12143 = vmatpush1.bf16.msra.mxu0 %v12142_v11  ;;  %12001 = vmatprep.subr.bf16.mxu1 %v12000_v30  ;;  %v3866_v11 = vld [vmem:[%s23928_s3 + $0xd68] sm:$0xff]  ;;  %v4740_v30 = vld [vmem:[%s23928_s3 + $0x28b8] sm:$0xff] }
 0x3e5   :  { %12145 = vmatprep.subr.bf16.mxu0 %v12144_v35  ;;  %v12014_v35 = vpack.c.bf16 %v4732_v52, %v4725_v39  ;;  %v12158_v36 = vpack.c.bf16 %v3866_v11, %v3859_v23  ;;  %v12016_v38 = vpack.c.bf16 %v4747_v33, %v4740_v30  ;;  %v3449_v39 = vld [vmem:[%s23928_s3 + $0x60] sm:$0xff]  ;;  %v3916_v52 = vld [vmem:[%s23928_s3 + $0xef8] sm:$0xff]  ;;  %v3923_v23 = vld [vmem:[%s23928_s3 + $0xf30] sm:$0xff] }
 0x3e6   :  { %v3915_v33 = vld [vmem:[%s23928_s3 + $0xef0] sm:$0xff] }
 0x3e7   :  { %12003 = vmatpush1.bf16.msra.mxu1 %v12002_v51  ;;  %v12160_v51 = vpack.c.bf16 %v3881_v46, %v3874_v34  ;;  %v3441_v34 = vld [vmem:[%s23928_s3 + $0x20] sm:$0xff]  ;;  %v3448_v46 = vld [vmem:[%s23928_s3 + $0x58] sm:$0xff] }
 0x3e8   :  { %12147 = vmatpush1.bf16.msra.mxu0 %v12146_v53  ;;  %12005 = vmatprep.subr.bf16.mxu1 %v12004_v20  ;;  %v3880_v53 = vld [vmem:[%s23928_s3 + $0xdd8] sm:$0xff]  ;;  %v4754_v20 = vld [vmem:[%s23928_s3 + $0x2928] sm:$0xff] }
 0x3e9   :  { %12149 = vmatprep.subr.bf16.mxu0 %v12148_v57  ;;  %v12018_v57 = vpack.c.bf16 %v4746_v7, %v4739_v40  ;;  %v12162_v25 = vpack.c.bf16 %v3880_v53, %v3873_v47  ;;  %v12020_v3 = vpack.c.bf16 %v4761_v61, %v4754_v20  ;;  %v3463_v40 = vld [vmem:[%s23928_s3 + $0xd0] sm:$0xff]  ;;  %v3930_v7 = vld [vmem:[%s23928_s3 + $0xf68] sm:$0xff]  ;;  %v3937_v47 = vld [vmem:[%s23928_s3 + $0xfa0] sm:$0xff]  ;;  %v19520_v53 = vmax.f32 %v18423_v50, 0.0 }
 0x3ea   :  { %v3936_v50 = vld [vmem:[%s23928_s3 + $0xf98] sm:$0xff] }
 0x3eb   :  { %12007 = vmatpush1.bf16.msra.mxu1 %v12006_v37  ;;  %v3887_v37 = vld [vmem:[%s23928_s3 + $0xe10] sm:$0xff] }
 0x3ec   :  { %12151 = vmatpush1.bf16.msra.mxu0 %v12150_v1  ;;  %12009 = vmatprep.subr.bf16.mxu1 %v12008_v2  ;;  %v3894_v1 = vld [vmem:[%s23928_s3 + $0xe48] sm:$0xff]  ;;  %v4768_v2 = vld [vmem:[%s23928_s3 + $0x2998] sm:$0xff] }
 0x3ed   :  { %12153 = vmatprep.subr.bf16.mxu0 %v12152_v59  ;;  %v12022_v59 = vpack.c.bf16 %v4760_v24, %v4753_v4  ;;  %v12166_v13 = vpack.c.bf16 %v3894_v1, %v3887_v37  ;;  %v12024_v32 = vpack.c.bf16 %v4775_v6, %v4768_v2  ;;  %v3477_v4 = vld [vmem:[%s23928_s3 + $0x140] sm:$0xff]  ;;  %v3944_v24 = vld [vmem:[%s23928_s3 + $0xfd8] sm:$0xff]  ;;  %v12178_v1 = vpack.c.bf16 %v3936_v50, %v3929_v27  ;;  %v3943_v6 = vld [vmem:[%s23928_s3 + $0xfd0] sm:$0xff] }
 0x3ee   :  { %v3519_v27 = vld [vmem:[%s23928_s3 + $0x290] sm:$0xff] }
 0x3ef   :  { %12011 = vmatpush1.bf16.msra.mxu1 %v12010_v43  ;;  %v12168_v43 = vpack.c.bf16 %v3909_v9, %v3902_v8  ;;  %v3469_v8 = vld [vmem:[%s23928_s3 + $0x100] sm:$0xff]  ;;  %v3476_v9 = vld [vmem:[%s23928_s3 + $0x138] sm:$0xff] }
 0x3f0   :  { %12155 = vmatpush1.bf16.msra.mxu0 %v12154_v16  ;;  %12013 = vmatprep.subr.bf16.mxu1 %v12012_v31  ;;  %v3908_v16 = vld [vmem:[%s23928_s3 + $0xeb8] sm:$0xff]  ;;  %v3442_v31 = vld [vmem:[%s23928_s3 + $0x28] sm:$0xff] }
 0x3f1   :  { %12157 = vmatprep.subr.bf16.mxu0 %v12156_v26  ;;  %v12026_v26 = vpack.c.bf16 %v4774_v29, %v4767_v14  ;;  %v12170_v11 = vpack.c.bf16 %v3908_v16, %v3901_v17  ;;  %v12428_v30 = vpack.c.bf16 %v3449_v39, %v3442_v31  ;;  %v3484_v14 = vld [vmem:[%s23928_s3 + $0x178] sm:$0xff]  ;;  %v3491_v29 = vld [vmem:[%s23928_s3 + $0x1b0] sm:$0xff]  ;;  %v3958_v17 = vld [vmem:[%s23928_s3 + $0x1048] sm:$0xff] }
 0x3f2   :  { %v12440_v31 = vpack.c.bf16 %v3491_v29, %v3484_v14  ;;  %v3957_v39 = vld [vmem:[%s23928_s3 + $0x1040] sm:$0xff]  ;;  %v3999_v29 = vld [vmem:[%s23928_s3 + $0x1190] sm:$0xff] }
 0x3f3   :  { %12015 = vmatpush1.bf16.msra.mxu1 %v12014_v35  ;;  %v12172_v35 = vpack.c.bf16 %v3923_v23, %v3916_v52  ;;  %v3483_v52 = vld [vmem:[%s23928_s3 + $0x170] sm:$0xff]  ;;  %v3490_v23 = vld [vmem:[%s23928_s3 + $0x1a8] sm:$0xff] }
 0x3f4   :  { %12159 = vmatpush1.bf16.msra.mxu0 %v12158_v36  ;;  %12017 = vmatprep.subr.bf16.mxu1 %v12016_v38  ;;  %v3922_v36 = vld [vmem:[%s23928_s3 + $0xf28] sm:$0xff]  ;;  %v3456_v38 = vld [vmem:[%s23928_s3 + $0x98] sm:$0xff] }
 0x3f5   :  { %12161 = vmatprep.subr.bf16.mxu0 %v12160_v51  ;;  %v12430_v51 = vpack.c.bf16 %v3448_v46, %v3441_v34  ;;  %v12174_v20 = vpack.c.bf16 %v3922_v36, %v3915_v33  ;;  %v12432_v61 = vpack.c.bf16 %v3463_v40, %v3456_v38  ;;  %v3505_v33 = vld [vmem:[%s23928_s3 + $0x220] sm:$0xff]  ;;  %v3972_v34 = vld [vmem:[%s23928_s3 + $0x10b8] sm:$0xff]  ;;  %v3979_v46 = vld [vmem:[%s23928_s3 + $0x10f0] sm:$0xff] }
 0x3f6   :  { %v3971_v40 = vld [vmem:[%s23928_s3 + $0x10b0] sm:$0xff] }
 0x3f7   :  { %12019 = vmatpush1.bf16.msra.mxu1 %v12018_v57  ;;  %v3462_v57 = vld [vmem:[%s23928_s3 + $0xc8] sm:$0xff] }
 0x3f8   :  { %12163 = vmatpush1.bf16.msra.mxu0 %v12162_v25  ;;  %12021 = vmatprep.subr.bf16.mxu1 %v12020_v3  ;;  %v12176_v25 = vpack.c.bf16 %v3937_v47, %v3930_v7  ;;  %v3470_v3 = vld [vmem:[%s23928_s3 + $0x108] sm:$0xff]  ;;  %v12434_v37 = vpack.c.bf16 %v3462_v57, %v3455_v56  ;;  %v3497_v7 = vld [vmem:[%s23928_s3 + $0x1e0] sm:$0xff]  ;;  %v3504_v47 = vld [vmem:[%s23928_s3 + $0x218] sm:$0xff] }
 0x3f9   :  { %12165 = vmatprep.subr.bf16.mxu0 %v12164_v41  ;;  %v3951_v41 = vld [vmem:[%s23928_s3 + $0x1010] sm:$0xff]  ;;  %v12436_v2 = vpack.c.bf16 %v3477_v4, %v3470_v3  ;;  %v3986_v56 = vld [vmem:[%s23928_s3 + $0x1128] sm:$0xff]  ;;  %v3993_v57 = vld [vmem:[%s23928_s3 + $0x1160] sm:$0xff] }
 0x3fa   :  { %v3985_v4 = vld [vmem:[%s23928_s3 + $0x1120] sm:$0xff] }
 0x3fb   :  { %5483 = vmatmul.mubr.f32.vlgmr.msra.gmra.mrb[12].mxu0 %v18246_v58  ;;  %12023 = vmatpush1.bf16.msra.mxu1 %v12022_v59  ;;  %v12180_v59 = vpack.c.bf16 %v3951_v41, %v3944_v24  ;;  %v3511_v24 = vld [vmem:[%s23928_s3 + $0x250] sm:$0xff]  ;;  %v3518_v41 = vld [vmem:[%s23928_s3 + $0x288] sm:$0xff] }
 0x3fc   :  { %12167 = vmatpush1.bf16.msra.mxu0 %v12166_v13  ;;  %5553 = vmatprep.mubr.f32.mxu0 %v18254_v62  ;;  %v3950_v13 = vld [vmem:[%s23928_s3 + $0x1008] sm:$0xff] }
 0x3fd   :  { %12025 = vmatprep.subr.bf16.mxu1 %v12024_v32  ;;  %12169 = vmatprep.subr.bf16.mxu0 %v12168_v43  ;;  %v3965_v32 = vld [vmem:[%s23928_s3 + $0x1080] sm:$0xff]  ;;  %v12438_v43 = vpack.c.bf16 %v3476_v9, %v3469_v8  ;;  %v12182_v16 = vpack.c.bf16 %v3950_v13, %v3943_v6  ;;  %v4000_v8 = vld [vmem:[%s23928_s3 + $0x1198] sm:$0xff]  ;;  %v4007_v9 = vld [vmem:[%s23928_s3 + $0x11d0] sm:$0xff] }
 0x3fe   :  { %v3533_v6 = vld [vmem:[%s23928_s3 + $0x300] sm:$0xff] }
 0x3ff   :  { %12027 = vmatpush1.bf16.msra.mxu1 %v12026_v26  ;;  %v12184_v26 = vpack.c.bf16 %v3965_v32, %v3958_v17  ;;  %v3525_v17 = vld [vmem:[%s23928_s3 + $0x2c0] sm:$0xff]  ;;  %v3532_v32 = vld [vmem:[%s23928_s3 + $0x2f8] sm:$0xff] }
 0x400   :  { %12171 = vmatpush1.bf16.msra.mxu0 %v12170_v11  ;;  %12429 = vmatprep.subr.bf16.mxu1 %v12428_v30  ;;  %v3964_v11 = vld [vmem:[%s23928_s3 + $0x1078] sm:$0xff]  ;;  %v3498_v30 = vld [vmem:[%s23928_s3 + $0x1e8] sm:$0xff] }
 0x401   :  { %12173 = vmatprep.subr.bf16.mxu0 %v12172_v35  ;;  %v12442_v35 = vpack.c.bf16 %v3490_v23, %v3483_v52  ;;  %v12186_v36 = vpack.c.bf16 %v3964_v11, %v3957_v39  ;;  %v12444_v38 = vpack.c.bf16 %v3505_v33, %v3498_v30  ;;  %v3547_v39 = vld [vmem:[%s23928_s3 + $0x370] sm:$0xff]  ;;  %v4014_v52 = vld [vmem:[%s23928_s3 + $0x1208] sm:$0xff]  ;;  %v4021_v23 = vld [vmem:[%s23928_s3 + $0x1240] sm:$0xff] }
 0x402   :  { %5270 = vmatmul.mubr.f32.vlgmr.msra.gmra.mrb[10].mxu1 %v19520_v53  ;;  %v4013_v33 = vld [vmem:[%s23928_s3 + $0x1200] sm:$0xff] }
 0x403   :  { %12431 = vmatpush1.bf16.msra.mxu1 %v12430_v51  ;;  %5908 = vmatprep.mubr.f32.mxu1 %v17746_v5  ;;  %v12188_v51 = vpack.c.bf16 %v3979_v46, %v3972_v34  ;;  %v3539_v34 = vld [vmem:[%s23928_s3 + $0x330] sm:$0xff]  ;;  %v3546_v46 = vld [vmem:[%s23928_s3 + $0x368] sm:$0xff] }
 0x404   :  { %12175 = vmatpush1.bf16.msra.mxu0 %v12174_v20  ;;  %12433 = vmatprep.subr.bf16.mxu1 %v12432_v61  ;;  %v3978_v20 = vld [vmem:[%s23928_s3 + $0x10e8] sm:$0xff]  ;;  %v3512_v61 = vld [vmem:[%s23928_s3 + $0x258] sm:$0xff] }
 0x405   :  { %12177 = vmatprep.subr.bf16.mxu0 %v12176_v25  ;;  %v12446_v25 = vpack.c.bf16 %v3504_v47, %v3497_v7  ;;  %v12190_v50 = vpack.c.bf16 %v3978_v20, %v3971_v40  ;;  %v12448_v3 = vpack.c.bf16 %v3519_v27, %v3512_v61  ;;  %v3561_v40 = vld [vmem:[%s23928_s3 + $0x3e0] sm:$0xff]  ;;  %v4028_v7 = vld [vmem:[%s23928_s3 + $0x1278] sm:$0xff]  ;;  %v4035_v47 = vld [vmem:[%s23928_s3 + $0x12b0] sm:$0xff] }
 0x406   :  { %v4027_v27 = vld [vmem:[%s23928_s3 + $0x1270] sm:$0xff] }
 0x407   :  { %12435 = vmatpush1.bf16.msra.mxu1 %v12434_v37  ;;  %v12192_v37 = vpack.c.bf16 %v3993_v57, %v3986_v56  ;;  %v3553_v56 = vld [vmem:[%s23928_s3 + $0x3a0] sm:$0xff]  ;;  %v3560_v57 = vld [vmem:[%s23928_s3 + $0x3d8] sm:$0xff] }
 0x408   :  { %12179 = vmatpush1.bf16.msra.mxu0 %v12178_v1  ;;  %12437 = vmatprep.subr.bf16.mxu1 %v12436_v2  ;;  %v3992_v1 = vld [vmem:[%s23928_s3 + $0x1158] sm:$0xff]  ;;  %v3526_v2 = vld [vmem:[%s23928_s3 + $0x2c8] sm:$0xff] }
 0x409   :  { %12181 = vmatprep.subr.bf16.mxu0 %v12180_v59  ;;  %v12450_v59 = vpack.c.bf16 %v3518_v41, %v3511_v24  ;;  %v12194_v13 = vpack.c.bf16 %v3992_v1, %v3985_v4  ;;  %v12452_v14 = vpack.c.bf16 %v3533_v6, %v3526_v2  ;;  %v3575_v4 = vld [vmem:[%s23928_s3 + $0x450] sm:$0xff]  ;;  %v4042_v24 = vld [vmem:[%s23928_s3 + $0x12e8] sm:$0xff]  ;;  %v4049_v41 = vld [vmem:[%s23928_s3 + $0x1320] sm:$0xff] }
 0x40a   :  { %v4041_v6 = vld [vmem:[%s23928_s3 + $0x12e0] sm:$0xff] }
 0x40b   :  { %12439 = vmatpush1.bf16.msra.mxu1 %v12438_v43  ;;  %v12196_v43 = vpack.c.bf16 %v4007_v9, %v4000_v8  ;;  %v3567_v8 = vld [vmem:[%s23928_s3 + $0x410] sm:$0xff]  ;;  %v3574_v9 = vld [vmem:[%s23928_s3 + $0x448] sm:$0xff] }
 0x40c   :  { %12183 = vmatpush1.bf16.msra.mxu0 %v12182_v16  ;;  %12441 = vmatprep.subr.bf16.mxu1 %v12440_v31  ;;  %v4006_v16 = vld [vmem:[%s23928_s3 + $0x11c8] sm:$0xff]  ;;  %v3540_v31 = vld [vmem:[%s23928_s3 + $0x338] sm:$0xff] }
 0x40d   :  { %12185 = vmatprep.subr.bf16.mxu0 %v12184_v26  ;;  %v12454_v26 = vpack.c.bf16 %v3532_v32, %v3525_v17  ;;  %v12198_v11 = vpack.c.bf16 %v4006_v16, %v3999_v29  ;;  %v12456_v30 = vpack.c.bf16 %v3547_v39, %v3540_v31  ;;  %v3589_v29 = vld [vmem:[%s23928_s3 + $0x4c0] sm:$0xff]  ;;  %v4056_v17 = vld [vmem:[%s23928_s3 + $0x1358] sm:$0xff]  ;;  %v4063_v32 = vld [vmem:[%s23928_s3 + $0x1390] sm:$0xff] }
 0x40e   :  { %v4055_v39 = vld [vmem:[%s23928_s3 + $0x1350] sm:$0xff] }
 0x40f   :  { %12443 = vmatpush1.bf16.msra.mxu1 %v12442_v35  ;;  %v12200_v35 = vpack.c.bf16 %v4021_v23, %v4014_v52  ;;  %v3581_v52 = vld [vmem:[%s23928_s3 + $0x480] sm:$0xff]  ;;  %v3588_v23 = vld [vmem:[%s23928_s3 + $0x4b8] sm:$0xff] }
 0x410   :  { %12187 = vmatpush1.bf16.msra.mxu0 %v12186_v36  ;;  %12445 = vmatprep.subr.bf16.mxu1 %v12444_v38  ;;  %v4020_v36 = vld [vmem:[%s23928_s3 + $0x1238] sm:$0xff]  ;;  %v3554_v38 = vld [vmem:[%s23928_s3 + $0x3a8] sm:$0xff] }
 0x411   :  { %12189 = vmatprep.subr.bf16.mxu0 %v12188_v51  ;;  %v12458_v51 = vpack.c.bf16 %v3546_v46, %v3539_v34  ;;  %v12202_v20 = vpack.c.bf16 %v4020_v36, %v4013_v33  ;;  %v12460_v61 = vpack.c.bf16 %v3561_v40, %v3554_v38  ;;  %v3603_v33 = vld [vmem:[%s23928_s3 + $0x530] sm:$0xff]  ;;  %v4070_v34 = vld [vmem:[%s23928_s3 + $0x13c8] sm:$0xff]  ;;  %v4077_v46 = vld [vmem:[%s23928_s3 + $0x1400] sm:$0xff] }
 0x412   :  { %v4069_v40 = vld [vmem:[%s23928_s3 + $0x13c0] sm:$0xff] }
 0x413   :  { %12447 = vmatpush1.bf16.msra.mxu1 %v12446_v25  ;;  %v12204_v25 = vpack.c.bf16 %v4035_v47, %v4028_v7  ;;  %v3595_v7 = vld [vmem:[%s23928_s3 + $0x4f0] sm:$0xff]  ;;  %v3602_v47 = vld [vmem:[%s23928_s3 + $0x528] sm:$0xff] }
 0x414   :  { %12191 = vmatpush1.bf16.msra.mxu0 %v12190_v50  ;;  %12449 = vmatprep.subr.bf16.mxu1 %v12448_v3  ;;  %v4034_v50 = vld [vmem:[%s23928_s3 + $0x12a8] sm:$0xff]  ;;  %v3568_v3 = vld [vmem:[%s23928_s3 + $0x418] sm:$0xff] }
 0x415   :  { %12193 = vmatprep.subr.bf16.mxu0 %v12192_v37  ;;  %v12462_v37 = vpack.c.bf16 %v3560_v57, %v3553_v56  ;;  %v12206_v1 = vpack.c.bf16 %v4034_v50, %v4027_v27  ;;  %v12464_v2 = vpack.c.bf16 %v3575_v4, %v3568_v3  ;;  %v3617_v27 = vld [vmem:[%s23928_s3 + $0x5a0] sm:$0xff]  ;;  %v4084_v56 = vld [vmem:[%s23928_s3 + $0x1438] sm:$0xff]  ;;  %v4091_v57 = vld [vmem:[%s23928_s3 + $0x1470] sm:$0xff] }
 0x416   :  { %v4083_v4 = vld [vmem:[%s23928_s3 + $0x1430] sm:$0xff] }
 0x417   :  { %12451 = vmatpush1.bf16.msra.mxu1 %v12450_v59  ;;  %v12208_v59 = vpack.c.bf16 %v4049_v41, %v4042_v24  ;;  %v3609_v24 = vld [vmem:[%s23928_s3 + $0x560] sm:$0xff]  ;;  %v3616_v41 = vld [vmem:[%s23928_s3 + $0x598] sm:$0xff] }
 0x418   :  { %12195 = vmatpush1.bf16.msra.mxu0 %v12194_v13  ;;  %12453 = vmatprep.subr.bf16.mxu1 %v12452_v14  ;;  %v4048_v13 = vld [vmem:[%s23928_s3 + $0x1318] sm:$0xff]  ;;  %v3582_v14 = vld [vmem:[%s23928_s3 + $0x488] sm:$0xff] }
 0x419   :  { %12197 = vmatprep.subr.bf16.mxu0 %v12196_v43  ;;  %v12466_v43 = vpack.c.bf16 %v3574_v9, %v3567_v8  ;;  %v12210_v16 = vpack.c.bf16 %v4048_v13, %v4041_v6  ;;  %v12468_v31 = vpack.c.bf16 %v3589_v29, %v3582_v14  ;;  %v3631_v6 = vld [vmem:[%s23928_s3 + $0x610] sm:$0xff]  ;;  %v4098_v8 = vld [vmem:[%s23928_s3 + $0x14a8] sm:$0xff]  ;;  %v4105_v9 = vld [vmem:[%s23928_s3 + $0x14e0] sm:$0xff] }
 0x41a   :  { %v4097_v29 = vld [vmem:[%s23928_s3 + $0x14a0] sm:$0xff] }
 0x41b   :  { %12455 = vmatpush1.bf16.msra.mxu1 %v12454_v26  ;;  %v12212_v26 = vpack.c.bf16 %v4063_v32, %v4056_v17  ;;  %v3623_v17 = vld [vmem:[%s23928_s3 + $0x5d0] sm:$0xff]  ;;  %v3630_v32 = vld [vmem:[%s23928_s3 + $0x608] sm:$0xff] }
 0x41c   :  { %12199 = vmatpush1.bf16.msra.mxu0 %v12198_v11  ;;  %12457 = vmatprep.subr.bf16.mxu1 %v12456_v30  ;;  %v4062_v11 = vld [vmem:[%s23928_s3 + $0x1388] sm:$0xff]  ;;  %v3596_v30 = vld [vmem:[%s23928_s3 + $0x4f8] sm:$0xff] }
 0x41d   :  { %12201 = vmatprep.subr.bf16.mxu0 %v12200_v35  ;;  %v12470_v35 = vpack.c.bf16 %v3588_v23, %v3581_v52  ;;  %v12214_v36 = vpack.c.bf16 %v4062_v11, %v4055_v39  ;;  %v12472_v38 = vpack.c.bf16 %v3603_v33, %v3596_v30  ;;  %v3645_v39 = vld [vmem:[%s23928_s3 + $0x680] sm:$0xff]  ;;  %v4112_v52 = vld [vmem:[%s23928_s3 + $0x1518] sm:$0xff]  ;;  %v4119_v23 = vld [vmem:[%s23928_s3 + $0x1550] sm:$0xff] }
 0x41e   :  { %v3637_v33 = vld [vmem:[%s23928_s3 + $0x640] sm:$0xff] }
 0x41f   :  { %12459 = vmatpush1.bf16.msra.mxu1 %v12458_v51  ;;  %v12216_v51 = vpack.c.bf16 %v4077_v46, %v4070_v34  ;;  %v3644_v34 = vld [vmem:[%s23928_s3 + $0x678] sm:$0xff]  ;;  %v12228_v46 = vpack.c.bf16 %v4119_v23, %v4112_v52  ;;  %v3679_v52 = vld [vmem:[%s23928_s3 + $0x790] sm:$0xff]  ;;  %v3686_v23 = vld [vmem:[%s23928_s3 + $0x7c8] sm:$0xff] }
 0x420   :  { %12203 = vmatpush1.bf16.msra.mxu0 %v12202_v20  ;;  %12461 = vmatprep.subr.bf16.mxu1 %v12460_v61  ;;  %v4076_v20 = vld [vmem:[%s23928_s3 + $0x13f8] sm:$0xff]  ;;  %v3610_v61 = vld [vmem:[%s23928_s3 + $0x568] sm:$0xff] }
 0x421   :  { %12205 = vmatprep.subr.bf16.mxu0 %v12204_v25  ;;  %v12474_v25 = vpack.c.bf16 %v3602_v47, %v3595_v7  ;;  %v12218_v50 = vpack.c.bf16 %v4076_v20, %v4069_v40  ;;  %v12476_v3 = vpack.c.bf16 %v3617_v27, %v3610_v61  ;;  %v4133_v40 = vld [vmem:[%s23928_s3 + $0x15c0] sm:$0xff]  ;;  %v3652_v7 = vld [vmem:[%s23928_s3 + $0x6b8] sm:$0xff]  ;;  %v3659_v47 = vld [vmem:[%s23928_s3 + $0x6f0] sm:$0xff] }
 0x422   :  { %v4125_v61 = vld [vmem:[%s23928_s3 + $0x1580] sm:$0xff]  ;;  %v3651_v27 = vld [vmem:[%s23928_s3 + $0x6b0] sm:$0xff] }
 0x423   :  { %12463 = vmatpush1.bf16.msra.mxu1 %v12462_v37  ;;  %v12220_v37 = vpack.c.bf16 %v4091_v57, %v4084_v56  ;;  %v3658_v56 = vld [vmem:[%s23928_s3 + $0x6e8] sm:$0xff] }
 0x424   :  { %12207 = vmatpush1.bf16.msra.mxu0 %v12206_v1  ;;  %12465 = vmatprep.subr.bf16.mxu1 %v12464_v2  ;;  %v4090_v1 = vld [vmem:[%s23928_s3 + $0x1468] sm:$0xff]  ;;  %v3624_v2 = vld [vmem:[%s23928_s3 + $0x5d8] sm:$0xff] }
 0x425   :  { %12209 = vmatprep.subr.bf16.mxu0 %v12208_v59  ;;  %v12478_v59 = vpack.c.bf16 %v3616_v41, %v3609_v24  ;;  %v12222_v13 = vpack.c.bf16 %v4090_v1, %v4083_v4  ;;  %v12480_v14 = vpack.c.bf16 %v3631_v6, %v3624_v2  ;;  %v3673_v4 = vld [vmem:[%s23928_s3 + $0x760] sm:$0xff]  ;;  %v4140_v24 = vld [vmem:[%s23928_s3 + $0x15f8] sm:$0xff]  ;;  %v4147_v41 = vld [vmem:[%s23928_s3 + $0x1630] sm:$0xff] }
 0x426   :  { %v4139_v6 = vld [vmem:[%s23928_s3 + $0x15f0] sm:$0xff] }
 0x427   :  { %12467 = vmatpush1.bf16.msra.mxu1 %v12466_v43  ;;  %v12224_v43 = vpack.c.bf16 %v4105_v9, %v4098_v8  ;;  %v3665_v8 = vld [vmem:[%s23928_s3 + $0x720] sm:$0xff]  ;;  %v3672_v9 = vld [vmem:[%s23928_s3 + $0x758] sm:$0xff] }
 0x428   :  { %12211 = vmatpush1.bf16.msra.mxu0 %v12210_v16  ;;  %12469 = vmatprep.subr.bf16.mxu1 %v12468_v31  ;;  %v4104_v16 = vld [vmem:[%s23928_s3 + $0x14d8] sm:$0xff]  ;;  %v3638_v31 = vld [vmem:[%s23928_s3 + $0x648] sm:$0xff] }
 0x429   :  { %12213 = vmatprep.subr.bf16.mxu0 %v12212_v26  ;;  %v12482_v26 = vpack.c.bf16 %v3630_v32, %v3623_v17  ;;  %v12226_v11 = vpack.c.bf16 %v4104_v16, %v4097_v29  ;;  %v12484_v30 = vpack.c.bf16 %v3645_v39, %v3638_v31  ;;  %v3687_v29 = vld [vmem:[%s23928_s3 + $0x7d0] sm:$0xff]  ;;  %v4154_v17 = vld [vmem:[%s23928_s3 + $0x1668] sm:$0xff]  ;;  %v4161_v32 = vld [vmem:[%s23928_s3 + $0x16a0] sm:$0xff] }
 0x42a   :  { %v4153_v39 = vld [vmem:[%s23928_s3 + $0x1660] sm:$0xff] }
 0x42b   :  { %12471 = vmatpush1.bf16.msra.mxu1 %v12470_v35  ;;  %v4111_v35 = vld [vmem:[%s23928_s3 + $0x1510] sm:$0xff] }
 0x42c   :  { %12215 = vmatpush1.bf16.msra.mxu0 %v12214_v36  ;;  %12473 = vmatprep.subr.bf16.mxu1 %v12472_v38  ;;  %v4118_v36 = vld [vmem:[%s23928_s3 + $0x1548] sm:$0xff] }
 0x42d   :  { %12217 = vmatprep.subr.bf16.mxu0 %v12216_v51  ;;  %v4126_v38 = vld [vmem:[%s23928_s3 + $0x1588] sm:$0xff]  ;;  %v12486_v51 = vpack.c.bf16 %v3644_v34, %v3637_v33  ;;  %v12230_v20 = vpack.c.bf16 %v4118_v36, %v4111_v35  ;;  %v3701_v33 = vld [vmem:[%s23928_s3 + $0x840] sm:$0xff]  ;;  %v4168_v34 = vld [vmem:[%s23928_s3 + $0x16d8] sm:$0xff]  ;;  %v12498_v35 = vpack.c.bf16 %v3686_v23, %v3679_v52 }
 0x42e   :  { %v12232_v57 = vpack.c.bf16 %v4133_v40, %v4126_v38  ;;  %v4167_v40 = vld [vmem:[%s23928_s3 + $0x16d0] sm:$0xff] }
 0x42f   :  { %12475 = vmatpush1.bf16.msra.mxu1 %v12474_v25  ;;  %v12488_v25 = vpack.c.bf16 %v3659_v47, %v3652_v7  ;;  %v3693_v7 = vld [vmem:[%s23928_s3 + $0x800] sm:$0xff]  ;;  %v3700_v47 = vld [vmem:[%s23928_s3 + $0x838] sm:$0xff]  ;;  %v3743_v52 = vld [vmem:[%s23928_s3 + $0x990] sm:$0xff] }
 0x430   :  { %12219 = vmatpush1.bf16.msra.mxu0 %v12218_v50  ;;  %12477 = vmatprep.subr.bf16.mxu1 %v12476_v3  ;;  %v4132_v50 = vld [vmem:[%s23928_s3 + $0x15b8] sm:$0xff]  ;;  %v3666_v3 = vld [vmem:[%s23928_s3 + $0x728] sm:$0xff] }
 0x431   :  { %12221 = vmatprep.subr.bf16.mxu0 %v12220_v37  ;;  %v12490_v37 = vpack.c.bf16 %v3658_v56, %v3651_v27  ;;  %v12234_v1 = vpack.c.bf16 %v4132_v50, %v4125_v61  ;;  %v12492_v2 = vpack.c.bf16 %v3673_v4, %v3666_v3  ;;  %v3708_v61 = vld [vmem:[%s23928_s3 + $0x878] sm:$0xff]  ;;  %v3715_v27 = vld [vmem:[%s23928_s3 + $0x8b0] sm:$0xff]  ;;  %v4182_v56 = vld [vmem:[%s23928_s3 + $0x1748] sm:$0xff] }
 0x432   :  { %v12504_v3 = vpack.c.bf16 %v3715_v27, %v3708_v61  ;;  %v4181_v4 = vld [vmem:[%s23928_s3 + $0x1740] sm:$0xff] }
 0x433   :  { %12479 = vmatpush1.bf16.msra.mxu1 %v12478_v59  ;;  %v12236_v59 = vpack.c.bf16 %v4147_v41, %v4140_v24  ;;  %v3707_v24 = vld [vmem:[%s23928_s3 + $0x870] sm:$0xff]  ;;  %v3714_v41 = vld [vmem:[%s23928_s3 + $0x8a8] sm:$0xff] }
 0x434   :  { %12223 = vmatpush1.bf16.msra.mxu0 %v12222_v13  ;;  %12481 = vmatprep.subr.bf16.mxu1 %v12480_v14  ;;  %v4146_v13 = vld [vmem:[%s23928_s3 + $0x1628] sm:$0xff]  ;;  %v3680_v14 = vld [vmem:[%s23928_s3 + $0x798] sm:$0xff] }
 0x435   :  { %12225 = vmatprep.subr.bf16.mxu0 %v12224_v43  ;;  %v12494_v43 = vpack.c.bf16 %v3672_v9, %v3665_v8  ;;  %v12238_v16 = vpack.c.bf16 %v4146_v13, %v4139_v6  ;;  %v12496_v31 = vpack.c.bf16 %v3687_v29, %v3680_v14  ;;  %v3729_v6 = vld [vmem:[%s23928_s3 + $0x920] sm:$0xff]  ;;  %v4196_v8 = vld [vmem:[%s23928_s3 + $0x17b8] sm:$0xff]  ;;  %v4203_v9 = vld [vmem:[%s23928_s3 + $0x17f0] sm:$0xff] }
 0x436   :  { %v4195_v29 = vld [vmem:[%s23928_s3 + $0x17b0] sm:$0xff] }
 0x437   :  { %12483 = vmatpush1.bf16.msra.mxu1 %v12482_v26  ;;  %v12240_v26 = vpack.c.bf16 %v4161_v32, %v4154_v17  ;;  %v3721_v17 = vld [vmem:[%s23928_s3 + $0x8e0] sm:$0xff]  ;;  %v3728_v32 = vld [vmem:[%s23928_s3 + $0x918] sm:$0xff] }
 0x438   :  { %12227 = vmatpush1.bf16.msra.mxu0 %v12226_v11  ;;  %12485 = vmatprep.subr.bf16.mxu1 %v12484_v30  ;;  %v4160_v11 = vld [vmem:[%s23928_s3 + $0x1698] sm:$0xff]  ;;  %v3694_v30 = vld [vmem:[%s23928_s3 + $0x808] sm:$0xff] }
 0x439   :  { %12229 = vmatprep.subr.bf16.mxu0 %v12228_v46  ;;  %v4175_v46 = vld [vmem:[%s23928_s3 + $0x1710] sm:$0xff]  ;;  %v12242_v36 = vpack.c.bf16 %v4160_v11, %v4153_v39  ;;  %v12500_v38 = vpack.c.bf16 %v3701_v33, %v3694_v30  ;;  %v3736_v39 = vld [vmem:[%s23928_s3 + $0x958] sm:$0xff]  ;;  %v4217_v11 = vld [vmem:[%s23928_s3 + $0x1860] sm:$0xff]  ;;  %v12510_v30 = vpack.c.bf16 %v3728_v32, %v3721_v17 }
 0x43a   :  { %v3778_v17 = vld [vmem:[%s23928_s3 + $0xaa8] sm:$0xff]  ;;  %v3785_v32 = vld [vmem:[%s23928_s3 + $0xae0] sm:$0xff] }
 0x43b   :  { %5554 = vmatmul.mubr.f32.vlgmr.msra.gmra.mrb[12].mxu0 %v18477_v18  ;;  %12487 = vmatpush1.bf16.msra.mxu1 %v12486_v51  ;;  %v12244_v51 = vpack.c.bf16 %v4175_v46, %v4168_v34  ;;  %v12512_v34 = vpack.c.bf16 %v3743_v52, %v3736_v39  ;;  %v4209_v46 = vld [vmem:[%s23928_s3 + $0x1820] sm:$0xff] }
 0x43c   :  { %12231 = vmatpush1.bf16.msra.mxu0 %v12230_v20  ;;  %5624 = vmatprep.mubr.f32.mxu0 %v18485_v49  ;;  %v4174_v20 = vld [vmem:[%s23928_s3 + $0x1708] sm:$0xff] }
 0x43d   :  { %12233 = vmatprep.subr.bf16.mxu0 %v12232_v57  ;;  %12489 = vmatprep.subr.bf16.mxu1 %v12488_v25  ;;  %v4189_v57 = vld [vmem:[%s23928_s3 + $0x1780] sm:$0xff]  ;;  %v12502_v25 = vpack.c.bf16 %v3700_v47, %v3693_v7  ;;  %v12246_v50 = vpack.c.bf16 %v4174_v20, %v4167_v40  ;;  %v4216_v40 = vld [vmem:[%s23928_s3 + $0x1858] sm:$0xff]  ;;  %v3750_v7 = vld [vmem:[%s23928_s3 + $0x9c8] sm:$0xff] }
 0x43e   :  { %v3757_v47 = vld [vmem:[%s23928_s3 + $0xa00] sm:$0xff]  ;;  %v4231_v20 = vld [vmem:[%s23928_s3 + $0x18d0] sm:$0xff]  ;;  %v12258_v27 = vpack.c.bf16 %v4216_v40, %v4209_v46  ;;  %v4258_v46 = vld [vmem:[%s23928_s3 + $0x19a8] sm:$0xff] }
 0x43f   :  { %12491 = vmatpush1.bf16.msra.mxu1 %v12490_v37  ;;  %v12248_v37 = vpack.c.bf16 %v4189_v57, %v4182_v56  ;;  %v12516_v56 = vpack.c.bf16 %v3757_v47, %v3750_v7  ;;  %v4223_v57 = vld [vmem:[%s23928_s3 + $0x1890] sm:$0xff]  ;;  %v4273_v40 = vld [vmem:[%s23928_s3 + $0x1a20] sm:$0xff] }
 0x440   :  { %12235 = vmatpush1.bf16.msra.mxu0 %v12234_v1  ;;  %12493 = vmatprep.subr.bf16.mxu1 %v12492_v2  ;;  %v4188_v1 = vld [vmem:[%s23928_s3 + $0x1778] sm:$0xff]  ;;  %v3722_v2 = vld [vmem:[%s23928_s3 + $0x8e8] sm:$0xff] }
 0x441   :  { %12237 = vmatprep.subr.bf16.mxu0 %v12236_v59  ;;  %v12506_v59 = vpack.c.bf16 %v3714_v41, %v3707_v24  ;;  %v12250_v13 = vpack.c.bf16 %v4188_v1, %v4181_v4  ;;  %v12508_v14 = vpack.c.bf16 %v3729_v6, %v3722_v2  ;;  %v4230_v4 = vld [vmem:[%s23928_s3 + $0x18c8] sm:$0xff]  ;;  %v3764_v24 = vld [vmem:[%s23928_s3 + $0xa38] sm:$0xff]  ;;  %v3771_v41 = vld [vmem:[%s23928_s3 + $0xa70] sm:$0xff] }
 0x442   :  { %5909 = vmatmul.mubr.f32.vlgmr.msra.gmra.mrb[12].mxu1 %v18006_v55  ;;  %v4245_v1 = vld [vmem:[%s23928_s3 + $0x1940] sm:$0xff]  ;;  %v12262_v6 = vpack.c.bf16 %v4230_v4, %v4223_v57  ;;  %v4272_v57 = vld [vmem:[%s23928_s3 + $0x1a18] sm:$0xff]  ;;  %v4287_v4 = vld [vmem:[%s23928_s3 + $0x1a90] sm:$0xff] }
 0x443   :  { %12495 = vmatpush1.bf16.msra.mxu1 %v12494_v43  ;;  %5979 = vmatprep.mubr.f32.mxu1 %v18014_v42 }
 0x444   :  { %12239 = vmatpush1.bf16.msra.mxu0 %v12238_v16  ;;  %12497 = vmatprep.subr.bf16.mxu1 %v12496_v31  ;;  %v12252_v16 = vpack.c.bf16 %v4203_v9, %v4196_v8  ;;  %v4202_v31 = vld [vmem:[%s23928_s3 + $0x17e8] sm:$0xff]  ;;  %v12520_v8 = vpack.c.bf16 %v3771_v41, %v3764_v24  ;;  %v4237_v9 = vld [vmem:[%s23928_s3 + $0x1900] sm:$0xff] }
 0x445   :  { %12241 = vmatprep.subr.bf16.mxu0 %v12240_v26  ;;  %v4210_v26 = vld [vmem:[%s23928_s3 + $0x1828] sm:$0xff]  ;;  %v12254_v33 = vpack.c.bf16 %v4202_v31, %v4195_v29  ;;  %v4244_v29 = vld [vmem:[%s23928_s3 + $0x1938] sm:$0xff]  ;;  %v4259_v31 = vld [vmem:[%s23928_s3 + $0x19b0] sm:$0xff] }
 0x446   :  { %v12266_v52 = vpack.c.bf16 %v4244_v29, %v4237_v9  ;;  %v4286_v9 = vld [vmem:[%s23928_s3 + $0x1a88] sm:$0xff]  ;;  %v4301_v29 = vld [vmem:[%s23928_s3 + $0x1b00] sm:$0xff] }
 0x447   :  { %12499 = vmatpush1.bf16.msra.mxu1 %v12498_v35  ;;  %v3735_v35 = vld [vmem:[%s23928_s3 + $0x950] sm:$0xff] }
 0x448   :  { %12243 = vmatpush1.bf16.msra.mxu0 %v12242_v36  ;;  %12501 = vmatprep.subr.bf16.mxu1 %v12500_v38  ;;  %v3742_v36 = vld [vmem:[%s23928_s3 + $0x988] sm:$0xff]  ;;  %v12256_v38 = vpack.c.bf16 %v4217_v11, %v4210_v26  ;;  %v12524_v26 = vpack.c.bf16 %v3785_v32, %v3778_v17  ;;  %v4251_v11 = vld [vmem:[%s23928_s3 + $0x1970] sm:$0xff] }
 0x449   :  { %12245 = vmatprep.subr.bf16.mxu0 %v12244_v51  ;;  %v4224_v51 = vld [vmem:[%s23928_s3 + $0x1898] sm:$0xff]  ;;  %v12514_v61 = vpack.c.bf16 %v3742_v36, %v3735_v35  ;;  %v3799_v36 = vld [vmem:[%s23928_s3 + $0xb50] sm:$0xff]  ;;  %v12270_v47 = vpack.c.bf16 %v4258_v46, %v4251_v11 }
 0x44a   :  { %v3792_v35 = vld [vmem:[%s23928_s3 + $0xb18] sm:$0xff]  ;;  %v4315_v46 = vld [vmem:[%s23928_s3 + $0x1b70] sm:$0xff] }
 0x44b   :  { %12503 = vmatpush1.bf16.msra.mxu1 %v12502_v25  ;;  %v3749_v25 = vld [vmem:[%s23928_s3 + $0x9c0] sm:$0xff]  ;;  %v4300_v11 = vld [vmem:[%s23928_s3 + $0x1af8] sm:$0xff] }
 0x44c   :  { %12247 = vmatpush1.bf16.msra.mxu0 %v12246_v50  ;;  %12505 = vmatprep.subr.bf16.mxu1 %v12504_v3  ;;  %v3756_v50 = vld [vmem:[%s23928_s3 + $0x9f8] sm:$0xff]  ;;  %v12260_v3 = vpack.c.bf16 %v4231_v20, %v4224_v51  ;;  %v12528_v51 = vpack.c.bf16 %v3799_v36, %v3792_v35  ;;  %v4265_v20 = vld [vmem:[%s23928_s3 + $0x19e0] sm:$0xff] }
 0x44d   :  { %v19993_v43 = vpop.f32.mrb[10].mxu0  ;;  %12249 = vmatprep.subr.bf16.mxu0 %v12248_v37  ;;  %v4238_v37 = vld [vmem:[%s23928_s3 + $0x1908] sm:$0xff]  ;;  %v12518_v2 = vpack.c.bf16 %v3756_v50, %v3749_v25  ;;  %v3813_v50 = vld [vmem:[%s23928_s3 + $0xbc0] sm:$0xff]  ;;  %v12274_v41 = vpack.c.bf16 %v4272_v57, %v4265_v20 }
 0x44e   :  { %v20004_v23 = vpop.f32.mrb[11].mxu0  ;;  %v3806_v25 = vld [vmem:[%s23928_s3 + $0xb88] sm:$0xff]  ;;  %v4329_v57 = vld [vmem:[%s23928_s3 + $0x1be0] sm:$0xff] }
 0x44f   :  { %12507 = vmatpush1.bf16.msra.mxu1 %v12506_v59  ;;  %v3763_v59 = vld [vmem:[%s23928_s3 + $0xa30] sm:$0xff]  ;;  %v4314_v20 = vld [vmem:[%s23928_s3 + $0x1b68] sm:$0xff] }
 0x450   :  { %12251 = vmatpush1.bf16.msra.mxu0 %v12250_v13  ;;  %12509 = vmatprep.subr.bf16.mxu1 %v12508_v14  ;;  %v3770_v13 = vld [vmem:[%s23928_s3 + $0xa68] sm:$0xff]  ;;  %v12264_v14 = vpack.c.bf16 %v4245_v1, %v4238_v37  ;;  %v12532_v37 = vpack.c.bf16 %v3813_v50, %v3806_v25  ;;  %v4279_v1 = vld [vmem:[%s23928_s3 + $0x1a50] sm:$0xff] }
 0x451   :  { %12253 = vmatprep.subr.bf16.mxu0 %v12252_v16  ;;  %v4252_v16 = vld [vmem:[%s23928_s3 + $0x1978] sm:$0xff]  ;;  %v12522_v39 = vpack.c.bf16 %v3770_v13, %v3763_v59  ;;  %v3827_v13 = vld [vmem:[%s23928_s3 + $0xc30] sm:$0xff]  ;;  %v12278_v32 = vpack.c.bf16 %v4286_v9, %v4279_v1 }
 0x452   :  { %v3820_v59 = vld [vmem:[%s23928_s3 + $0xbf8] sm:$0xff]  ;;  %v4343_v9 = vld [vmem:[%s23928_s3 + $0x1c50] sm:$0xff] }
 0x453   :  { %12511 = vmatpush1.bf16.msra.mxu1 %v12510_v30  ;;  %v3777_v30 = vld [vmem:[%s23928_s3 + $0xaa0] sm:$0xff]  ;;  %v4328_v1 = vld [vmem:[%s23928_s3 + $0x1bd8] sm:$0xff] }
 0x454   :  { %12255 = vmatpush1.bf16.msra.mxu0 %v12254_v33  ;;  %12513 = vmatprep.subr.bf16.mxu1 %v12512_v34  ;;  %v3784_v33 = vld [vmem:[%s23928_s3 + $0xad8] sm:$0xff]  ;;  %v12268_v34 = vpack.c.bf16 %v4259_v31, %v4252_v16  ;;  %v12536_v16 = vpack.c.bf16 %v3827_v13, %v3820_v59  ;;  %v4293_v31 = vld [vmem:[%s23928_s3 + $0x1ac0] sm:$0xff] }
 0x455   :  { %12257 = vmatprep.subr.bf16.mxu0 %v12256_v38  ;;  %v4266_v38 = vld [vmem:[%s23928_s3 + $0x19e8] sm:$0xff]  ;;  %v12526_v7 = vpack.c.bf16 %v3784_v33, %v3777_v30  ;;  %v3841_v33 = vld [vmem:[%s23928_s3 + $0xca0] sm:$0xff]  ;;  %v12282_v36 = vpack.c.bf16 %v4300_v11, %v4293_v31  ;;  %v3883_v11 = vld [vmem:[%s23928_s3 + $0xdf0] sm:$0xff] }
 0x456   :  { %v3834_v30 = vld [vmem:[%s23928_s3 + $0xc68] sm:$0xff] }
 0x457   :  { %12515 = vmatpush1.bf16.msra.mxu1 %v12514_v61  ;;  %v3791_v61 = vld [vmem:[%s23928_s3 + $0xb10] sm:$0xff]  ;;  %v4342_v31 = vld [vmem:[%s23928_s3 + $0x1c48] sm:$0xff] }
 0x458   :  { %12259 = vmatpush1.bf16.msra.mxu0 %v12258_v27  ;;  %12517 = vmatprep.subr.bf16.mxu1 %v12516_v56  ;;  %v3798_v27 = vld [vmem:[%s23928_s3 + $0xb48] sm:$0xff]  ;;  %v12272_v56 = vpack.c.bf16 %v4273_v40, %v4266_v38  ;;  %v12540_v38 = vpack.c.bf16 %v3841_v33, %v3834_v30  ;;  %v4307_v40 = vld [vmem:[%s23928_s3 + $0x1b30] sm:$0xff] }
 0x459   :  { %12261 = vmatprep.subr.bf16.mxu0 %v12260_v3  ;;  %v4280_v3 = vld [vmem:[%s23928_s3 + $0x1a58] sm:$0xff]  ;;  %v12530_v24 = vpack.c.bf16 %v3798_v27, %v3791_v61  ;;  %v3855_v27 = vld [vmem:[%s23928_s3 + $0xd10] sm:$0xff]  ;;  %v12286_v50 = vpack.c.bf16 %v4314_v20, %v4307_v40 }
 0x45a   :  { %v3848_v61 = vld [vmem:[%s23928_s3 + $0xcd8] sm:$0xff]  ;;  %v4371_v20 = vld [vmem:[%s23928_s3 + $0x1d30] sm:$0xff] }
 0x45b   :  { %12519 = vmatpush1.bf16.msra.mxu1 %v12518_v2  ;;  %v3805_v2 = vld [vmem:[%s23928_s3 + $0xb80] sm:$0xff]  ;;  %v4356_v40 = vld [vmem:[%s23928_s3 + $0x1cb8] sm:$0xff] }
 0x45c   :  { %12263 = vmatpush1.bf16.msra.mxu0 %v12262_v6  ;;  %12521 = vmatprep.subr.bf16.mxu1 %v12520_v8  ;;  %v3812_v6 = vld [vmem:[%s23928_s3 + $0xbb8] sm:$0xff]  ;;  %v12276_v8 = vpack.c.bf16 %v4287_v4, %v4280_v3  ;;  %v12544_v3 = vpack.c.bf16 %v3855_v27, %v3848_v61  ;;  %v4321_v4 = vld [vmem:[%s23928_s3 + $0x1ba0] sm:$0xff] }
 0x45d   :  { %12265 = vmatprep.subr.bf16.mxu0 %v12264_v14  ;;  %v4294_v14 = vld [vmem:[%s23928_s3 + $0x1ac8] sm:$0xff]  ;;  %v12534_v17 = vpack.c.bf16 %v3812_v6, %v3805_v2  ;;  %v3869_v6 = vld [vmem:[%s23928_s3 + $0xd80] sm:$0xff]  ;;  %v12290_v13 = vpack.c.bf16 %v4328_v1, %v4321_v4 }
 0x45e   :  { %v3862_v2 = vld [vmem:[%s23928_s3 + $0xd48] sm:$0xff]  ;;  %v4385_v1 = vld [vmem:[%s23928_s3 + $0x1da0] sm:$0xff] }
 0x45f   :  { %12523 = vmatpush1.bf16.msra.mxu1 %v12522_v39  ;;  %v3819_v39 = vld [vmem:[%s23928_s3 + $0xbf0] sm:$0xff]  ;;  %v4370_v4 = vld [vmem:[%s23928_s3 + $0x1d28] sm:$0xff] }
 0x460   :  { %12267 = vmatpush1.bf16.msra.mxu0 %v12266_v52  ;;  %12525 = vmatprep.subr.bf16.mxu1 %v12524_v26  ;;  %v3826_v52 = vld [vmem:[%s23928_s3 + $0xc28] sm:$0xff]  ;;  %v12280_v26 = vpack.c.bf16 %v4301_v29, %v4294_v14  ;;  %v12548_v14 = vpack.c.bf16 %v3869_v6, %v3862_v2  ;;  %v3861_v29 = vld [vmem:[%s23928_s3 + $0xd40] sm:$0xff] }
 0x461   :  { %12269 = vmatprep.subr.bf16.mxu0 %v12268_v34  ;;  %v4308_v34 = vld [vmem:[%s23928_s3 + $0x1b38] sm:$0xff]  ;;  %v12538_v35 = vpack.c.bf16 %v3826_v52, %v3819_v39  ;;  %v4350_v39 = vld [vmem:[%s23928_s3 + $0x1c88] sm:$0xff]  ;;  %v4357_v52 = vld [vmem:[%s23928_s3 + $0x1cc0] sm:$0xff] }
 0x463   :  { %12527 = vmatpush1.bf16.msra.mxu1 %v12526_v7  ;;  %v3833_v7 = vld [vmem:[%s23928_s3 + $0xc60] sm:$0xff] }
 0x464   :  { %12271 = vmatpush1.bf16.msra.mxu0 %v12270_v47  ;;  %12529 = vmatprep.subr.bf16.mxu1 %v12528_v51  ;;  %v3840_v47 = vld [vmem:[%s23928_s3 + $0xc98] sm:$0xff]  ;;  %v12284_v51 = vpack.c.bf16 %v4315_v46, %v4308_v34  ;;  %v4349_v34 = vld [vmem:[%s23928_s3 + $0x1c80] sm:$0xff]  ;;  %v3875_v46 = vld [vmem:[%s23928_s3 + $0xdb0] sm:$0xff] }
 0x465   :  { %12273 = vmatprep.subr.bf16.mxu0 %v12272_v56  ;;  %v4322_v56 = vld [vmem:[%s23928_s3 + $0x1ba8] sm:$0xff]  ;;  %v12542_v25 = vpack.c.bf16 %v3840_v47, %v3833_v7  ;;  %v3897_v47 = vld [vmem:[%s23928_s3 + $0xe60] sm:$0xff]  ;;  %v12298_v27 = vpack.c.bf16 %v4356_v40, %v4349_v34 }
 0x466   :  { %v3890_v7 = vld [vmem:[%s23928_s3 + $0xe28] sm:$0xff]  ;;  %v4413_v40 = vld [vmem:[%s23928_s3 + $0x1e80] sm:$0xff] }
 0x467   :  { %12531 = vmatpush1.bf16.msra.mxu1 %v12530_v24  ;;  %v3847_v24 = vld [vmem:[%s23928_s3 + $0xcd0] sm:$0xff] }
 0x468   :  { %12275 = vmatpush1.bf16.msra.mxu0 %v12274_v41  ;;  %12533 = vmatprep.subr.bf16.mxu1 %v12532_v37  ;;  %v3854_v41 = vld [vmem:[%s23928_s3 + $0xd08] sm:$0xff]  ;;  %v12288_v37 = vpack.c.bf16 %v4329_v57, %v4322_v56  ;;  %v12556_v56 = vpack.c.bf16 %v3897_v47, %v3890_v7  ;;  %v4363_v57 = vld [vmem:[%s23928_s3 + $0x1cf0] sm:$0xff] }
 0x469   :  { %12277 = vmatprep.subr.bf16.mxu0 %v12276_v8  ;;  %v4336_v8 = vld [vmem:[%s23928_s3 + $0x1c18] sm:$0xff]  ;;  %v12546_v59 = vpack.c.bf16 %v3854_v41, %v3847_v24  ;;  %v3911_v41 = vld [vmem:[%s23928_s3 + $0xed0] sm:$0xff]  ;;  %v12302_v6 = vpack.c.bf16 %v4370_v4, %v4363_v57 }
 0x46a   :  { %v3904_v24 = vld [vmem:[%s23928_s3 + $0xe98] sm:$0xff]  ;;  %v4427_v4 = vld [vmem:[%s23928_s3 + $0x1ef0] sm:$0xff] }
 0x46b   :  { %12535 = vmatpush1.bf16.msra.mxu1 %v12534_v17  ;;  %v3868_v17 = vld [vmem:[%s23928_s3 + $0xd78] sm:$0xff] }
 0x46c   :  { %12279 = vmatpush1.bf16.msra.mxu0 %v12278_v32  ;;  %12537 = vmatprep.subr.bf16.mxu1 %v12536_v16  ;;  %v12292_v32 = vpack.c.bf16 %v4343_v9, %v4336_v8  ;;  %v4335_v16 = vld [vmem:[%s23928_s3 + $0x1c10] sm:$0xff]  ;;  %v12550_v30 = vpack.c.bf16 %v3868_v17, %v3861_v29  ;;  %v12560_v8 = vpack.c.bf16 %v3911_v41, %v3904_v24  ;;  %v4377_v9 = vld [vmem:[%s23928_s3 + $0x1d60] sm:$0xff]  ;;  %v4384_v29 = vld [vmem:[%s23928_s3 + $0x1d98] sm:$0xff] }
 0x46d   :  { %12281 = vmatprep.subr.bf16.mxu0 %v12280_v26  ;;  %v3876_v26 = vld [vmem:[%s23928_s3 + $0xdb8] sm:$0xff]  ;;  %v12294_v33 = vpack.c.bf16 %v4342_v31, %v4335_v16  ;;  %v3918_v17 = vld [vmem:[%s23928_s3 + $0xf08] sm:$0xff]  ;;  %v4399_v31 = vld [vmem:[%s23928_s3 + $0x1e10] sm:$0xff] }
 0x46e   :  { %v4392_v16 = vld [vmem:[%s23928_s3 + $0x1dd8] sm:$0xff] }
 0x46f   :  { %12539 = vmatpush1.bf16.msra.mxu1 %v12538_v35  ;;  %v3882_v35 = vld [vmem:[%s23928_s3 + $0xde8] sm:$0xff]  ;;  %v12308_v34 = vpack.c.bf16 %v4399_v31, %v4392_v16  ;;  %v4412_v57 = vld [vmem:[%s23928_s3 + $0x1e78] sm:$0xff]  ;;  %v4433_v31 = vld [vmem:[%s23928_s3 + $0x1f20] sm:$0xff] }
 0x470   :  { %12283 = vmatpush1.bf16.msra.mxu0 %v12282_v36  ;;  %12541 = vmatprep.subr.bf16.mxu1 %v12540_v38  ;;  %v12296_v36 = vpack.c.bf16 %v4357_v52, %v4350_v39  ;;  %v12552_v38 = vpack.c.bf16 %v3883_v11, %v3876_v26  ;;  %v12554_v61 = vpack.c.bf16 %v3882_v35, %v3875_v46  ;;  %v4391_v11 = vld [vmem:[%s23928_s3 + $0x1dd0] sm:$0xff]  ;;  %v4398_v46 = vld [vmem:[%s23928_s3 + $0x1e08] sm:$0xff]  ;;  %v3932_v35 = vld [vmem:[%s23928_s3 + $0xf78] sm:$0xff] }
 0x471   :  { %12285 = vmatprep.subr.bf16.mxu0 %v12284_v51  ;;  %v4364_v51 = vld [vmem:[%s23928_s3 + $0x1cf8] sm:$0xff]  ;;  %v12306_v52 = vpack.c.bf16 %v4384_v29, %v4377_v9  ;;  %v12310_v47 = vpack.c.bf16 %v4398_v46, %v4391_v11  ;;  %v4426_v9 = vld [vmem:[%s23928_s3 + $0x1ee8] sm:$0xff]  ;;  %v4441_v29 = vld [vmem:[%s23928_s3 + $0x1f60] sm:$0xff] }
 0x472   :  { %v4440_v11 = vld [vmem:[%s23928_s3 + $0x1f58] sm:$0xff]  ;;  %v4455_v46 = vld [vmem:[%s23928_s3 + $0x1fd0] sm:$0xff] }
 0x473   :  { %12543 = vmatpush1.bf16.msra.mxu1 %v12542_v25  ;;  %v3889_v25 = vld [vmem:[%s23928_s3 + $0xe20] sm:$0xff] }
 0x474   :  { %12287 = vmatpush1.bf16.msra.mxu0 %v12286_v50  ;;  %12545 = vmatprep.subr.bf16.mxu1 %v12544_v3  ;;  %v3896_v50 = vld [vmem:[%s23928_s3 + $0xe58] sm:$0xff]  ;;  %v12300_v3 = vpack.c.bf16 %v4371_v20, %v4364_v51  ;;  %v4405_v20 = vld [vmem:[%s23928_s3 + $0x1e40] sm:$0xff] }
 0x475   :  { %12289 = vmatprep.subr.bf16.mxu0 %v12288_v37  ;;  %v4378_v37 = vld [vmem:[%s23928_s3 + $0x1d68] sm:$0xff]  ;;  %v12558_v2 = vpack.c.bf16 %v3896_v50, %v3889_v25  ;;  %v3953_v50 = vld [vmem:[%s23928_s3 + $0x1020] sm:$0xff]  ;;  %v12314_v41 = vpack.c.bf16 %v4412_v57, %v4405_v20 }
 0x476   :  { %v3946_v25 = vld [vmem:[%s23928_s3 + $0xfe8] sm:$0xff]  ;;  %v4469_v57 = vld [vmem:[%s23928_s3 + $0x2040] sm:$0xff] }
 0x477   :  { %12547 = vmatpush1.bf16.msra.mxu1 %v12546_v59  ;;  %v3903_v59 = vld [vmem:[%s23928_s3 + $0xe90] sm:$0xff]  ;;  %v4454_v20 = vld [vmem:[%s23928_s3 + $0x1fc8] sm:$0xff] }
 0x478   :  { %12291 = vmatpush1.bf16.msra.mxu0 %v12290_v13  ;;  %12549 = vmatprep.subr.bf16.mxu1 %v12548_v14  ;;  %v3910_v13 = vld [vmem:[%s23928_s3 + $0xec8] sm:$0xff]  ;;  %v12304_v14 = vpack.c.bf16 %v4385_v1, %v4378_v37  ;;  %v12572_v37 = vpack.c.bf16 %v3953_v50, %v3946_v25  ;;  %v4419_v1 = vld [vmem:[%s23928_s3 + $0x1eb0] sm:$0xff] }
 0x479   :  { %12293 = vmatprep.subr.bf16.mxu0 %v12292_v32  ;;  %v3925_v32 = vld [vmem:[%s23928_s3 + $0xf40] sm:$0xff]  ;;  %v12562_v39 = vpack.c.bf16 %v3910_v13, %v3903_v59  ;;  %v3960_v59 = vld [vmem:[%s23928_s3 + $0x1058] sm:$0xff]  ;;  %v3967_v13 = vld [vmem:[%s23928_s3 + $0x1090] sm:$0xff] }
 0x47a   :  { %v12564_v26 = vpack.c.bf16 %v3925_v32, %v3918_v17  ;;  %v12318_v32 = vpack.c.bf16 %v4426_v9, %v4419_v1  ;;  %v12576_v16 = vpack.c.bf16 %v3967_v13, %v3960_v59  ;;  %v4468_v1 = vld [vmem:[%s23928_s3 + $0x2038] sm:$0xff]  ;;  %v4483_v9 = vld [vmem:[%s23928_s3 + $0x20b0] sm:$0xff] }
 0x47b   :  { %5625 = vmatmul.mubr.f32.vlgmr.msra.gmra.mrb[12].mxu0 %v18733_v60  ;;  %12551 = vmatpush1.bf16.msra.mxu1 %v12550_v30  ;;  %v3917_v30 = vld [vmem:[%s23928_s3 + $0xf00] sm:$0xff] }
 0x47c   :  { %12295 = vmatpush1.bf16.msra.mxu0 %v12294_v33  ;;  %5695 = vmatprep.mubr.f32.mxu0 %v18744_v48  ;;  %v3924_v33 = vld [vmem:[%s23928_s3 + $0xf38] sm:$0xff] }
 0x47d   :  { %12297 = vmatprep.subr.bf16.mxu0 %v12296_v36  ;;  %12553 = vmatprep.subr.bf16.mxu1 %v12552_v38  ;;  %v3939_v36 = vld [vmem:[%s23928_s3 + $0xfb0] sm:$0xff]  ;;  %v4406_v38 = vld [vmem:[%s23928_s3 + $0x1e48] sm:$0xff]  ;;  %v12566_v7 = vpack.c.bf16 %v3924_v33, %v3917_v30  ;;  %v3981_v33 = vld [vmem:[%s23928_s3 + $0x1100] sm:$0xff] }
 0x47e   :  { %v12568_v51 = vpack.c.bf16 %v3939_v36, %v3932_v35  ;;  %v3974_v30 = vld [vmem:[%s23928_s3 + $0x10c8] sm:$0xff]  ;;  %v12322_v36 = vpack.c.bf16 %v4440_v11, %v4433_v31  ;;  %v4497_v11 = vld [vmem:[%s23928_s3 + $0x2120] sm:$0xff] }
 0x47f   :  { %12555 = vmatpush1.bf16.msra.mxu1 %v12554_v61  ;;  %v3931_v61 = vld [vmem:[%s23928_s3 + $0xf70] sm:$0xff]  ;;  %v4482_v31 = vld [vmem:[%s23928_s3 + $0x20a8] sm:$0xff] }
 0x480   :  { %12299 = vmatpush1.bf16.msra.mxu0 %v12298_v27  ;;  %12557 = vmatprep.subr.bf16.mxu1 %v12556_v56  ;;  %v3938_v27 = vld [vmem:[%s23928_s3 + $0xfa8] sm:$0xff]  ;;  %v12312_v56 = vpack.c.bf16 %v4413_v40, %v4406_v38  ;;  %v12580_v38 = vpack.c.bf16 %v3981_v33, %v3974_v30  ;;  %v4447_v40 = vld [vmem:[%s23928_s3 + $0x1f90] sm:$0xff] }
 0x481   :  { %12301 = vmatprep.subr.bf16.mxu0 %v12300_v3  ;;  %v4420_v3 = vld [vmem:[%s23928_s3 + $0x1eb8] sm:$0xff]  ;;  %v12570_v24 = vpack.c.bf16 %v3938_v27, %v3931_v61  ;;  %v3995_v27 = vld [vmem:[%s23928_s3 + $0x1170] sm:$0xff]  ;;  %v12326_v50 = vpack.c.bf16 %v4454_v20, %v4447_v40 }
 0x482   :  { %5980 = vmatmul.mubr.f32.vlgmr.msra.gmra.mrb[12].mxu1 %v18246_v58  ;;  %v3988_v61 = vld [vmem:[%s23928_s3 + $0x1138] sm:$0xff]  ;;  %v4511_v20 = vld [vmem:[%s23928_s3 + $0x2190] sm:$0xff] }
 0x483   :  { %12559 = vmatpush1.bf16.msra.mxu1 %v12558_v2  ;;  %6050 = vmatprep.mubr.f32.mxu1 %v18254_v62  ;;  %v3945_v2 = vld [vmem:[%s23928_s3 + $0xfe0] sm:$0xff]  ;;  %v4496_v40 = vld [vmem:[%s23928_s3 + $0x2118] sm:$0xff] }
 0x484   :  { %12303 = vmatpush1.bf16.msra.mxu0 %v12302_v6  ;;  %12561 = vmatprep.subr.bf16.mxu1 %v12560_v8  ;;  %v3952_v6 = vld [vmem:[%s23928_s3 + $0x1018] sm:$0xff]  ;;  %v12316_v8 = vpack.c.bf16 %v4427_v4, %v4420_v3  ;;  %v12584_v3 = vpack.c.bf16 %v3995_v27, %v3988_v61  ;;  %v4461_v4 = vld [vmem:[%s23928_s3 + $0x2000] sm:$0xff] }
 0x485   :  { %12305 = vmatprep.subr.bf16.mxu0 %v12304_v14  ;;  %v4434_v14 = vld [vmem:[%s23928_s3 + $0x1f28] sm:$0xff]  ;;  %v12574_v17 = vpack.c.bf16 %v3952_v6, %v3945_v2  ;;  %v4009_v6 = vld [vmem:[%s23928_s3 + $0x11e0] sm:$0xff]  ;;  %v12330_v13 = vpack.c.bf16 %v4468_v1, %v4461_v4 }
 0x486   :  { %v4002_v2 = vld [vmem:[%s23928_s3 + $0x11a8] sm:$0xff]  ;;  %v4525_v1 = vld [vmem:[%s23928_s3 + $0x2200] sm:$0xff] }
 0x487   :  { %12563 = vmatpush1.bf16.msra.mxu1 %v12562_v39  ;;  %v3959_v39 = vld [vmem:[%s23928_s3 + $0x1050] sm:$0xff]  ;;  %v4510_v4 = vld [vmem:[%s23928_s3 + $0x2188] sm:$0xff] }
 0x488   :  { %12307 = vmatpush1.bf16.msra.mxu0 %v12306_v52  ;;  %12565 = vmatprep.subr.bf16.mxu1 %v12564_v26  ;;  %v3966_v52 = vld [vmem:[%s23928_s3 + $0x1088] sm:$0xff]  ;;  %v12320_v26 = vpack.c.bf16 %v4441_v29, %v4434_v14  ;;  %v12588_v14 = vpack.c.bf16 %v4009_v6, %v4002_v2  ;;  %v4475_v29 = vld [vmem:[%s23928_s3 + $0x2070] sm:$0xff] }
 0x489   :  { %12309 = vmatprep.subr.bf16.mxu0 %v12308_v34  ;;  %v4448_v34 = vld [vmem:[%s23928_s3 + $0x1f98] sm:$0xff]  ;;  %v12578_v35 = vpack.c.bf16 %v3966_v52, %v3959_v39  ;;  %v4023_v52 = vld [vmem:[%s23928_s3 + $0x1250] sm:$0xff]  ;;  %v12334_v33 = vpack.c.bf16 %v4482_v31, %v4475_v29 }
 0x48a   :  { %v4016_v39 = vld [vmem:[%s23928_s3 + $0x1218] sm:$0xff]  ;;  %v4539_v31 = vld [vmem:[%s23928_s3 + $0x2270] sm:$0xff] }
 0x48b   :  { %12567 = vmatpush1.bf16.msra.mxu1 %v12566_v7  ;;  %v3973_v7 = vld [vmem:[%s23928_s3 + $0x10c0] sm:$0xff]  ;;  %v4524_v29 = vld [vmem:[%s23928_s3 + $0x21f8] sm:$0xff] }
 0x48c   :  { %12311 = vmatpush1.bf16.msra.mxu0 %v12310_v47  ;;  %12569 = vmatprep.subr.bf16.mxu1 %v12568_v51  ;;  %v3980_v47 = vld [vmem:[%s23928_s3 + $0x10f8] sm:$0xff]  ;;  %v12324_v51 = vpack.c.bf16 %v4455_v46, %v4448_v34  ;;  %v12592_v34 = vpack.c.bf16 %v4023_v52, %v4016_v39  ;;  %v4489_v46 = vld [vmem:[%s23928_s3 + $0x20e0] sm:$0xff] }
 0x48d   :  { %12313 = vmatprep.subr.bf16.mxu0 %v12312_v56  ;;  %v4462_v56 = vld [vmem:[%s23928_s3 + $0x2008] sm:$0xff]  ;;  %v12582_v25 = vpack.c.bf16 %v3980_v47, %v3973_v7  ;;  %v4037_v47 = vld [vmem:[%s23928_s3 + $0x12c0] sm:$0xff]  ;;  %v12338_v27 = vpack.c.bf16 %v4496_v40, %v4489_v46 }
 0x48e   :  { %v4030_v7 = vld [vmem:[%s23928_s3 + $0x1288] sm:$0xff]  ;;  %v4553_v40 = vld [vmem:[%s23928_s3 + $0x22e0] sm:$0xff] }
 0x48f   :  { %12571 = vmatpush1.bf16.msra.mxu1 %v12570_v24  ;;  %v3987_v24 = vld [vmem:[%s23928_s3 + $0x1130] sm:$0xff]  ;;  %v4538_v46 = vld [vmem:[%s23928_s3 + $0x2268] sm:$0xff] }
 0x490   :  { %12315 = vmatpush1.bf16.msra.mxu0 %v12314_v41  ;;  %12573 = vmatprep.subr.bf16.mxu1 %v12572_v37  ;;  %v3994_v41 = vld [vmem:[%s23928_s3 + $0x1168] sm:$0xff]  ;;  %v12328_v37 = vpack.c.bf16 %v4469_v57, %v4462_v56  ;;  %v12596_v56 = vpack.c.bf16 %v4037_v47, %v4030_v7  ;;  %v4503_v57 = vld [vmem:[%s23928_s3 + $0x2150] sm:$0xff] }
 0x491   :  { %12317 = vmatprep.subr.bf16.mxu0 %v12316_v8  ;;  %v4476_v8 = vld [vmem:[%s23928_s3 + $0x2078] sm:$0xff]  ;;  %v12586_v59 = vpack.c.bf16 %v3994_v41, %v3987_v24  ;;  %v4051_v41 = vld [vmem:[%s23928_s3 + $0x1330] sm:$0xff]  ;;  %v12342_v6 = vpack.c.bf16 %v4510_v4, %v4503_v57 }
 0x492   :  { %v4044_v24 = vld [vmem:[%s23928_s3 + $0x12f8] sm:$0xff]  ;;  %v4567_v4 = vld [vmem:[%s23928_s3 + $0x2350] sm:$0xff] }
 0x493   :  { %12575 = vmatpush1.bf16.msra.mxu1 %v12574_v17  ;;  %v4001_v17 = vld [vmem:[%s23928_s3 + $0x11a0] sm:$0xff]  ;;  %v4552_v57 = vld [vmem:[%s23928_s3 + $0x22d8] sm:$0xff] }
 0x494   :  { %12319 = vmatpush1.bf16.msra.mxu0 %v12318_v32  ;;  %12577 = vmatprep.subr.bf16.mxu1 %v12576_v16  ;;  %v4008_v32 = vld [vmem:[%s23928_s3 + $0x11d8] sm:$0xff]  ;;  %v12332_v16 = vpack.c.bf16 %v4483_v9, %v4476_v8  ;;  %v12600_v8 = vpack.c.bf16 %v4051_v41, %v4044_v24  ;;  %v4517_v9 = vld [vmem:[%s23928_s3 + $0x21c0] sm:$0xff] }
 0x495   :  { %12321 = vmatprep.subr.bf16.mxu0 %v12320_v26  ;;  %v4490_v26 = vld [vmem:[%s23928_s3 + $0x20e8] sm:$0xff]  ;;  %v12590_v30 = vpack.c.bf16 %v4008_v32, %v4001_v17  ;;  %v4065_v32 = vld [vmem:[%s23928_s3 + $0x13a0] sm:$0xff]  ;;  %v12346_v52 = vpack.c.bf16 %v4524_v29, %v4517_v9  ;;  %v4107_v29 = vld [vmem:[%s23928_s3 + $0x14f0] sm:$0xff] }
 0x496   :  { %v4058_v17 = vld [vmem:[%s23928_s3 + $0x1368] sm:$0xff] }
 0x497   :  { %12579 = vmatpush1.bf16.msra.mxu1 %v12578_v35  ;;  %v4015_v35 = vld [vmem:[%s23928_s3 + $0x1210] sm:$0xff]  ;;  %v4566_v9 = vld [vmem:[%s23928_s3 + $0x2348] sm:$0xff] }
 0x498   :  { %12323 = vmatpush1.bf16.msra.mxu0 %v12322_v36  ;;  %12581 = vmatprep.subr.bf16.mxu1 %v12580_v38  ;;  %v4022_v36 = vld [vmem:[%s23928_s3 + $0x1248] sm:$0xff]  ;;  %v12336_v38 = vpack.c.bf16 %v4497_v11, %v4490_v26  ;;  %v12604_v26 = vpack.c.bf16 %v4065_v32, %v4058_v17  ;;  %v4531_v11 = vld [vmem:[%s23928_s3 + $0x2230] sm:$0xff] }
 0x499   :  { %12325 = vmatprep.subr.bf16.mxu0 %v12324_v51  ;;  %v4504_v51 = vld [vmem:[%s23928_s3 + $0x2158] sm:$0xff]  ;;  %v12594_v61 = vpack.c.bf16 %v4022_v36, %v4015_v35  ;;  %v4079_v36 = vld [vmem:[%s23928_s3 + $0x1410] sm:$0xff]  ;;  %v12350_v47 = vpack.c.bf16 %v4538_v46, %v4531_v11 }
 0x49a   :  { %v4072_v35 = vld [vmem:[%s23928_s3 + $0x13d8] sm:$0xff]  ;;  %v4595_v46 = vld [vmem:[%s23928_s3 + $0x2430] sm:$0xff] }
 0x49b   :  { %12583 = vmatpush1.bf16.msra.mxu1 %v12582_v25  ;;  %v4029_v25 = vld [vmem:[%s23928_s3 + $0x1280] sm:$0xff]  ;;  %v4580_v11 = vld [vmem:[%s23928_s3 + $0x23b8] sm:$0xff] }
 0x49c   :  { %12327 = vmatpush1.bf16.msra.mxu0 %v12326_v50  ;;  %12585 = vmatprep.subr.bf16.mxu1 %v12584_v3  ;;  %v4036_v50 = vld [vmem:[%s23928_s3 + $0x12b8] sm:$0xff]  ;;  %v12340_v3 = vpack.c.bf16 %v4511_v20, %v4504_v51  ;;  %v12608_v51 = vpack.c.bf16 %v4079_v36, %v4072_v35  ;;  %v4545_v20 = vld [vmem:[%s23928_s3 + $0x22a0] sm:$0xff] }
 0x49d   :  { %12329 = vmatprep.subr.bf16.mxu0 %v12328_v37  ;;  %v4518_v37 = vld [vmem:[%s23928_s3 + $0x21c8] sm:$0xff]  ;;  %v12598_v2 = vpack.c.bf16 %v4036_v50, %v4029_v25  ;;  %v4093_v50 = vld [vmem:[%s23928_s3 + $0x1480] sm:$0xff]  ;;  %v12354_v41 = vpack.c.bf16 %v4552_v57, %v4545_v20 }
 0x49e   :  { %v4086_v25 = vld [vmem:[%s23928_s3 + $0x1448] sm:$0xff]  ;;  %v4609_v57 = vld [vmem:[%s23928_s3 + $0x24a0] sm:$0xff] }
 0x49f   :  { %12587 = vmatpush1.bf16.msra.mxu1 %v12586_v59  ;;  %v4043_v59 = vld [vmem:[%s23928_s3 + $0x12f0] sm:$0xff]  ;;  %v4594_v20 = vld [vmem:[%s23928_s3 + $0x2428] sm:$0xff] }
 0x4a0   :  { %12331 = vmatpush1.bf16.msra.mxu0 %v12330_v13  ;;  %12589 = vmatprep.subr.bf16.mxu1 %v12588_v14  ;;  %v4050_v13 = vld [vmem:[%s23928_s3 + $0x1328] sm:$0xff]  ;;  %v12344_v14 = vpack.c.bf16 %v4525_v1, %v4518_v37  ;;  %v12612_v37 = vpack.c.bf16 %v4093_v50, %v4086_v25  ;;  %v4085_v1 = vld [vmem:[%s23928_s3 + $0x1440] sm:$0xff] }
 0x4a1   :  { %12333 = vmatprep.subr.bf16.mxu0 %v12332_v16  ;;  %v4532_v16 = vld [vmem:[%s23928_s3 + $0x2238] sm:$0xff]  ;;  %v12602_v39 = vpack.c.bf16 %v4050_v13, %v4043_v59  ;;  %v4574_v59 = vld [vmem:[%s23928_s3 + $0x2388] sm:$0xff]  ;;  %v4581_v13 = vld [vmem:[%s23928_s3 + $0x23c0] sm:$0xff] }
 0x4a3   :  { %12591 = vmatpush1.bf16.msra.mxu1 %v12590_v30  ;;  %v4057_v30 = vld [vmem:[%s23928_s3 + $0x1360] sm:$0xff] }
 0x4a4   :  { %12335 = vmatpush1.bf16.msra.mxu0 %v12334_v33  ;;  %12593 = vmatprep.subr.bf16.mxu1 %v12592_v34  ;;  %v4064_v33 = vld [vmem:[%s23928_s3 + $0x1398] sm:$0xff]  ;;  %v12348_v34 = vpack.c.bf16 %v4539_v31, %v4532_v16  ;;  %v4573_v16 = vld [vmem:[%s23928_s3 + $0x2380] sm:$0xff]  ;;  %v4099_v31 = vld [vmem:[%s23928_s3 + $0x14b0] sm:$0xff] }
 0x4a5   :  { %12337 = vmatprep.subr.bf16.mxu0 %v12336_v38  ;;  %v4546_v38 = vld [vmem:[%s23928_s3 + $0x22a8] sm:$0xff]  ;;  %v12606_v7 = vpack.c.bf16 %v4064_v33, %v4057_v30  ;;  %v4121_v33 = vld [vmem:[%s23928_s3 + $0x1560] sm:$0xff]  ;;  %v12362_v36 = vpack.c.bf16 %v4580_v11, %v4573_v16 }
 0x4a6   :  { %v4114_v30 = vld [vmem:[%s23928_s3 + $0x1528] sm:$0xff]  ;;  %v4637_v11 = vld [vmem:[%s23928_s3 + $0x2580] sm:$0xff] }
 0x4a7   :  { %12595 = vmatpush1.bf16.msra.mxu1 %v12594_v61  ;;  %v4071_v61 = vld [vmem:[%s23928_s3 + $0x13d0] sm:$0xff] }
 0x4a8   :  { %12339 = vmatpush1.bf16.msra.mxu0 %v12338_v27  ;;  %12597 = vmatprep.subr.bf16.mxu1 %v12596_v56  ;;  %v4078_v27 = vld [vmem:[%s23928_s3 + $0x1408] sm:$0xff]  ;;  %v12352_v56 = vpack.c.bf16 %v4553_v40, %v4546_v38  ;;  %v12620_v38 = vpack.c.bf16 %v4121_v33, %v4114_v30  ;;  %v4587_v40 = vld [vmem:[%s23928_s3 + $0x23f0] sm:$0xff] }
 0x4a9   :  { %12341 = vmatprep.subr.bf16.mxu0 %v12340_v3  ;;  %v4560_v3 = vld [vmem:[%s23928_s3 + $0x2318] sm:$0xff]  ;;  %v12610_v24 = vpack.c.bf16 %v4078_v27, %v4071_v61  ;;  %v4135_v27 = vld [vmem:[%s23928_s3 + $0x15d0] sm:$0xff]  ;;  %v12366_v50 = vpack.c.bf16 %v4594_v20, %v4587_v40 }
 0x4aa   :  { %v4128_v61 = vld [vmem:[%s23928_s3 + $0x1598] sm:$0xff]  ;;  %v4651_v20 = vld [vmem:[%s23928_s3 + $0x25f0] sm:$0xff] }
 0x4ab   :  { %12599 = vmatpush1.bf16.msra.mxu1 %v12598_v2  ;;  %v4092_v2 = vld [vmem:[%s23928_s3 + $0x1478] sm:$0xff] }
 0x4ac   :  { %12343 = vmatpush1.bf16.msra.mxu0 %v12342_v6  ;;  %12601 = vmatprep.subr.bf16.mxu1 %v12600_v8  ;;  %v12356_v6 = vpack.c.bf16 %v4567_v4, %v4560_v3  ;;  %v4559_v8 = vld [vmem:[%s23928_s3 + $0x2310] sm:$0xff]  ;;  %v12614_v17 = vpack.c.bf16 %v4092_v2, %v4085_v1  ;;  %v12624_v3 = vpack.c.bf16 %v4135_v27, %v4128_v61  ;;  %v4601_v4 = vld [vmem:[%s23928_s3 + $0x2460] sm:$0xff]  ;;  %v4608_v1 = vld [vmem:[%s23928_s3 + $0x2498] sm:$0xff] }
 0x4ad   :  { %12345 = vmatprep.subr.bf16.mxu0 %v12344_v14  ;;  %v4100_v14 = vld [vmem:[%s23928_s3 + $0x14b8] sm:$0xff]  ;;  %v12358_v32 = vpack.c.bf16 %v4566_v9, %v4559_v8  ;;  %v4142_v2 = vld [vmem:[%s23928_s3 + $0x1608] sm:$0xff]  ;;  %v4623_v9 = vld [vmem:[%s23928_s3 + $0x2510] sm:$0xff] }
 0x4ae   :  { %v4616_v8 = vld [vmem:[%s23928_s3 + $0x24d8] sm:$0xff] }
 0x4af   :  { %12603 = vmatpush1.bf16.msra.mxu1 %v12602_v39  ;;  %v4106_v39 = vld [vmem:[%s23928_s3 + $0x14e8] sm:$0xff]  ;;  %v12372_v16 = vpack.c.bf16 %v4623_v9, %v4616_v8  ;;  %v4636_v40 = vld [vmem:[%s23928_s3 + $0x2578] sm:$0xff] }
 0x4b0   :  { %12347 = vmatpush1.bf16.msra.mxu0 %v12346_v52  ;;  %12605 = vmatprep.subr.bf16.mxu1 %v12604_v26  ;;  %v12360_v52 = vpack.c.bf16 %v4581_v13, %v4574_v59  ;;  %v12616_v26 = vpack.c.bf16 %v4107_v29, %v4100_v14  ;;  %v12618_v35 = vpack.c.bf16 %v4106_v39, %v4099_v31  ;;  %v4615_v29 = vld [vmem:[%s23928_s3 + $0x24d0] sm:$0xff]  ;;  %v4622_v31 = vld [vmem:[%s23928_s3 + $0x2508] sm:$0xff]  ;;  %v4156_v39 = vld [vmem:[%s23928_s3 + $0x1678] sm:$0xff] }
 0x4b1   :  { %12349 = vmatprep.subr.bf16.mxu0 %v12348_v34  ;;  %v4588_v34 = vld [vmem:[%s23928_s3 + $0x23f8] sm:$0xff]  ;;  %v12370_v13 = vpack.c.bf16 %v4608_v1, %v4601_v4  ;;  %v12374_v33 = vpack.c.bf16 %v4622_v31, %v4615_v29  ;;  %v4650_v4 = vld [vmem:[%s23928_s3 + $0x25e8] sm:$0xff]  ;;  %v4665_v1 = vld [vmem:[%s23928_s3 + $0x2660] sm:$0xff] }
 0x4b3   :  { %12607 = vmatpush1.bf16.msra.mxu1 %v12606_v7  ;;  %v4113_v7 = vld [vmem:[%s23928_s3 + $0x1520] sm:$0xff] }
 0x4b4   :  { %12351 = vmatpush1.bf16.msra.mxu0 %v12350_v47  ;;  %12609 = vmatprep.subr.bf16.mxu1 %v12608_v51  ;;  %v4120_v47 = vld [vmem:[%s23928_s3 + $0x1558] sm:$0xff]  ;;  %v12364_v51 = vpack.c.bf16 %v4595_v46, %v4588_v34  ;;  %v4629_v46 = vld [vmem:[%s23928_s3 + $0x2540] sm:$0xff] }
 0x4b5   :  { %12353 = vmatprep.subr.bf16.mxu0 %v12352_v56  ;;  %v4602_v56 = vld [vmem:[%s23928_s3 + $0x2468] sm:$0xff]  ;;  %v12622_v25 = vpack.c.bf16 %v4120_v47, %v4113_v7  ;;  %v4177_v47 = vld [vmem:[%s23928_s3 + $0x1720] sm:$0xff]  ;;  %v12378_v27 = vpack.c.bf16 %v4636_v40, %v4629_v46 }
 0x4b6   :  { %v4170_v7 = vld [vmem:[%s23928_s3 + $0x16e8] sm:$0xff]  ;;  %v4197_v46 = vld [vmem:[%s23928_s3 + $0x17c0] sm:$0xff] }
 0x4b7   :  { %12611 = vmatpush1.bf16.msra.mxu1 %v12610_v24  ;;  %v4127_v24 = vld [vmem:[%s23928_s3 + $0x1590] sm:$0xff]  ;;  %v4678_v40 = vld [vmem:[%s23928_s3 + $0x26c8] sm:$0xff] }
 0x4b8   :  { %12355 = vmatpush1.bf16.msra.mxu0 %v12354_v41  ;;  %12613 = vmatprep.subr.bf16.mxu1 %v12612_v37  ;;  %v4134_v41 = vld [vmem:[%s23928_s3 + $0x15c8] sm:$0xff]  ;;  %v12368_v37 = vpack.c.bf16 %v4609_v57, %v4602_v56  ;;  %v12636_v56 = vpack.c.bf16 %v4177_v47, %v4170_v7  ;;  %v4643_v57 = vld [vmem:[%s23928_s3 + $0x25b0] sm:$0xff]  ;;  %v4212_v7 = vld [vmem:[%s23928_s3 + $0x1838] sm:$0xff] }
 0x4b9   :  { %12357 = vmatprep.subr.bf16.mxu0 %v12356_v6  ;;  %v4149_v6 = vld [vmem:[%s23928_s3 + $0x1640] sm:$0xff]  ;;  %v12626_v59 = vpack.c.bf16 %v4134_v41, %v4127_v24  ;;  %v4184_v24 = vld [vmem:[%s23928_s3 + $0x1758] sm:$0xff]  ;;  %v4191_v41 = vld [vmem:[%s23928_s3 + $0x1790] sm:$0xff]  ;;  %v12382_v8 = vpack.c.bf16 %v4650_v4, %v4643_v57 }
 0x4ba   :  { %v12628_v14 = vpack.c.bf16 %v4149_v6, %v4142_v2  ;;  %v4809_v6 = vld [vmem:[%s23929_s4] sm:$0x7f]  ;;  %v12640_v9 = vpack.c.bf16 %v4191_v41, %v4184_v24  ;;  %v4219_v47 = vld [vmem:[%s23928_s3 + $0x1870] sm:$0xff]  ;;  %v4218_v41 = vld [vmem:[%s23928_s3 + $0x1868] sm:$0xff] }
 0x4bb   :  { %5696 = vmatmul.mubr.f32.vlgmr.msra.gmra.mrb[12].mxu0 %v19126_v12  ;;  %12615 = vmatpush1.bf16.msra.mxu1 %v12614_v17  ;;  %v4141_v17 = vld [vmem:[%s23928_s3 + $0x1600] sm:$0xff]  ;;  %v4814_v31 = vrot.slane %v4809_v6, %v17959_v10  ;;  %v4211_v24 = vld [vmem:[%s23928_s3 + $0x1830] sm:$0xff] }
 0x4bc   :  { %12359 = vmatpush1.bf16.msra.mxu0 %v12358_v32  ;;  %5766 = vmatprep.mubr.f32.mxu0 %v19138_v15  ;;  %v4148_v32 = vld [vmem:[%s23928_s3 + $0x1638] sm:$0xff]  ;;  %v4685_v4 = vld [vmem:[%s23928_s3 + $0x2700] sm:$0xff] }
 0x4bd   :  { %12361 = vmatprep.subr.bf16.mxu0 %v12360_v52  ;;  %12617 = vmatprep.subr.bf16.mxu1 %v12616_v26  ;;  %v4163_v52 = vld [vmem:[%s23928_s3 + $0x16b0] sm:$0xff]  ;;  %v4630_v26 = vld [vmem:[%s23928_s3 + $0x2548] sm:$0xff]  ;;  %v12630_v30 = vpack.c.bf16 %v4148_v32, %v4141_v17  ;;  %v4664_v17 = vld [vmem:[%s23928_s3 + $0x2658] sm:$0xff] }
 0x4be   :  { %v12632_v34 = vpack.c.bf16 %v4163_v52, %v4156_v39  ;;  %v4198_v32 = vld [vmem:[%s23928_s3 + $0x17c8] sm:$0xff]  ;;  %v4672_v39 = vld [vmem:[%s23928_s3 + $0x2698] sm:$0xff]  ;;  %v4679_v52 = vld [vmem:[%s23928_s3 + $0x26d0] sm:$0xff] }
 0x4bf   :  { %12619 = vmatpush1.bf16.msra.mxu1 %v12618_v35  ;;  %v4155_v35 = vld [vmem:[%s23928_s3 + $0x1670] sm:$0xff] }
 0x4c0   :  { %12363 = vmatpush1.bf16.msra.mxu0 %v12362_v36  ;;  %12621 = vmatprep.subr.bf16.mxu1 %v12620_v38  ;;  %v4162_v36 = vld [vmem:[%s23928_s3 + $0x16a8] sm:$0xff]  ;;  %v12376_v38 = vpack.c.bf16 %v4637_v11, %v4630_v26  ;;  %v4818_v26 = vrot.slane %v4809_v6, %v17665_v19  ;;  %v4233_v6 = vld [vmem:[%s23928_s3 + $0x18e0] sm:$0xff]  ;;  %v6925_v19 = vld [vmem:[%s23930_s5 + $0x158] sm:$0xff] }
 0x4c1   :  { %12365 = vmatprep.subr.bf16.mxu0 %v12364_v51  ;;  %v4644_v51 = vld [vmem:[%s23928_s3 + $0x25b8] sm:$0xff]  ;;  %v12634_v61 = vpack.c.bf16 %v4162_v36, %v4155_v35 }
 0x4c2   :  { %6051 = vmatmul.mubr.f32.vlgmr.msra.gmra.mrb[12].mxu1 %v18477_v18  ;;  %v4204_v35 = vld [vmem:[%s23928_s3 + $0x17f8] sm:$0xff] }
 0x4c3   :  { %12623 = vmatpush1.bf16.msra.mxu1 %v12622_v25  ;;  %6121 = vmatprep.mubr.f32.mxu1 %v18485_v49  ;;  %v4169_v25 = vld [vmem:[%s23928_s3 + $0x16e0] sm:$0xff]  ;;  %v12646_v57 = vpack.c.bf16 %v4204_v35, %v4197_v46  ;;  %v4239_v46 = vld [vmem:[%s23928_s3 + $0x1910] sm:$0xff]  ;;  %v4246_v35 = vld [vmem:[%s23928_s3 + $0x1948] sm:$0xff] }
 0x4c4   :  { %12367 = vmatpush1.bf16.msra.mxu0 %v12366_v50  ;;  %12625 = vmatprep.subr.bf16.mxu1 %v12624_v3  ;;  %v4176_v50 = vld [vmem:[%s23928_s3 + $0x1718] sm:$0xff]  ;;  %v12380_v3 = vpack.c.bf16 %v4651_v20, %v4644_v51 }
 0x4c5   :  { %12369 = vmatprep.subr.bf16.mxu0 %v12368_v37  ;;  %v4658_v37 = vld [vmem:[%s23928_s3 + $0x2628] sm:$0xff]  ;;  %v12638_v2 = vpack.c.bf16 %v4176_v50, %v4169_v25 }
 0x4c6   :  { %v12384_v29 = vpack.c.bf16 %v4665_v1, %v4658_v37  ;;  %v4692_v1 = vld [vmem:[%s23928_s3 + $0x2738] sm:$0xff] }
 0x4c7   :  { %12627 = vmatpush1.bf16.msra.mxu1 %v12626_v59  ;;  %v4657_v59 = vld [vmem:[%s23928_s3 + $0x2620] sm:$0xff] }
 0x4c8   :  { %12371 = vmatpush1.bf16.msra.mxu0 %v12370_v13  ;;  %12629 = vmatprep.subr.bf16.mxu1 %v12628_v14  ;;  %v4183_v13 = vld [vmem:[%s23928_s3 + $0x1750] sm:$0xff]  ;;  %v4190_v14 = vld [vmem:[%s23928_s3 + $0x1788] sm:$0xff] }
 0x4c9   :  { %12373 = vmatprep.subr.bf16.mxu0 %v12372_v16  ;;  %v4205_v16 = vld [vmem:[%s23928_s3 + $0x1800] sm:$0xff]  ;;  %v12642_v11 = vpack.c.bf16 %v4190_v14, %v4183_v13  ;;  %v4699_v14 = vld [vmem:[%s23928_s3 + $0x2770] sm:$0xff] }
 0x4cb   :  { %12631 = vmatpush1.bf16.msra.mxu1 %v12630_v30  ;;  %v12386_v30 = vpack.c.bf16 %v4664_v17, %v4657_v59  ;;  %v12394_v59 = vpack.c.bf16 %v4692_v1, %v4685_v4  ;;  %v4232_v17 = vld [vmem:[%s23928_s3 + $0x18d8] sm:$0xff]  ;;  %v4734_v4 = vld [vmem:[%s23928_s3 + $0x2888] sm:$0xff]  ;;  %v4749_v1 = vld [vmem:[%s23928_s3 + $0x2900] sm:$0xff] }
 0x4cc   :  { %12375 = vmatpush1.bf16.msra.mxu0 %v12374_v33  ;;  %12633 = vmatprep.subr.bf16.mxu1 %v12632_v34  ;;  %v12644_v33 = vpack.c.bf16 %v4205_v16, %v4198_v32  ;;  %v4671_v34 = vld [vmem:[%s23928_s3 + $0x2690] sm:$0xff]  ;;  %v4706_v16 = vld [vmem:[%s23928_s3 + $0x27a8] sm:$0xff] }
 0x4cd   :  { %12377 = vmatprep.subr.bf16.mxu0 %v12376_v38  ;;  %v12388_v38 = vpack.c.bf16 %v4679_v52, %v4672_v39  ;;  %v12390_v50 = vpack.c.bf16 %v4678_v40, %v4671_v34  ;;  %v4247_v39 = vld [vmem:[%s23928_s3 + $0x1950] sm:$0xff]  ;;  %v4714_v52 = vld [vmem:[%s23928_s3 + $0x27e8] sm:$0xff]  ;;  %v4713_v34 = vld [vmem:[%s23928_s3 + $0x27e0] sm:$0xff] }
 0x4ce   :  { %v4254_v40 = vld [vmem:[%s23928_s3 + $0x1988] sm:$0xff] }
 0x4cf   :  { %12635 = vmatpush1.bf16.msra.mxu1 %v12634_v61  ;;  %v4686_v61 = vld [vmem:[%s23928_s3 + $0x2708] sm:$0xff] }
 0x4d0   :  { %12379 = vmatpush1.bf16.msra.mxu0 %v12378_v27  ;;  %12637 = vmatprep.subr.bf16.mxu1 %v12636_v56  ;;  %v4693_v27 = vld [vmem:[%s23928_s3 + $0x2740] sm:$0xff] }
 0x4d1   :  { %12381 = vmatprep.subr.bf16.mxu0 %v12380_v3  ;;  %v12648_v3 = vpack.c.bf16 %v4219_v47, %v4212_v7  ;;  %v4261_v7 = vld [vmem:[%s23928_s3 + $0x19c0] sm:$0xff]  ;;  %v4728_v47 = vld [vmem:[%s23928_s3 + $0x2858] sm:$0xff] }
 0x4d3   :  { %12639 = vmatpush1.bf16.msra.mxu1 %v12638_v2  ;;  %v4226_v2 = vld [vmem:[%s23928_s3 + $0x18a8] sm:$0xff] }
 0x4d4   :  { %12383 = vmatpush1.bf16.msra.mxu0 %v12382_v8  ;;  %12641 = vmatprep.subr.bf16.mxu1 %v12640_v9  ;;  %v4700_v8 = vld [vmem:[%s23928_s3 + $0x2778] sm:$0xff]  ;;  %v12650_v9 = vpack.c.bf16 %v4218_v41, %v4211_v24  ;;  %v12652_v13 = vpack.c.bf16 %v4233_v6, %v4226_v2  ;;  %v4275_v41 = vld [vmem:[%s23928_s3 + $0x1a30] sm:$0xff] }
 0x4d5   :  { %v5271_v36 = vpop.f32.mrb[10].mxu1  ;;  %12385 = vmatprep.subr.bf16.mxu0 %v12384_v29  ;;  %v4225_v29 = vld [vmem:[%s23928_s3 + $0x18a0] sm:$0xff]  ;;  %v4268_v24 = vld [vmem:[%s23928_s3 + $0x19f8] sm:$0xff] }
 0x4d6   :  { %v13615_v51 = vadd.f32 %v5271_v36, %v4814_v31  ;;  %v5273_v20 = vpop.f32.mrb[11].mxu1  ;;  %v4240_v31 = vld [vmem:[%s23928_s3 + $0x1918] sm:$0xff] }
 0x4d7   :  { %v13617_v56 = vadd.f32 %v5273_v20, %v4818_v26  ;;  %12643 = vmatpush1.bf16.msra.mxu1 %v12642_v11  ;;  %v4721_v26 = vld [vmem:[%s23928_s3 + $0x2820] sm:$0xff]  ;;  %v12654_v11 = vpack.c.bf16 %v4232_v17, %v4225_v29  ;;  %v12658_v20 = vpack.c.bf16 %v4246_v35, %v4239_v46  ;;  %v4282_v29 = vld [vmem:[%s23928_s3 + $0x1a68] sm:$0xff]  ;;  %v4296_v46 = vld [vmem:[%s23928_s3 + $0x1ad8] sm:$0xff] }
 0x4d8   :  { %v20842_v25 = vadd.f32 %v13615_v51, %v19993_v43  ;;  %12387 = vmatpush1.bf16.msra.mxu0 %v12386_v30  ;;  %12645 = vmatprep.subr.bf16.mxu1 %v12644_v33  ;;  %v12392_v43 = vpack.c.bf16 %v4693_v27, %v4686_v61  ;;  %v12398_v30 = vpack.c.bf16 %v4706_v16, %v4699_v14  ;;  %v4735_v51 = vld [vmem:[%s23928_s3 + $0x2890] sm:$0xff]  ;;  %v4748_v14 = vld [vmem:[%s23928_s3 + $0x28f8] sm:$0xff]  ;;  %v4289_v17 = vld [vmem:[%s23928_s3 + $0x1aa0] sm:$0xff] }
 0x4d9   :  { %v20854_v37 = vadd.f32 %v13617_v56, %v20004_v23  ;;  %12389 = vmatprep.subr.bf16.mxu0 %v12388_v38  ;;  %v4707_v23 = vld [vmem:[%s23928_s3 + $0x27b0] sm:$0xff]  ;;  %v12656_v33 = vpack.c.bf16 %v4247_v39, %v4240_v31  ;;  %v12400_v36 = vpack.c.bf16 %v4721_v26, %v4714_v52  ;;  %v4720_v38 = vld [vmem:[%s23928_s3 + $0x2818] sm:$0xff]  ;;  %v12660_v27 = vpack.c.bf16 %v4261_v7, %v4254_v40 }
 0x4da   :  { %v12396_v32 = vpack.c.bf16 %v4707_v23, %v4700_v8  ;;  %v12402_v61 = vpack.c.bf16 %v4720_v38, %v4713_v34  ;;  %v4727_v56 = vld [vmem:[%s23928_s3 + $0x2850] sm:$0xff]  ;;  %v12664_v8 = vpack.c.bf16 %v4275_v41, %v4268_v24  ;;  %v4741_v23 = vld [vmem:[%s23928_s3 + $0x28c0] sm:$0xff]  ;;  %v12668_v52 = vpack.c.bf16 %v4289_v17, %v4282_v29  ;;  %v4762_v34 = vld [vmem:[%s23928_s3 + $0x2968] sm:$0xff] }
 0x4db   :  { %12647 = vmatpush1.bf16.msra.mxu1 %v12646_v57  ;;  %v4253_v57 = vld [vmem:[%s23928_s3 + $0x1980] sm:$0xff]  ;;  %v12406_v6 = vpack.c.bf16 %v4734_v4, %v4727_v56  ;;  %v4763_v16 = vld [vmem:[%s23928_s3 + $0x2970] sm:$0xff]  ;;  %v12410_v39 = vpack.c.bf16 %v4748_v14, %v4741_v23  ;;  %v4776_v56 = vld [vmem:[%s23928_s3 + $0x29d8] sm:$0xff] }
 0x4dc   :  { %12391 = vmatpush1.bf16.msra.mxu0 %v12390_v50  ;;  %12649 = vmatprep.subr.bf16.mxu1 %v12648_v3  ;;  %v4260_v50 = vld [vmem:[%s23928_s3 + $0x19b8] sm:$0xff]  ;;  %v12404_v3 = vpack.c.bf16 %v4735_v51, %v4728_v47  ;;  %v4755_v26 = vld [vmem:[%s23928_s3 + $0x2930] sm:$0xff]  ;;  %v4777_v38 = vld [vmem:[%s23928_s3 + $0x29e0] sm:$0xff] }
 0x4dd   :  { %12393 = vmatprep.subr.bf16.mxu0 %v12392_v43  ;;  %v4742_v43 = vld [vmem:[%s23928_s3 + $0x28c8] sm:$0xff]  ;;  %v12662_v2 = vpack.c.bf16 %v4260_v50, %v4253_v57  ;;  %v4303_v35 = vld [vmem:[%s23928_s3 + $0x1b10] sm:$0xff]  ;;  %v12414_v7 = vpack.c.bf16 %v4762_v34, %v4755_v26  ;;  %v4769_v51 = vld [vmem:[%s23928_s3 + $0x29a0] sm:$0xff] }
 0x4de   :  { %v12672_v47 = vpack.c.bf16 %v4303_v35, %v4296_v46  ;;  %v4310_v57 = vld [vmem:[%s23928_s3 + $0x1b48] sm:$0xff]  ;;  %v4317_v50 = vld [vmem:[%s23928_s3 + $0x1b80] sm:$0xff]  ;;  %v4791_v4 = vld [vmem:[%s23928_s3 + $0x2a50] sm:$0xff]  ;;  %v12418_v41 = vpack.c.bf16 %v4776_v56, %v4769_v51 }
 0x4df   :  { %12651 = vmatpush1.bf16.msra.mxu1 %v12650_v9  ;;  %v4267_v9 = vld [vmem:[%s23928_s3 + $0x19f0] sm:$0xff]  ;;  %v4790_v23 = vld [vmem:[%s23928_s3 + $0x2a48] sm:$0xff]  ;;  %v4805_v14 = vld [vmem:[%s23928_s3 + $0x2ac0] sm:$0xff] }
 0x4e0   :  { %12395 = vmatpush1.bf16.msra.mxu0 %v12394_v59  ;;  %12653 = vmatprep.subr.bf16.mxu1 %v12652_v13  ;;  %v4274_v59 = vld [vmem:[%s23928_s3 + $0x1a28] sm:$0xff]  ;;  %v12408_v13 = vpack.c.bf16 %v4749_v1, %v4742_v43  ;;  %v12676_v43 = vpack.c.bf16 %v4317_v50, %v4310_v57  ;;  %v4783_v1 = vld [vmem:[%s23928_s3 + $0x2a10] sm:$0xff]  ;;  %v4804_v26 = vld [vmem:[%s23928_s3 + $0x2ab8] sm:$0xff] }
 0x4e1   :  { %12397 = vmatprep.subr.bf16.mxu0 %v12396_v32  ;;  %v4756_v32 = vld [vmem:[%s23928_s3 + $0x2938] sm:$0xff]  ;;  %v12666_v31 = vpack.c.bf16 %v4274_v59, %v4267_v9  ;;  %v4331_v59 = vld [vmem:[%s23928_s3 + $0x1bf0] sm:$0xff]  ;;  %v12422_v17 = vpack.c.bf16 %v4790_v23, %v4783_v1  ;;  %v3562_v34 = vld [vmem:[%s23928_s3 + $0x3e8] sm:$0xff] }
 0x4e2   :  { %v4324_v9 = vld [vmem:[%s23928_s3 + $0x1bb8] sm:$0xff]  ;;  %v3450_v51 = vld [vmem:[%s23928_s3 + $0x68] sm:$0xff]  ;;  %v3569_v56 = vld [vmem:[%s23928_s3 + $0x420] sm:$0xff] }
 0x4e3   :  { %12655 = vmatpush1.bf16.msra.mxu1 %v12654_v11  ;;  %v4281_v11 = vld [vmem:[%s23928_s3 + $0x1a60] sm:$0xff]  ;;  %v3576_v57 = vld [vmem:[%s23928_s3 + $0x458] sm:$0xff]  ;;  %v4366_v1 = vld [vmem:[%s23928_s3 + $0x1d08] sm:$0xff] }
 0x4e4   :  { %12399 = vmatpush1.bf16.msra.mxu0 %v12398_v30  ;;  %12657 = vmatprep.subr.bf16.mxu1 %v12656_v33  ;;  %v4288_v30 = vld [vmem:[%s23928_s3 + $0x1a98] sm:$0xff]  ;;  %v12412_v33 = vpack.c.bf16 %v4763_v16, %v4756_v32  ;;  %v12680_v32 = vpack.c.bf16 %v4331_v59, %v4324_v9  ;;  %v4797_v16 = vld [vmem:[%s23928_s3 + $0x2a80] sm:$0xff]  ;;  %v3590_v23 = vld [vmem:[%s23928_s3 + $0x4c8] sm:$0xff] }
 0x4e5   :  { %12401 = vmatprep.subr.bf16.mxu0 %v12400_v36  ;;  %v4770_v36 = vld [vmem:[%s23928_s3 + $0x29a8] sm:$0xff]  ;;  %v12670_v40 = vpack.c.bf16 %v4288_v30, %v4281_v11  ;;  %v4345_v30 = vld [vmem:[%s23928_s3 + $0x1c60] sm:$0xff]  ;;  %v12426_v35 = vpack.c.bf16 %v4804_v26, %v4797_v16 }
 0x4e6   :  { %v4338_v11 = vld [vmem:[%s23928_s3 + $0x1c28] sm:$0xff] }
 0x4e7   :  { %12659 = vmatpush1.bf16.msra.mxu1 %v12658_v20  ;;  %v4295_v20 = vld [vmem:[%s23928_s3 + $0x1ad0] sm:$0xff]  ;;  %v3478_v16 = vld [vmem:[%s23928_s3 + $0x148] sm:$0xff] }
 0x4e8   :  { %12403 = vmatpush1.bf16.msra.mxu0 %v12402_v61  ;;  %12661 = vmatprep.subr.bf16.mxu1 %v12660_v27  ;;  %v4302_v61 = vld [vmem:[%s23928_s3 + $0x1b08] sm:$0xff]  ;;  %v12416_v27 = vpack.c.bf16 %v4777_v38, %v4770_v36  ;;  %v12684_v36 = vpack.c.bf16 %v4345_v30, %v4338_v11  ;;  %v4337_v38 = vld [vmem:[%s23928_s3 + $0x1c20] sm:$0xff] }
 0x4e9   :  { %12405 = vmatprep.subr.bf16.mxu0 %v12404_v3  ;;  %v4784_v3 = vld [vmem:[%s23928_s3 + $0x2a18] sm:$0xff]  ;;  %v12674_v24 = vpack.c.bf16 %v4302_v61, %v4295_v20  ;;  %v4359_v61 = vld [vmem:[%s23928_s3 + $0x1cd0] sm:$0xff] }
 0x4ea   :  { %v4352_v20 = vld [vmem:[%s23928_s3 + $0x1c98] sm:$0xff] }
 0x4eb   :  { %12663 = vmatpush1.bf16.msra.mxu1 %v12662_v2  ;;  %v4309_v2 = vld [vmem:[%s23928_s3 + $0x1b40] sm:$0xff] }
 0x4ec   :  { %12407 = vmatpush1.bf16.msra.mxu0 %v12406_v6  ;;  %12665 = vmatprep.subr.bf16.mxu1 %v12664_v8  ;;  %v4316_v6 = vld [vmem:[%s23928_s3 + $0x1b78] sm:$0xff]  ;;  %v12420_v8 = vpack.c.bf16 %v4791_v4, %v4784_v3  ;;  %v4351_v3 = vld [vmem:[%s23928_s3 + $0x1c90] sm:$0xff]  ;;  %v4358_v4 = vld [vmem:[%s23928_s3 + $0x1cc8] sm:$0xff] }
 0x4ed   :  { %12409 = vmatprep.subr.bf16.mxu0 %v12408_v13  ;;  %v4798_v13 = vld [vmem:[%s23928_s3 + $0x2a88] sm:$0xff]  ;;  %v12678_v29 = vpack.c.bf16 %v4316_v6, %v4309_v2  ;;  %v4373_v2 = vld [vmem:[%s23928_s3 + $0x1d40] sm:$0xff]  ;;  %v12824_v6 = vpack.c.bf16 %v3576_v57, %v3569_v56  ;;  %v12690_v9 = vpack.c.bf16 %v4358_v4, %v4351_v3  ;;  %v4400_v56 = vld [vmem:[%s23928_s3 + $0x1e18] sm:$0xff] }
 0x4ee   :  { %v3499_v57 = vld [vmem:[%s23928_s3 + $0x1f0] sm:$0xff]  ;;  %v3506_v3 = vld [vmem:[%s23928_s3 + $0x228] sm:$0xff]  ;;  %v4408_v4 = vld [vmem:[%s23928_s3 + $0x1e58] sm:$0xff] }
 0x4ef   :  { %12667 = vmatpush1.bf16.msra.mxu1 %v12666_v31  ;;  %v4323_v31 = vld [vmem:[%s23928_s3 + $0x1bb0] sm:$0xff] }
 0x4f0   :  { %12411 = vmatpush1.bf16.msra.mxu0 %v12410_v39  ;;  %12669 = vmatprep.subr.bf16.mxu1 %v12668_v52  ;;  %v4330_v39 = vld [vmem:[%s23928_s3 + $0x1be8] sm:$0xff]  ;;  %v12424_v52 = vpack.c.bf16 %v4805_v14, %v4798_v13  ;;  %v12692_v13 = vpack.c.bf16 %v4373_v2, %v4366_v1  ;;  %v4365_v14 = vld [vmem:[%s23928_s3 + $0x1d00] sm:$0xff]  ;;  %v12838_v2 = vpack.c.bf16 %v3506_v3, %v3499_v57  ;;  %v3779_v57 = vld [vmem:[%s23928_s3 + $0xab0] sm:$0xff] }
 0x4f1   :  { %12413 = vmatprep.subr.bf16.mxu0 %v12412_v33  ;;  %v3555_v33 = vld [vmem:[%s23928_s3 + $0x3b0] sm:$0xff]  ;;  %v12682_v46 = vpack.c.bf16 %v4330_v39, %v4323_v31  ;;  %v4380_v31 = vld [vmem:[%s23928_s3 + $0x1d78] sm:$0xff] }
 0x4f2   :  { %v4387_v39 = vld [vmem:[%s23928_s3 + $0x1db0] sm:$0xff] }
 0x4f3   :  { %12671 = vmatpush1.bf16.msra.mxu1 %v12670_v40  ;;  %v4344_v40 = vld [vmem:[%s23928_s3 + $0x1c58] sm:$0xff]  ;;  %v12696_v30 = vpack.c.bf16 %v4387_v39, %v4380_v31 }
 0x4f4   :  { %12415 = vmatpush1.bf16.msra.mxu0 %v12414_v7  ;;  %12673 = vmatprep.subr.bf16.mxu1 %v12672_v47  ;;  %v12820_v7 = vpack.c.bf16 %v3562_v34, %v3555_v33  ;;  %v3443_v47 = vld [vmem:[%s23928_s3 + $0x30] sm:$0xff]  ;;  %v4386_v34 = vld [vmem:[%s23928_s3 + $0x1da8] sm:$0xff] }
 0x4f5   :  { %12417 = vmatprep.subr.bf16.mxu0 %v12416_v27  ;;  %v12686_v27 = vpack.c.bf16 %v4344_v40, %v4337_v38  ;;  %v12822_v50 = vpack.c.bf16 %v3450_v51, %v3443_v47  ;;  %v4379_v33 = vld [vmem:[%s23928_s3 + $0x1d70] sm:$0xff]  ;;  %v4394_v38 = vld [vmem:[%s23928_s3 + $0x1de8] sm:$0xff]  ;;  %v4401_v40 = vld [vmem:[%s23928_s3 + $0x1e20] sm:$0xff] }
 0x4f6   :  { %v3618_v47 = vld [vmem:[%s23928_s3 + $0x5a8] sm:$0xff]  ;;  %v12698_v51 = vpack.c.bf16 %v4386_v34, %v4379_v33  ;;  %v4436_v33 = vld [vmem:[%s23928_s3 + $0x1f38] sm:$0xff]  ;;  %v4443_v34 = vld [vmem:[%s23928_s3 + $0x1f70] sm:$0xff] }
 0x4f7   :  { %12675 = vmatpush1.bf16.msra.mxu1 %v12674_v24  ;;  %v3457_v24 = vld [vmem:[%s23928_s3 + $0xa0] sm:$0xff] }
 0x4f8   :  { %12419 = vmatpush1.bf16.msra.mxu0 %v12418_v41  ;;  %12677 = vmatprep.subr.bf16.mxu1 %v12676_v43  ;;  %v12688_v41 = vpack.c.bf16 %v4359_v61, %v4352_v20  ;;  %v3464_v43 = vld [vmem:[%s23928_s3 + $0xd8] sm:$0xff]  ;;  %v12700_v61 = vpack.c.bf16 %v4401_v40, %v4394_v38  ;;  %v12712_v40 = vpack.c.bf16 %v4443_v34, %v4436_v33 }
 0x4f9   :  { %12421 = vmatprep.subr.bf16.mxu0 %v12420_v8  ;;  %v3583_v8 = vld [vmem:[%s23928_s3 + $0x490] sm:$0xff]  ;;  %v12826_v59 = vpack.c.bf16 %v3464_v43, %v3457_v24  ;;  %v3632_v43 = vld [vmem:[%s23928_s3 + $0x618] sm:$0xff] }
 0x4fa   :  { %v4415_v24 = vld [vmem:[%s23928_s3 + $0x1e90] sm:$0xff] }
 0x4fb   :  { %5767 = vmatmul.mubr.f32.vlgmr.msra.gmra.mrb[12].mxu0 %v19520_v53  ;;  %12679 = vmatpush1.bf16.msra.mxu1 %v12678_v29  ;;  %v4372_v29 = vld [vmem:[%s23928_s3 + $0x1d38] sm:$0xff] }
 0x4fc   :  { %12423 = vmatpush1.bf16.msra.mxu0 %v12422_v17  ;;  %12681 = vmatprep.subr.bf16.mxu1 %v12680_v32  ;;  %v3471_v17 = vld [vmem:[%s23928_s3 + $0x110] sm:$0xff]  ;;  %v12828_v32 = vpack.c.bf16 %v3590_v23, %v3583_v8  ;;  %v12694_v26 = vpack.c.bf16 %v4372_v29, %v4365_v14  ;;  %v4414_v23 = vld [vmem:[%s23928_s3 + $0x1e88] sm:$0xff]  ;;  %v4429_v29 = vld [vmem:[%s23928_s3 + $0x1f00] sm:$0xff] }
 0x4fd   :  { %12425 = vmatprep.subr.bf16.mxu0 %v12424_v52  ;;  %5837 = vmatprep.mubr.f32.mxu0 %v23941_v21  ;;  %v3597_v52 = vld [vmem:[%s23928_s3 + $0x500] sm:$0xff]  ;;  %v12830_v11 = vpack.c.bf16 %v3478_v16, %v3471_v17  ;;  %v4407_v8 = vld [vmem:[%s23928_s3 + $0x1e50] sm:$0xff]  ;;  %v4422_v14 = vld [vmem:[%s23928_s3 + $0x1ec8] sm:$0xff] }
 0x4fe   :  { %v3639_v17 = vld [vmem:[%s23928_s3 + $0x650] sm:$0xff]  ;;  %v12706_v16 = vpack.c.bf16 %v4414_v23, %v4407_v8  ;;  %v12708_v39 = vpack.c.bf16 %v4429_v29, %v4422_v14  ;;  %v4464_v8 = vld [vmem:[%s23928_s3 + $0x2018] sm:$0xff] }
 0x4ff   :  { %12683 = vmatpush1.bf16.msra.mxu1 %v12682_v46  ;;  %v3485_v46 = vld [vmem:[%s23928_s3 + $0x180] sm:$0xff]  ;;  %v4471_v23 = vld [vmem:[%s23928_s3 + $0x2050] sm:$0xff] }
 0x500   :  { %12427 = vmatpush1.bf16.msra.mxu0 %v12426_v35  ;;  %12685 = vmatprep.subr.bf16.mxu1 %v12684_v36  ;;  %v3492_v36 = vld [vmem:[%s23928_s3 + $0x1b8] sm:$0xff]  ;;  %v4463_v29 = vld [vmem:[%s23928_s3 + $0x2010] sm:$0xff] }
 0x501   :  { %12821 = vmatprep.subr.bf16.mxu0 %v12820_v7  ;;  %v3611_v7 = vld [vmem:[%s23928_s3 + $0x570] sm:$0xff]  ;;  %v12834_v20 = vpack.c.bf16 %v3492_v36, %v3485_v46  ;;  %v3653_v46 = vld [vmem:[%s23928_s3 + $0x6c0] sm:$0xff] }
 0x502   :  { %6122 = vmatmul.mubr.f32.vlgmr.msra.gmra.mrb[12].mxu1 %v18733_v60 }
 0x503   :  { %9542 = vmatmul.mubr.msk.f32.vlgmr.msra.gmra.mrb[12].mxu0 %vm4846_vm2, %v18682_v0  ;;  %12687 = vmatpush1.bf16.msra.mxu1 %v12686_v27  ;;  %v4393_v27 = vld [vmem:[%s23928_s3 + $0x1de0] sm:$0xff] }
 0x504   :  { %6192 = vmatprep.mubr.f32.mxu1 %v18744_v48  ;;  %12823 = vmatpush3.bf16.msra.mxu0 %v12822_v50  ;;  %v12836_v50 = vpack.c.bf16 %v3618_v47, %v3611_v7  ;;  %v12702_v1 = vpack.c.bf16 %v4400_v56, %v4393_v27  ;;  %v4435_v7 = vld [vmem:[%s23928_s3 + $0x1f30] sm:$0xff]  ;;  %v4442_v47 = vld [vmem:[%s23928_s3 + $0x1f68] sm:$0xff]  ;;  %v4457_v56 = vld [vmem:[%s23928_s3 + $0x1fe0] sm:$0xff] }
 0x505   :  { %6405 = vmatprep.mubr.f32.mxu0 %v17746_v5  ;;  %12689 = vmatprep.subr.bf16.mxu1 %v12688_v41  ;;  %v3604_v5 = vld [vmem:[%s23928_s3 + $0x538] sm:$0xff]  ;;  %v3625_v41 = vld [vmem:[%s23928_s3 + $0x5e0] sm:$0xff]  ;;  %v4450_v27 = vld [vmem:[%s23928_s3 + $0x1fa8] sm:$0xff]  ;;  %v12714_v3 = vpack.c.bf16 %v4442_v47, %v4435_v7 }
 0x506   :  { %12825 = vmatprep.subr.bf16.mxu0 %v12824_v6  ;;  %v12832_v35 = vpack.c.bf16 %v3604_v5, %v3597_v52  ;;  %v12704_v6 = vpack.c.bf16 %v4415_v24, %v4408_v4  ;;  %v4421_v52 = vld [vmem:[%s23928_s3 + $0x1ec0] sm:$0xff]  ;;  %v4428_v5 = vld [vmem:[%s23928_s3 + $0x1ef8] sm:$0xff]  ;;  %v12716_v24 = vpack.c.bf16 %v4457_v56, %v4450_v27  ;;  %v4491_v27 = vld [vmem:[%s23928_s3 + $0x20f0] sm:$0xff] }
 0x507   :  { %12691 = vmatpush1.bf16.msra.mxu1 %v12690_v9  ;;  %v3513_v9 = vld [vmem:[%s23928_s3 + $0x260] sm:$0xff]  ;;  %v12710_v36 = vpack.c.bf16 %v4428_v5, %v4421_v52  ;;  %v4478_v52 = vld [vmem:[%s23928_s3 + $0x2088] sm:$0xff]  ;;  %v3828_v47 = vld [vmem:[%s23928_s3 + $0xc38] sm:$0xff] }
 0x508   :  { %12827 = vmatpush3.bf16.msra.mxu0 %v12826_v59  ;;  %12693 = vmatprep.subr.bf16.mxu1 %v12692_v13  ;;  %v12840_v59 = vpack.c.bf16 %v3632_v43, %v3625_v41  ;;  %v3520_v13 = vld [vmem:[%s23928_s3 + $0x298] sm:$0xff]  ;;  %v4449_v41 = vld [vmem:[%s23928_s3 + $0x1fa0] sm:$0xff]  ;;  %v4498_v56 = vld [vmem:[%s23928_s3 + $0x2128] sm:$0xff] }
 0x509   :  { %12829 = vmatprep.subr.bf16.mxu0 %v12828_v32  ;;  %v3646_v32 = vld [vmem:[%s23928_s3 + $0x688] sm:$0xff]  ;;  %v12842_v31 = vpack.c.bf16 %v3520_v13, %v3513_v9  ;;  %v4456_v43 = vld [vmem:[%s23928_s3 + $0x1fd8] sm:$0xff]  ;;  %v3793_v9 = vld [vmem:[%s23928_s3 + $0xb20] sm:$0xff] }
 0x50a   :  { %v12718_v13 = vpack.c.bf16 %v4456_v43, %v4449_v41  ;;  %v4485_v5 = vld [vmem:[%s23928_s3 + $0x20c0] sm:$0xff]  ;;  %v3835_v41 = vld [vmem:[%s23928_s3 + $0xc70] sm:$0xff]  ;;  %v3842_v43 = vld [vmem:[%s23928_s3 + $0xca8] sm:$0xff] }
 0x50b   :  { %12695 = vmatpush1.bf16.msra.mxu1 %v12694_v26  ;;  %v3527_v26 = vld [vmem:[%s23928_s3 + $0x2d0] sm:$0xff]  ;;  %v12724_v34 = vpack.c.bf16 %v4485_v5, %v4478_v52  ;;  %v3821_v7 = vld [vmem:[%s23928_s3 + $0xc00] sm:$0xff]  ;;  %v4526_v5 = vld [vmem:[%s23928_s3 + $0x2208] sm:$0xff] }
 0x50c   :  { %12831 = vmatpush3.bf16.msra.mxu0 %v12830_v11  ;;  %12697 = vmatprep.subr.bf16.mxu1 %v12696_v30  ;;  %v12844_v11 = vpack.c.bf16 %v3646_v32, %v3639_v17  ;;  %v3534_v30 = vld [vmem:[%s23928_s3 + $0x308] sm:$0xff]  ;;  %v3681_v32 = vld [vmem:[%s23928_s3 + $0x7a0] sm:$0xff]  ;;  %v4519_v52 = vld [vmem:[%s23928_s3 + $0x21d0] sm:$0xff] }
 0x50d   :  { %12833 = vmatprep.subr.bf16.mxu0 %v12832_v35  ;;  %v3660_v35 = vld [vmem:[%s23928_s3 + $0x6f8] sm:$0xff]  ;;  %v12846_v38 = vpack.c.bf16 %v3534_v30, %v3527_v26  ;;  %v4470_v17 = vld [vmem:[%s23928_s3 + $0x2048] sm:$0xff]  ;;  %v3807_v26 = vld [vmem:[%s23928_s3 + $0xb90] sm:$0xff] }
 0x50e   :  { %v12722_v30 = vpack.c.bf16 %v4470_v17, %v4463_v29  ;;  %v4527_v29 = vld [vmem:[%s23928_s3 + $0x2210] sm:$0xff]  ;;  %v3849_v17 = vld [vmem:[%s23928_s3 + $0xce0] sm:$0xff] }
 0x50f   :  { %12699 = vmatpush1.bf16.msra.mxu1 %v12698_v51  ;;  %v3541_v51 = vld [vmem:[%s23928_s3 + $0x340] sm:$0xff] }
 0x510   :  { %12835 = vmatpush3.bf16.msra.mxu0 %v12834_v20  ;;  %12701 = vmatprep.subr.bf16.mxu1 %v12700_v61  ;;  %v12848_v20 = vpack.c.bf16 %v3660_v35, %v3653_v46  ;;  %v3548_v61 = vld [vmem:[%s23928_s3 + $0x378] sm:$0xff]  ;;  %v4477_v46 = vld [vmem:[%s23928_s3 + $0x2080] sm:$0xff] }
 0x511   :  { %12837 = vmatprep.subr.bf16.mxu0 %v12836_v50  ;;  %v3786_v50 = vld [vmem:[%s23928_s3 + $0xae8] sm:$0xff]  ;;  %v12850_v4 = vpack.c.bf16 %v3548_v61, %v3541_v51  ;;  %v4484_v35 = vld [vmem:[%s23928_s3 + $0x20b8] sm:$0xff] }
 0x512   :  { %v12726_v51 = vpack.c.bf16 %v4484_v35, %v4477_v46  ;;  %v3863_v46 = vld [vmem:[%s23928_s3 + $0xd50] sm:$0xff]  ;;  %v3870_v35 = vld [vmem:[%s23928_s3 + $0xd88] sm:$0xff] }
 0x513   :  { %12703 = vmatpush1.bf16.msra.mxu1 %v12702_v1  ;;  %v12852_v1 = vpack.c.bf16 %v3786_v50, %v3779_v57  ;;  %v3709_v57 = vld [vmem:[%s23928_s3 + $0x880] sm:$0xff]  ;;  %v12864_v50 = vpack.c.bf16 %v3828_v47, %v3821_v7  ;;  %v3751_v7 = vld [vmem:[%s23928_s3 + $0x9d0] sm:$0xff]  ;;  %v12876_v47 = vpack.c.bf16 %v3870_v35, %v3863_v46  ;;  %v3912_v35 = vld [vmem:[%s23928_s3 + $0xed8] sm:$0xff] }
 0x514   :  { %12839 = vmatpush3.bf16.msra.mxu0 %v12838_v2  ;;  %12705 = vmatprep.subr.bf16.mxu1 %v12704_v6  ;;  %v3667_v2 = vld [vmem:[%s23928_s3 + $0x730] sm:$0xff]  ;;  %v3674_v6 = vld [vmem:[%s23928_s3 + $0x768] sm:$0xff] }
 0x515   :  { %12841 = vmatprep.subr.bf16.mxu0 %v12840_v59  ;;  %v3800_v59 = vld [vmem:[%s23928_s3 + $0xb58] sm:$0xff]  ;;  %v12854_v14 = vpack.c.bf16 %v3674_v6, %v3667_v2 }
 0x517   :  { %12707 = vmatpush1.bf16.msra.mxu1 %v12706_v16  ;;  %v12720_v16 = vpack.c.bf16 %v4471_v23, %v4464_v8  ;;  %v4505_v8 = vld [vmem:[%s23928_s3 + $0x2160] sm:$0xff]  ;;  %v4512_v23 = vld [vmem:[%s23928_s3 + $0x2198] sm:$0xff] }
 0x518   :  { %12843 = vmatpush3.bf16.msra.mxu0 %v12842_v31  ;;  %12709 = vmatprep.subr.bf16.mxu1 %v12708_v39  ;;  %v12856_v31 = vpack.c.bf16 %v3800_v59, %v3793_v9  ;;  %v3688_v39 = vld [vmem:[%s23928_s3 + $0x7d8] sm:$0xff]  ;;  %v3723_v9 = vld [vmem:[%s23928_s3 + $0x8f0] sm:$0xff]  ;;  %v12868_v59 = vpack.c.bf16 %v3842_v43, %v3835_v41  ;;  %v3765_v41 = vld [vmem:[%s23928_s3 + $0xa40] sm:$0xff] }
 0x519   :  { %12845 = vmatprep.subr.bf16.mxu0 %v12844_v11  ;;  %v3814_v11 = vld [vmem:[%s23928_s3 + $0xbc8] sm:$0xff]  ;;  %v12858_v33 = vpack.c.bf16 %v3688_v39, %v3681_v32  ;;  %v3856_v32 = vld [vmem:[%s23928_s3 + $0xd18] sm:$0xff] }
 0x51b   :  { %12711 = vmatpush1.bf16.msra.mxu1 %v12710_v36  ;;  %v3695_v36 = vld [vmem:[%s23928_s3 + $0x810] sm:$0xff] }
 0x51c   :  { %12847 = vmatpush3.bf16.msra.mxu0 %v12846_v38  ;;  %12713 = vmatprep.subr.bf16.mxu1 %v12712_v40  ;;  %v4492_v38 = vld [vmem:[%s23928_s3 + $0x20f8] sm:$0xff]  ;;  %v4499_v40 = vld [vmem:[%s23928_s3 + $0x2130] sm:$0xff] }
 0x51d   :  { %12849 = vmatprep.subr.bf16.mxu0 %v12848_v20  ;;  %v12728_v61 = vpack.c.bf16 %v4499_v40, %v4492_v38  ;;  %v4533_v38 = vld [vmem:[%s23928_s3 + $0x2240] sm:$0xff]  ;;  %v4540_v40 = vld [vmem:[%s23928_s3 + $0x2278] sm:$0xff] }
 0x51f   :  { %12715 = vmatpush1.bf16.msra.mxu1 %v12714_v3  ;;  %v3716_v3 = vld [vmem:[%s23928_s3 + $0x8b8] sm:$0xff] }
 0x520   :  { %12851 = vmatpush3.bf16.msra.mxu0 %v12850_v4  ;;  %12717 = vmatprep.subr.bf16.mxu1 %v12716_v24  ;;  %v4506_v4 = vld [vmem:[%s23928_s3 + $0x2168] sm:$0xff]  ;;  %v4513_v24 = vld [vmem:[%s23928_s3 + $0x21a0] sm:$0xff]  ;;  %v12866_v2 = vpack.c.bf16 %v3716_v3, %v3709_v57  ;;  %v12742_v57 = vpack.c.bf16 %v4540_v40, %v4533_v38  ;;  %v4031_v38 = vld [vmem:[%s23928_s3 + $0x1290] sm:$0xff] }
 0x521   :  { %12853 = vmatprep.subr.bf16.mxu0 %v12852_v1  ;;  %v12730_v1 = vpack.c.bf16 %v4498_v56, %v4491_v27  ;;  %v12732_v6 = vpack.c.bf16 %v4513_v24, %v4506_v4  ;;  %v3877_v27 = vld [vmem:[%s23928_s3 + $0xdc0] sm:$0xff]  ;;  %v3884_v56 = vld [vmem:[%s23928_s3 + $0xdf8] sm:$0xff]  ;;  %v4547_v4 = vld [vmem:[%s23928_s3 + $0x22b0] sm:$0xff] }
 0x522   :  { %v4554_v24 = vld [vmem:[%s23928_s3 + $0x22e8] sm:$0xff]  ;;  %v12880_v43 = vpack.c.bf16 %v3884_v56, %v3877_v27  ;;  %v3919_v27 = vld [vmem:[%s23928_s3 + $0xf10] sm:$0xff] }
 0x523   :  { %6406 = vmatmul.mubr.f32.vlgmr.msra.gmra.mrb[14].mxu0 %v18006_v55  ;;  %12719 = vmatpush1.bf16.msra.mxu1 %v12718_v13  ;;  %v12860_v55 = vpack.c.bf16 %v3814_v11, %v3807_v26  ;;  %v3730_v13 = vld [vmem:[%s23928_s3 + $0x928] sm:$0xff]  ;;  %v3737_v26 = vld [vmem:[%s23928_s3 + $0x960] sm:$0xff]  ;;  %v12872_v11 = vpack.c.bf16 %v3856_v32, %v3849_v17  ;;  %v3891_v32 = vld [vmem:[%s23928_s3 + $0xe30] sm:$0xff] }
 0x524   :  { %12855 = vmatpush3.bf16.msra.mxu0 %v12854_v14  ;;  %6475 = vmatprep.mubr.f32.mxu0 %v18014_v42  ;;  %v3702_v42 = vld [vmem:[%s23928_s3 + $0x848] sm:$0xff]  ;;  %v4520_v14 = vld [vmem:[%s23928_s3 + $0x21d8] sm:$0xff] }
 0x525   :  { %12721 = vmatprep.subr.bf16.mxu1 %v12720_v16  ;;  %12857 = vmatprep.subr.bf16.mxu0 %v12856_v31  ;;  %v12862_v20 = vpack.c.bf16 %v3702_v42, %v3695_v36  ;;  %v12734_v16 = vpack.c.bf16 %v4512_v23, %v4505_v8  ;;  %v12870_v31 = vpack.c.bf16 %v3730_v13, %v3723_v9  ;;  %v4003_v8 = vld [vmem:[%s23928_s3 + $0x11b0] sm:$0xff]  ;;  %v4010_v23 = vld [vmem:[%s23928_s3 + $0x11e8] sm:$0xff] }
 0x526   :  { %v12736_v39 = vpack.c.bf16 %v4527_v29, %v4520_v14  ;;  %v12738_v36 = vpack.c.bf16 %v4526_v5, %v4519_v52  ;;  %v12746_v9 = vpack.c.bf16 %v4554_v24, %v4547_v4  ;;  %v4561_v14 = vld [vmem:[%s23928_s3 + $0x2320] sm:$0xff]  ;;  %v4568_v29 = vld [vmem:[%s23928_s3 + $0x2358] sm:$0xff]  ;;  %v12884_v17 = vpack.c.bf16 %v4010_v23, %v4003_v8  ;;  %v4038_v40 = vld [vmem:[%s23928_s3 + $0x12c8] sm:$0xff] }
 0x527   :  { %12723 = vmatpush1.bf16.msra.mxu1 %v12722_v30  ;;  %v3744_v30 = vld [vmem:[%s23928_s3 + $0x998] sm:$0xff]  ;;  %v12750_v52 = vpack.c.bf16 %v4568_v29, %v4561_v14  ;;  %v4017_v5 = vld [vmem:[%s23928_s3 + $0x1220] sm:$0xff]  ;;  %v3926_v56 = vld [vmem:[%s23928_s3 + $0xf48] sm:$0xff] }
 0x528   :  { %12859 = vmatpush3.bf16.msra.mxu0 %v12858_v33  ;;  %12725 = vmatprep.subr.bf16.mxu1 %v12724_v34  ;;  %v4534_v33 = vld [vmem:[%s23928_s3 + $0x2248] sm:$0xff]  ;;  %v4541_v34 = vld [vmem:[%s23928_s3 + $0x2280] sm:$0xff]  ;;  %v12894_v24 = vpack.c.bf16 %v3926_v56, %v3919_v27  ;;  %v3940_v8 = vld [vmem:[%s23928_s3 + $0xfb8] sm:$0xff] }
 0x529   :  { %12861 = vmatprep.subr.bf16.mxu0 %v12860_v55  ;;  %v12874_v55 = vpack.c.bf16 %v3744_v30, %v3737_v26  ;;  %v12740_v42 = vpack.c.bf16 %v4541_v34, %v4534_v33  ;;  %v4024_v26 = vld [vmem:[%s23928_s3 + $0x1258] sm:$0xff]  ;;  %v4575_v30 = vld [vmem:[%s23928_s3 + $0x2390] sm:$0xff]  ;;  %v4582_v33 = vld [vmem:[%s23928_s3 + $0x23c8] sm:$0xff] }
 0x52a   :  { %v3905_v34 = vld [vmem:[%s23928_s3 + $0xea0] sm:$0xff]  ;;  %v4618_v23 = vld [vmem:[%s23928_s3 + $0x24e8] sm:$0xff]  ;;  %v4652_v56 = vld [vmem:[%s23928_s3 + $0x25f8] sm:$0xff] }
 0x52b   :  { %12727 = vmatpush1.bf16.msra.mxu1 %v12726_v51  ;;  %v3758_v51 = vld [vmem:[%s23928_s3 + $0xa08] sm:$0xff] }
 0x52c   :  { %12863 = vmatpush3.bf16.msra.mxu0 %v12862_v20  ;;  %12729 = vmatprep.subr.bf16.mxu1 %v12728_v61  ;;  %v4548_v20 = vld [vmem:[%s23928_s3 + $0x22b8] sm:$0xff]  ;;  %v4555_v61 = vld [vmem:[%s23928_s3 + $0x22f0] sm:$0xff] }
 0x52d   :  { %12865 = vmatprep.subr.bf16.mxu0 %v12864_v50  ;;  %v12878_v50 = vpack.c.bf16 %v3758_v51, %v3751_v7  ;;  %v12744_v3 = vpack.c.bf16 %v4555_v61, %v4548_v20  ;;  %v12754_v7 = vpack.c.bf16 %v4582_v33, %v4575_v30  ;;  %v4589_v20 = vld [vmem:[%s23928_s3 + $0x2400] sm:$0xff]  ;;  %v4596_v61 = vld [vmem:[%s23928_s3 + $0x2438] sm:$0xff] }
 0x52e   :  { %v12758_v4 = vpack.c.bf16 %v4596_v61, %v4589_v20  ;;  %v4080_v30 = vld [vmem:[%s23928_s3 + $0x1418] sm:$0xff] }
 0x52f   :  { %12731 = vmatpush1.bf16.msra.mxu1 %v12730_v1  ;;  %v3772_v1 = vld [vmem:[%s23928_s3 + $0xa78] sm:$0xff] }
 0x530   :  { %12867 = vmatpush3.bf16.msra.mxu0 %v12866_v2  ;;  %12733 = vmatprep.subr.bf16.mxu1 %v12732_v6  ;;  %v4562_v2 = vld [vmem:[%s23928_s3 + $0x2328] sm:$0xff]  ;;  %v4569_v6 = vld [vmem:[%s23928_s3 + $0x2360] sm:$0xff] }
 0x531   :  { %12869 = vmatprep.subr.bf16.mxu0 %v12868_v59  ;;  %v12882_v59 = vpack.c.bf16 %v3772_v1, %v3765_v41  ;;  %v12748_v13 = vpack.c.bf16 %v4569_v6, %v4562_v2  ;;  %v4610_v1 = vld [vmem:[%s23928_s3 + $0x24a8] sm:$0xff]  ;;  %v3933_v2 = vld [vmem:[%s23928_s3 + $0xf80] sm:$0xff] }
 0x532   :  { %v12898_v29 = vpack.c.bf16 %v3940_v8, %v3933_v2  ;;  %v4666_v8 = vld [vmem:[%s23928_s3 + $0x2668] sm:$0xff] }
 0x533   :  { %12735 = vmatpush1.bf16.msra.mxu1 %v12734_v16  ;;  %v3898_v16 = vld [vmem:[%s23928_s3 + $0xe68] sm:$0xff] }
 0x534   :  { %12871 = vmatpush3.bf16.msra.mxu0 %v12870_v31  ;;  %12737 = vmatprep.subr.bf16.mxu1 %v12736_v39  ;;  %v4576_v31 = vld [vmem:[%s23928_s3 + $0x2398] sm:$0xff]  ;;  %v4583_v39 = vld [vmem:[%s23928_s3 + $0x23d0] sm:$0xff] }
 0x535   :  { %12873 = vmatprep.subr.bf16.mxu0 %v12872_v11  ;;  %v12886_v11 = vpack.c.bf16 %v3898_v16, %v3891_v32  ;;  %v12752_v46 = vpack.c.bf16 %v4583_v39, %v4576_v31  ;;  %v4617_v32 = vld [vmem:[%s23928_s3 + $0x24e0] sm:$0xff]  ;;  %v4624_v16 = vld [vmem:[%s23928_s3 + $0x2518] sm:$0xff]  ;;  %v3947_v31 = vld [vmem:[%s23928_s3 + $0xff0] sm:$0xff] }
 0x536   :  { %v12766_v33 = vpack.c.bf16 %v4624_v16, %v4617_v32 }
 0x537   :  { %12739 = vmatpush1.bf16.msra.mxu1 %v12738_v36  ;;  %v4590_v36 = vld [vmem:[%s23928_s3 + $0x2408] sm:$0xff] }
 0x538   :  { %12875 = vmatpush3.bf16.msra.mxu0 %v12874_v55  ;;  %12741 = vmatprep.subr.bf16.mxu1 %v12740_v42  ;;  %v4597_v55 = vld [vmem:[%s23928_s3 + $0x2440] sm:$0xff]  ;;  %v12888_v42 = vpack.c.bf16 %v4024_v26, %v4017_v5  ;;  %v4632_v5 = vld [vmem:[%s23928_s3 + $0x2558] sm:$0xff]  ;;  %v4639_v26 = vld [vmem:[%s23928_s3 + $0x2590] sm:$0xff] }
 0x539   :  { %12877 = vmatprep.subr.bf16.mxu0 %v12876_v47  ;;  %v12890_v47 = vpack.c.bf16 %v3912_v35, %v3905_v34  ;;  %v12756_v51 = vpack.c.bf16 %v4597_v55, %v4590_v36  ;;  %v4631_v35 = vld [vmem:[%s23928_s3 + $0x2550] sm:$0xff]  ;;  %v4638_v36 = vld [vmem:[%s23928_s3 + $0x2588] sm:$0xff]  ;;  %v3961_v55 = vld [vmem:[%s23928_s3 + $0x1060] sm:$0xff] }
 0x53a   :  { %v12770_v20 = vpack.c.bf16 %v4638_v36, %v4631_v35 }
 0x53b   :  { %12743 = vmatpush1.bf16.msra.mxu1 %v12742_v57  ;;  %v4604_v57 = vld [vmem:[%s23928_s3 + $0x2478] sm:$0xff] }
 0x53c   :  { %12879 = vmatpush3.bf16.msra.mxu0 %v12878_v50  ;;  %12745 = vmatprep.subr.bf16.mxu1 %v12744_v3  ;;  %v4611_v50 = vld [vmem:[%s23928_s3 + $0x24b0] sm:$0xff]  ;;  %v4045_v3 = vld [vmem:[%s23928_s3 + $0x1300] sm:$0xff] }
 0x53d   :  { %12881 = vmatprep.subr.bf16.mxu0 %v12880_v43  ;;  %v12760_v41 = vpack.c.bf16 %v4611_v50, %v4604_v57  ;;  %v4603_v43 = vld [vmem:[%s23928_s3 + $0x2470] sm:$0xff] }
 0x53e   :  { %v12762_v14 = vpack.c.bf16 %v4610_v1, %v4603_v43  ;;  %v3975_v57 = vld [vmem:[%s23928_s3 + $0x10d0] sm:$0xff] }
 0x53f   :  { %12747 = vmatpush1.bf16.msra.mxu1 %v12746_v9  ;;  %v4625_v9 = vld [vmem:[%s23928_s3 + $0x2520] sm:$0xff] }
 0x540   :  { %12883 = vmatpush3.bf16.msra.mxu0 %v12882_v59  ;;  %12749 = vmatprep.subr.bf16.mxu1 %v12748_v13  ;;  %v4059_v59 = vld [vmem:[%s23928_s3 + $0x1370] sm:$0xff]  ;;  %v4066_v13 = vld [vmem:[%s23928_s3 + $0x13a8] sm:$0xff] }
 0x541   :  { %12885 = vmatprep.subr.bf16.mxu0 %v12884_v17  ;;  %v12764_v17 = vpack.c.bf16 %v4625_v9, %v4618_v23  ;;  %v12900_v39 = vpack.c.bf16 %v4066_v13, %v4059_v59  ;;  %v3989_v23 = vld [vmem:[%s23928_s3 + $0x1140] sm:$0xff]  ;;  %v3996_v59 = vld [vmem:[%s23928_s3 + $0x1178] sm:$0xff]  ;;  %v4674_v13 = vld [vmem:[%s23928_s3 + $0x26a8] sm:$0xff] }
 0x542   :  { %6193 = vmatmul.mubr.f32.vlgmr.msra.gmra.mrb[12].mxu1 %v19126_v12  ;;  %v12914_v16 = vpack.c.bf16 %v3996_v59, %v3989_v23  ;;  %v4722_v23 = vld [vmem:[%s23928_s3 + $0x2828] sm:$0xff] }
 0x543   :  { %6476 = vmatmul.mubr.f32.vlgmr.msra.gmra.mrb[16].mxu0 %v18246_v58  ;;  %12751 = vmatpush1.bf16.msra.mxu1 %v12750_v52  ;;  %v12892_v58 = vpack.c.bf16 %v4038_v40, %v4031_v38  ;;  %v3954_v52 = vld [vmem:[%s23928_s3 + $0x1028] sm:$0xff]  ;;  %v3968_v38 = vld [vmem:[%s23928_s3 + $0x1098] sm:$0xff] }
 0x544   :  { %6263 = vmatprep.mubr.f32.mxu1 %v19138_v15  ;;  %12887 = vmatpush3.bf16.msra.mxu0 %v12886_v11  ;;  %v4073_v11 = vld [vmem:[%s23928_s3 + $0x13e0] sm:$0xff]  ;;  %v12902_v34 = vpack.c.bf16 %v3954_v52, %v3947_v31  ;;  %v4646_v40 = vld [vmem:[%s23928_s3 + $0x25c8] sm:$0xff]  ;;  %v12906_v61 = vpack.c.bf16 %v3968_v38, %v3961_v55  ;;  %v4680_v52 = vld [vmem:[%s23928_s3 + $0x26d8] sm:$0xff] }
 0x545   :  { %6545 = vmatprep.mubr.f32.mxu0 %v18254_v62  ;;  %12753 = vmatprep.subr.bf16.mxu1 %v12752_v46  ;;  %v4052_v62 = vld [vmem:[%s23928_s3 + $0x1338] sm:$0xff]  ;;  %v12768_v46 = vpack.c.bf16 %v4639_v26, %v4632_v5  ;;  %v4115_v26 = vld [vmem:[%s23928_s3 + $0x1530] sm:$0xff]  ;;  %v4129_v38 = vld [vmem:[%s23928_s3 + $0x15a0] sm:$0xff] }
 0x546   :  { %12889 = vmatprep.subr.bf16.mxu0 %v12888_v42  ;;  %v12896_v6 = vpack.c.bf16 %v4052_v62, %v4045_v3  ;;  %v12904_v42 = vpack.c.bf16 %v4080_v30, %v4073_v11  ;;  %v3982_v3 = vld [vmem:[%s23928_s3 + $0x1108] sm:$0xff]  ;;  %v4660_v62 = vld [vmem:[%s23928_s3 + $0x2638] sm:$0xff]  ;;  %v4687_v55 = vld [vmem:[%s23928_s3 + $0x2710] sm:$0xff] }
 0x547   :  { %12755 = vmatpush1.bf16.msra.mxu1 %v12754_v7  ;;  %v4653_v7 = vld [vmem:[%s23928_s3 + $0x2600] sm:$0xff]  ;;  %v12910_v1 = vpack.c.bf16 %v3982_v3, %v3975_v57  ;;  %v4122_v11 = vld [vmem:[%s23928_s3 + $0x1568] sm:$0xff]  ;;  %v4688_v30 = vld [vmem:[%s23928_s3 + $0x2718] sm:$0xff] }
 0x548   :  { %12891 = vmatpush3.bf16.msra.mxu0 %v12890_v47  ;;  %12757 = vmatprep.subr.bf16.mxu1 %v12756_v51  ;;  %v4087_v47 = vld [vmem:[%s23928_s3 + $0x1450] sm:$0xff]  ;;  %v4094_v51 = vld [vmem:[%s23928_s3 + $0x1488] sm:$0xff]  ;;  %v12772_v27 = vpack.c.bf16 %v4653_v7, %v4646_v40  ;;  %v12918_v36 = vpack.c.bf16 %v4122_v11, %v4115_v26  ;;  %v4708_v3 = vld [vmem:[%s23928_s3 + $0x27b8] sm:$0xff] }
 0x549   :  { %12893 = vmatprep.subr.bf16.mxu0 %v12892_v58  ;;  %v4645_v58 = vld [vmem:[%s23928_s3 + $0x25c0] sm:$0xff]  ;;  %v12908_v50 = vpack.c.bf16 %v4094_v51, %v4087_v47  ;;  %v4136_v47 = vld [vmem:[%s23928_s3 + $0x15d8] sm:$0xff]  ;;  %v4702_v51 = vld [vmem:[%s23928_s3 + $0x2788] sm:$0xff] }
 0x54a   :  { %v12774_v43 = vpack.c.bf16 %v4652_v56, %v4645_v58  ;;  %v12922_v56 = vpack.c.bf16 %v4136_v47, %v4129_v38  ;;  %v4171_v26 = vld [vmem:[%s23928_s3 + $0x16f0] sm:$0xff] }
 0x54b   :  { %12759 = vmatpush1.bf16.msra.mxu1 %v12758_v4  ;;  %v4667_v4 = vld [vmem:[%s23928_s3 + $0x2670] sm:$0xff] }
 0x54c   :  { %12895 = vmatpush3.bf16.msra.mxu0 %v12894_v24  ;;  %12761 = vmatprep.subr.bf16.mxu1 %v12760_v41  ;;  %v4101_v24 = vld [vmem:[%s23928_s3 + $0x14c0] sm:$0xff]  ;;  %v4108_v41 = vld [vmem:[%s23928_s3 + $0x14f8] sm:$0xff]  ;;  %v12776_v2 = vpack.c.bf16 %v4667_v4, %v4660_v62  ;;  %v4143_v62 = vld [vmem:[%s23928_s3 + $0x1610] sm:$0xff] }
 0x54d   :  { %12897 = vmatprep.subr.bf16.mxu0 %v12896_v6  ;;  %v4659_v6 = vld [vmem:[%s23928_s3 + $0x2630] sm:$0xff]  ;;  %v12912_v9 = vpack.c.bf16 %v4108_v41, %v4101_v24  ;;  %v4716_v4 = vld [vmem:[%s23928_s3 + $0x27f8] sm:$0xff]  ;;  %v4269_v41 = vld [vmem:[%s23928_s3 + $0x1a00] sm:$0xff] }
 0x54e   :  { %v12778_v32 = vpack.c.bf16 %v4666_v8, %v4659_v6  ;;  %v4723_v24 = vld [vmem:[%s23928_s3 + $0x2830] sm:$0xff] }
 0x54f   :  { %12763 = vmatpush1.bf16.msra.mxu1 %v12762_v14  ;;  %v4681_v14 = vld [vmem:[%s23928_s3 + $0x26e0] sm:$0xff]  ;;  %v12792_v6 = vpack.c.bf16 %v4723_v24, %v4716_v4  ;;  %v4715_v8 = vld [vmem:[%s23928_s3 + $0x27f0] sm:$0xff]  ;;  %v4206_v4 = vld [vmem:[%s23928_s3 + $0x1808] sm:$0xff] }
 0x550   :  { %12899 = vmatpush3.bf16.msra.mxu0 %v12898_v29  ;;  %12765 = vmatprep.subr.bf16.mxu1 %v12764_v17  ;;  %v4227_v29 = vld [vmem:[%s23928_s3 + $0x18b0] sm:$0xff]  ;;  %v4234_v17 = vld [vmem:[%s23928_s3 + $0x18e8] sm:$0xff]  ;;  %v12780_v31 = vpack.c.bf16 %v4681_v14, %v4674_v13  ;;  %v4164_v13 = vld [vmem:[%s23928_s3 + $0x16b8] sm:$0xff] }
 0x551   :  { %12901 = vmatprep.subr.bf16.mxu0 %v12900_v39  ;;  %v4673_v39 = vld [vmem:[%s23928_s3 + $0x26a0] sm:$0xff]  ;;  %v12916_v5 = vpack.c.bf16 %v4234_v17, %v4227_v29  ;;  %v4730_v14 = vld [vmem:[%s23928_s3 + $0x2868] sm:$0xff]  ;;  %v4283_v17 = vld [vmem:[%s23928_s3 + $0x1a70] sm:$0xff] }
 0x552   :  { %v12782_v35 = vpack.c.bf16 %v4680_v52, %v4673_v39  ;;  %v4737_v29 = vld [vmem:[%s23928_s3 + $0x28a0] sm:$0xff]  ;;  %v4743_v38 = vld [vmem:[%s23928_s3 + $0x28d0] sm:$0xff]  ;;  %v4772_v24 = vld [vmem:[%s23928_s3 + $0x29b8] sm:$0xff] }
 0x553   :  { %12767 = vmatpush1.bf16.msra.mxu1 %v12766_v33  ;;  %v4695_v33 = vld [vmem:[%s23928_s3 + $0x2750] sm:$0xff]  ;;  %v12796_v39 = vpack.c.bf16 %v4737_v29, %v4730_v14  ;;  %v4729_v52 = vld [vmem:[%s23928_s3 + $0x2860] sm:$0xff]  ;;  %v4220_v14 = vld [vmem:[%s23928_s3 + $0x1878] sm:$0xff] }
 0x554   :  { %12903 = vmatpush3.bf16.msra.mxu0 %v12902_v34  ;;  %12769 = vmatprep.subr.bf16.mxu1 %v12768_v46  ;;  %v4241_v34 = vld [vmem:[%s23928_s3 + $0x1920] sm:$0xff]  ;;  %v4248_v46 = vld [vmem:[%s23928_s3 + $0x1958] sm:$0xff]  ;;  %v12784_v40 = vpack.c.bf16 %v4695_v33, %v4688_v30  ;;  %v4178_v30 = vld [vmem:[%s23928_s3 + $0x1728] sm:$0xff] }
 0x555   :  { %12905 = vmatprep.subr.bf16.mxu0 %v12904_v42  ;;  %v4694_v42 = vld [vmem:[%s23928_s3 + $0x2748] sm:$0xff]  ;;  %v12920_v7 = vpack.c.bf16 %v4248_v46, %v4241_v34  ;;  %v4744_v33 = vld [vmem:[%s23928_s3 + $0x28d8] sm:$0xff]  ;;  %v4751_v34 = vld [vmem:[%s23928_s3 + $0x2910] sm:$0xff] }
 0x556   :  { %v12786_v58 = vpack.c.bf16 %v4694_v42, %v4687_v55  ;;  %v4297_v46 = vld [vmem:[%s23928_s3 + $0x1ae0] sm:$0xff]  ;;  %v12934_v55 = vpack.c.bf16 %v4178_v30, %v4171_v26  ;;  %v12800_v42 = vpack.c.bf16 %v4751_v34, %v4744_v33  ;;  %v4786_v29 = vld [vmem:[%s23928_s3 + $0x2a28] sm:$0xff]  ;;  %v4792_v26 = vld [vmem:[%s23928_s3 + $0x2a58] sm:$0xff] }
 0x557   :  { %12771 = vmatpush1.bf16.msra.mxu1 %v12770_v20  ;;  %v4709_v20 = vld [vmem:[%s23928_s3 + $0x27c0] sm:$0xff]  ;;  %v4339_v30 = vld [vmem:[%s23928_s3 + $0x1c30] sm:$0xff]  ;;  %v4346_v33 = vld [vmem:[%s23928_s3 + $0x1c68] sm:$0xff] }
 0x558   :  { %12907 = vmatpush3.bf16.msra.mxu0 %v12906_v61  ;;  %12773 = vmatprep.subr.bf16.mxu1 %v12772_v27  ;;  %v4255_v61 = vld [vmem:[%s23928_s3 + $0x1990] sm:$0xff]  ;;  %v4262_v27 = vld [vmem:[%s23928_s3 + $0x19c8] sm:$0xff]  ;;  %v12788_v57 = vpack.c.bf16 %v4709_v20, %v4702_v51  ;;  %v4192_v51 = vld [vmem:[%s23928_s3 + $0x1798] sm:$0xff] }
 0x559   :  { %12909 = vmatprep.subr.bf16.mxu0 %v12908_v50  ;;  %v4701_v50 = vld [vmem:[%s23928_s3 + $0x2780] sm:$0xff]  ;;  %v4758_v20 = vld [vmem:[%s23928_s3 + $0x2948] sm:$0xff]  ;;  %v4800_v34 = vld [vmem:[%s23928_s3 + $0x2a98] sm:$0xff] }
 0x55b   :  { %12775 = vmatpush1.bf16.msra.mxu1 %v12774_v43  ;;  %v4276_v43 = vld [vmem:[%s23928_s3 + $0x1a38] sm:$0xff] }
 0x55c   :  { %12911 = vmatpush3.bf16.msra.mxu0 %v12910_v1  ;;  %12777 = vmatprep.subr.bf16.mxu1 %v12776_v2  ;;  %v12790_v1 = vpack.c.bf16 %v4708_v3, %v4701_v50  ;;  %v12928_v59 = vpack.c.bf16 %v4276_v43, %v4269_v41  ;;  %v4757_v3 = vld [vmem:[%s23928_s3 + $0x2940] sm:$0xff]  ;;  %v4779_v41 = vld [vmem:[%s23928_s3 + $0x29f0] sm:$0xff] }
 0x55d   :  { %12913 = vmatprep.subr.bf16.mxu0 %v12912_v9  ;;  %v4157_v9 = vld [vmem:[%s23928_s3 + $0x1680] sm:$0xff] }
 0x55e   :  { %v4325_v43 = vld [vmem:[%s23928_s3 + $0x1bc0] sm:$0xff] }
 0x55f   :  { %12779 = vmatpush1.bf16.msra.mxu1 %v12778_v32  ;;  %v4290_v32 = vld [vmem:[%s23928_s3 + $0x1aa8] sm:$0xff] }
 0x560   :  { %12915 = vmatpush3.bf16.msra.mxu0 %v12914_v16  ;;  %12781 = vmatprep.subr.bf16.mxu1 %v12780_v31  ;;  %v12794_v16 = vpack.c.bf16 %v4722_v23, %v4715_v8  ;;  %v12930_v31 = vpack.c.bf16 %v4164_v13, %v4157_v9  ;;  %v12932_v11 = vpack.c.bf16 %v4290_v32, %v4283_v17  ;;  %v4771_v23 = vld [vmem:[%s23928_s3 + $0x29b0] sm:$0xff]  ;;  %v4778_v9 = vld [vmem:[%s23928_s3 + $0x29e8] sm:$0xff]  ;;  %v4793_v17 = vld [vmem:[%s23928_s3 + $0x2a60] sm:$0xff] }
 0x561   :  { %12917 = vmatprep.subr.bf16.mxu0 %v12916_v5  ;;  %v4736_v5 = vld [vmem:[%s23928_s3 + $0x2898] sm:$0xff]  ;;  %v12808_v8 = vpack.c.bf16 %v4779_v41, %v4772_v24  ;;  %v4451_v32 = vld [vmem:[%s23928_s3 + $0x1fb0] sm:$0xff]  ;;  %v4514_v41 = vld [vmem:[%s23928_s3 + $0x21a8] sm:$0xff] }
 0x562   :  { %v4507_v24 = vld [vmem:[%s23928_s3 + $0x2170] sm:$0xff] }
 0x563   :  { %6546 = vmatmul.mubr.f32.vlgmr.msra.gmra.mrb[18].mxu0 %v18477_v18  ;;  %12783 = vmatpush1.bf16.msra.mxu1 %v12782_v35  ;;  %v12924_v18 = vpack.c.bf16 %v4262_v27, %v4255_v61  ;;  %v4304_v35 = vld [vmem:[%s23928_s3 + $0x1b18] sm:$0xff]  ;;  %v4765_v61 = vld [vmem:[%s23928_s3 + $0x2980] sm:$0xff]  ;;  %v4311_v27 = vld [vmem:[%s23928_s3 + $0x1b50] sm:$0xff] }
 0x564   :  { %12919 = vmatpush3.bf16.msra.mxu0 %v12918_v36  ;;  %6615 = vmatprep.mubr.f32.mxu0 %v18485_v49  ;;  %v4150_v49 = vld [vmem:[%s23928_s3 + $0x1648] sm:$0xff]  ;;  %v12798_v36 = vpack.c.bf16 %v4736_v5, %v4729_v52  ;;  %v12936_v47 = vpack.c.bf16 %v4304_v35, %v4297_v46  ;;  %v12804_v50 = vpack.c.bf16 %v4765_v61, %v4758_v20  ;;  %v4785_v5 = vld [vmem:[%s23928_s3 + $0x2a20] sm:$0xff]  ;;  %v4807_v46 = vld [vmem:[%s23928_s3 + $0x2ad0] sm:$0xff] }
 0x565   :  { %12785 = vmatprep.subr.bf16.mxu1 %v12784_v40  ;;  %12921 = vmatprep.subr.bf16.mxu0 %v12920_v7  ;;  %v12926_v2 = vpack.c.bf16 %v4150_v49, %v4143_v62  ;;  %v4750_v40 = vld [vmem:[%s23928_s3 + $0x2908] sm:$0xff]  ;;  %v4185_v7 = vld [vmem:[%s23928_s3 + $0x1760] sm:$0xff]  ;;  %v4764_v62 = vld [vmem:[%s23928_s3 + $0x2978] sm:$0xff]  ;;  %v12812_v52 = vpack.c.bf16 %v4793_v17, %v4786_v29 }
 0x566   :  { %v4465_v35 = vld [vmem:[%s23928_s3 + $0x2020] sm:$0xff]  ;;  %v4360_v20 = vld [vmem:[%s23928_s3 + $0x1cd8] sm:$0xff]  ;;  %v4479_v61 = vld [vmem:[%s23928_s3 + $0x2090] sm:$0xff] }
 0x567   :  { %12787 = vmatpush1.bf16.msra.mxu1 %v12786_v58  ;;  %v4318_v58 = vld [vmem:[%s23928_s3 + $0x1b88] sm:$0xff]  ;;  %v4535_v29 = vld [vmem:[%s23928_s3 + $0x2250] sm:$0xff] }
 0x568   :  { %12923 = vmatpush3.bf16.msra.mxu0 %v12922_v56  ;;  %12789 = vmatprep.subr.bf16.mxu1 %v12788_v57  ;;  %v12802_v56 = vpack.c.bf16 %v4750_v40, %v4743_v38  ;;  %v12938_v57 = vpack.c.bf16 %v4192_v51, %v4185_v7  ;;  %v12940_v49 = vpack.c.bf16 %v4318_v58, %v4311_v27  ;;  %v4799_v38 = vld [vmem:[%s23928_s3 + $0x2a90] sm:$0xff]  ;;  %v4806_v40 = vld [vmem:[%s23928_s3 + $0x2ac8] sm:$0xff]  ;;  %v4353_v51 = vld [vmem:[%s23928_s3 + $0x1ca0] sm:$0xff] }
 0x569   :  { %12925 = vmatprep.subr.bf16.mxu0 %v12924_v18  ;;  %v4199_v18 = vld [vmem:[%s23928_s3 + $0x17d0] sm:$0xff]  ;;  %v12816_v7 = vpack.c.bf16 %v4807_v46, %v4800_v34  ;;  %v4486_v27 = vld [vmem:[%s23928_s3 + $0x20c8] sm:$0xff]  ;;  %v12818_v58 = vpack.c.bf16 %v4806_v40, %v4799_v38  ;;  %v4689_v38 = vld [vmem:[%s23928_s3 + $0x2720] sm:$0xff] }
 0x56a   :  { %v4542_v17 = vld [vmem:[%s23928_s3 + $0x2288] sm:$0xff]  ;;  %v4675_v34 = vld [vmem:[%s23928_s3 + $0x26b0] sm:$0xff]  ;;  %v4696_v40 = vld [vmem:[%s23928_s3 + $0x2758] sm:$0xff] }
 0x56b   :  { %12791 = vmatpush1.bf16.msra.mxu1 %v12790_v1  ;;  %v4332_v1 = vld [vmem:[%s23928_s3 + $0x1bf8] sm:$0xff]  ;;  %v4682_v46 = vld [vmem:[%s23928_s3 + $0x26e8] sm:$0xff] }
 0x56c   :  { %12927 = vmatpush3.bf16.msra.mxu0 %v12926_v2  ;;  %12793 = vmatprep.subr.bf16.mxu1 %v12792_v6  ;;  %v12806_v2 = vpack.c.bf16 %v4764_v62, %v4757_v3  ;;  %v12942_v6 = vpack.c.bf16 %v4206_v4, %v4199_v18  ;;  %v12944_v13 = vpack.c.bf16 %v4332_v1, %v4325_v43  ;;  %v4374_v3 = vld [vmem:[%s23928_s3 + $0x1d48] sm:$0xff]  ;;  %v4388_v4 = vld [vmem:[%s23928_s3 + $0x1db8] sm:$0xff] }
 0x56d   :  { %12929 = vmatprep.subr.bf16.mxu0 %v12928_v59  ;;  %v4213_v59 = vld [vmem:[%s23928_s3 + $0x1840] sm:$0xff]  ;;  %v12964_v1 = vpack.c.bf16 %v4514_v41, %v4507_v24  ;;  %v4619_v41 = vld [vmem:[%s23928_s3 + $0x24f0] sm:$0xff] }
 0x56f   :  { %12795 = vmatpush1.bf16.msra.mxu1 %v12794_v16  ;;  %v4458_v16 = vld [vmem:[%s23928_s3 + $0x1fe8] sm:$0xff] }
 0x570   :  { %12931 = vmatpush3.bf16.msra.mxu0 %v12930_v31  ;;  %12797 = vmatprep.subr.bf16.mxu1 %v12796_v39  ;;  %v12810_v31 = vpack.c.bf16 %v4778_v9, %v4771_v23  ;;  %v12946_v39 = vpack.c.bf16 %v4220_v14, %v4213_v59  ;;  %v4528_v23 = vld [vmem:[%s23928_s3 + $0x2218] sm:$0xff] }
 0x571   :  { %12933 = vmatprep.subr.bf16.mxu0 %v12932_v11  ;;  %v12948_v11 = vpack.c.bf16 %v4458_v16, %v4451_v32  ;;  %v4416_v14 = vld [vmem:[%s23928_s3 + $0x1e98] sm:$0xff]  ;;  %v12972_v16 = vpack.c.bf16 %v4542_v17, %v4535_v29 }
 0x573   :  { %12799 = vmatpush1.bf16.msra.mxu1 %v12798_v36  ;;  %v4472_v36 = vld [vmem:[%s23928_s3 + $0x2058] sm:$0xff] }
 0x574   :  { %12935 = vmatpush3.bf16.msra.mxu0 %v12934_v55  ;;  %12801 = vmatprep.subr.bf16.mxu1 %v12800_v42  ;;  %v12814_v55 = vpack.c.bf16 %v4792_v26, %v4785_v5  ;;  %v12950_v42 = vpack.c.bf16 %v4346_v33, %v4339_v30  ;;  %v4556_v5 = vld [vmem:[%s23928_s3 + $0x22f8] sm:$0xff]  ;;  %v4437_v30 = vld [vmem:[%s23928_s3 + $0x1f40] sm:$0xff] }
 0x575   :  { %12937 = vmatprep.subr.bf16.mxu0 %v12936_v47  ;;  %v12952_v47 = vpack.c.bf16 %v4472_v36, %v4465_v35  ;;  %v4444_v33 = vld [vmem:[%s23928_s3 + $0x1f78] sm:$0xff]  ;;  %v12980_v36 = vpack.c.bf16 %v4682_v46, %v4675_v34  ;;  %v6962_v34 = vld [vmem:[%s23930_s5 + $0x280] sm:$0xff]  ;;  %v6963_v46 = vld [vmem:[%s23930_s5 + $0x288] sm:$0xff] }
 0x576   :  { %v12978_v35 = vpack.c.bf16 %v4444_v33, %v4437_v30  ;;  %v4668_v30 = vld [vmem:[%s23928_s3 + $0x2678] sm:$0xff] }
 0x577   :  { %12803 = vmatpush1.bf16.msra.mxu1 %v12802_v56  ;;  %v12954_v56 = vpack.c.bf16 %v4360_v20, %v4353_v51  ;;  %v4577_v51 = vld [vmem:[%s23928_s3 + $0x23a0] sm:$0xff]  ;;  %v4584_v20 = vld [vmem:[%s23928_s3 + $0x23d8] sm:$0xff] }
 0x578   :  { %12939 = vmatpush3.bf16.msra.mxu0 %v12938_v57  ;;  %12805 = vmatprep.subr.bf16.mxu1 %v12804_v50  ;;  %v12956_v57 = vpack.c.bf16 %v4486_v27, %v4479_v61  ;;  %v4367_v50 = vld [vmem:[%s23928_s3 + $0x1d10] sm:$0xff]  ;;  %v4710_v27 = vld [vmem:[%s23928_s3 + $0x27c8] sm:$0xff] }
 0x579   :  { %12941 = vmatprep.subr.bf16.mxu0 %v12940_v49  ;;  %v12958_v62 = vpack.c.bf16 %v4374_v3, %v4367_v50  ;;  %v4381_v49 = vld [vmem:[%s23928_s3 + $0x1d80] sm:$0xff]  ;;  %v4703_v61 = vld [vmem:[%s23928_s3 + $0x2790] sm:$0xff]  ;;  %v4598_v50 = vld [vmem:[%s23928_s3 + $0x2448] sm:$0xff] }
 0x57a   :  { %v12962_v43 = vpack.c.bf16 %v4388_v4, %v4381_v49  ;;  %v4717_v3 = vld [vmem:[%s23928_s3 + $0x2800] sm:$0xff]  ;;  %v4738_v49 = vld [vmem:[%s23928_s3 + $0x28a8] sm:$0xff] }
 0x57b   :  { %12807 = vmatpush1.bf16.msra.mxu1 %v12806_v2  ;;  %v4395_v2 = vld [vmem:[%s23928_s3 + $0x1df0] sm:$0xff] }
 0x57c   :  { %12943 = vmatpush3.bf16.msra.mxu0 %v12942_v6  ;;  %12809 = vmatprep.subr.bf16.mxu1 %v12808_v8  ;;  %v4402_v6 = vld [vmem:[%s23928_s3 + $0x1e28] sm:$0xff]  ;;  %v4521_v8 = vld [vmem:[%s23928_s3 + $0x21e0] sm:$0xff] }
 0x57d   :  { %12945 = vmatprep.subr.bf16.mxu0 %v12944_v13  ;;  %v12966_v9 = vpack.c.bf16 %v4402_v6, %v4395_v2  ;;  %v12968_v59 = vpack.c.bf16 %v4528_v23, %v4521_v8  ;;  %v4409_v13 = vld [vmem:[%s23928_s3 + $0x1e60] sm:$0xff]  ;;  %v4752_v2 = vld [vmem:[%s23928_s3 + $0x2918] sm:$0xff] }
 0x57e   :  { %v12970_v32 = vpack.c.bf16 %v4416_v14, %v4409_v13  ;;  %v4633_v23 = vld [vmem:[%s23928_s3 + $0x2560] sm:$0xff]  ;;  %v4766_v13 = vld [vmem:[%s23928_s3 + $0x2988] sm:$0xff]  ;;  %v6839_v14 = vsel %vm6831_vm3, %v20854_v37, 0.0 }
 0x57f   :  { %12811 = vmatpush1.bf16.msra.mxu1 %v12810_v31  ;;  %v4423_v31 = vld [vmem:[%s23928_s3 + $0x1ed0] sm:$0xff] }
 0x580   :  { %12947 = vmatpush3.bf16.msra.mxu0 %v12946_v39  ;;  %12813 = vmatprep.subr.bf16.mxu1 %v12812_v52  ;;  %v4430_v39 = vld [vmem:[%s23928_s3 + $0x1f08] sm:$0xff]  ;;  %v4549_v52 = vld [vmem:[%s23928_s3 + $0x22c0] sm:$0xff] }
 0x581   :  { %12949 = vmatprep.subr.bf16.mxu0 %v12948_v11  ;;  %v12974_v26 = vpack.c.bf16 %v4430_v39, %v4423_v31  ;;  %v12976_v11 = vpack.c.bf16 %v4556_v5, %v4549_v52  ;;  %v6840_v31 = vrot.slane %v6839_v14, 4  ;;  %v4773_v39 = vld [vmem:[%s23928_s3 + $0x29c0] sm:$0xff]  ;;  %v4780_v52 = vld [vmem:[%s23928_s3 + $0x29f8] sm:$0xff] }
 0x582   :  { %6264 = vmatmul.mubr.f32.vlgmr.msra.gmra.mrb[12].mxu1 %v19520_v53 }
 0x583   :  { %6616 = vmatmul.mubr.f32.vlgmr.msra.gmra.mrb[20].mxu0 %v18733_v60  ;;  %12815 = vmatpush1.bf16.msra.mxu1 %v12814_v55  ;;  %v4493_v60 = vld [vmem:[%s23928_s3 + $0x2100] sm:$0xff]  ;;  %v4563_v55 = vld [vmem:[%s23928_s3 + $0x2330] sm:$0xff]  ;;  %v6841_v33 = vadd.f32 %v6840_v31, %v6839_v14  ;;  %v6887_v14 = vld [vmem:[%s23930_s5 + $0x28] sm:$0xff] }
 0x584   :  { %12951 = vmatpush3.bf16.msra.mxu0 %v12950_v42  ;;  %6685 = vmatprep.mubr.f32.mxu0 %v18744_v48  ;;  %v4500_v48 = vld [vmem:[%s23928_s3 + $0x2138] sm:$0xff]  ;;  %v4570_v42 = vld [vmem:[%s23928_s3 + $0x2368] sm:$0xff] }
 0x585   :  { %12817 = vmatprep.subr.bf16.mxu1 %v12816_v7  ;;  %12953 = vmatprep.subr.bf16.mxu0 %v12952_v47  ;;  %v12960_v18 = vpack.c.bf16 %v4500_v48, %v4493_v60  ;;  %v12982_v7 = vpack.c.bf16 %v4570_v42, %v4563_v55  ;;  %v12984_v47 = vpack.c.bf16 %v4696_v40, %v4689_v38  ;;  %v4605_v48 = vld [vmem:[%s23928_s3 + $0x2480] sm:$0xff]  ;;  %v6947_v55 = vld [vmem:[%s23930_s5 + $0x208] sm:$0xff]  ;;  %v6964_v42 = vld [vmem:[%s23930_s5 + $0x290] sm:$0xff] }
 0x586   :  { %6334 = vmatprep.mubr.f32.mxu1 %v23941_v21  ;;  %v6965_v38 = vld [vmem:[%s23930_s5 + $0x298] sm:$0xff] }
 0x587   :  { %12819 = vmatpush1.bf16.msra.mxu1 %v12818_v58  ;;  %v12986_v58 = vpack.c.bf16 %v4584_v20, %v4577_v51  ;;  %v4794_v51 = vld [vmem:[%s23928_s3 + $0x2a68] sm:$0xff]  ;;  %v22088_v20 = vpack.c.bf16 %v6965_v38, %v6964_v42  ;;  %v6889_v31 = vld [vmem:[%s23930_s5 + $0x38] sm:$0xff] }
 0x588   :  { %12955 = vmatpush3.bf16.msra.mxu0 %v12954_v56  ;;  %v12988_v56 = vpack.c.bf16 %v4710_v27, %v4703_v61  ;;  %v6948_v61 = vld [vmem:[%s23930_s5 + $0x210] sm:$0xff]  ;;  %v6949_v27 = vld [vmem:[%s23930_s5 + $0x218] sm:$0xff] }
 0x589   :  { %12957 = vmatprep.subr.bf16.mxu0 %v12956_v57  ;;  %v4591_v57 = vld [vmem:[%s23928_s3 + $0x2410] sm:$0xff]  ;;  %v6909_v38 = vld [vmem:[%s23930_s5 + $0xd8] sm:$0xff] }
 0x58a   :  { %9543 = vmatmul.mubr.msk.f32.vlgmr.msra.gmra.mrb[12].mxu1 %vm4846_vm2, %v18682_v0 }
 0x58c   :  { %12959 = vmatpush3.bf16.msra.mxu0 %v12958_v62  ;;  %v4612_v62 = vld [vmem:[%s23928_s3 + $0x24b8] sm:$0xff] }
 0x58d   :  { %12961 = vmatprep.subr.bf16.mxu0 %v12960_v18  ;;  %v4731_v18 = vld [vmem:[%s23928_s3 + $0x2870] sm:$0xff]  ;;  %v12994_v4 = vpack.c.bf16 %v4612_v62, %v4605_v48 }
 0x58e   :  { %v12996_v24 = vpack.c.bf16 %v4738_v49, %v4731_v18  ;;  %v6882_v18 = vld [vmem:[%s23930_s5] sm:$0xff]  ;;  %v6883_v49 = vld [vmem:[%s23930_s5 + $0x8] sm:$0xff] }
 0x590   :  { %12963 = vmatpush3.bf16.msra.mxu0 %v12962_v43  ;;  %v4626_v43 = vld [vmem:[%s23928_s3 + $0x2528] sm:$0xff] }
 0x591   :  { %12965 = vmatprep.subr.bf16.mxu0 %v12964_v1  ;;  %v4745_v1 = vld [vmem:[%s23928_s3 + $0x28e0] sm:$0xff]  ;;  %v12998_v6 = vpack.c.bf16 %v4626_v43, %v4619_v41  ;;  %v22133_v41 = vpack.c.bf16 %v6883_v49, %v6882_v18  ;;  %v6911_v49 = vld [vmem:[%s23930_s5 + $0xe8] sm:$0xff] }
 0x592   :  { %v13000_v8 = vpack.c.bf16 %v4752_v2, %v4745_v1  ;;  %v6884_v1 = vld [vmem:[%s23930_s5 + $0x10] sm:$0xff]  ;;  %v6885_v2 = vld [vmem:[%s23930_s5 + $0x18] sm:$0xff]  ;;  %v6910_v18 = vld [vmem:[%s23930_s5 + $0xe0] sm:$0xff] }
 0x594   :  { %12967 = vmatpush3.bf16.msra.mxu0 %v12966_v9  ;;  %v4640_v9 = vld [vmem:[%s23928_s3 + $0x2598] sm:$0xff] }
 0x595   :  { %12969 = vmatprep.subr.bf16.mxu0 %v12968_v59  ;;  %v4759_v59 = vld [vmem:[%s23928_s3 + $0x2950] sm:$0xff]  ;;  %v13002_v29 = vpack.c.bf16 %v4640_v9, %v4633_v23  ;;  %v6903_v23 = vld [vmem:[%s23930_s5 + $0xa8] sm:$0xff]  ;;  %v22153_v9 = vpack.c.bf16 %v6885_v2, %v6884_v1 }
 0x596   :  { %v13004_v17 = vpack.c.bf16 %v4766_v13, %v4759_v59  ;;  %v6886_v13 = vld [vmem:[%s23930_s5 + $0x20] sm:$0xff]  ;;  %v6952_v1 = vld [vmem:[%s23930_s5 + $0x230] sm:$0xff] }
 0x598   :  { %12971 = vmatpush3.bf16.msra.mxu0 %v12970_v32  ;;  %v4647_v32 = vld [vmem:[%s23928_s3 + $0x25d0] sm:$0xff] }
 0x599   :  { %12973 = vmatprep.subr.bf16.mxu0 %v12972_v16  ;;  %v4654_v16 = vld [vmem:[%s23928_s3 + $0x2608] sm:$0xff] }
 0x59a   :  { %v13006_v5 = vpack.c.bf16 %v4654_v16, %v4647_v32  ;;  %v6888_v16 = vld [vmem:[%s23930_s5 + $0x30] sm:$0xff] }
 0x59c   :  { %12975 = vmatpush3.bf16.msra.mxu0 %v12974_v26  ;;  %v13008_v26 = vpack.c.bf16 %v4780_v52, %v4773_v39  ;;  %v6832_v39 = vsel %vm6831_vm3, %v20842_v25, 0.0  ;;  %v6906_v52 = vld [vmem:[%s23930_s5 + $0xc0] sm:$0xff] }
 0x59d   :  { %12977 = vmatprep.subr.bf16.mxu0 %v12976_v11  ;;  %v4661_v11 = vld [vmem:[%s23928_s3 + $0x2640] sm:$0xff] }
 0x59e   :  { %v13010_v40 = vpack.c.bf16 %v4668_v30, %v4661_v11  ;;  %v22198_v30 = vpack.c.bf16 %v6889_v31, %v6888_v16  ;;  %v6894_v16 = vld [vmem:[%s23930_s5 + $0x60] sm:$0xff]  ;;  %v6895_v31 = vld [vmem:[%s23930_s5 + $0x68] sm:$0xff] }
 0x5a0   :  { %12979 = vmatpush3.bf16.msra.mxu0 %v12978_v35  ;;  %v6946_v35 = vld [vmem:[%s23930_s5 + $0x200] sm:$0xff] }
 0x5a1   :  { %12981 = vmatprep.subr.bf16.mxu0 %v12980_v36  ;;  %v22069_v36 = vpack.c.bf16 %v6963_v46, %v6962_v34  ;;  %v6890_v46 = vld [vmem:[%s23930_s5 + $0x40] sm:$0xff] }
 0x5a3   :  { %6686 = vmatmul.mubr.f32.vlgmr.msra.gmra.mrb[22].mxu0 %v19126_v12  ;;  %v4724_v12 = vld [vmem:[%s23928_s3 + $0x2838] sm:$0xff]  ;;  %13197 = vmatprep.subr.bf16.mxu1 %v22069_v36 }
 0x5a4   :  { %12983 = vmatpush3.bf16.msra.mxu0 %v12982_v7  ;;  %6755 = vmatprep.mubr.f32.mxu0 %v19138_v15  ;;  %v12990_v15 = vpack.c.bf16 %v4598_v50, %v4591_v57  ;;  %v12992_v60 = vpack.c.bf16 %v4724_v12, %v4717_v3  ;;  %v4787_v7 = vld [vmem:[%s23928_s3 + $0x2a30] sm:$0xff]  ;;  %v22099_v57 = vpack.c.bf16 %v6949_v27, %v6948_v61  ;;  %v4801_v50 = vld [vmem:[%s23928_s3 + $0x2aa0] sm:$0xff]  ;;  %v4808_v3 = vld [vmem:[%s23928_s3 + $0x2ad8] sm:$0xff] }
 0x5a5   :  { %12985 = vmatprep.subr.bf16.mxu0 %v12984_v47  ;;  %v22083_v47 = vpack.c.bf16 %v6947_v55, %v6946_v35  ;;  %v6898_v12 = vld [vmem:[%s23930_s5 + $0x80] sm:$0xff]  ;;  %v13016_v48 = vpack.c.bf16 %v4808_v3, %v4801_v50  ;;  %v6891_v35 = vld [vmem:[%s23930_s5 + $0x48] sm:$0xff]  ;;  %v6908_v55 = vld [vmem:[%s23930_s5 + $0xd0] sm:$0xff] }
 0x5a6   :  { %v6950_v27 = vld [vmem:[%s23930_s5 + $0x220] sm:$0xff]  ;;  %v22234_v50 = vpack.c.bf16 %v6891_v35, %v6890_v46  ;;  %v6892_v3 = vld [vmem:[%s23930_s5 + $0x50] sm:$0xff] }
 0x5a7   :  { %13199 = vmatpush3.bf16.msra.mxu1 %v22083_v47  ;;  %v6954_v35 = vld [vmem:[%s23930_s5 + $0x240] sm:$0xff] }
 0x5a8   :  { %12987 = vmatpush3.bf16.msra.mxu0 %v12986_v58  ;;  %v6842_v58 = vrot.slane %v6841_v33, 2  ;;  %13201 = vmatprep.subr.bf16.mxu1 %v22088_v20 }
 0x5a9   :  { %12989 = vmatprep.subr.bf16.mxu0 %v12988_v56  ;;  %v13013_v56 = vpack.c.bf16 %v4794_v51, %v4787_v7  ;;  %v6967_v7 = vld [vmem:[%s23930_s5 + $0x2a8] sm:$0xff] }
 0x5ab   :  { %13203 = vmatpush3.bf16.msra.mxu1 %v22099_v57 }
 0x5ac   :  { %12991 = vmatpush3.bf16.msra.mxu0 %v12990_v15  ;;  %v6899_v15 = vld [vmem:[%s23930_s5 + $0x88] sm:$0xff] }
 0x5ad   :  { %12993 = vmatprep.subr.bf16.mxu0 %v12992_v60  ;;  %v6843_v60 = vadd.f32 %v6842_v58, %v6841_v33  ;;  %v22119_v62 = vpack.c.bf16 %v6899_v15, %v6898_v12  ;;  %v6833_v33 = vrot.slane %v6832_v39, 4  ;;  %v6951_v58 = vld [vmem:[%s23930_s5 + $0x228] sm:$0xff] }
 0x5ae   :  { %v22239_v12 = vpack.c.bf16 %v6951_v58, %v6950_v27  ;;  %v6896_v27 = vld [vmem:[%s23930_s5 + $0x70] sm:$0xff]  ;;  %v6897_v58 = vld [vmem:[%s23930_s5 + $0x78] sm:$0xff] }
 0x5af   :  { %v6834_v15 = vadd.f32 %v6833_v33, %v6832_v39  ;;  %v6912_v39 = vld [vmem:[%s23930_s5 + $0xf0] sm:$0xff] }
 0x5b0   :  { %12995 = vmatpush3.bf16.msra.mxu0 %v12994_v4  ;;  %v6844_v4 = vrot.slane %v6843_v60, 1 }
 0x5b1   :  { %12997 = vmatprep.subr.bf16.mxu0 %v12996_v24  ;;  %v6901_v24 = vld [vmem:[%s23930_s5 + $0x98] sm:$0xff] }
 0x5b4   :  { %12999 = vmatpush3.bf16.msra.mxu0 %v12998_v6  ;;  %v6845_v6 = vadd.f32 %v6844_v4, %v6843_v60  ;;  %v22242_v60 = vpack.c.bf16 %v6909_v38, %v6908_v55  ;;  %v6955_v55 = vld [vmem:[%s23930_s5 + $0x248] sm:$0xff]  ;;  %v22308_v38 = vpack.c.bf16 %v6895_v31, %v6894_v16  ;;  %v6932_v31 = vld [vmem:[%s23930_s5 + $0x190] sm:$0xff] }
 0x5b5   :  { %13001 = vmatprep.subr.bf16.mxu0 %v13000_v8  ;;  %v6902_v8 = vld [vmem:[%s23930_s5 + $0xa0] sm:$0xff]  ;;  %v6915_v16 = vld [vmem:[%s23930_s5 + $0x108] sm:$0xff] }
 0x5b6   :  { %v22156_v59 = vpack.c.bf16 %v6903_v23, %v6902_v8  ;;  %v6953_v8 = vld [vmem:[%s23930_s5 + $0x238] sm:$0xff] }
 0x5b8   :  { %13003 = vmatpush3.bf16.msra.mxu0 %v13002_v29  ;;  %v6905_v29 = vld [vmem:[%s23930_s5 + $0xb8] sm:$0xff] }
 0x5b9   :  { %13005 = vmatprep.subr.bf16.mxu0 %v13004_v17  ;;  %v22171_v17 = vpack.c.bf16 %v6887_v14, %v6886_v13  ;;  %v22274_v13 = vpack.c.bf16 %v6953_v8, %v6952_v1  ;;  %v6835_v14 = vrot.slane %v6834_v15, 2  ;;  %v22344_v1 = vpack.c.bf16 %v6897_v58, %v6896_v27  ;;  %v6916_v58 = vld [vmem:[%s23930_s5 + $0x110] sm:$0xff] }
 0x5bc   :  { %13007 = vmatpush3.bf16.msra.mxu0 %v13006_v5  ;;  %v6907_v5 = vld [vmem:[%s23930_s5 + $0xc8] sm:$0xff] }
 0x5bd   :  { %13009 = vmatprep.subr.bf16.mxu0 %v13008_v26  ;;  %v22194_v26 = vld [vmem:[%s23929_s4] sm:$0x7f]  ;;  %v22201_v34 = vpack.c.bf16 %v6907_v5, %v6906_v52  ;;  %v6913_v52 = vld [vmem:[%s23930_s5 + $0xf8] sm:$0xff] }
 0x5be   :  { %v4826_v11 = vrot.slane %v22194_v26, %v17968_v63  ;;  %v6970_v5 = vld [vmem:[%s23930_s5 + $0x2c0] sm:$0xff]  ;;  %v6924_v63 = vld [vmem:[%s23930_s5 + $0x150] sm:$0xff] }
 0x5c0   :  { %13011 = vmatpush3.bf16.msra.mxu0 %v13010_v40  ;;  %v6966_v40 = vld [vmem:[%s23930_s5 + $0x2a0] sm:$0xff] }
 0x5c1   :  { %13012 = vmatprep.subr.bf16.mxu0 %v23943_v45  ;;  %v22223_v61 = vpack.c.bf16 %v6967_v7, %v6966_v40  ;;  %v22310_v40 = vpack.c.bf16 %v6955_v55, %v6954_v35  ;;  %v6836_v7 = vadd.f32 %v6835_v14, %v6834_v15  ;;  %v6931_v15 = vld [vmem:[%s23930_s5 + $0x188] sm:$0xff]  ;;  %v6958_v35 = vld [vmem:[%s23930_s5 + $0x260] sm:$0xff] }
 0x5c2   :  { %v6959_v55 = vld [vmem:[%s23930_s5 + $0x268] sm:$0xff] }
 0x5c3   :  { %6756 = vmatmul.mubr.f32.vlgmr.msra.gmra.mrb[24].mxu0 %v19520_v53  ;;  %v6900_v53 = vld [vmem:[%s23930_s5 + $0x90] sm:$0xff]  ;;  %13205 = vmatprep.subr.bf16.mxu1 %v22223_v61  ;;  %v6837_v8 = vrot.slane %v6836_v7, 1 }
 0x5c4   :  { %13014 = vmatpush3.bf16.msra.mxu0 %v13013_v56  ;;  %10285 = vmatprep.mubr.msk.f32.mxu0 %vm13739_vm1, %v23941_v21  ;;  %v22136_v43 = vpack.c.bf16 %v6901_v24, %v6900_v53  ;;  %v6968_v53 = vld [vmem:[%s23930_s5 + $0x2b0] sm:$0xff]  ;;  %v6969_v24 = vld [vmem:[%s23930_s5 + $0x2b8] sm:$0xff] }
 0x5c5   :  { %13015 = vmatprep.subr.bf16.mxu0 %v23943_v45  ;;  %13207 = vmatpush3.bf16.msra.mxu1 %v22239_v12  ;;  %v6940_v21 = vld [vmem:[%s23930_s5 + $0x1d0] sm:$0xff] }
 0x5c8   :  { %13017 = vmatpush3.bf16.msra.mxu0 %v13016_v48  ;;  %v6893_v48 = vld [vmem:[%s23930_s5 + $0x58] sm:$0xff] }
 0x5c9   :  { %13019 = vmatprep.subr.bf16.mxu0 %v22119_v62  ;;  %v22272_v23 = vpack.c.bf16 %v6893_v48, %v6892_v3  ;;  %v6930_v3 = vld [vmem:[%s23930_s5 + $0x180] sm:$0xff] }
 0x5ca   :  { %v22349_v14 = vpack.c.bf16 %v6931_v15, %v6930_v3  ;;  %v6917_v3 = vld [vmem:[%s23930_s5 + $0x118] sm:$0xff]  ;;  %v22388_v15 = vpack.c.bf16 %v6959_v55, %v6958_v35  ;;  %v6918_v35 = vld [vmem:[%s23930_s5 + $0x120] sm:$0xff]  ;;  %v6919_v55 = vld [vmem:[%s23930_s5 + $0x128] sm:$0xff] }
 0x5cb   :  { %10286 = vmatmul.mubr.msk.f32.vlgmr.msra.gmra.mrb[26].mxu0 %vm4846_vm2, %v18682_v0  ;;  %v6904_v0 = vld [vmem:[%s23930_s5 + $0xb0] sm:$0xff] }
 0x5cc   :  { %13021 = vmatpush3.bf16.msra.mxu0 %v22133_v41  ;;  %7047 = vmatprep.mubr.f32.mxu0 %v6845_v6  ;;  %v22174_v32 = vpack.c.bf16 %v6905_v29, %v6904_v0  ;;  %v22266_v6 = vpack.c.bf16 %v6969_v24, %v6968_v53  ;;  %v22277_v29 = vpack.c.bf16 %v6911_v49, %v6910_v18  ;;  %v6972_v18 = vld [vmem:[%s23930_s5 + $0x2d0] sm:$0xff]  ;;  %v6973_v49 = vld [vmem:[%s23930_s5 + $0x2d8] sm:$0xff] }
 0x5cd   :  { %13023 = vmatprep.subr.bf16.mxu0 %v22136_v43  ;;  %v6956_v53 = vld [vmem:[%s23930_s5 + $0x250] sm:$0xff]  ;;  %v6957_v24 = vld [vmem:[%s23930_s5 + $0x258] sm:$0xff] }
 0x5ce   :  { %13209 = vmatprep.subr.bf16.mxu1 %v22266_v6 }
 0x5cf   :  { %13211 = vmatpush3.bf16.msra.mxu1 %v22274_v13 }
 0x5d0   :  { %13025 = vmatpush3.bf16.msra.mxu0 %v22153_v9 }
 0x5d1   :  { %13027 = vmatprep.subr.bf16.mxu0 %v22156_v59 }
 0x5d4   :  { %13029 = vmatpush3.bf16.msra.mxu0 %v22171_v17 }
 0x5d5   :  { %13031 = vmatprep.subr.bf16.mxu0 %v22174_v32 }
 0x5d6   :  { %v22212_v42 = vpop.f32.mrb[12].mxu0 }
 0x5d7   :  { %v5841_v51 = vpop.f32.mrb[13].mxu0 }
 0x5d8   :  { %v22231_v56 = vadd.f32 %v5841_v51, %v4826_v11  ;;  %13033 = vmatpush3.bf16.msra.mxu0 %v22198_v30  ;;  %v6971_v11 = vld [vmem:[%s23930_s5 + $0x2c8] sm:$0xff]  ;;  %v22313_v51 = vpack.c.bf16 %v6913_v52, %v6912_v39  ;;  %v6933_v52 = vld [vmem:[%s23930_s5 + $0x198] sm:$0xff] }
 0x5d9   :  { %13035 = vmatprep.subr.bf16.mxu0 %v22201_v34  ;;  %v22299_v46 = vpack.c.bf16 %v6971_v11, %v6970_v5  ;;  %v6974_v5 = vld [vmem:[%s23930_s5 + $0x2e0] sm:$0xff]  ;;  %v6975_v11 = vld [vmem:[%s23930_s5 + $0x2e8] sm:$0xff] }
 0x5da   :  { %v6853_v4 = vsel %vm6831_vm3, %v22231_v56, 0.0 }
 0x5db   :  { %v6854_v2 = vrot.slane %v6853_v4, 4  ;;  %13213 = vmatprep.subr.bf16.mxu1 %v22299_v46 }
 0x5dc   :  { %13037 = vmatpush3.bf16.msra.mxu0 %v22234_v50  ;;  %13215 = vmatpush3.bf16.msra.mxu1 %v22310_v40 }
 0x5dd   :  { %v6855_v0 = vadd.f32 %v6854_v2, %v6853_v4  ;;  %13039 = vmatprep.subr.bf16.mxu0 %v22242_v60  ;;  %v22335_v4 = vpack.c.bf16 %v6973_v49, %v6972_v18  ;;  %v22346_v2 = vpack.c.bf16 %v6957_v24, %v6956_v53  ;;  %v6838_v18 = vadd.f32 %v6837_v8, %v6836_v7  ;;  %v6976_v53 = vld [vmem:[%s23930_s5 + $0x2f0] sm:$0xff]  ;;  %v6977_v24 = vld [vmem:[%s23930_s5 + $0x2f8] sm:$0xff] }
 0x5de   :  { %v22391_v49 = vpack.c.bf16 %v6933_v52, %v6932_v31  ;;  %v4822_v7 = vrot.slane %v22194_v26, %v18187_v22  ;;  %v6935_v31 = vld [vmem:[%s23930_s5 + $0x1a8] sm:$0xff]  ;;  %v6961_v52 = vld [vmem:[%s23930_s5 + $0x278] sm:$0xff] }
 0x5df   :  { %v6856_v33 = vrot.slane %v6855_v0, 2  ;;  %13217 = vmatprep.subr.bf16.mxu1 %v22335_v4 }
 0x5e0   :  { %13041 = vmatpush3.bf16.msra.mxu0 %v22272_v23  ;;  %13219 = vmatpush3.bf16.msra.mxu1 %v22346_v2 }
 0x5e1   :  { %13043 = vmatprep.subr.bf16.mxu0 %v22277_v29  ;;  %v6857_v48 = vadd.f32 %v6856_v33, %v6855_v0  ;;  %v6914_v0 = vld [vmem:[%s23930_s5 + $0x100] sm:$0xff]  ;;  %v22371_v33 = vpack.c.bf16 %v6975_v11, %v6974_v5  ;;  %v22415_v5 = vpack.c.bf16 %v6977_v24, %v6976_v53  ;;  %v22443_v53 = vpack.c.bf16 %v6919_v55, %v6918_v35 }
 0x5e2   :  { %v22380_v27 = vpack.c.bf16 %v6915_v16, %v6914_v0  ;;  %v6960_v0 = vld [vmem:[%s23930_s5 + $0x270] sm:$0xff]  ;;  %v6934_v16 = vld [vmem:[%s23930_s5 + $0x1a0] sm:$0xff] }
 0x5e3   :  { %v6858_v39 = vrot.slane %v6857_v48, 1  ;;  %13221 = vmatprep.subr.bf16.mxu1 %v22371_v33  ;;  %v22423_v11 = vpack.c.bf16 %v6935_v31, %v6934_v16  ;;  %v6939_v16 = vld [vmem:[%s23930_s5 + $0x1c8] sm:$0xff]  ;;  %v6922_v55 = vld [vmem:[%s23930_s5 + $0x140] sm:$0xff] }
 0x5e4   :  { %13045 = vmatpush3.bf16.msra.mxu0 %v22308_v38  ;;  %13223 = vmatpush3.bf16.msra.mxu1 %v22388_v15 }
 0x5e5   :  { %13047 = vmatprep.subr.bf16.mxu0 %v22313_v51  ;;  %v6859_v8 = vadd.f32 %v6858_v39, %v6857_v48  ;;  %v22418_v48 = vpack.c.bf16 %v6917_v3, %v6916_v58  ;;  %v22420_v39 = vpack.c.bf16 %v6961_v52, %v6960_v0  ;;  %13225 = vmatprep.subr.bf16.mxu1 %v22415_v5  ;;  %v6936_v58 = vld [vmem:[%s23930_s5 + $0x1b0] sm:$0xff]  ;;  %v6937_v3 = vld [vmem:[%s23930_s5 + $0x1b8] sm:$0xff] }
 0x5e6   :  { %v22446_v24 = vpack.c.bf16 %v6937_v3, %v6936_v58  ;;  %v6921_v0 = vld [vmem:[%s23930_s5 + $0x138] sm:$0xff]  ;;  %v6923_v58 = vld [vmem:[%s23930_s5 + $0x148] sm:$0xff] }
 0x5e8   :  { %13049 = vmatpush3.bf16.msra.mxu0 %v22344_v1  ;;  %13227 = vmatpush3.bf16.msra.mxu1 %v22420_v39 }
 0x5e9   :  { %13051 = vmatprep.subr.bf16.mxu0 %v22349_v14 }
 0x5eb   :  { %7048 = vmatmul.mubr.f32.vlgmr.msra.gmra.mrb[28].mxu0 %v6838_v18  ;;  %v22433_v18 = vadd.f32 %v22212_v42, %v4822_v7  ;;  %v6920_v42 = vld [vmem:[%s23930_s5 + $0x130] sm:$0xff] }
 0x5ec   :  { %13053 = vmatpush3.bf16.msra.mxu0 %v22380_v27  ;;  %7117 = vmatprep.mubr.f32.mxu0 %v6859_v8  ;;  %v6938_v8 = vld [vmem:[%s23930_s5 + $0x1c0] sm:$0xff]  ;;  %v22463_v31 = vpack.c.bf16 %v6921_v0, %v6920_v42  ;;  %v6941_v42 = vld [vmem:[%s23930_s5 + $0x1d8] sm:$0xff] }
 0x5ed   :  { %13055 = vmatprep.subr.bf16.mxu0 %v22391_v49  ;;  %v6846_v7 = vsel %vm6831_vm3, %v22433_v18, 0.0  ;;  %v22466_v35 = vpack.c.bf16 %v6939_v16, %v6938_v8  ;;  %v22481_v16 = vpack.c.bf16 %v6923_v58, %v6922_v55  ;;  %v22484_v22 = vpack.c.bf16 %v6941_v42, %v6940_v21  ;;  %v6926_v58 = vld [vmem:[%s23930_s5 + $0x160] sm:$0xff]  ;;  %v6927_v42 = vld [vmem:[%s23930_s5 + $0x168] sm:$0xff] }
 0x5ee   :  { %v6847_v52 = vrot.slane %v6846_v7, 4  ;;  %v22499_v21 = vpack.c.bf16 %v6925_v19, %v6924_v63  ;;  %v6945_v19 = vld [vmem:[%s23930_s5 + $0x1f8] sm:$0xff]  ;;  %v22517_v63 = vpack.c.bf16 %v6927_v42, %v6926_v58 }
 0x5ef   :  { %23958 = vst [vmem:[#allocation8_spill] sm:$0xff] %v22466_v35  ;;  %23959 = vst [vmem:[#allocation9_spill] sm:$0xff] %v22481_v16 }
 0x5f0   :  { %13057 = vmatpush3.bf16.msra.mxu0 %v22418_v48  ;;  %v6848_v45 = vadd.f32 %v6847_v52, %v6846_v7  ;;  %23960 = vst [vmem:[#allocation10_spill] sm:$0xff] %v22484_v22  ;;  %v6943_v7 = vld [vmem:[%s23930_s5 + $0x1e8] sm:$0xff]  ;;  %23961 = vst [vmem:[#allocation11_spill] sm:$0xff] %v22499_v21 }
 0x5f1   :  { %13059 = vmatprep.subr.bf16.mxu0 %v22423_v11 }
 0x5f2   :  { %v6849_v52 = vrot.slane %v6848_v45, 2 }
 0x5f4   :  { %13061 = vmatpush3.bf16.msra.mxu0 %v22443_v53 }
 0x5f5   :  { %13063 = vmatprep.subr.bf16.mxu0 %v22446_v24 }
 0x5f6   :  { %v9700_v3 = vpop.f32.mrb[14].mxu0 }
 0x5f7   :  { %v9701_v0 = vpop.f32.mrb[15].mxu0 }
 0x5f8   :  { %v9702_v8 = vadd.f32 %v9701_v0, %v9700_v3  ;;  %13065 = vmatpush3.bf16.msra.mxu0 %v22463_v31  ;;  %v6942_v3 = vld [vmem:[%s23930_s5 + $0x1e0] sm:$0xff]  ;;  %v6944_v0 = vld [vmem:[%s23930_s5 + $0x1f0] sm:$0xff] }
 0x5f9   :  { %13067 = vmatprep.subr.bf16.mxu0 %v22466_v35  ;;  %v22502_v55 = vpack.c.bf16 %v6943_v7, %v6942_v3  ;;  %v6850_v3 = vadd.f32 %v6849_v52, %v6848_v45  ;;  %v22520_v7 = vpack.c.bf16 %v6945_v19, %v6944_v0 }
 0x5fc   :  { %13069 = vmatpush3.bf16.msra.mxu0 %v22481_v16  ;;  %v6929_v16 = vld [vmem:[%s23930_s5 + $0x178] sm:$0xff] }
 0x5fd   :  { %13071 = vmatprep.subr.bf16.mxu0 %v22484_v22  ;;  %v6928_v22 = vld [vmem:[%s23930_s5 + $0x170] sm:$0xff] }
 0x5fe   :  { %v22529_v35 = vpack.c.bf16 %v6929_v16, %v6928_v22  ;;  %v4838_v22 = vrot.slane %v22194_v26, %v18649_v44 }
 0x600   :  { %13073 = vmatpush3.bf16.msra.mxu0 %v22499_v21  ;;  %v6851_v21 = vrot.slane %v6850_v3, 1  ;;  %v6408_v52 = vadd.f32 %v9702_v8, %v4838_v22 }
 0x601   :  { %13075 = vmatprep.subr.bf16.mxu0 %v22502_v55 }
 0x602   :  { %v6852_v45 = vadd.f32 %v6851_v21, %v6850_v3 }
 0x604   :  { %13077 = vmatpush3.bf16.msra.mxu0 %v22517_v63 }
 0x605   :  { %13079 = vmatprep.subr.bf16.mxu0 %v22520_v7 }
 0x608   :  { %13081 = vmatpush3.bf16.msra.mxu0 %v22529_v35 }
 0x609   :  { %13083 = vmatprep.subr.bf16.mxu0 %v22069_v36 }
 0x60b   :  { %7118 = vmatmul.mubr.f32.vlgmr.msra.gmra.mrb[30].mxu0 %v6852_v45 }
 0x60c   :  { %13085 = vmatpush3.bf16.msra.mxu0 %v22083_v47 }
 0x60d   :  { %13087 = vmatprep.subr.bf16.mxu0 %v22088_v20  ;;  %v23962_v20 = vmov 0.0|0.0  }
 0x610   :  { %13089 = vmatpush3.bf16.msra.mxu0 %v22099_v57 }
 0x611   :  { %13091 = vmatprep.subr.bf16.mxu0 %v22223_v61 }
 0x614   :  { %13093 = vmatpush3.bf16.msra.mxu0 %v22239_v12 }
 0x615   :  { %13095 = vmatprep.subr.bf16.mxu0 %v22266_v6 }
 0x616   :  { %v9735_v16 = vpop.f32.mrb[16].mxu0 }
 0x617   :  { %v9736_v21 = vpop.f32.mrb[17].mxu0 }
 0x618   :  { %v9737_v36 = vadd.f32 %v9736_v21, %v9735_v16  ;;  %13097 = vmatpush3.bf16.msra.mxu0 %v22274_v13 }
 0x619   :  { %13099 = vmatprep.subr.bf16.mxu0 %v22299_v46 }
 0x61a   :  { %v6478_v47 = vadd.f32 %v9737_v36, %v6408_v52  ;;  %v6978_v36 = vld [vmem:[%s23930_s5 + $0x300] sm:$0xff] }
 0x61c   :  { %13101 = vmatpush3.bf16.msra.mxu0 %v22310_v40 }
 0x61d   :  { %13103 = vmatprep.subr.bf16.mxu0 %v22335_v4 }
 0x620   :  { %13105 = vmatpush3.bf16.msra.mxu0 %v22346_v2  ;;  %v4830_v2 = vrot.slane %v22194_v26, %v18428_v54 }
 0x621   :  { %13107 = vmatprep.subr.bf16.mxu0 %v22371_v33  ;;  %v4834_v33 = vrot.slane %v22194_v26, %v18199_v28 }
 0x624   :  { %13109 = vmatpush3.bf16.msra.mxu0 %v22388_v15 }
 0x625   :  { %13111 = vmatprep.subr.bf16.mxu0 %v22415_v5 }
 0x628   :  { %13113 = vmatpush3.bf16.msra.mxu0 %v22420_v39 }
 0x629   :  { %13114 = vmatprep.subr.bf16.mxu0 %v23962_v20 }
 0x636   :  { %v9770_v57 = vpop.f32.mrb[18].mxu0 }
 0x637   :  { %v9771_v61 = vpop.f32.mrb[19].mxu0 }
 0x638   :  { %v9772_v12 = vadd.f32 %v9771_v61, %v9770_v57 }
 0x63a   :  { %v6548_v6 = vadd.f32 %v9772_v12, %v6478_v47  ;;  %v6979_v47 = vld [vmem:[%s23930_s5 + $0x308] sm:$0xff] }
 0x63b   :  { %v22570_v12 = vpack.c.bf16 %v6979_v47, %v6978_v36 }
 0x656   :  { %v9805_v13 = vpop.f32.mrb[20].mxu0 }
 0x657   :  { %v9806_v46 = vpop.f32.mrb[21].mxu0 }
 0x658   :  { %v9807_v40 = vadd.f32 %v9806_v46, %v9805_v13  ;;  %v23963_v13 = vmov 0.0  }
 0x65a   :  { %v6618_v4 = vadd.f32 %v9807_v40, %v6548_v6 }
 0x65d   :  { %v6336_v15 = vpop.f32.mrb[12].mxu1 }
 0x65e   :  { %v22556_v5 = vadd.f32 %v6336_v15, %v4830_v2  ;;  %v6338_v39 = vpop.f32.mrb[13].mxu1 }
 0x65f   :  { %v22558_v8 = vadd.f32 %v6338_v39, %v4834_v33 }
 0x660   :  { %v6860_v58 = vsel %vm6831_vm3, %v22556_v5, 0.0 }
 0x661   :  { %v6861_v42 = vrot.slane %v6860_v58, 4  ;;  %v6867_v0 = vsel %vm6831_vm3, %v22558_v8, 0.0 }
 0x662   :  { %v6868_v19 = vrot.slane %v6867_v0, 4 }
 0x663   :  { %v6862_v3 = vadd.f32 %v6861_v42, %v6860_v58 }
 0x664   :  { %v6869_v45 = vadd.f32 %v6868_v19, %v6867_v0 }
 0x665   :  { %v6863_v22 = vrot.slane %v6862_v3, 2 }
 0x666   :  { %v6870_v16 = vrot.slane %v6869_v45, 2 }
 0x667   :  { %v6864_v21 = vadd.f32 %v6863_v22, %v6862_v3 }
 0x668   :  { %v6871_v26 = vadd.f32 %v6870_v16, %v6869_v45 }
 0x669   :  { %v6865_v52 = vrot.slane %v6864_v21, 1 }
 0x66a   :  { %v6872_v57 = vrot.slane %v6871_v26, 1 }
 0x66b   :  { %v6866_v6 = vadd.f32 %v6865_v52, %v6864_v21 }
 0x66c   :  { %v6873_v61 = vadd.f32 %v6872_v57, %v6871_v26 }
 0x66e   :  { %7187 = vmatprep.mubr.f32.mxu0 %v6873_v61 }
 0x66f   :  { %7188 = vmatmul.mubr.f32.vlgmr.msra.gmra.mrb[32].mxu0 %v6866_v6 }
 0x670   :  { %13116 = vmatpush3.bf16.msra.mxu0 %v22570_v12  ;;  %10292 = vmatprep.mubr.msk.f32.mxu0 %vm13739_vm1, %v23963_v13 }
 0x676   :  { %v9840_v46 = vpop.f32.mrb[22].mxu0 }
 0x677   :  { %v9841_v40 = vpop.f32.mrb[23].mxu0 }
 0x678   :  { %v9842_v2 = vadd.f32 %v9841_v40, %v9840_v46 }
 0x67a   :  { %v6688_v33 = vadd.f32 %v9842_v2, %v6618_v4  ;;  %v7265_v2 = vld [vmem:[%s23931_s6 + $0x8] sm:$0xff] }
 0x696   :  { %v9875_v15 = vpop.f32.mrb[24].mxu0 }
 0x697   :  { %v9876_v39 = vpop.f32.mrb[25].mxu0 }
 0x698   :  { %v9877_v58 = vadd.f32 %v9876_v39, %v9875_v15  ;;  %v7264_v39 = vld [vmem:[%s23931_s6] sm:$0xff] }
 0x69a   :  { %v6758_v42 = vadd.f32 %v9877_v58, %v6688_v33  ;;  %v7272_v33 = vld [vmem:[%s23931_s6 + $0x40] sm:$0xff]  ;;  %v7271_v58 = vld [vmem:[%s23931_s6 + $0x38] sm:$0xff] }
 0x69b   :  { %v22587_v15 = vpack.c.bf16 %v7272_v33, %v7265_v2  ;;  %v7268_v33 = vld [vmem:[%s23931_s6 + $0x20] sm:$0xff] }
 0x69d   :  { %13118 = vmatprep.subr.bf16.mxu0 %v22587_v15 }
 0x69e   :  { %v6827_v0 = vpop.f32.mrb[26].mxu0 }
 0x69f   :  { %v22575_v19 = vadd.f32 %v6827_v0, %v6758_v42  ;;  %v10287_v3 = vpop.f32.mrb[27].mxu0  ;;  %v22595_v42 = vpack.c.bf16 %v7271_v58, %v7264_v39  ;;  %v7267_v0 = vld [vmem:[%s23931_s6 + $0x18] sm:$0xff] }
 0x6a0   :  { %v7274_v3 = vld [vmem:[%s23931_s6 + $0x50] sm:$0xff]  ;;  %v7275_v39 = vld [vmem:[%s23931_s6 + $0x58] sm:$0xff] }
 0x6a1   :  { %v6875_v45 = vsel %vm6874_vm4, %v22575_v19, 0.0  ;;  %v22633_v58 = vpack.c.bf16 %v7275_v39, %v7268_v33 }
 0x6a2   :  { %v6876_v22 = vrot.slane %v6875_v45, 4 }
 0x6a4   :  { %v6877_v16 = vadd.f32 %v6876_v22, %v6875_v45  ;;  %v22605_v45 = vpack.c.bf16 %v7274_v3, %v7267_v0  ;;  %v7270_v0 = vld [vmem:[%s23931_s6 + $0x30] sm:$0xff]  ;;  %v7277_v3 = vld [vmem:[%s23931_s6 + $0x68] sm:$0xff] }
 0x6a6   :  { %v6878_v21 = vrot.slane %v6877_v16, 2 }
 0x6a8   :  { %v6879_v26 = vadd.f32 %v6878_v21, %v6877_v16 }
 0x6aa   :  { %v6880_v52 = vrot.slane %v6879_v26, 1 }
 0x6ac   :  { %v6881_v36 = vadd.f32 %v6880_v52, %v6879_v26  ;;  %v7266_v52 = vld [vmem:[%s23931_s6 + $0x10] sm:$0xff] }
 0x6ae   :  { %10293 = vmatmul.mubr.msk.f32.vlgmr.msra.gmra.mrb[34].mxu0 %vm1437_vm0, %v6881_v36  ;;  %v7273_v36 = vld [vmem:[%s23931_s6 + $0x48] sm:$0xff] }
 0x6af   :  { %7345 = vmatprep.mubr.f32.mxu0 %v23963_v13  ;;  %13120 = vmatpush1.bf16.msra.mxu0 %v22595_v42 }
 0x6b0   :  { %13122 = vmatprep.subr.bf16.mxu0 %v22605_v45 }
 0x6be   :  { %v9915_v4 = vpop.f32.mrb[28].mxu0 }
 0x6bf   :  { %v9916_v47 = vpop.f32.mrb[29].mxu0 }
 0x6c0   :  { %v9917_v57 = vadd.f32 %v9916_v47, %v9915_v4  ;;  %v7269_v47 = vld [vmem:[%s23931_s6 + $0x28] sm:$0xff] }
 0x6de   :  { %v9950_v61 = vpop.f32.mrb[30].mxu0 }
 0x6df   :  { %v9951_v6 = vpop.f32.mrb[31].mxu0 }
 0x6e0   :  { %v9952_v46 = vadd.f32 %v9951_v6, %v9950_v61 }
 0x6e2   :  { %v7120_v40 = vadd.f32 %v9952_v46, %v9917_v57  ;;  %v7276_v57 = vld [vmem:[%s23931_s6 + $0x60] sm:$0xff]  ;;  %v22620_v46 = vpack.c.bf16 %v7273_v36, %v7266_v52 }
 0x6e3   :  { %v22622_v2 = vpack.c.bf16 %v7276_v57, %v7269_v47 }
 0x742   :  { %v9985_v22 = vpop.f32.mrb[32].mxu0 }
 0x743   :  { %v9986_v16 = vpop.f32.mrb[33].mxu0 }
 0x744   :  { %v9987_v21 = vadd.f32 %v9986_v16, %v9985_v22  ;;  %v22645_v22 = vpack.c.bf16 %v7277_v3, %v7270_v0 }
 0x746   :  { %v7190_v26 = vadd.f32 %v9987_v21, %v7120_v40 }
 0x781   :  { %v7259_v4 = vpop.f32.mrb[34].mxu0 }
 0x782   :  { %v7260_v61 = vadd.f32 %v7259_v4, %v7190_v26  ;;  %v10294_v6 = vpop.f32.mrb[35].mxu0 }
 0x784   :  { %v7263_v40 = vmul.f32 0.010204081, %v7260_v61 }
 0x786   :  { %9546 = vmatmul.mubr.msk.f32.vlgmr.msra.gmra.mrb[36].mxu0 %vm1437_vm0, %v7263_v40 }
 0x787   :  { %13124 = vmatpush1.bf16.msra.mxu0 %v22620_v46  ;;  %7416 = vmatprep.mubr.f32.mxu0 %v23963_v13 }
 0x788   :  { %13126 = vmatprep.subr.bf16.mxu0 %v22622_v2 }
 0x78a   :  { %9547 = vmatmul.mubr.msk.f32.vlgmr.msra.gmra.mrb[38].mxu0 %vm1437_vm0, %v7263_v40 }
 0x78b   :  { %13128 = vmatpush1.bf16.msra.mxu0 %v22633_v58  ;;  %7487 = vmatprep.mubr.f32.mxu0 %v23963_v13 }
 0x78c   :  { %13129 = vmatprep.subr.bf16.mxu0 %v23962_v20 }
 0x78e   :  { %9548 = vmatmul.mubr.msk.f32.vlgmr.msra.gmra.mrb[40].mxu0 %vm1437_vm0, %v7263_v40 }
 0x78f   :  { %13131 = vmatpush3.bf16.msra.mxu0 %v22645_v22  ;;  %10299 = vmatprep.mubr.msk.f32.mxu0 %vm13739_vm1, %v23963_v13 }
 0x790   :  { %13133 = vmatprep.subr.bf16.mxu0 %v22119_v62 }
 0x792   :  { %10300 = vmatmul.mubr.msk.f32.vlgmr.msra.gmra.mrb[42].mxu0 %vm1437_vm0, %v7263_v40 }
 0x793   :  { %13135 = vmatpush3.bf16.msra.mxu0 %v22133_v41 }
 0x794   :  { %13137 = vmatprep.subr.bf16.mxu0 %v22136_v43 }
 0x797   :  { %13139 = vmatpush3.bf16.msra.mxu0 %v22153_v9 }
 0x798   :  { %13141 = vmatprep.subr.bf16.mxu0 %v22156_v59 }
 0x79b   :  { %13143 = vmatpush3.bf16.msra.mxu0 %v22171_v17 }
 0x79c   :  { %13145 = vmatprep.subr.bf16.mxu0 %v22174_v32 }
 0x79f   :  { %13147 = vmatpush3.bf16.msra.mxu0 %v22198_v30 }
 0x7a0   :  { %13149 = vmatprep.subr.bf16.mxu0 %v22201_v34 }
 0x7a3   :  { %13151 = vmatpush3.bf16.msra.mxu0 %v22234_v50 }
 0x7a4   :  { %13153 = vmatprep.subr.bf16.mxu0 %v22242_v60 }
 0x7a7   :  { %13155 = vmatpush3.bf16.msra.mxu0 %v22272_v23 }
 0x7a8   :  { %13157 = vmatprep.subr.bf16.mxu0 %v22277_v29 }
 0x7ab   :  { %13159 = vmatpush3.bf16.msra.mxu0 %v22308_v38 }
 0x7ac   :  { %13161 = vmatprep.subr.bf16.mxu0 %v22313_v51 }
 0x7af   :  { %13163 = vmatpush3.bf16.msra.mxu0 %v22344_v1 }
 0x7b0   :  { %13165 = vmatprep.subr.bf16.mxu0 %v22349_v14 }
 0x859   :  { %v7347_v62 = vpop.f32.mrb[36].mxu0 }
 0x85a   :  { %v7567_v41 = vrot.slane %v7347_v62, %v17959_v10  ;;  %v7349_v43 = vpop.f32.mrb[37].mxu0 }
 0x85b   :  { %v7571_v9 = vrot.slane %v7349_v43, %v17959_v10 }
 0x85c   :  { %v22673_v59 = vsub.f32 %v20842_v25, %v7567_v41 }
 0x85d   :  { %v22676_v17 = vsub.f32 %v20854_v37, %v7571_v9  ;;  %v7418_v32 = vpop.f32.mrb[38].mxu0 }
 0x85e   :  { %v7599_v30 = vmul.f32 %v22673_v59, %v22673_v59  ;;  %v7420_v34 = vpop.f32.mrb[39].mxu0  ;;  %v7575_v9 = vrot.slane %v7418_v32, %v17959_v10 }
 0x85f   :  { %v7600_v50 = vmul.f32 %v22676_v17, %v22676_v17  ;;  %v7579_v60 = vrot.slane %v7420_v34, %v17959_v10 }
 0x860   :  { %v7606_v23 = vsel %vm6831_vm3, %v7599_v30, 0.0 }
 0x861   :  { %v7607_v29 = vrot.slane %v7606_v23, 4  ;;  %v7613_v38 = vsel %vm6831_vm3, %v7600_v50, 0.0  ;;  %v22686_v25 = vsub.f32 %v22231_v56, %v7579_v60  ;;  %v7489_v37 = vpop.f32.mrb[40].mxu0 }
 0x862   :  { %v7614_v51 = vrot.slane %v7613_v38, 4  ;;  %v7583_v1 = vrot.slane %v7489_v37, %v17959_v10  ;;  %v7491_v14 = vpop.f32.mrb[41].mxu0 }
 0x863   :  { %v7608_v16 = vadd.f32 %v7607_v29, %v7606_v23  ;;  %v7602_v21 = vmul.f32 %v22686_v25, %v22686_v25  ;;  %v7587_v26 = vrot.slane %v7491_v14, %v17959_v10 }
 0x864   :  { %v7615_v52 = vadd.f32 %v7614_v51, %v7613_v38  ;;  %v22693_v36 = vsub.f32 %v22556_v5, %v7583_v1  ;;  %v22707_v1 = vsub.f32 %v22433_v18, %v7575_v9 }
 0x865   :  { %v7609_v4 = vrot.slane %v7608_v16, 2  ;;  %v7627_v47 = vsel %vm6831_vm3, %v7602_v21, 0.0  ;;  %v22697_v56 = vsub.f32 %v22558_v8, %v7587_v26  ;;  %v7560_v57 = vpop.f32.mrb[42].mxu0 }
 0x866   :  { %v7628_v61 = vrot.slane %v7627_v47, 4  ;;  %v7603_v6 = vmul.f32 %v22693_v36, %v22693_v36  ;;  %v10301_v40 = vpop.f32.mrb[43].mxu0  ;;  %v7616_v33 = vrot.slane %v7615_v52, 2  ;;  %v7591_v14 = vrot.slane %v7560_v57, %v17959_v10 }
 0x867   :  { %v7604_v39 = vmul.f32 %v22697_v56, %v22697_v56  ;;  %v7610_v0 = vadd.f32 %v7609_v4, %v7608_v16 }
 0x868   :  { %v7629_v3 = vadd.f32 %v7628_v61, %v7627_v47  ;;  %v7634_v5 = vsel %vm6831_vm3, %v7603_v6, 0.0  ;;  %v7617_v62 = vadd.f32 %v7616_v33, %v7615_v52  ;;  %v7601_v47 = vmul.f32 %v22707_v1, %v22707_v1 }
 0x869   :  { %v7635_v41 = vrot.slane %v7634_v5, 4  ;;  %v7641_v43 = vsel %vm6831_vm3, %v7604_v39, 0.0  ;;  %v7611_v8 = vrot.slane %v7610_v0, 1  ;;  %v22715_v18 = vsub.f32 %v22575_v19, %v7591_v14  ;;  %v23965_v39 = vld [vmem:[#allocation9_spill] sm:$0xff]  ;;  %v8376_v14 = vld [vmem:[%s23934_s9 + $0x98] sm:$0xff] }
 0x86a   :  { %v7642_v30 = vrot.slane %v7641_v43, 4  ;;  %v7618_v34 = vrot.slane %v7617_v62, 1  ;;  %v7630_v50 = vrot.slane %v7629_v3, 2 }
 0x86b   :  { %v7636_v60 = vadd.f32 %v7635_v41, %v7634_v5  ;;  %v7612_v51 = vadd.f32 %v7611_v8, %v7610_v0  ;;  %v23966_v5 = vld [vmem:[#allocation10_spill] sm:$0xff] }
 0x86c   :  { %v7643_v23 = vadd.f32 %v7642_v30, %v7641_v43  ;;  %v7619_v29 = vadd.f32 %v7618_v34, %v7617_v62  ;;  %v7631_v38 = vadd.f32 %v7630_v50, %v7629_v3  ;;  %v23967_v62 = vld [vmem:[#allocation11_spill] sm:$0xff]  ;;  %v8366_v50 = vld [vmem:[%s23934_s9 + $0x48] sm:$0xff] }
 0x86d   :  { %v7637_v37 = vrot.slane %v7636_v60, 2  ;;  %v8363_v34 = vld [vmem:[%s23934_s9 + $0x30] sm:$0xff] }
 0x86e   :  { %7722 = vmatprep.mubr.f32.mxu0 %v7619_v29  ;;  %v7632_v16 = vrot.slane %v7631_v38, 1  ;;  %v7644_v21 = vrot.slane %v7643_v23, 2  ;;  %v13252_v29 = vpack.c.bf16 %v8366_v50, %v8363_v34  ;;  %v8411_v50 = vld [vmem:[%s23934_s9 + $0x1b0] sm:$0xff] }
 0x86f   :  { %7723 = vmatmul.mubr.f32.vlgmr.msra.gmra.mrb[44].mxu0 %v7612_v51  ;;  %v7638_v26 = vadd.f32 %v7637_v37, %v7636_v60  ;;  %v8370_v60 = vld [vmem:[%s23934_s9 + $0x68] sm:$0xff]  ;;  %v8369_v37 = vld [vmem:[%s23934_s9 + $0x60] sm:$0xff]  ;;  %v8372_v51 = vld [vmem:[%s23934_s9 + $0x78] sm:$0xff] }
 0x870   :  { %13167 = vmatpush3.bf16.msra.mxu0 %v22380_v27  ;;  %v7633_v32 = vadd.f32 %v7632_v16, %v7631_v38  ;;  %v7645_v52 = vadd.f32 %v7644_v21, %v7643_v23  ;;  %v7620_v27 = vsel %vm6831_vm3, %v7601_v47, 0.0  ;;  %v8373_v23 = vld [vmem:[%s23934_s9 + $0x80] sm:$0xff]  ;;  %v8379_v16 = vld [vmem:[%s23934_s9 + $0xb0] sm:$0xff]  ;;  %v13256_v21 = vpack.c.bf16 %v8372_v51, %v8369_v37 }
 0x871   :  { %13169 = vmatprep.subr.bf16.mxu0 %v22391_v49  ;;  %v7639_v4 = vrot.slane %v7638_v26, 1  ;;  %v7605_v49 = vmul.f32 %v22715_v18, %v22715_v18  ;;  %v7621_v40 = vrot.slane %v7620_v27, 4  ;;  %v13254_v38 = vpack.c.bf16 %v8373_v23, %v8370_v60  ;;  %v8385_v47 = vld [vmem:[%s23934_s9 + $0xe0] sm:$0xff]  ;;  %v8414_v60 = vld [vmem:[%s23934_s9 + $0x1c8] sm:$0xff] }
 0x872   :  { %7792 = vmatprep.mubr.f32.mxu0 %v7633_v32  ;;  %v7646_v57 = vrot.slane %v7645_v52, 1  ;;  %v8375_v32 = vld [vmem:[%s23934_s9 + $0x90] sm:$0xff]  ;;  %v8418_v23 = vld [vmem:[%s23934_s9 + $0x1e8] sm:$0xff]  ;;  %v8417_v51 = vld [vmem:[%s23934_s9 + $0x1e0] sm:$0xff] }
 0x873   :  { %v7640_v6 = vadd.f32 %v7639_v4, %v7638_v26  ;;  %v7648_v19 = vsel %vm6874_vm4, %v7605_v49, 0.0  ;;  %v13258_v26 = vpack.c.bf16 %v8379_v16, %v8376_v14  ;;  %v8382_v4 = vld [vmem:[%s23934_s9 + $0xc8] sm:$0xff]  ;;  %v8388_v49 = vld [vmem:[%s23934_s9 + $0xf8] sm:$0xff] }
 0x874   :  { %13171 = vmatpush3.bf16.msra.mxu0 %v22418_v48  ;;  %v7647_v61 = vadd.f32 %v7646_v57, %v7645_v52  ;;  %v7622_v48 = vadd.f32 %v7621_v40, %v7620_v27  ;;  %v7649_v33 = vrot.slane %v7648_v19, 4  ;;  %v8378_v52 = vld [vmem:[%s23934_s9 + $0xa8] sm:$0xff]  ;;  %v8384_v27 = vld [vmem:[%s23934_s9 + $0xd8] sm:$0xff]  ;;  %v8391_v40 = vld [vmem:[%s23934_s9 + $0x110] sm:$0xff] }
 0x875   :  { %13173 = vmatprep.subr.bf16.mxu0 %v22423_v11  ;;  %v23964_v11 = vld [vmem:[#allocation8_spill] sm:$0xff]  ;;  %v13260_v57 = vpack.c.bf16 %v8378_v52, %v8375_v32  ;;  %v8423_v52 = vld [vmem:[%s23934_s9 + $0x210] sm:$0xff] }
 0x876   :  { %7862 = vmatprep.mubr.f32.mxu1 %v7647_v61  ;;  %v7623_v0 = vrot.slane %v7622_v48, 2  ;;  %v7650_v3 = vadd.f32 %v7649_v33, %v7648_v19  ;;  %v13262_v61 = vpack.c.bf16 %v8385_v47, %v8382_v4  ;;  %v8387_v33 = vld [vmem:[%s23934_s9 + $0xf0] sm:$0xff]  ;;  %v8420_v14 = vld [vmem:[%s23934_s9 + $0x1f8] sm:$0xff]  ;;  %v8426_v4 = vld [vmem:[%s23934_s9 + $0x228] sm:$0xff] }
 0x877   :  { %7863 = vmatmul.mubr.f32.vlgmr.msra.gmra.mrb[14].mxu1 %v7640_v6  ;;  %v8381_v6 = vld [vmem:[%s23934_s9 + $0xc0] sm:$0xff]  ;;  %v8424_v16 = vld [vmem:[%s23934_s9 + $0x218] sm:$0xff]  ;;  %v8430_v47 = vld [vmem:[%s23934_s9 + $0x248] sm:$0xff] }
 0x878   :  { %13175 = vmatpush3.bf16.msra.mxu0 %v22443_v53  ;;  %v7651_v53 = vrot.slane %v7650_v3, 2  ;;  %v13264_v19 = vpack.c.bf16 %v8384_v27, %v8381_v6  ;;  %v8429_v27 = vld [vmem:[%s23934_s9 + $0x240] sm:$0xff] }
 0x879   :  { %13177 = vmatprep.subr.bf16.mxu0 %v22446_v24  ;;  %v7624_v24 = vadd.f32 %v7623_v0, %v7622_v48  ;;  %v13266_v48 = vpack.c.bf16 %v8391_v40, %v8388_v49  ;;  %v8397_v0 = vld [vmem:[%s23934_s9 + $0x140] sm:$0xff]  ;;  %v8432_v49 = vld [vmem:[%s23934_s9 + $0x258] sm:$0xff] }
 0x87a   :  { %v7652_v41 = vadd.f32 %v7651_v53, %v7650_v3  ;;  %v8396_v53 = vld [vmem:[%s23934_s9 + $0x138] sm:$0xff]  ;;  %v13296_v40 = vpack.c.bf16 %v8432_v49, %v8429_v27  ;;  %v8439_v27 = vld [vmem:[%s23934_s9 + $0x290] sm:$0xff]  ;;  %v8437_v49 = vld [vmem:[%s23934_s9 + $0x280] sm:$0xff] }
 0x87c   :  { %13179 = vmatpush3.bf16.msra.mxu0 %v22463_v31  ;;  %v7625_v31 = vrot.slane %v7624_v24, 1  ;;  %v7653_v43 = vrot.slane %v7652_v41, 1 }
 0x87d   :  { %13181 = vmatprep.subr.bf16.mxu0 %v23964_v11  ;;  %v8390_v11 = vld [vmem:[%s23934_s9 + $0x108] sm:$0xff] }
 0x87e   :  { %v7626_v8 = vadd.f32 %v7625_v31, %v7624_v24  ;;  %v13268_v3 = vpack.c.bf16 %v8390_v11, %v8387_v33  ;;  %v8400_v24 = vld [vmem:[%s23934_s9 + $0x158] sm:$0xff] }
 0x880   :  { %13183 = vmatpush3.bf16.msra.mxu0 %v23965_v39  ;;  %v8394_v39 = vld [vmem:[%s23934_s9 + $0x128] sm:$0xff] }
 0x881   :  { %13185 = vmatprep.subr.bf16.mxu0 %v23966_v5  ;;  %v13270_v5 = vpack.c.bf16 %v8397_v0, %v8394_v39 }
 0x884   :  { %13187 = vmatpush3.bf16.msra.mxu0 %v23967_v62  ;;  %v8393_v62 = vld [vmem:[%s23934_s9 + $0x120] sm:$0xff] }
 0x885   :  { %13189 = vmatprep.subr.bf16.mxu0 %v22502_v55  ;;  %v7654_v55 = vadd.f32 %v7653_v43, %v7652_v41  ;;  %v8403_v41 = vld [vmem:[%s23934_s9 + $0x170] sm:$0xff]  ;;  %v13272_v31 = vpack.c.bf16 %v8396_v53, %v8393_v62 }
 0x886   :  { %v13274_v43 = vpack.c.bf16 %v8403_v41, %v8400_v24 }
 0x888   :  { %13191 = vmatpush3.bf16.msra.mxu0 %v22517_v63  ;;  %v8361_v63 = vld [vmem:[%s23934_s9 + $0x20] sm:$0xff] }
 0x889   :  { %13193 = vmatprep.subr.bf16.mxu0 %v22520_v7  ;;  %v8357_v7 = vld [vmem:[%s23934_s9] sm:$0xff] }
 0x88c   :  { %13195 = vmatpush3.bf16.msra.mxu0 %v22529_v35  ;;  %v8358_v35 = vld [vmem:[%s23934_s9 + $0x8] sm:$0xff] }
 0x88d   :  { %13228 = vmatprep.subr.bf16.mxu0 %v23962_v20 }
 0x88f   :  { %7793 = vmatmul.mubr.f32.vlgmr.msra.gmra.mrb[46].mxu0 %v7626_v8  ;;  %v8399_v8 = vld [vmem:[%s23934_s9 + $0x150] sm:$0xff] }
 0x890   :  { %13230 = vmatpush3.bf16.msra.mxu0 %v22570_v12  ;;  %10306 = vmatprep.mubr.msk.f32.mxu0 %vm13739_vm1, %v23963_v13  ;;  %v13246_v12 = vpack.c.bf16 %v8361_v63, %v8358_v35  ;;  %v8406_v35 = vld [vmem:[%s23934_s9 + $0x188] sm:$0xff]  ;;  %v8409_v63 = vld [vmem:[%s23934_s9 + $0x1a0] sm:$0xff] }
 0x891   :  { %13232 = vmatprep.subr.bf16.mxu0 %v22587_v15  ;;  %v8360_v15 = vld [vmem:[%s23934_s9 + $0x18] sm:$0xff] }
 0x892   :  { %v13248_v9 = vpack.c.bf16 %v8360_v15, %v8357_v7  ;;  %13247 = vmatprep.subr.bf16.mxu1 %v13246_v12  ;;  %v13278_v12 = vpack.c.bf16 %v8409_v63, %v8406_v35  ;;  %v8405_v15 = vld [vmem:[%s23934_s9 + $0x180] sm:$0xff]  ;;  %v8407_v63 = vld [vmem:[%s23934_s9 + $0x190] sm:$0xff] }
 0x893   :  { %10307 = vmatmul.mubr.msk.f32.vlgmr.msra.gmra.mrb[48].mxu0 %vm1437_vm0, %v7654_v55  ;;  %v8402_v55 = vld [vmem:[%s23934_s9 + $0x168] sm:$0xff] }
 0x894   :  { %13234 = vmatpush1.bf16.msra.mxu0 %v22595_v42  ;;  %8008 = vmatprep.mubr.f32.mxu0 %v23963_v13  ;;  %v8364_v42 = vld [vmem:[%s23934_s9 + $0x38] sm:$0xff]  ;;  %v13276_v7 = vpack.c.bf16 %v8402_v55, %v8399_v8 }
 0x895   :  { %13236 = vmatprep.subr.bf16.mxu0 %v22605_v45  ;;  %v8367_v45 = vld [vmem:[%s23934_s9 + $0x50] sm:$0xff]  ;;  %13249 = vmatpush1.bf16.msra.mxu1 %v13248_v9 }
 0x896   :  { %v13250_v30 = vpack.c.bf16 %v8367_v45, %v8364_v42  ;;  %v8408_v42 = vld [vmem:[%s23934_s9 + $0x198] sm:$0xff]  ;;  %v8415_v9 = vld [vmem:[%s23934_s9 + $0x1d0] sm:$0xff] }
 0x897   :  { %v8412_v45 = vld [vmem:[%s23934_s9 + $0x1b8] sm:$0xff] }
 0x898   :  { %13251 = vmatprep.subr.bf16.mxu1 %v13250_v30  ;;  %v13280_v30 = vpack.c.bf16 %v8408_v42, %v8405_v15  ;;  %v13282_v34 = vpack.c.bf16 %v8415_v9, %v8412_v45  ;;  %v8413_v15 = vld [vmem:[%s23934_s9 + $0x1c0] sm:$0xff] }
 0x899   :  { %13253 = vmatpush1.bf16.msra.mxu1 %v13252_v29  ;;  %v8421_v29 = vld [vmem:[%s23934_s9 + $0x200] sm:$0xff] }
 0x89a   :  { %13255 = vmatprep.subr.bf16.mxu1 %v13254_v38  ;;  %v13284_v38 = vpack.c.bf16 %v8414_v60, %v8411_v50  ;;  %v13286_v37 = vpack.c.bf16 %v8421_v29, %v8418_v23  ;;  %v8365_v9 = vld [vmem:[%s23934_s9 + $0x40] sm:$0xff]  ;;  %v8371_v23 = vld [vmem:[%s23934_s9 + $0x70] sm:$0xff]  ;;  %v8374_v29 = vld [vmem:[%s23934_s9 + $0x88] sm:$0xff] }
 0x89d   :  { %13257 = vmatpush1.bf16.msra.mxu1 %v13256_v21  ;;  %v8427_v21 = vld [vmem:[%s23934_s9 + $0x230] sm:$0xff] }
 0x89e   :  { %13259 = vmatprep.subr.bf16.mxu1 %v13258_v26  ;;  %v13288_v26 = vpack.c.bf16 %v8420_v14, %v8417_v51  ;;  %v13290_v32 = vpack.c.bf16 %v8427_v21, %v8424_v16  ;;  %v13452_v51 = vpack.c.bf16 %v8374_v29, %v8371_v23  ;;  %v8377_v16 = vld [vmem:[%s23934_s9 + $0xa0] sm:$0xff]  ;;  %v8380_v21 = vld [vmem:[%s23934_s9 + $0xb8] sm:$0xff]  ;;  %v8454_v23 = vld [vmem:[%s23934_s9 + $0x308] sm:$0xff] }
 0x89f   :  { %v8457_v29 = vld [vmem:[%s23934_s9 + $0x320] sm:$0xff] }
 0x8a1   :  { %13261 = vmatpush1.bf16.msra.mxu1 %v13260_v57  ;;  %v8433_v57 = vld [vmem:[%s23934_s9 + $0x260] sm:$0xff] }
 0x8a2   :  { %13263 = vmatprep.subr.bf16.mxu1 %v13262_v61  ;;  %v13292_v61 = vpack.c.bf16 %v8426_v4, %v8423_v52  ;;  %v13294_v6 = vpack.c.bf16 %v8433_v57, %v8430_v47  ;;  %v13456_v52 = vpack.c.bf16 %v8380_v21, %v8377_v16  ;;  %v8383_v47 = vld [vmem:[%s23934_s9 + $0xd0] sm:$0xff]  ;;  %v8386_v57 = vld [vmem:[%s23934_s9 + $0xe8] sm:$0xff]  ;;  %v23059_v16 = vld [vmem:[%s23932_s7] sm:$0x7f] }
 0x8a5   :  { %13265 = vmatpush1.bf16.msra.mxu1 %v13264_v19 }
 0x8a6   :  { %13267 = vmatprep.subr.bf16.mxu1 %v13266_v48 }
 0x8a9   :  { %13269 = vmatpush1.bf16.msra.mxu1 %v13268_v3 }
 0x8aa   :  { %13271 = vmatprep.subr.bf16.mxu1 %v13270_v5 }
 0x8ad   :  { %13273 = vmatpush1.bf16.msra.mxu1 %v13272_v31 }
 0x8ae   :  { %13275 = vmatprep.subr.bf16.mxu1 %v13274_v43 }
 0x8b1   :  { %13277 = vmatpush1.bf16.msra.mxu1 %v13276_v7  ;;  %v8410_v7 = vld [vmem:[%s23934_s9 + $0x1a8] sm:$0xff] }
 0x8b2   :  { %13279 = vmatprep.subr.bf16.mxu1 %v13278_v12  ;;  %v8362_v12 = vld [vmem:[%s23934_s9 + $0x28] sm:$0xff] }
 0x8b5   :  { %13281 = vmatpush1.bf16.msra.mxu1 %v13280_v30  ;;  %v8368_v30 = vld [vmem:[%s23934_s9 + $0x58] sm:$0xff] }
 0x8b6   :  { %13283 = vmatprep.subr.bf16.mxu1 %v13282_v34  ;;  %v8419_v34 = vld [vmem:[%s23934_s9 + $0x1f0] sm:$0xff]  ;;  %v13448_v50 = vpack.c.bf16 %v8368_v30, %v8365_v9  ;;  %v8450_v9 = vld [vmem:[%s23934_s9 + $0x2e8] sm:$0xff] }
 0x8b9   :  { %13285 = vmatpush1.bf16.msra.mxu1 %v13284_v38  ;;  %v8425_v38 = vld [vmem:[%s23934_s9 + $0x220] sm:$0xff] }
 0x8ba   :  { %13287 = vmatprep.subr.bf16.mxu1 %v13286_v37  ;;  %v8428_v37 = vld [vmem:[%s23934_s9 + $0x238] sm:$0xff] }
 0x8bb   :  { %v13454_v14 = vpack.c.bf16 %v8428_v37, %v8425_v38  ;;  %v8503_v38 = vld [vmem:[%s23934_s9 + $0x490] sm:$0xff]  ;;  %v13310_v37 = vpack.c.bf16 %v8457_v29, %v8454_v23  ;;  %v8466_v23 = vld [vmem:[%s23934_s9 + $0x368] sm:$0xff]  ;;  %v8469_v29 = vld [vmem:[%s23934_s9 + $0x380] sm:$0xff] }
 0x8bd   :  { %13289 = vmatpush1.bf16.msra.mxu1 %v13288_v26  ;;  %v8431_v26 = vld [vmem:[%s23934_s9 + $0x250] sm:$0xff] }
 0x8be   :  { %13291 = vmatprep.subr.bf16.mxu1 %v13290_v32  ;;  %v8434_v32 = vld [vmem:[%s23934_s9 + $0x268] sm:$0xff] }
 0x8bf   :  { %v13458_v4 = vpack.c.bf16 %v8434_v32, %v8431_v26  ;;  %v23064_v26 = vld [vmem:[%s23933_s8] sm:$0x7f] }
 0x8c1   :  { %13293 = vmatpush1.bf16.msra.mxu1 %v13292_v61  ;;  %v13460_v61 = vpack.c.bf16 %v8386_v57, %v8383_v47  ;;  %v23968_v57 = vld [vmem:[#allocation5_spill] sm:$0xff] }
 0x8c2   :  { %13295 = vmatprep.subr.bf16.mxu1 %v13294_v6  ;;  %v8436_v6 = vld [vmem:[%s23934_s9 + $0x278] sm:$0xff] }
 0x8c5   :  { %13297 = vmatpush1.bf16.msra.mxu1 %v13296_v40  ;;  %v13298_v40 = vpack.c.bf16 %v8439_v27, %v8436_v6  ;;  %v8311_v27 = vrot.slane %v23064_v26, %v17959_v10 }
 0x8c7   :  { %13299 = vmatprep.subr.bf16.mxu1 %v13298_v40 }
 0x942   :  { %v10026_v19 = vpop.f32.mrb[44].mxu0 }
 0x943   :  { %v10027_v48 = vpop.f32.mrb[45].mxu0 }
 0x944   :  { %v10028_v33 = vadd.f32 %v10027_v48, %v10026_v19  ;;  %v8440_v19 = vld [vmem:[%s23934_s9 + $0x298] sm:$0xff]  ;;  %v8435_v48 = vld [vmem:[%s23934_s9 + $0x270] sm:$0xff] }
 0x94a   :  { %v10096_v11 = vpop.f32.mrb[14].mxu1 }
 0x94b   :  { %v10097_v39 = vpop.f32.mrb[15].mxu1 }
 0x94c   :  { %v10098_v0 = vadd.f32 %v10097_v39, %v10096_v11  ;;  %v13462_v11 = vpack.c.bf16 %v8440_v19, %v8437_v49  ;;  %v8315_v19 = vrot.slane %v23064_v26, %v23968_v57 }
 0x962   :  { %v10061_v3 = vpop.f32.mrb[46].mxu0 }
 0x963   :  { %v10062_v5 = vpop.f32.mrb[47].mxu0 }
 0x964   :  { %v10063_v62 = vadd.f32 %v10062_v5, %v10061_v3  ;;  %v8392_v3 = vld [vmem:[%s23934_s9 + $0x118] sm:$0xff] }
 0x966   :  { %v7795_v53 = vadd.f32 %v10063_v62, %v10028_v33  ;;  %v7934_v24 = vpop.f32.mrb[48].mxu0  ;;  %v8438_v33 = vld [vmem:[%s23934_s9 + $0x288] sm:$0xff] }
 0x967   :  { %v10308_v41 = vpop.f32.mrb[49].mxu0  ;;  %v13300_v39 = vpack.c.bf16 %v8438_v33, %v8435_v48  ;;  %v8442_v62 = vld [vmem:[%s23934_s9 + $0x2a8] sm:$0xff] }
 0x968   :  { %v7865_v31 = vadd.f32 %v10098_v0, %v7795_v53  ;;  %v8389_v0 = vld [vmem:[%s23934_s9 + $0x100] sm:$0xff] }
 0x969   :  { %v13464_v5 = vpack.c.bf16 %v8392_v3, %v8389_v0  ;;  %13301 = vmatpush1.bf16.msra.mxu1 %v13300_v39  ;;  %v8445_v53 = vld [vmem:[%s23934_s9 + $0x2c0] sm:$0xff]  ;;  %v23969_v0 = vld [vmem:[#allocation6_spill] sm:$0xff] }
 0x96a   :  { %v7935_v43 = vadd.f32 %v7934_v24, %v7865_v31  ;;  %v8443_v24 = vld [vmem:[%s23934_s9 + $0x2b0] sm:$0xff]  ;;  %v13302_v41 = vpack.c.bf16 %v8445_v53, %v8442_v62  ;;  %v8446_v31 = vld [vmem:[%s23934_s9 + $0x2c8] sm:$0xff]  ;;  %v8279_v3 = vrot.slane %v23059_v16, %v23969_v0 }
 0x96b   :  { %v8455_v62 = vld [vmem:[%s23934_s9 + $0x310] sm:$0xff]  ;;  %v8458_v53 = vld [vmem:[%s23934_s9 + $0x328] sm:$0xff] }
 0x96c   :  { %v7938_v8 = vmul.f32 0.010204081, %v7935_v43  ;;  %v8441_v43 = vld [vmem:[%s23934_s9 + $0x2a0] sm:$0xff]  ;;  %13303 = vmatprep.subr.bf16.mxu1 %v13302_v41 }
 0x96e   :  { %v7939_v55 = vadd.f32 1e-05, %v7938_v8  ;;  %v13466_v8 = vpack.c.bf16 %v8446_v31, %v8443_v24  ;;  %v8460_v24 = vld [vmem:[%s23934_s9 + $0x338] sm:$0xff] }
 0x970   :  { %13708 = vrsqrt.f32 %v7939_v55  ;;  %v8444_v55 = vld [vmem:[%s23934_s9 + $0x2b8] sm:$0xff] }
 0x97a   :  { %v13709_v35 = vpop.eup %13708 }
 0x97b   :  { %9551 = vmatmul.mubr.msk.f32.vlgmr.msra.gmra.mrb[50].mxu0 %vm1437_vm0, %v13709_v35 }
 0x97c   :  { %13238 = vmatpush1.bf16.msra.mxu0 %v22620_v46  ;;  %8079 = vmatprep.mubr.f32.mxu0 %v23963_v13  ;;  %v13442_v46 = vpack.c.bf16 %v8410_v7, %v8407_v63  ;;  %v8398_v63 = vld [vmem:[%s23934_s9 + $0x148] sm:$0xff]  ;;  %v13304_v7 = vpack.c.bf16 %v8444_v55, %v8441_v43  ;;  %v8323_v55 = vrot.slane %v23064_v26, %v23969_v0  ;;  %v8472_v0 = vld [vmem:[%s23934_s9 + $0x398] sm:$0xff] }
 0x97d   :  { %13240 = vmatprep.subr.bf16.mxu0 %v22622_v2  ;;  %v8359_v2 = vld [vmem:[%s23934_s9 + $0x10] sm:$0xff] }
 0x97e   :  { %v13444_v42 = vpack.c.bf16 %v8362_v12, %v8359_v2  ;;  %v8448_v2 = vld [vmem:[%s23934_s9 + $0x2d8] sm:$0xff]  ;;  %v8451_v12 = vld [vmem:[%s23934_s9 + $0x2f0] sm:$0xff]  ;;  %13305 = vmatpush1.bf16.msra.mxu1 %v13304_v7 }
 0x97f   :  { %9552 = vmatmul.mubr.msk.f32.vlgmr.msra.gmra.mrb[52].mxu0 %vm1437_vm0, %v13709_v35 }
 0x980   :  { %13242 = vmatpush1.bf16.msra.mxu0 %v22633_v58  ;;  %8150 = vmatprep.mubr.f32.mxu0 %v23963_v13  ;;  %v8416_v58 = vld [vmem:[%s23934_s9 + $0x1d8] sm:$0xff] }
 0x981   :  { %13243 = vmatprep.subr.bf16.mxu0 %v23962_v20  ;;  %v13446_v45 = vpack.c.bf16 %v8416_v58, %v8413_v15  ;;  %v8449_v15 = vld [vmem:[%s23934_s9 + $0x2e0] sm:$0xff]  ;;  %v13306_v58 = vpack.c.bf16 %v8451_v12, %v8448_v2 }
 0x983   :  { %9553 = vmatmul.mubr.msk.f32.vlgmr.msra.gmra.mrb[54].mxu0 %vm1437_vm0, %v13709_v35  ;;  %13307 = vmatprep.subr.bf16.mxu1 %v13306_v58 }
 0x984   :  { %13245 = vmatpush3.bf16.msra.mxu0 %v22645_v22  ;;  %10313 = vmatprep.mubr.msk.f32.mxu0 %vm13739_vm1, %v23963_v13  ;;  %v8422_v22 = vld [vmem:[%s23934_s9 + $0x208] sm:$0xff] }
 0x985   :  { %13443 = vmatprep.subr.bf16.mxu0 %v13442_v46  ;;  %v13450_v60 = vpack.c.bf16 %v8422_v22, %v8419_v34  ;;  %v8401_v22 = vld [vmem:[%s23934_s9 + $0x160] sm:$0xff] }
 0x987   :  { %10314 = vmatmul.mubr.msk.f32.vlgmr.msra.gmra.mrb[56].mxu0 %vm1437_vm0, %v13709_v35  ;;  %v8395_v35 = vld [vmem:[%s23934_s9 + $0x130] sm:$0xff] }
 0x988   :  { %13445 = vmatpush3.bf16.msra.mxu0 %v13444_v42  ;;  %v13468_v46 = vpack.c.bf16 %v8398_v63, %v8395_v35  ;;  %v8452_v42 = vld [vmem:[%s23934_s9 + $0x2f8] sm:$0xff]  ;;  %v8509_v35 = vld [vmem:[%s23934_s9 + $0x4c0] sm:$0xff] }
 0x989   :  { %13447 = vmatprep.subr.bf16.mxu0 %v13446_v45  ;;  %v8447_v45 = vld [vmem:[%s23934_s9 + $0x2d0] sm:$0xff]  ;;  %v13470_v30 = vpack.c.bf16 %v8452_v42, %v8449_v15  ;;  %v8512_v63 = vld [vmem:[%s23934_s9 + $0x4d8] sm:$0xff]  ;;  %v8327_v15 = vrot.slane %v23064_v26, %v18428_v54  ;;  %v13476_v42 = vpack.c.bf16 %v8458_v53, %v8455_v62 }
 0x98a   :  { %v13308_v34 = vpack.c.bf16 %v8450_v9, %v8447_v45  ;;  %v8459_v45 = vld [vmem:[%s23934_s9 + $0x330] sm:$0xff]  ;;  %v8462_v9 = vld [vmem:[%s23934_s9 + $0x348] sm:$0xff] }
 0x98b   :  { %v8471_v53 = vld [vmem:[%s23934_s9 + $0x390] sm:$0xff] }
 0x98c   :  { %13449 = vmatpush3.bf16.msra.mxu0 %v13448_v50  ;;  %v8404_v50 = vld [vmem:[%s23934_s9 + $0x178] sm:$0xff]  ;;  %13309 = vmatpush1.bf16.msra.mxu1 %v13308_v34 }
 0x98d   :  { %13451 = vmatprep.subr.bf16.mxu0 %v13450_v60  ;;  %v13472_v60 = vpack.c.bf16 %v8404_v50, %v8401_v22  ;;  %13311 = vmatprep.subr.bf16.mxu1 %v13310_v37  ;;  %v8291_v37 = vrot.slane %v23059_v16, %v18649_v44 }
 0x990   :  { %13453 = vmatpush3.bf16.msra.mxu0 %v13452_v51  ;;  %v8506_v51 = vld [vmem:[%s23934_s9 + $0x4a8] sm:$0xff] }
 0x991   :  { %13455 = vmatprep.subr.bf16.mxu0 %v13454_v14  ;;  %v13474_v14 = vpack.c.bf16 %v8506_v51, %v8503_v38  ;;  %v8515_v51 = vld [vmem:[%s23934_s9 + $0x4f0] sm:$0xff] }
 0x994   :  { %13457 = vmatpush3.bf16.msra.mxu0 %v13456_v52  ;;  %v8267_v52 = vrot.slane %v23059_v16, %v17959_v10 }
 0x995   :  { %13459 = vmatprep.subr.bf16.mxu0 %v13458_v4 }
 0x998   :  { %13461 = vmatpush3.bf16.msra.mxu0 %v13460_v61  ;;  %v8271_v61 = vrot.slane %v23059_v16, %v23968_v57 }
 0x999   :  { %13463 = vmatprep.subr.bf16.mxu0 %v13462_v11 }
 0x99c   :  { %13465 = vmatpush3.bf16.msra.mxu0 %v13464_v5 }
 0x99d   :  { %13467 = vmatprep.subr.bf16.mxu0 %v13466_v8  ;;  %v8463_v8 = vld [vmem:[%s23934_s9 + $0x350] sm:$0xff] }
 0x99e   :  { %v13314_v50 = vpack.c.bf16 %v8463_v8, %v8460_v24  ;;  %v8474_v24 = vld [vmem:[%s23934_s9 + $0x3a8] sm:$0xff]  ;;  %v8473_v8 = vld [vmem:[%s23934_s9 + $0x3a0] sm:$0xff] }
 0x9a0   :  { %13469 = vmatpush3.bf16.msra.mxu0 %v13468_v46 }
 0x9a1   :  { %13471 = vmatprep.subr.bf16.mxu0 %v13470_v30  ;;  %v8461_v30 = vld [vmem:[%s23934_s9 + $0x340] sm:$0xff] }
 0x9a4   :  { %13473 = vmatpush3.bf16.msra.mxu0 %v13472_v60  ;;  %v13478_v60 = vpack.c.bf16 %v8512_v63, %v8509_v35  ;;  %v8478_v35 = vld [vmem:[%s23934_s9 + $0x3c8] sm:$0xff]  ;;  %v8481_v63 = vld [vmem:[%s23934_s9 + $0x3e0] sm:$0xff] }
 0x9a5   :  { %13475 = vmatprep.subr.bf16.mxu0 %v13474_v14  ;;  %v8518_v14 = vld [vmem:[%s23934_s9 + $0x508] sm:$0xff] }
 0xa4e   :  { %v8010_v21 = vpop.f32.mrb[50].mxu0 }
 0xa4f   :  { %v8230_v32 = vrot.slane %v8010_v21, %v17959_v10  ;;  %v8012_v4 = vpop.f32.mrb[51].mxu0 }
 0xa50   :  { %v8234_v47 = vrot.slane %v8012_v4, %v17959_v10  ;;  %v13316_v4 = vpack.c.bf16 %v8462_v9, %v8459_v45  ;;  %v8479_v9 = vld [vmem:[%s23934_s9 + $0x3d0] sm:$0xff] }
 0xa51   :  { %v8255_v6 = vmul.f32 %v8230_v32, %v22673_v59  ;;  %v8453_v59 = vld [vmem:[%s23934_s9 + $0x300] sm:$0xff] }
 0xa52   :  { %v8256_v49 = vmul.f32 %v8234_v47, %v22676_v17  ;;  %v23076_v40 = vpop.f32.mrb[52].mxu0  ;;  %v8456_v17 = vld [vmem:[%s23934_s9 + $0x318] sm:$0xff]  ;;  %v8335_v47 = vrot.slane %v23064_v26, %v18649_v44  ;;  %v13482_v44 = vpack.c.bf16 %v8518_v14, %v8515_v51  ;;  %v8485_v14 = vld [vmem:[%s23934_s9 + $0x400] sm:$0xff] }
 0xa53   :  { %v8299_v48 = vmul.f32 %v8267_v52, %v8255_v6  ;;  %v8083_v33 = vpop.f32.mrb[53].mxu0  ;;  %v13312_v2 = vpack.c.bf16 %v8456_v17, %v8453_v59  ;;  %v8524_v59 = vld [vmem:[%s23934_s9 + $0x538] sm:$0xff] }
 0xa54   :  { %v8300_v11 = vmul.f32 %v8271_v61, %v8256_v49  ;;  %v8242_v39 = vrot.slane %v8083_v33, %v17959_v10  ;;  %v8465_v49 = vld [vmem:[%s23934_s9 + $0x360] sm:$0xff] }
 0xa55   :  { %v8343_v5 = vadd.f32 %v8311_v27, %v8299_v48  ;;  %v13318_v27 = vpack.c.bf16 %v8469_v29, %v8466_v23  ;;  %v8483_v29 = vld [vmem:[%s23934_s9 + $0x3f0] sm:$0xff] }
 0xa56   :  { %v8258_v41 = vmul.f32 %v8242_v39, %v22686_v25  ;;  %v8152_v31 = vpop.f32.mrb[54].mxu0  ;;  %v8344_v43 = vadd.f32 %v8315_v19, %v8300_v11  ;;  %v8283_v25 = vrot.slane %v23059_v16, %v18428_v54  ;;  %v8464_v54 = vld [vmem:[%s23934_s9 + $0x358] sm:$0xff]  ;;  %v8467_v11 = vld [vmem:[%s23934_s9 + $0x370] sm:$0xff]  ;;  %v8470_v39 = vld [vmem:[%s23934_s9 + $0x388] sm:$0xff] }
 0xa57   :  { %v8246_v7 = vrot.slane %v8152_v31, %v17959_v10  ;;  %v23113_v46 = vpop.f32.mrb[55].mxu0  ;;  %v8350_v34 = vmax.f32 %v8343_v5, 0.0  ;;  %v13480_v6 = vpack.c.bf16 %v8464_v54, %v8461_v30  ;;  %v8468_v19 = vld [vmem:[%s23934_s9 + $0x378] sm:$0xff]  ;;  %v13484_v62 = vpack.c.bf16 %v8470_v39, %v8467_v11  ;;  %v8482_v30 = vld [vmem:[%s23934_s9 + $0x3e8] sm:$0xff]  ;;  %v8491_v39 = vld [vmem:[%s23934_s9 + $0x430] sm:$0xff] }
 0xa58   :  { %v8302_v12 = vmul.f32 %v8279_v3, %v8258_v41  ;;  %v8351_v58 = vmax.f32 %v8344_v43, 0.0  ;;  %v8521_v3 = vld [vmem:[%s23934_s9 + $0x520] sm:$0xff]  ;;  %v13320_v5 = vpack.c.bf16 %v8468_v19, %v8465_v49  ;;  %v13492_v23 = vpack.c.bf16 %v8482_v30, %v8479_v9 }
 0xa59   :  { %v8259_v22 = vmul.f32 %v8246_v7, %v22693_v36  ;;  %v13486_v43 = vpack.c.bf16 %v8524_v59, %v8521_v3  ;;  %v8527_v7 = vld [vmem:[%s23934_s9 + $0x550] sm:$0xff]  ;;  %v8489_v19 = vld [vmem:[%s23934_s9 + $0x420] sm:$0xff]  ;;  %v8548_v59 = vld [vmem:[%s23934_s9 + $0x5f8] sm:$0xff] }
 0xa5a   :  { %v8223_v38 = vpop.f32.mrb[56].mxu0  ;;  %8735 = vmatprep.mubr.f32.mxu1 %v8351_v58  ;;  %9019 = vmatprep.mubr.f32.mxu0 %v8351_v58  ;;  %v8346_v36 = vadd.f32 %v8323_v55, %v8302_v12  ;;  %v8476_v55 = vld [vmem:[%s23934_s9 + $0x3b8] sm:$0xff]  ;;  %v8545_v3 = vld [vmem:[%s23934_s9 + $0x5e0] sm:$0xff] }
 0xa5b   :  { %v8303_v21 = vmul.f32 %v8283_v25, %v8259_v22  ;;  %v8254_v32 = vrot.slane %v8223_v38, %v17959_v10  ;;  %v10315_v52 = vpop.f32.mrb[57].mxu0  ;;  %8736 = vmatmul.mubr.f32.vlgmr.msra.gmra.mrb[16].mxu1 %v8350_v34  ;;  %9020 = vmatmul.mubr.f32.vlgmr.msra.gmra.mrb[58].mxu0 %v8350_v34  ;;  %v8530_v25 = vld [vmem:[%s23934_s9 + $0x568] sm:$0xff]  ;;  %v13488_v12 = vpack.c.bf16 %v8476_v55, %v8473_v8  ;;  %v8480_v58 = vld [vmem:[%s23934_s9 + $0x3d8] sm:$0xff]  ;;  %v8487_v22 = vld [vmem:[%s23934_s9 + $0x410] sm:$0xff] }
 0xa5c   :  { %13313 = vmatpush1.bf16.msra.mxu1 %v13312_v2  ;;  %13477 = vmatpush3.bf16.msra.mxu0 %v13476_v42  ;;  %v8353_v61 = vmax.f32 %v8346_v36, 0.0  ;;  %v13324_v2 = vpack.c.bf16 %v8474_v24, %v8471_v53  ;;  %v13326_v42 = vpack.c.bf16 %v8481_v63, %v8478_v35  ;;  %v13490_v45 = vpack.c.bf16 %v8530_v25, %v8527_v7  ;;  %v8484_v34 = vld [vmem:[%s23934_s9 + $0x3f8] sm:$0xff]  ;;  %v8486_v38 = vld [vmem:[%s23934_s9 + $0x408] sm:$0xff]  ;;  %v8539_v52 = vld [vmem:[%s23934_s9 + $0x5b0] sm:$0xff] }
 0xa5d   :  { %v23153_v48 = vadd.f32 %v8327_v15, %v8303_v21  ;;  %v8261_v33 = vmul.f32 %v8254_v32, %v22715_v18  ;;  %13315 = vmatprep.subr.bf16.mxu1 %v13314_v50  ;;  %13479 = vmatprep.subr.bf16.mxu0 %v13478_v60  ;;  %v8475_v18 = vld [vmem:[%s23934_s9 + $0x3b0] sm:$0xff]  ;;  %v8477_v15 = vld [vmem:[%s23934_s9 + $0x3c0] sm:$0xff]  ;;  %v8536_v60 = vld [vmem:[%s23934_s9 + $0x598] sm:$0xff]  ;;  %v13330_v36 = vpack.c.bf16 %v8487_v22, %v8484_v34 }
 0xa5e   :  { %8806 = vmatprep.mubr.f32.mxu1 %v8353_v61  ;;  %9089 = vmatprep.mubr.f32.mxu0 %v8353_v61  ;;  %v13322_v31 = vpack.c.bf16 %v8475_v18, %v8472_v0  ;;  %v8533_v50 = vld [vmem:[%s23934_s9 + $0x580] sm:$0xff]  ;;  %v13328_v54 = vpack.c.bf16 %v8480_v58, %v8477_v15  ;;  %v8488_v21 = vld [vmem:[%s23934_s9 + $0x418] sm:$0xff]  ;;  %v8490_v32 = vld [vmem:[%s23934_s9 + $0x428] sm:$0xff]  ;;  %v8331_v15 = vrot.slane %v23064_v26, %v18199_v28 }
 0xa5f   :  { %v8305_v17 = vmul.f32 %v8291_v37, %v8261_v33  ;;  %v8238_v37 = vrot.slane %v23076_v40, %v17959_v10  ;;  %v13494_v51 = vpack.c.bf16 %v8536_v60, %v8533_v50  ;;  %v8493_v40 = vld [vmem:[%s23934_s9 + $0x440] sm:$0xff]  ;;  %v23970_v61 = vld [vmem:[#allocation7_spill] sm:$0xff]  ;;  %v13496_v49 = vpack.c.bf16 %v8488_v21, %v8485_v14  ;;  %v8494_v0 = vld [vmem:[%s23934_s9 + $0x448] sm:$0xff] }
 0xa60   :  { %13317 = vmatpush1.bf16.msra.mxu1 %v13316_v4  ;;  %13481 = vmatpush3.bf16.msra.mxu0 %v13480_v6  ;;  %v8542_v4 = vld [vmem:[%s23934_s9 + $0x5c8] sm:$0xff]  ;;  %v8275_v6 = vrot.slane %v23059_v16, %v23970_v61  ;;  %v8492_v33 = vld [vmem:[%s23934_s9 + $0x438] sm:$0xff]  ;;  %v13500_v24 = vpack.c.bf16 %v8494_v0, %v8491_v39  ;;  %v8497_v55 = vld [vmem:[%s23934_s9 + $0x460] sm:$0xff] }
 0xa61   :  { %v23180_v41 = vadd.f32 %v8335_v47, %v8305_v17  ;;  %13319 = vmatprep.subr.bf16.mxu1 %v13318_v27  ;;  %13483 = vmatprep.subr.bf16.mxu0 %v13482_v44  ;;  %v8250_v47 = vrot.slane %v23113_v46, %v17959_v10  ;;  %v13332_v27 = vpack.c.bf16 %v8486_v38, %v8483_v29  ;;  %v8496_v18 = vld [vmem:[%s23934_s9 + $0x458] sm:$0xff]  ;;  %v8502_v63 = vld [vmem:[%s23934_s9 + $0x488] sm:$0xff]  ;;  %v8505_v7 = vld [vmem:[%s23934_s9 + $0x4a0] sm:$0xff] }
 0xa62   :  { %v8257_v44 = vmul.f32 %v8238_v37, %v22707_v1  ;;  %v13334_v46 = vpack.c.bf16 %v8493_v40, %v8490_v32  ;;  %v13498_v11 = vpack.c.bf16 %v8542_v4, %v8539_v52  ;;  %v8499_v1 = vld [vmem:[%s23934_s9 + $0x470] sm:$0xff]  ;;  %v13336_v53 = vpack.c.bf16 %v8492_v33, %v8489_v19  ;;  %v8500_v35 = vld [vmem:[%s23934_s9 + $0x478] sm:$0xff]  ;;  %v8557_v32 = vld [vmem:[%s23934_s9 + $0x640] sm:$0xff] }
 0xa63   :  { %v8260_v17 = vmul.f32 %v8250_v47, %v22697_v56  ;;  %v13338_v56 = vpack.c.bf16 %v8499_v1, %v8496_v18  ;;  %v8599_v25 = vld [vmem:[%s23934_s9 + $0x790] sm:$0xff]  ;;  %v13342_v30 = vpack.c.bf16 %v8505_v7, %v8502_v63  ;;  %v8504_v22 = vld [vmem:[%s23934_s9 + $0x498] sm:$0xff]  ;;  %v8514_v52 = vld [vmem:[%s23934_s9 + $0x4e8] sm:$0xff] }
 0xa64   :  { %13321 = vmatpush1.bf16.msra.mxu1 %v13320_v5  ;;  %13485 = vmatpush3.bf16.msra.mxu0 %v13484_v62  ;;  %v8287_v5 = vrot.slane %v23059_v16, %v18199_v28  ;;  %v8319_v62 = vrot.slane %v23064_v26, %v23970_v61  ;;  %v8301_v8 = vmul.f32 %v8275_v6, %v8257_v44  ;;  %v8551_v28 = vld [vmem:[%s23934_s9 + $0x610] sm:$0xff]  ;;  %v8554_v26 = vld [vmem:[%s23934_s9 + $0x628] sm:$0xff]  ;;  %v8508_v50 = vld [vmem:[%s23934_s9 + $0x4b8] sm:$0xff] }
 0xa65   :  { %13323 = vmatprep.subr.bf16.mxu1 %v13322_v31  ;;  %13487 = vmatprep.subr.bf16.mxu0 %v13486_v43  ;;  %v8495_v31 = vld [vmem:[%s23934_s9 + $0x450] sm:$0xff]  ;;  %v8498_v43 = vld [vmem:[%s23934_s9 + $0x468] sm:$0xff]  ;;  %v13502_v16 = vpack.c.bf16 %v8548_v59, %v8545_v3  ;;  %v8608_v29 = vld [vmem:[%s23934_s9 + $0x7d8] sm:$0xff]  ;;  %v13508_v37 = vpack.c.bf16 %v8554_v26, %v8551_v28 }
 0xa66   :  { %v13340_v58 = vpack.c.bf16 %v8498_v43, %v8495_v31  ;;  %v23313_v9 = vadd.f32 %v8319_v62, %v8301_v8  ;;  %v8511_v60 = vld [vmem:[%s23934_s9 + $0x4d0] sm:$0xff]  ;;  %v8560_v40 = vld [vmem:[%s23934_s9 + $0x658] sm:$0xff]  ;;  %v8517_v47 = vld [vmem:[%s23934_s9 + $0x500] sm:$0xff] }
 0xa67   :  { %v13346_v21 = vpack.c.bf16 %v8511_v60, %v8508_v50  ;;  %v8611_v6 = vld [vmem:[%s23934_s9 + $0x7f0] sm:$0xff]  ;;  %v13512_v33 = vpack.c.bf16 %v8560_v40, %v8557_v32  ;;  %v8513_v44 = vld [vmem:[%s23934_s9 + $0x4e0] sm:$0xff]  ;;  %v8566_v18 = vld [vmem:[%s23934_s9 + $0x688] sm:$0xff] }
 0xa68   :  { %13325 = vmatpush1.bf16.msra.mxu1 %v13324_v2  ;;  %13489 = vmatpush3.bf16.msra.mxu0 %v13488_v12  ;;  %v8602_v2 = vld [vmem:[%s23934_s9 + $0x7a8] sm:$0xff]  ;;  %v8304_v12 = vmul.f32 %v8287_v5, %v8260_v17  ;;  %v8352_v14 = vmax.f32 %v23313_v9, 0.0  ;;  %v8563_v0 = vld [vmem:[%s23934_s9 + $0x670] sm:$0xff]  ;;  %v8520_v1 = vld [vmem:[%s23934_s9 + $0x518] sm:$0xff] }
 0xa69   :  { %13327 = vmatprep.subr.bf16.mxu1 %v13326_v42  ;;  %13491 = vmatprep.subr.bf16.mxu0 %v13490_v45  ;;  %v13504_v42 = vpack.c.bf16 %v8500_v35, %v8497_v55  ;;  %v8501_v45 = vld [vmem:[%s23934_s9 + $0x480] sm:$0xff]  ;;  %v13506_v34 = vpack.c.bf16 %v8602_v2, %v8599_v25  ;;  %v8523_v3 = vld [vmem:[%s23934_s9 + $0x530] sm:$0xff]  ;;  %v8620_v17 = vld [vmem:[%s23934_s9 + $0x838] sm:$0xff]  ;;  %v13516_v62 = vpack.c.bf16 %v8566_v18, %v8563_v0 }
 0xa6a   :  { %v13344_v38 = vpack.c.bf16 %v8504_v22, %v8501_v45  ;;  %v8617_v59 = vld [vmem:[%s23934_s9 + $0x820] sm:$0xff]  ;;  %v13354_v31 = vpack.c.bf16 %v8523_v3, %v8520_v1  ;;  %v8623_v35 = vld [vmem:[%s23934_s9 + $0x850] sm:$0xff]  ;;  %v8626_v63 = vld [vmem:[%s23934_s9 + $0x868] sm:$0xff] }
 0xa6b   :  { %v13518_v43 = vpack.c.bf16 %v8620_v17, %v8617_v59  ;;  %v8569_v8 = vld [vmem:[%s23934_s9 + $0x6a0] sm:$0xff]  ;;  %v8578_v45 = vld [vmem:[%s23934_s9 + $0x6e8] sm:$0xff]  ;;  %v8632_v28 = vld [vmem:[%s23934_s9 + $0x898] sm:$0xff] }
 0xa6c   :  { %13329 = vmatpush1.bf16.msra.mxu1 %v13328_v54  ;;  %13493 = vmatpush3.bf16.msra.mxu0 %v13492_v23  ;;  %v23330_v54 = vadd.f32 %v8331_v15, %v8304_v12  ;;  %v8605_v23 = vld [vmem:[%s23934_s9 + $0x7c0] sm:$0xff]  ;;  %v8528_v12 = vld [vmem:[%s23934_s9 + $0x558] sm:$0xff]  ;;  %v8531_v60 = vld [vmem:[%s23934_s9 + $0x570] sm:$0xff] }
 0xa6d   :  { %13331 = vmatprep.subr.bf16.mxu1 %v13330_v36  ;;  %13495 = vmatprep.subr.bf16.mxu0 %v13494_v51  ;;  %v8507_v36 = vld [vmem:[%s23934_s9 + $0x4b0] sm:$0xff]  ;;  %v8510_v51 = vld [vmem:[%s23934_s9 + $0x4c8] sm:$0xff]  ;;  %v13510_v4 = vpack.c.bf16 %v8608_v29, %v8605_v23  ;;  %v8529_v55 = vld [vmem:[%s23934_s9 + $0x560] sm:$0xff] }
 0xa6e   :  { %v13348_v19 = vpack.c.bf16 %v8510_v51, %v8507_v36  ;;  %v8525_v2 = vld [vmem:[%s23934_s9 + $0x540] sm:$0xff]  ;;  %v8534_v23 = vld [vmem:[%s23934_s9 + $0x588] sm:$0xff]  ;;  %v8584_v36 = vld [vmem:[%s23934_s9 + $0x718] sm:$0xff] }
 0xa6f   :  { %v8629_v22 = vld [vmem:[%s23934_s9 + $0x880] sm:$0xff]  ;;  %v13360_v26 = vpack.c.bf16 %v8528_v12, %v8525_v2  ;;  %v8538_v51 = vld [vmem:[%s23934_s9 + $0x5a8] sm:$0xff]  ;;  %v8635_v32 = vld [vmem:[%s23934_s9 + $0x8b0] sm:$0xff]  ;;  %v8354_v12 = vmax.f32 %v23153_v48, 0.0 }
 0xa70   :  { %13333 = vmatpush1.bf16.msra.mxu1 %v13332_v27  ;;  %13497 = vmatpush3.bf16.msra.mxu0 %v13496_v49  ;;  %v8614_v27 = vld [vmem:[%s23934_s9 + $0x808] sm:$0xff]  ;;  %v8355_v49 = vmax.f32 %v23330_v54, 0.0  ;;  %v8644_v0 = vld [vmem:[%s23934_s9 + $0x8f8] sm:$0xff]  ;;  %v8543_v3 = vld [vmem:[%s23934_s9 + $0x5d0] sm:$0xff] }
 0xa71   :  { %13335 = vmatprep.subr.bf16.mxu1 %v13334_v46  ;;  %13499 = vmatprep.subr.bf16.mxu0 %v13498_v11  ;;  %v8516_v46 = vld [vmem:[%s23934_s9 + $0x4f8] sm:$0xff]  ;;  %v13350_v11 = vpack.c.bf16 %v8517_v47, %v8514_v52  ;;  %v13514_v39 = vpack.c.bf16 %v8614_v27, %v8611_v6  ;;  %v8638_v40 = vld [vmem:[%s23934_s9 + $0x8c8] sm:$0xff]  ;;  %v13364_v52 = vpack.c.bf16 %v8534_v23, %v8531_v60  ;;  %v8537_v47 = vld [vmem:[%s23934_s9 + $0x5a0] sm:$0xff] }
 0xa72   :  { %v13352_v5 = vpack.c.bf16 %v8516_v46, %v8513_v44  ;;  %v8540_v6 = vld [vmem:[%s23934_s9 + $0x5b8] sm:$0xff]  ;;  %v8590_v44 = vld [vmem:[%s23934_s9 + $0x748] sm:$0xff]  ;;  %v8567_v23 = vld [vmem:[%s23934_s9 + $0x690] sm:$0xff] }
 0xa73   :  { %v8544_v46 = vld [vmem:[%s23934_s9 + $0x5d8] sm:$0xff]  ;;  %v13368_v18 = vpack.c.bf16 %v8540_v6, %v8537_v47  ;;  %v8579_v6 = vld [vmem:[%s23934_s9 + $0x6f0] sm:$0xff]  ;;  %v9238_v48 = vld [vmem:[%s23936_s11] sm:$0xff] }
 0xa74   :  { %13337 = vmatpush1.bf16.msra.mxu1 %v13336_v53  ;;  %13501 = vmatpush3.bf16.msra.mxu0 %v13500_v24  ;;  %v8519_v53 = vld [vmem:[%s23934_s9 + $0x510] sm:$0xff]  ;;  %v8522_v24 = vld [vmem:[%s23934_s9 + $0x528] sm:$0xff]  ;;  %v8564_v9 = vld [vmem:[%s23934_s9 + $0x678] sm:$0xff] }
 0xa75   :  { %13339 = vmatprep.subr.bf16.mxu1 %v13338_v56  ;;  %13503 = vmatprep.subr.bf16.mxu0 %v13502_v16  ;;  %v8572_v56 = vld [vmem:[%s23934_s9 + $0x6b8] sm:$0xff]  ;;  %v8526_v16 = vld [vmem:[%s23934_s9 + $0x548] sm:$0xff]  ;;  %v13356_v7 = vpack.c.bf16 %v8522_v24, %v8519_v53 }
 0xa76   :  { %v13520_v25 = vpack.c.bf16 %v8572_v56, %v8569_v8  ;;  %v13358_v15 = vpack.c.bf16 %v8529_v55, %v8526_v16  ;;  %v8596_v53 = vld [vmem:[%s23934_s9 + $0x778] sm:$0xff]  ;;  %v8550_v24 = vld [vmem:[%s23934_s9 + $0x608] sm:$0xff]  ;;  %v8549_v16 = vld [vmem:[%s23934_s9 + $0x600] sm:$0xff] }
 0xa77   :  { %v8552_v55 = vld [vmem:[%s23934_s9 + $0x618] sm:$0xff] }
 0xa78   :  { %13341 = vmatpush1.bf16.msra.mxu1 %v13340_v58  ;;  %13505 = vmatpush3.bf16.msra.mxu0 %v13504_v42  ;;  %v13522_v58 = vpack.c.bf16 %v8626_v63, %v8623_v35  ;;  %v8575_v42 = vld [vmem:[%s23934_s9 + $0x6d0] sm:$0xff]  ;;  %v8650_v63 = vld [vmem:[%s23934_s9 + $0x928] sm:$0xff]  ;;  %v13376_v2 = vpack.c.bf16 %v8552_v55, %v8549_v16  ;;  %v8568_v54 = vld [vmem:[%s23934_s9 + $0x698] sm:$0xff] }
 0xa79   :  { %13343 = vmatprep.subr.bf16.mxu1 %v13342_v30  ;;  %13507 = vmatprep.subr.bf16.mxu0 %v13506_v34  ;;  %v8532_v30 = vld [vmem:[%s23934_s9 + $0x578] sm:$0xff]  ;;  %v8535_v34 = vld [vmem:[%s23934_s9 + $0x590] sm:$0xff]  ;;  %v13524_v50 = vpack.c.bf16 %v8578_v45, %v8575_v42  ;;  %v8558_v42 = vld [vmem:[%s23934_s9 + $0x648] sm:$0xff] }
 0xa7a   :  { %v13362_v29 = vpack.c.bf16 %v8535_v34, %v8532_v30  ;;  %v8647_v35 = vld [vmem:[%s23934_s9 + $0x910] sm:$0xff]  ;;  %v8562_v30 = vld [vmem:[%s23934_s9 + $0x668] sm:$0xff]  ;;  %v8565_v34 = vld [vmem:[%s23934_s9 + $0x680] sm:$0xff] }
 0xa7b   :  { %9090 = vmatmul.mubr.f32.vlgmr.msra.gmra.mrb[60].mxu0 %v8352_v14 }
 0xa7c   :  { %13345 = vmatpush1.bf16.msra.mxu1 %v13344_v38  ;;  %13509 = vmatpush3.bf16.msra.mxu0 %v13508_v37  ;;  %v13526_v38 = vpack.c.bf16 %v8632_v28, %v8629_v22  ;;  %v8581_v37 = vld [vmem:[%s23934_s9 + $0x700] sm:$0xff]  ;;  %v13382_v28 = vpack.c.bf16 %v8565_v34, %v8562_v30  ;;  %v8619_v30 = vld [vmem:[%s23934_s9 + $0x830] sm:$0xff] }
 0xa7d   :  { %9159 = vmatprep.mubr.f32.mxu0 %v8355_v49  ;;  %13347 = vmatprep.subr.bf16.mxu1 %v13346_v21  ;;  %v8541_v21 = vld [vmem:[%s23934_s9 + $0x5c0] sm:$0xff] }
 0xa7e   :  { %13511 = vmatprep.subr.bf16.mxu0 %v13510_v4  ;;  %v13528_v4 = vpack.c.bf16 %v8584_v36, %v8581_v37  ;;  %v13366_v27 = vpack.c.bf16 %v8541_v21, %v8538_v51  ;;  %v8577_v37 = vld [vmem:[%s23934_s9 + $0x6e0] sm:$0xff] }
 0xa7f   :  { %v8573_v21 = vld [vmem:[%s23934_s9 + $0x6c0] sm:$0xff] }
 0xa80   :  { %13349 = vmatpush1.bf16.msra.mxu1 %v13348_v19  ;;  %13513 = vmatpush3.bf16.msra.mxu0 %v13512_v33  ;;  %v13530_v19 = vpack.c.bf16 %v8638_v40, %v8635_v32  ;;  %v8587_v33 = vld [vmem:[%s23934_s9 + $0x730] sm:$0xff]  ;;  %v8576_v32 = vld [vmem:[%s23934_s9 + $0x6d8] sm:$0xff] }
 0xa81   :  { %13351 = vmatprep.subr.bf16.mxu1 %v13350_v11  ;;  %13515 = vmatprep.subr.bf16.mxu0 %v13514_v39  ;;  %v8547_v11 = vld [vmem:[%s23934_s9 + $0x5f0] sm:$0xff]  ;;  %v8641_v39 = vld [vmem:[%s23934_s9 + $0x8e0] sm:$0xff]  ;;  %v13532_v1 = vpack.c.bf16 %v8590_v44, %v8587_v33  ;;  %v8580_v40 = vld [vmem:[%s23934_s9 + $0x6f8] sm:$0xff] }
 0xa82   :  { %v13370_v59 = vpack.c.bf16 %v8547_v11, %v8544_v46  ;;  %v13534_v17 = vpack.c.bf16 %v8644_v0, %v8641_v39  ;;  %v8589_v33 = vld [vmem:[%s23934_s9 + $0x740] sm:$0xff]  ;;  %v8588_v39 = vld [vmem:[%s23934_s9 + $0x738] sm:$0xff] }
 0xa83   :  { %v8585_v11 = vld [vmem:[%s23934_s9 + $0x720] sm:$0xff]  ;;  %v8592_v0 = vld [vmem:[%s23934_s9 + $0x758] sm:$0xff] }
 0xa84   :  { %13353 = vmatpush1.bf16.msra.mxu1 %v13352_v5  ;;  %13517 = vmatpush3.bf16.msra.mxu0 %v13516_v62  ;;  %v8546_v5 = vld [vmem:[%s23934_s9 + $0x5e8] sm:$0xff]  ;;  %v8593_v62 = vld [vmem:[%s23934_s9 + $0x760] sm:$0xff] }
 0xa85   :  { %13355 = vmatprep.subr.bf16.mxu1 %v13354_v31  ;;  %13519 = vmatprep.subr.bf16.mxu0 %v13518_v43  ;;  %v8553_v31 = vld [vmem:[%s23934_s9 + $0x620] sm:$0xff]  ;;  %v13372_v43 = vpack.c.bf16 %v8546_v5, %v8543_v3  ;;  %v13536_v8 = vpack.c.bf16 %v8596_v53, %v8593_v62  ;;  %v8598_v5 = vld [vmem:[%s23934_s9 + $0x788] sm:$0xff] }
 0xa86   :  { %v13374_v56 = vpack.c.bf16 %v8553_v31, %v8550_v24  ;;  %v8601_v62 = vld [vmem:[%s23934_s9 + $0x7a0] sm:$0xff] }
 0xa87   :  { %v13406_v24 = vpack.c.bf16 %v8601_v62, %v8598_v5  ;;  %v8597_v31 = vld [vmem:[%s23934_s9 + $0x780] sm:$0xff]  ;;  %v9255_v62 = vld [vmem:[%s23936_s11 + $0x88] sm:$0xff] }
 0xa88   :  { %13357 = vmatpush1.bf16.msra.mxu1 %v13356_v7  ;;  %13521 = vmatpush3.bf16.msra.mxu0 %v13520_v25  ;;  %v8556_v7 = vld [vmem:[%s23934_s9 + $0x638] sm:$0xff]  ;;  %v8559_v25 = vld [vmem:[%s23934_s9 + $0x650] sm:$0xff]  ;;  %v9254_v5 = vld [vmem:[%s23936_s11 + $0x80] sm:$0xff] }
 0xa89   :  { %13359 = vmatprep.subr.bf16.mxu1 %v13358_v15  ;;  %13523 = vmatprep.subr.bf16.mxu0 %v13522_v58  ;;  %v13539_v15 = vpack.c.bf16 %v8650_v63, %v8647_v35  ;;  %v8555_v58 = vld [vmem:[%s23934_s9 + $0x630] sm:$0xff]  ;;  %v13378_v45 = vpack.c.bf16 %v8559_v25, %v8556_v7  ;;  %v8606_v63 = vld [vmem:[%s23934_s9 + $0x7c8] sm:$0xff]  ;;  %v8613_v25 = vld [vmem:[%s23934_s9 + $0x800] sm:$0xff] }
 0xa8a   :  { %v13380_v22 = vpack.c.bf16 %v8558_v42, %v8555_v58  ;;  %v8603_v35 = vld [vmem:[%s23934_s9 + $0x7b0] sm:$0xff]  ;;  %v8610_v7 = vld [vmem:[%s23934_s9 + $0x7e8] sm:$0xff]  ;;  %v8609_v58 = vld [vmem:[%s23934_s9 + $0x7e0] sm:$0xff] }
 0xa8b   :  { %v8612_v42 = vld [vmem:[%s23934_s9 + $0x7f8] sm:$0xff] }
 0xa8c   :  { %13361 = vmatpush1.bf16.msra.mxu1 %v13360_v26  ;;  %13525 = vmatpush3.bf16.msra.mxu0 %v13524_v50  ;;  %v8561_v26 = vld [vmem:[%s23934_s9 + $0x660] sm:$0xff]  ;;  %v13416_v34 = vpack.c.bf16 %v8612_v42, %v8609_v58  ;;  %v9244_v42 = vld [vmem:[%s23936_s11 + $0x30] sm:$0xff] }
 0xa8d   :  { %13363 = vmatprep.subr.bf16.mxu1 %v13362_v29  ;;  %13527 = vmatprep.subr.bf16.mxu0 %v13526_v38  ;;  %v13384_v50 = vpack.c.bf16 %v8564_v9, %v8561_v26  ;;  %v8570_v29 = vld [vmem:[%s23934_s9 + $0x6a8] sm:$0xff] }
 0xa8e   :  { %v8574_v38 = vld [vmem:[%s23934_s9 + $0x6c8] sm:$0xff]  ;;  %v13388_v36 = vpack.c.bf16 %v8570_v29, %v8567_v23  ;;  %v8624_v23 = vld [vmem:[%s23934_s9 + $0x858] sm:$0xff] }
 0xa8f   :  { %v13390_v51 = vpack.c.bf16 %v8577_v37, %v8574_v38  ;;  %v8618_v26 = vld [vmem:[%s23934_s9 + $0x828] sm:$0xff]  ;;  %v8628_v29 = vld [vmem:[%s23934_s9 + $0x878] sm:$0xff]  ;;  %v8631_v38 = vld [vmem:[%s23934_s9 + $0x890] sm:$0xff] }
 0xa90   :  { %13365 = vmatpush1.bf16.msra.mxu1 %v13364_v52  ;;  %13529 = vmatpush3.bf16.msra.mxu0 %v13528_v4  ;;  %v8583_v52 = vld [vmem:[%s23934_s9 + $0x710] sm:$0xff]  ;;  %v13392_v4 = vpack.c.bf16 %v8576_v32, %v8573_v21  ;;  %v8622_v9 = vld [vmem:[%s23934_s9 + $0x848] sm:$0xff] }
 0xa91   :  { %13367 = vmatprep.subr.bf16.mxu1 %v13366_v27  ;;  %13531 = vmatprep.subr.bf16.mxu0 %v13530_v19  ;;  %v13394_v47 = vpack.c.bf16 %v8583_v52, %v8580_v40  ;;  %v8582_v27 = vld [vmem:[%s23934_s9 + $0x708] sm:$0xff]  ;;  %v8637_v40 = vld [vmem:[%s23934_s9 + $0x8c0] sm:$0xff] }
 0xa92   :  { %v8586_v19 = vld [vmem:[%s23934_s9 + $0x728] sm:$0xff]  ;;  %v13396_v44 = vpack.c.bf16 %v8582_v27, %v8579_v6  ;;  %v8636_v6 = vld [vmem:[%s23934_s9 + $0x8b8] sm:$0xff] }
 0xa93   :  { %v13398_v46 = vpack.c.bf16 %v8589_v33, %v8586_v19  ;;  %v8630_v21 = vld [vmem:[%s23934_s9 + $0x888] sm:$0xff]  ;;  %v8640_v27 = vld [vmem:[%s23934_s9 + $0x8d8] sm:$0xff]  ;;  %v8643_v19 = vld [vmem:[%s23934_s9 + $0x8f0] sm:$0xff] }
 0xa94   :  { %13369 = vmatpush1.bf16.msra.mxu1 %v13368_v18  ;;  %13533 = vmatpush3.bf16.msra.mxu0 %v13532_v1  ;;  %v8595_v18 = vld [vmem:[%s23934_s9 + $0x770] sm:$0xff]  ;;  %v13400_v1 = vpack.c.bf16 %v8588_v39, %v8585_v11  ;;  %v8634_v32 = vld [vmem:[%s23934_s9 + $0x8a8] sm:$0xff] }
 0xa95   :  { %13371 = vmatprep.subr.bf16.mxu1 %v13370_v59  ;;  %13535 = vmatprep.subr.bf16.mxu0 %v13534_v17  ;;  %v13402_v3 = vpack.c.bf16 %v8595_v18, %v8592_v0  ;;  %v8591_v59 = vld [vmem:[%s23934_s9 + $0x750] sm:$0xff]  ;;  %v8594_v17 = vld [vmem:[%s23934_s9 + $0x768] sm:$0xff]  ;;  %v8649_v0 = vld [vmem:[%s23934_s9 + $0x920] sm:$0xff] }
 0xa96   :  { %v13404_v53 = vpack.c.bf16 %v8594_v17, %v8591_v59  ;;  %v8642_v11 = vld [vmem:[%s23934_s9 + $0x8e8] sm:$0xff]  ;;  %v8648_v59 = vld [vmem:[%s23934_s9 + $0x918] sm:$0xff] }
 0xa97   :  { %v8646_v39 = vld [vmem:[%s23934_s9 + $0x908] sm:$0xff] }
 0xa98   :  { %13373 = vmatpush1.bf16.msra.mxu1 %v13372_v43  ;;  %13537 = vmatpush3.bf16.msra.mxu0 %v13536_v8  ;;  %v8600_v43 = vld [vmem:[%s23934_s9 + $0x798] sm:$0xff] }
 0xa99   :  { %13375 = vmatprep.subr.bf16.mxu1 %v13374_v56  ;;  %13538 = vmatprep.subr.bf16.mxu0 %v23962_v20  ;;  %v8604_v8 = vld [vmem:[%s23934_s9 + $0x7b8] sm:$0xff]  ;;  %v8607_v56 = vld [vmem:[%s23934_s9 + $0x7d0] sm:$0xff]  ;;  %v13408_v16 = vpack.c.bf16 %v8600_v43, %v8597_v31 }
 0xa9a   :  { %v13410_v55 = vpack.c.bf16 %v8607_v56, %v8604_v8  ;;  %v9240_v43 = vld [vmem:[%s23936_s11 + $0x10] sm:$0xff]  ;;  %v9241_v8 = vld [vmem:[%s23936_s11 + $0x18] sm:$0xff]  ;;  %v9258_v56 = vld [vmem:[%s23936_s11 + $0xa0] sm:$0xff] }
 0xa9b   :  { %8807 = vmatmul.mubr.f32.vlgmr.msra.gmra.mrb[16].mxu1 %v8352_v14  ;;  %9160 = vmatmul.mubr.f32.vlgmr.msra.gmra.mrb[62].mxu0 %v8354_v12  ;;  %v8356_v14 = vmax.f32 %v23180_v41, 0.0  ;;  %v9256_v41 = vld [vmem:[%s23936_s11 + $0x90] sm:$0xff] }
 0xa9c   :  { %13377 = vmatpush1.bf16.msra.mxu1 %v13376_v2  ;;  %8877 = vmatprep.mubr.f32.mxu1 %v8355_v49  ;;  %v8571_v49 = vld [vmem:[%s23934_s9 + $0x6b0] sm:$0xff]  ;;  %v13412_v2 = vpack.c.bf16 %v8606_v63, %v8603_v35  ;;  %v9242_v63 = vld [vmem:[%s23936_s11 + $0x20] sm:$0xff] }
 0xa9d   :  { %13540 = vmatpush3.bf16.msra.mxu0 %v13539_v15  ;;  %10320 = vmatprep.mubr.msk.f32.mxu0 %vm13739_vm1, %v23963_v13  ;;  %v13386_v60 = vpack.c.bf16 %v8571_v49, %v8568_v54  ;;  %v13414_v15 = vpack.c.bf16 %v8613_v25, %v8610_v7  ;;  %v8625_v54 = vld [vmem:[%s23934_s9 + $0x860] sm:$0xff]  ;;  %v9243_v7 = vld [vmem:[%s23936_s11 + $0x28] sm:$0xff]  ;;  %v9260_v25 = vld [vmem:[%s23936_s11 + $0xb0] sm:$0xff] }
 0xa9e   :  { %13379 = vmatprep.subr.bf16.mxu1 %v13378_v45  ;;  %v8616_v45 = vld [vmem:[%s23934_s9 + $0x818] sm:$0xff] }
 0xaa0   :  { %10321 = vmatmul.mubr.msk.f32.vlgmr.msra.gmra.mrb[64].mxu0 %vm1437_vm0, %v8356_v14  ;;  %13381 = vmatpush1.bf16.msra.mxu1 %v13380_v22  ;;  %v13418_v22 = vpack.c.bf16 %v8619_v30, %v8616_v45  ;;  %v9245_v45 = vld [vmem:[%s23936_s11 + $0x38] sm:$0xff]  ;;  %v9262_v30 = vld [vmem:[%s23936_s11 + $0xc0] sm:$0xff] }
 0xaa1   :  { %13383 = vmatprep.subr.bf16.mxu1 %v13382_v28  ;;  %v8615_v28 = vld [vmem:[%s23934_s9 + $0x810] sm:$0xff] }
 0xaa2   :  { %v13420_v49 = vpack.c.bf16 %v8618_v26, %v8615_v28  ;;  %v9246_v26 = vld [vmem:[%s23936_s11 + $0x40] sm:$0xff] }
 0xaa4   :  { %13385 = vmatpush1.bf16.msra.mxu1 %v13384_v50  ;;  %v13422_v50 = vpack.c.bf16 %v8625_v54, %v8622_v9  ;;  %v9247_v9 = vld [vmem:[%s23936_s11 + $0x48] sm:$0xff]  ;;  %v9264_v54 = vld [vmem:[%s23936_s11 + $0xd0] sm:$0xff] }
 0xaa5   :  { %13387 = vmatprep.subr.bf16.mxu1 %v13386_v60  ;;  %v8621_v60 = vld [vmem:[%s23934_s9 + $0x840] sm:$0xff] }
 0xaa6   :  { %v13424_v37 = vpack.c.bf16 %v8624_v23, %v8621_v60  ;;  %v9248_v23 = vld [vmem:[%s23936_s11 + $0x50] sm:$0xff] }
 0xaa8   :  { %13389 = vmatpush1.bf16.msra.mxu1 %v13388_v36  ;;  %v13426_v36 = vpack.c.bf16 %v8631_v38, %v8628_v29  ;;  %v9249_v29 = vld [vmem:[%s23936_s11 + $0x58] sm:$0xff]  ;;  %v9266_v38 = vld [vmem:[%s23936_s11 + $0xe0] sm:$0xff] }
 0xaa9   :  { %13391 = vmatprep.subr.bf16.mxu1 %v13390_v51  ;;  %v8627_v51 = vld [vmem:[%s23934_s9 + $0x870] sm:$0xff] }
 0xaaa   :  { %v13428_v52 = vpack.c.bf16 %v8630_v21, %v8627_v51  ;;  %v9250_v21 = vld [vmem:[%s23936_s11 + $0x60] sm:$0xff] }
 0xaac   :  { %13393 = vmatpush1.bf16.msra.mxu1 %v13392_v4  ;;  %v13430_v4 = vpack.c.bf16 %v8637_v40, %v8634_v32  ;;  %v9251_v32 = vld [vmem:[%s23936_s11 + $0x68] sm:$0xff] }
 0xaad   :  { %13395 = vmatprep.subr.bf16.mxu1 %v13394_v47  ;;  %v8633_v47 = vld [vmem:[%s23934_s9 + $0x8a0] sm:$0xff]  ;;  %v13567_v40 = vpack.c.bf16 %v9251_v32, %v9250_v21  ;;  %v9440_v21 = vld [vmem:[%s23938_s13 + $0x78] sm:$0xff] }
 0xaae   :  { %v13432_v33 = vpack.c.bf16 %v8636_v6, %v8633_v47  ;;  %v9268_v6 = vld [vmem:[%s23936_s11 + $0xf0] sm:$0xff] }
 0xab0   :  { %13397 = vmatpush1.bf16.msra.mxu1 %v13396_v44  ;;  %v13434_v44 = vpack.c.bf16 %v8643_v19, %v8640_v27  ;;  %v9269_v27 = vld [vmem:[%s23936_s11 + $0xf8] sm:$0xff] }
 0xab1   :  { %13399 = vmatprep.subr.bf16.mxu1 %v13398_v46  ;;  %v8639_v46 = vld [vmem:[%s23934_s9 + $0x8d0] sm:$0xff]  ;;  %v13569_v19 = vpack.c.bf16 %v9269_v27, %v9268_v6 }
 0xab2   :  { %v13436_v18 = vpack.c.bf16 %v8642_v11, %v8639_v46  ;;  %v8651_v11 = vld [vmem:[%s23935_s10] sm:$0x7] }
 0xab4   :  { %13401 = vmatpush1.bf16.msra.mxu1 %v13400_v1  ;;  %v13438_v1 = vpack.c.bf16 %v8649_v0, %v8646_v39  ;;  %v8664_v39 = vrot.slane %v8651_v11, %v23970_v61  ;;  %v9270_v61 = vld [vmem:[%s23936_s11 + $0x100] sm:$0xff] }
 0xab5   :  { %13403 = vmatprep.subr.bf16.mxu1 %v13402_v3  ;;  %v8645_v3 = vld [vmem:[%s23934_s9 + $0x900] sm:$0xff] }
 0xab6   :  { %v13440_v17 = vpack.c.bf16 %v8648_v59, %v8645_v3 }
 0xab8   :  { %13405 = vmatpush1.bf16.msra.mxu1 %v13404_v53  ;;  %v9239_v53 = vld [vmem:[%s23936_s11 + $0x8] sm:$0xff] }
 0xab9   :  { %13407 = vmatprep.subr.bf16.mxu1 %v13406_v24  ;;  %v13543_v24 = vpack.c.bf16 %v9239_v53, %v9238_v48 }
 0xabc   :  { %13409 = vmatpush1.bf16.msra.mxu1 %v13408_v16  ;;  %v9259_v16 = vld [vmem:[%s23936_s11 + $0xa8] sm:$0xff] }
 0xabd   :  { %13411 = vmatprep.subr.bf16.mxu1 %v13410_v55  ;;  %v13547_v55 = vpack.c.bf16 %v9241_v8, %v9240_v43  ;;  %v13549_v35 = vpack.c.bf16 %v9259_v16, %v9258_v56  ;;  %v9271_v56 = vld [vmem:[%s23936_s11 + $0x108] sm:$0xff] }
 0xac0   :  { %13413 = vmatpush1.bf16.msra.mxu1 %v13412_v2  ;;  %v9261_v2 = vld [vmem:[%s23936_s11 + $0xb8] sm:$0xff] }
 0xac1   :  { %13415 = vmatprep.subr.bf16.mxu1 %v13414_v15  ;;  %v13551_v15 = vpack.c.bf16 %v9243_v7, %v9242_v63  ;;  %v13553_v58 = vpack.c.bf16 %v9261_v2, %v9260_v25  ;;  %v9425_v25 = vld [vmem:[%s23938_s13] sm:$0xff]  ;;  %v9426_v2 = vld [vmem:[%s23938_s13 + $0x8] sm:$0xff] }
 0xac4   :  { %13417 = vmatpush1.bf16.msra.mxu1 %v13416_v34  ;;  %v9263_v34 = vld [vmem:[%s23936_s11 + $0xc8] sm:$0xff] }
 0xac5   :  { %13419 = vmatprep.subr.bf16.mxu1 %v13418_v22  ;;  %v13555_v22 = vpack.c.bf16 %v9245_v45, %v9244_v42  ;;  %v13557_v28 = vpack.c.bf16 %v9263_v34, %v9262_v30  ;;  %v9427_v42 = vld [vmem:[%s23938_s13 + $0x10] sm:$0xff]  ;;  %v9428_v45 = vld [vmem:[%s23938_s13 + $0x18] sm:$0xff]  ;;  %v9429_v34 = vld [vmem:[%s23938_s13 + $0x20] sm:$0xff] }
 0xac6   :  { %v13583_v30 = vpack.c.bf16 %v9428_v45, %v9427_v42 }
 0xac8   :  { %13421 = vmatpush1.bf16.msra.mxu1 %v13420_v49  ;;  %v9265_v49 = vld [vmem:[%s23936_s11 + $0xd8] sm:$0xff] }
 0xac9   :  { %13423 = vmatprep.subr.bf16.mxu1 %v13422_v50  ;;  %v13559_v50 = vpack.c.bf16 %v9247_v9, %v9246_v26  ;;  %v13561_v60 = vpack.c.bf16 %v9265_v49, %v9264_v54  ;;  %v9431_v26 = vld [vmem:[%s23938_s13 + $0x30] sm:$0xff]  ;;  %v9433_v54 = vld [vmem:[%s23938_s13 + $0x40] sm:$0xff]  ;;  %v9434_v49 = vld [vmem:[%s23938_s13 + $0x48] sm:$0xff] }
 0xacc   :  { %13425 = vmatpush1.bf16.msra.mxu1 %v13424_v37  ;;  %v9267_v37 = vld [vmem:[%s23936_s11 + $0xe8] sm:$0xff] }
 0xacd   :  { %13427 = vmatprep.subr.bf16.mxu1 %v13426_v36  ;;  %v13563_v36 = vpack.c.bf16 %v9249_v29, %v9248_v23  ;;  %v13565_v51 = vpack.c.bf16 %v9267_v37, %v9266_v38  ;;  %v9436_v23 = vld [vmem:[%s23938_s13 + $0x58] sm:$0xff]  ;;  %v9437_v38 = vld [vmem:[%s23938_s13 + $0x60] sm:$0xff]  ;;  %v9438_v37 = vld [vmem:[%s23938_s13 + $0x68] sm:$0xff] }
 0xad0   :  { %13429 = vmatpush1.bf16.msra.mxu1 %v13428_v52 }
 0xad1   :  { %13431 = vmatprep.subr.bf16.mxu1 %v13430_v4 }
 0xad4   :  { %13433 = vmatpush1.bf16.msra.mxu1 %v13432_v33  ;;  %v9252_v33 = vld [vmem:[%s23936_s11 + $0x70] sm:$0xff] }
 0xad5   :  { %13435 = vmatprep.subr.bf16.mxu1 %v13434_v44  ;;  %v9253_v44 = vld [vmem:[%s23936_s11 + $0x78] sm:$0xff] }
 0xad6   :  { %v13571_v46 = vpack.c.bf16 %v9253_v44, %v9252_v33  ;;  %v9559_v44 = vld [vmem:[%s23939_s14] ss:$0 sm:$0xff] }
 0xad8   :  { %13437 = vmatpush1.bf16.msra.mxu1 %v13436_v18 }
 0xad9   :  { %13439 = vmatprep.subr.bf16.mxu1 %v13438_v1 }
 0xadb   :  { %8878 = vmatmul.mubr.f32.vlgmr.msra.gmra.mrb[16].mxu1 %v8354_v12  ;;  %v13541_v12 = vpack.c.bf16 %v9255_v62, %v9254_v5 }
 0xadc   :  { %13441 = vmatpush1.bf16.msra.mxu1 %v13440_v17  ;;  %8948 = vmatprep.mubr.f32.mxu1 %v23963_v13 }
 0xadd   :  { %13542 = vmatprep.subr.bf16.mxu0 %v13541_v12 }
 0xade   :  { %13544 = vmatpush3.bf16.msra.mxu0 %v13543_v24  ;;  %v8660_v24 = vrot.slane %v8651_v11, %v23968_v57  ;;  %v9273_v57 = vld [vmem:[%s23936_s11 + $0x118] sm:$0xff] }
 0xae3   :  { %9555 = vmatmul.mubr.msk.f32.vlgmr.msra.gmra.mrb[16].mxu1 %vm1437_vm0, %v8356_v14  ;;  %v9257_v14 = vld [vmem:[%s23936_s11 + $0x98] sm:$0xff] }
 0xae4   :  { %v13545_v31 = vpack.c.bf16 %v9257_v14, %v9256_v41  ;;  %v8656_v14 = vrot.slane %v8651_v11, %v17959_v10  ;;  %v9272_v10 = vld [vmem:[%s23936_s11 + $0x110] sm:$0xff] }
 0xae5   :  { %v13577_v7 = vpack.c.bf16 %v9273_v57, %v9272_v10 }
 0xae6   :  { %13546 = vmatprep.subr.bf16.mxu0 %v13545_v31 }
 0xae7   :  { %13548 = vmatpush3.bf16.msra.mxu0 %v13547_v55 }
 0xae8   :  { %13550 = vmatprep.subr.bf16.mxu0 %v13549_v35  ;;  %v13574_v35 = vpack.c.bf16 %v9271_v56, %v9270_v61 }
 0xaeb   :  { %13552 = vmatpush3.bf16.msra.mxu0 %v13551_v15  ;;  %v13580_v15 = vpack.c.bf16 %v9426_v2, %v9425_v25 }
 0xaec   :  { %13554 = vmatprep.subr.bf16.mxu0 %v13553_v58 }
 0xaef   :  { %13556 = vmatpush3.bf16.msra.mxu0 %v13555_v22  ;;  %v9430_v22 = vld [vmem:[%s23938_s13 + $0x28] sm:$0xff] }
 0xaf0   :  { %13558 = vmatprep.subr.bf16.mxu0 %v13557_v28  ;;  %v13586_v28 = vpack.c.bf16 %v9430_v22, %v9429_v34 }
 0xaf3   :  { %13560 = vmatpush3.bf16.msra.mxu0 %v13559_v50  ;;  %v13592_v50 = vpack.c.bf16 %v9434_v49, %v9433_v54 }
 0xaf4   :  { %13562 = vmatprep.subr.bf16.mxu0 %v13561_v60  ;;  %v9435_v60 = vld [vmem:[%s23938_s13 + $0x50] sm:$0xff] }
 0xaf5   :  { %v13595_v29 = vpack.c.bf16 %v9436_v23, %v9435_v60 }
 0xaf7   :  { %13564 = vmatpush3.bf16.msra.mxu0 %v13563_v36  ;;  %v13598_v36 = vpack.c.bf16 %v9438_v37, %v9437_v38 }
 0xaf8   :  { %13566 = vmatprep.subr.bf16.mxu0 %v13565_v51  ;;  %v9439_v51 = vld [vmem:[%s23938_s13 + $0x70] sm:$0xff] }
 0xaf9   :  { %v13601_v32 = vpack.c.bf16 %v9440_v21, %v9439_v51 }
 0xafb   :  { %13568 = vmatpush3.bf16.msra.mxu0 %v13567_v40 }
 0xafc   :  { %13570 = vmatprep.subr.bf16.mxu0 %v13569_v19 }
 0xaff   :  { %13572 = vmatpush3.bf16.msra.mxu0 %v13571_v46 }
 0xb00   :  { %13573 = vmatprep.subr.bf16.mxu0 %v23962_v20 }
 0xb2e   :  { %v10137_v52 = vpop.f32.mrb[58].mxu0 }
 0xb2f   :  { %v10138_v4 = vpop.f32.mrb[59].mxu0 }
 0xb30   :  { %v10139_v47 = vadd.f32 %v10138_v4, %v10137_v52 }
 0xb32   :  { %v9022_v1 = vadd.f32 %v10139_v47, %v8664_v39  ;;  %v9557_v47 = vld [vmem:[%s23937_s12] ss:$0 sm:$0xff] }
 0xb4e   :  { %v10172_v0 = vpop.f32.mrb[60].mxu0 }
 0xb4f   :  { %v10173_v18 = vpop.f32.mrb[61].mxu0 }
 0xb50   :  { %v10174_v3 = vadd.f32 %v10173_v18, %v10172_v0 }
 0xb52   :  { %v9092_v59 = vadd.f32 %v10174_v3, %v9022_v1 }
 0xb6e   :  { %v10207_v17 = vpop.f32.mrb[62].mxu0 }
 0xb6f   :  { %v10208_v5 = vpop.f32.mrb[63].mxu0 }
 0xb70   :  { %v10209_v62 = vadd.f32 %v10208_v5, %v10207_v17 }
 0xb72   :  { %v9162_v48 = vadd.f32 %v10209_v62, %v9092_v59 }
 0xb73   :  { %v9231_v12 = vpop.f32.mrb[64].mxu0 }
 0xb74   :  { %v9232_v53 = vadd.f32 %v9231_v12, %v9162_v48  ;;  %v10322_v41 = vpop.f32.mrb[65].mxu0 }
 0xb76   :  { %v9237_v58 = vmax.f32 %v9232_v53, 0.0 }
 0xbb6   :  { %v8950_v31 = vpop.f32.mrb[16].mxu1 }
 0xbb7   :  { %v13623_v43 = vadd.f32 %v8950_v31, %v8656_v14  ;;  %v8952_v8 = vpop.f32.mrb[17].mxu1 }
 0xbb8   :  { %v13624_v16 = vadd.f32 %v8952_v8, %v8660_v24 }
 0xbb9   :  { %v9235_v63 = vmax.f32 %v13623_v43, 0.0 }
 0xbba   :  { %v9236_v55 = vmax.f32 %v13624_v16, 0.0 }
 0xbbc   :  { %9348 = vmatprep.mubr.f32.mxu0 %v9236_v55 }
 0xbbd   :  { %9349 = vmatmul.mubr.f32.vlgmr.msra.gmra.mrb[66].mxu0 %v9235_v63 }
 0xbbe   :  { %13575 = vmatpush3.bf16.msra.mxu0 %v13574_v35  ;;  %10331 = vmatprep.mubr.msk.f32.mxu0 %vm13739_vm1, %v23963_v13 }
 0xbbf   :  { %13576 = vmatprep.subr.bf16.mxu0 %v23962_v20 }
 0xbc2   :  { %13578 = vmatpush3.bf16.msra.mxu0 %v13577_v7 }
 0xbc3   :  { %13579 = vmatprep.subr.bf16.mxu0 %v23962_v20 }
 0xbc5   :  { %10332 = vmatmul.mubr.msk.f32.vlgmr.msra.gmra.mrb[68].mxu0 %vm4846_vm2, %v9237_v58 }
 0xbc6   :  { %13581 = vmatpush3.bf16.msra.mxu0 %v13580_v15  ;;  %10366 = vmatprep.mubr.msk.f32.mxu0 %vm13739_vm1, %v23963_v13  ;;  %v9432_v13 = vld [vmem:[%s23938_s13 + $0x38] sm:$0xff]  ;;  %s13740_s13 = smov [#allocation2]  }
 0xbc7   :  { %13582 = vmatprep.subr.bf16.mxu0 %v23962_v20  ;;  %v13589_v9 = vpack.c.bf16 %v9432_v13, %v9431_v26  ;;  %s9526_s2 = sshll.u32 %s13740_s13, 4  ;;  %s9527_s2 = int_to_ptr.vmem [resolvable:$true] %s9526_s2 }
 0xbc8   :  { %s13712_s21 = scalar_lea.vmem %s9527_s2, 32  ;;  %p13717_p1 = scmp.lt.s32.totalorder %s9527_s2, %s9527_s2 }
 0xbc9   :  { %p13713_p0 = scmp.ne.s32.totalorder %s9527_s2, %s13712_s21  ;;  %p13718_p2 = scmp.lt.s32.totalorder %s13712_s21, %s13712_s21 }
 0xbca   :  { %13584 = vmatpush3.bf16.msra.mxu0 %v13583_v30 }
 0xbcb   :  { %13585 = vmatprep.subr.bf16.mxu0 %v23962_v20  ;;  %p13719_p3 = por %p13718_p2, %p13717_p1 }
 0xbcd   :  { %p13720_p4 = pnand %p13719_p3, %p13713_p0 }
 0xbce   :  { %13587 = vmatpush3.bf16.msra.mxu0 %v13586_v28 }
 0xbcf   :  { %13588 = vmatprep.subr.bf16.mxu0 %v23962_v20 }
 0xbd2   :  { %13590 = vmatpush3.bf16.msra.mxu0 %v13589_v9 }
 0xbd3   :  { %13591 = vmatprep.subr.bf16.mxu0 %v23962_v20 }
 0xbd6   :  { %13593 = vmatpush3.bf16.msra.mxu0 %v13592_v50 }
 0xbd7   :  { %13594 = vmatprep.subr.bf16.mxu0 %v23962_v20 }
 0xbda   :  { %13596 = vmatpush3.bf16.msra.mxu0 %v13595_v29 }
 0xbdb   :  { %13597 = vmatprep.subr.bf16.mxu0 %v23962_v20 }
 0xbde   :  { %13599 = vmatpush3.bf16.msra.mxu0 %v13598_v36 }
 0xbdf   :  { %13600 = vmatprep.subr.bf16.mxu0 %v23962_v20 }
 0xbe2   :  { %13602 = vmatpush3.bf16.msra.mxu0 %v13601_v32 }
 0xc90   :  { %v10245_v40 = vpop.f32.mrb[66].mxu0 }
 0xc91   :  { %v10246_v52 = vpop.f32.mrb[67].mxu0 }
 0xc92   :  { %v10247_v4 = vadd.f32 %v10246_v52, %v10245_v40 }
 0xc94   :  { %v9351_v6 = vadd.f32 %v10247_v4, %v9557_v47 }
 0xc98   :  { %v9420_v27 = vpop.f32.mrb[68].mxu0 }
 0xc99   :  { %v9421_v20 = vadd.f32 %v9420_v27, %v9351_v6  ;;  %v10333_v19 = vpop.f32.mrb[69].mxu0 }
 0xc9b   :  { %v9424_v33 = vmax.f32 %v9421_v20, 0.0 }
 0xc9d   :  { %10367 = vmatmul.mubr.f32.vlgmr.msra.gmra.mrb[70].mxu0 %v9424_v33 }
 0xd70   :  { %v9514_v46 = vpop.f32.mrb[70].mxu0 }
 0xd71   :  { %v9515_v11 = vadd.f32 %v9559_v44, %v9514_v46  ;;  %v10368_v39 = vpop.f32.mrb[71].mxu0 }
 0xd73   :  { %9519 = vst.msk [vmem:[#allocation2] sm:$0x3] %vm9518_vm5, %v9515_v11 }
 0xd74   :  { %13723 = shalt.err (!%p13720_p4)
}
 0xd75   :  { %s13724_s4 = scalar_lea.hbm %s23940_s15, 32 }
 0xd76   :  { %p13725_p5 = scmp.ne.s32.totalorder %s23940_s15, %s13724_s4  ;;  %p13728_p6 = scmp.lt.u32.totalorder %s13724_s4, %s23940_s15 }
 0xd78   :  { %p13730_p7 = pnand %p13728_p6, %p13725_p5 }
 0xd7a   :  { %13733 = shalt.err (!%p13730_p7)
}
 0xd7b   :  { %9529 = dma.vmem_to_hbm [thread:$0]  %s9527_s2, 32, %s23940_s15, [#allocation3]  }
 0xd7c   :  { %13734 = dma.done.wait [#allocation3], 32  }
 0xd7d   :  { %13735 = vsyncadd [#allocation3], 4294967264 }
 0xd7e   :  { %9533 = vsyncpa [#allocation3], 1 }

</bundles_post_ra>
